<compile_context>
chip_gen: v7x
topology: tpu7x:2x2x1
jax: 0.10.0
libtpu: 0.0.40
codegen_flags: <defaults>
</compile_context>

<pallas_src>
import functools

import jax
import jax.numpy as jnp
import numpy as np
from jax.experimental import pallas as pl
from jax.experimental.pallas import tpu as pltpu

LEAKY_SLOPE = 0.01   # PyTorch nn.LeakyReLU default
BN_EPS = 1e-5        # PyTorch nn.BatchNorm1d default
CPAD = 128           # lane-dense padded channel width


def _round_up(x, m):
    return ((x + m - 1) // m) * m


# ---------------------------- Pallas kernels ---------------------------------

def _conv_pool_kernel(p_ref, w_ref, b_ref, o_ref, *, slope):
    """Fused im2col-matmul + MaxPool3d(2,2,2) + bias + LeakyReLU.

    p_ref: (TR, K)  bf16 patch rows; every 8 consecutive rows = one pool window.
    w_ref: (K, 128) bf16;  b_ref: (1, 128) f32;  o_ref: (TR//8, 128) bf16.
    """
    acc = jnp.dot(p_ref[...], w_ref[...], preferred_element_type=jnp.float32)
    n = acc.shape[0] // 8
    # Max over the 8 window rows first (max commutes with the per-channel bias
    # add and the monotonic LeakyReLU) -> 8x less epilogue VPU work.
    pooled = jnp.max(acc.reshape(n, 8, acc.shape[1]), axis=1)
    pooled = pooled + b_ref[...]
    pooled = jnp.where(pooled >= 0.0, pooled, slope * pooled)
    o_ref[...] = pooled.astype(o_ref.dtype)


def _head_kernel(x_ref, w1_ref, b1_ref, g_ref, be_ref, mu_ref, v_ref,
                 w2_ref, b2_ref, o_ref):
    """Fused fc1 -> LeakyReLU -> BatchNorm1d(eval) -> [Dropout=id] -> fc2."""
    h = jnp.dot(x_ref[...].astype(jnp.bfloat16), w1_ref[...],
                preferred_element_type=jnp.float32)
    h = h + b1_ref[...]
    h = jnp.where(h >= 0.0, h, LEAKY_SLOPE * h)
    h = (h - mu_ref[...]) * jax.lax.rsqrt(v_ref[...] + BN_EPS)
    h = h * g_ref[...] + be_ref[...]
    # TODO(synk): train-mode Dropout(p=0.15) / batch-statistic BatchNorm not implemented.
    o_ref[...] = jnp.dot(h.astype(jnp.bfloat16), w2_ref[...],
                         preferred_element_type=jnp.float32) + b2_ref[...]


# ------------------------------ layer wrappers --------------------------------

def conv_pool_layer(x, w_flat, b_row, *, tile_r=2048):
    """Conv3d(3x3x3, valid) + LeakyReLU + MaxPool3d(2) on NDHWC input.

    x: (B, D, H, W, C);  w_flat: (27*C, 128) bf16, K ordered (kd, kh, kw, ci);
    b_row: (1, 128) f32.  Returns (B, Dp, Hp, Wp, 128) bf16.
    """
    B, D, H, W, C = x.shape
    Dp, Hp, Wp = (D - 2) // 2, (H - 2) // 2, (W - 2) // 2
    K = 27 * C
    CO = w_flat.shape[1]

    xb = x.astype(jnp.bfloat16)
    taps = []
    for kd in range(3):
        for kh in range(3):
            for kw in range(3):
                win = xb[:, kd:kd + 2 * Dp, kh:kh + 2 * Hp, kw:kw + 2 * Wp, :]
                win = win.reshape(B, Dp, 2, Hp, 2, Wp, 2, C)
                taps.append(win.transpose(0, 1, 3, 5, 2, 4, 6, 7))
    # rows ordered (b, dp, hp, wp, dd, dh, dw); columns ordered (tap, ci)
    patches = jnp.stack(taps, axis=7).reshape(B * Dp * Hp * Wp * 8, K)

    R = patches.shape[0]                      # always a multiple of 8
    TR = R if R <= tile_r else tile_r         # whole-M block for small layers
    Rp = _round_up(R, TR)
    if Rp != R:
        patches = jnp.pad(patches, ((0, Rp - R), (0, 0)))

    out = pl.pallas_call(
        functools.partial(_conv_pool_kernel, slope=LEAKY_SLOPE),
        out_shape=jax.ShapeDtypeStruct((Rp // 8, CO), jnp.bfloat16),
        grid=(Rp // TR,),
        in_specs=[pl.BlockSpec((TR, K), lambda i: (i, 0)),
                  pl.BlockSpec((K, CO), lambda i: (0, 0)),
                  pl.BlockSpec((1, CO), lambda i: (0, 0))],
        out_specs=pl.BlockSpec((TR // 8, CO), lambda i: (i, 0)),
        compiler_params=pltpu.CompilerParams(dimension_semantics=("parallel",)),
    )(patches, w_flat, b_row)
    return out[:B * Dp * Hp * Wp].reshape(B, Dp, Hp, Wp, CO)


def head(x, p):
    """x: (B, F1) bf16 (NDHWC-flattened, padded channels). Returns (B, 128)."""
    B, F1 = x.shape
    Hd = p['fc1_wp'].shape[1]
    Cp = p['fc2_wp'].shape[1]

    def full(shape):
        return pl.BlockSpec(shape, lambda i, _s=shape: (0,) * len(_s))

    # Note: full-block loads are fine at this size; tile F1/B before scaling up.
    return pl.pallas_call(
        _head_kernel,
        out_shape=jax.ShapeDtypeStruct((B, Cp), jnp.float32),
        grid=(1,),
        in_specs=[full((B, F1)), full((F1, Hd)), full((1, Hd)), full((1, Hd)),
                  full((1, Hd)), full((1, Hd)), full((1, Hd)),
                  full((Hd, Cp)), full((1, Cp))],
        out_specs=full((B, Cp)),
    )(x, p['fc1_wp'], p['fc1_bp'], p['bn_g'], p['bn_b'], p['bn_mean'],
      p['bn_var'], p['fc2_wp'], p['fc2_bp'])


def cnn3d_forward(x_ncdhw, p, n_classes):
    x = x_ncdhw.transpose(0, 2, 3, 4, 1)             # NCDHW -> NDHWC (Cin=1)
    h1 = conv_pool_layer(x, p['w1p'], p['b1p'])      # (B, 5, 9, 9, 128)
    h2 = conv_pool_layer(h1, p['w2p'], p['b2p'])     # (B, 1, 3, 3, 128)
    feats = h2.reshape(h2.shape[0], -1)              # NDHWC flatten (fc1_w permuted to match)
    logits = head(feats, p)                          # (B, 128) padded classes
    return logits[:, :n_classes]


# --------------------------- parameter preparation ----------------------------

def prepare_params(raw, pooled2_spatial):
    """One-time host-side layout work: Cout padding, bf16 casts, fc1 row permute."""
    Dp2, Hp2, Wp2 = pooled2_spatial

    w1 = raw['w1_full']                               # (3,3,3,1,32)
    cin1, c1 = w1.shape[3], w1.shape[4]
    w1p = jnp.pad(w1, ((0, 0),) * 4 + ((0, CPAD - c1),))
    w1p = w1p.reshape(27 * cin1, CPAD).astype(jnp.bfloat16)
    b1p = jnp.pad(raw['b1'], (0, CPAD - c1)).reshape(1, CPAD).astype(jnp.float32)

    w2 = raw['w2_full']                               # (3,3,3,32,64)
    cin2, c2 = w2.shape[3], w2.shape[4]
    w2p = jnp.pad(w2, ((0, 0),) * 3 + ((0, CPAD - cin2), (0, CPAD - c2)))
    w2p = w2p.reshape(27 * CPAD, CPAD).astype(jnp.bfloat16)
    b2p = jnp.pad(raw['b2'], (0, CPAD - c2)).reshape(1, CPAD).astype(jnp.float32)

    # fc1 rows: torch flatten order (c, d, h, w) -> our order (d, h, w, c_padded)
    fc1_w = raw['fc1_w']                              # (c2*Dp2*Hp2*Wp2, 128)
    Hd = fc1_w.shape[1]
    fc1_wp = fc1_w.reshape(c2, Dp2, Hp2, Wp2, Hd).transpose(1, 2, 3, 0, 4)
    fc1_wp = jnp.pad(fc1_wp, ((0, 0), (0, 0), (0, 0), (0, CPAD - c2), (0, 0)))
    fc1_wp = fc1_wp.reshape(Dp2 * Hp2 * Wp2 * CPAD, Hd).astype(jnp.bfloat16)
    fc1_bp = raw['fc1_b'].reshape(1, Hd).astype(jnp.float32)

    fc2_w = raw['fc2_w']                              # (128, n_classes)
    ncls = fc2_w.shape[1]
    fc2_wp = jnp.pad(fc2_w, ((0, 0), (0, CPAD - ncls))).astype(jnp.bfloat16)
    fc2_bp = jnp.pad(raw['fc2_b'], (0, CPAD - ncls)).reshape(1, CPAD).astype(jnp.float32)

    row = lambda a: a.reshape(1, -1).astype(jnp.float32)
    return dict(w1p=w1p, b1p=b1p, w2p=w2p, b2p=b2p,
                fc1_wp=fc1_wp, fc1_bp=fc1_bp,
                bn_g=row(raw['bn_g']), bn_b=row(raw['bn_b']),
                bn_mean=row(raw['bn_mean']), bn_var=row(raw['bn_var']),
                fc2_wp=fc2_wp, fc2_bp=fc2_bp)


# --------------------------- pure-JAX reference -------------------------------

def cnn3d_reference(x, raw):
    def conv3d(t, w, b):
        y = jax.lax.conv_general_dilated(
            t, w, window_strides=(1, 1, 1), padding='VALID',
            dimension_numbers=('NCDHW', 'OIDHW', 'NCDHW'),
            precision=jax.lax.Precision.HIGHEST)
        return y + b[None, :, None, None, None]

    leaky = lambda t: jnp.where(t >= 0, t, LEAKY_SLOPE * t)

    def maxpool(t):
        return jax.lax.reduce_window(t, -jnp.inf, jax.lax.max,
                                     (1, 1, 2, 2, 2), (1, 1, 2, 2, 2), 'VALID')

    w1_oidhw = raw['w1_full'].transpose(4, 3, 0, 1, 2)
    w2_oidhw = raw['w2_full'].transpose(4, 3, 0, 1, 2)
    out = maxpool(leaky(conv3d(x, w1_oidhw, raw['b1'])))
    out = maxpool(leaky(conv3d(out, w2_oidhw, raw['b2'])))
    out = out.reshape(out.shape[0], -1)
    out = leaky(out @ raw['fc1_w'] + raw['fc1_b'])
    out = (out - raw['bn_mean']) / jnp.sqrt(raw['bn_var'] + BN_EPS)
    out = out * raw['bn_g'] + raw['bn_b']
    return out @ raw['fc2_w'] + raw['fc2_b']


# --------------------------------- main ----------------------------------------

if __name__ == "__main__":
    key = jax.random.PRNGKey(0)
    B, D, H, W = 2, 12, 20, 20        # small synthetic volume (depth, height, width)
    n_classes = 3
    # conv1(3^3,valid)+pool2: (12,20,20)->(10,18,18)->(5,9,9)
    # conv2(3^3,valid)+pool2: (5,9,9)->(3,7,7)->(1,3,3)
    d1, h1s, w1s = (D - 2) // 2, (H - 2) // 2, (W - 2) // 2
    Dp2, Hp2, Wp2 = (d1 - 2) // 2, (h1s - 2) // 2, (w1s - 2) // 2
    F1 = 64 * Dp2 * Hp2 * Wp2         # flattened fc1 input features (torch order)

    ks = jax.random.split(key, 9)
    w1_full = jax.random.normal(ks[0], (3, 3, 3, 1, 32), jnp.float32) / np.sqrt(27.0)
    b1 = jax.random.normal(ks[1], (32,), jnp.float32) * 0.05
    w2_full = jax.random.normal(ks[2], (3, 3, 3, 32, 64), jnp.float32) / np.sqrt(27.0 * 32)
    b2 = jax.random.normal(ks[3], (64,), jnp.float32) * 0.05
    fc1_w = jax.random.normal(ks[4], (F1, 128), jnp.float32) / np.sqrt(float(F1))
    fc1_b = jax.random.normal(ks[5], (128,), jnp.float32) * 0.05
    fc2_w = jax.random.normal(ks[6], (128, n_classes), jnp.float32) / np.sqrt(128.0)
    fc2_b = jax.random.normal(ks[7], (n_classes,), jnp.float32) * 0.05

    raw = dict(
        w1_full=w1_full, b1=b1, w2_full=w2_full, b2=b2,
        fc1_w=fc1_w, fc1_b=fc1_b, fc2_w=fc2_w, fc2_b=fc2_b,
        bn_g=jnp.ones((128,), jnp.float32), bn_b=jnp.zeros((128,), jnp.float32),
        bn_mean=jnp.zeros((128,), jnp.float32), bn_var=jnp.ones((128,), jnp.float32),
    )
    params = prepare_params(raw, (Dp2, Hp2, Wp2))

    x = jax.random.normal(ks[8], (B, 1, D, H, W), jnp.float32)   # NCDHW like PyTorch

    fwd = jax.jit(cnn3d_forward, static_argnums=2)
    out = jax.block_until_ready(fwd(x, params, n_classes))
    ref = jax.block_until_ready(cnn3d_reference(x, raw))

    assert out.shape == (B, n_classes), out.shape
    # bf16 MXU operands with f32 accumulation; reference is f32/HIGHEST.
    np.testing.assert_allclose(np.asarray(out), np.asarray(ref), atol=2e-2, rtol=2e-2)
    print("KERNEL_OK")
</pallas_src>

<mosaic_0001>
module attributes {stable_mosaic.version = 11 : i64} {
  func.func @_conv_pool_kernel(%arg0: i32, %arg1: memref<2048x27xbf16, #tpu.memory_space<vmem>>, %arg2: memref<27x128xbf16, #tpu.memory_space<vmem>>, %arg3: memref<1x128xf32, #tpu.memory_space<vmem>>, %arg4: memref<256x128xbf16, #tpu.memory_space<vmem>>) attributes {dimension_semantics = [#tpu.dimension_semantics<parallel>], iteration_bounds = array<i64: 4>, scalar_prefetch = 0 : i64, scratch_operands = 0 : i64, tpu.core_type = #tpu.core_type<tc>, window_params = [{transform_indices = @transform_0, window_bounds = array<i64: 2048, 27>}, {pipeline_mode = #tpu.pipeline_mode<synchronous>, transform_indices = @transform_1, window_bounds = array<i64: 27, 128>}, {pipeline_mode = #tpu.pipeline_mode<synchronous>, transform_indices = @transform_2, window_bounds = array<i64: 1, 128>}, {transform_indices = @transform_3, window_bounds = array<i64: 256, 128>}]} {
    %c0 = arith.constant 0 : index
    %c0_0 = arith.constant 0 : index
    %0 = vector.load %arg1[%c0, %c0_0] : memref<2048x27xbf16, #tpu.memory_space<vmem>>, vector<2048x27xbf16>
    %c0_1 = arith.constant 0 : index
    %c0_2 = arith.constant 0 : index
    %1 = vector.load %arg2[%c0_1, %c0_2] : memref<27x128xbf16, #tpu.memory_space<vmem>>, vector<27x128xbf16>
    %cst = arith.constant dense<0.000000e+00> : vector<2048x128xf32>
    %2 = tpu.matmul %0, %1, %cst {dimension_numbers = #tpu.dot_dimension_numbers<[1], [0], [0], [1], [0, 0, 1, 1], [], []>} : vector<2048x27xbf16>, vector<27x128xbf16>, vector<2048x128xf32> -> vector<2048x128xf32>
    %3 = vector.shape_cast %2 : vector<2048x128xf32> to vector<256x8x128xf32>
    %cst_3 = arith.constant dense<0xFF800000> : vector<256x128xf32>
    %4 = vector.multi_reduction <maximumf>, %3, %cst_3 [1] : vector<256x8x128xf32> to vector<256x128xf32>
    %c0_4 = arith.constant 0 : index
    %c0_5 = arith.constant 0 : index
    %5 = vector.load %arg3[%c0_4, %c0_5] : memref<1x128xf32, #tpu.memory_space<vmem>>, vector<1x128xf32>
    %6 = vector.broadcast %5 : vector<1x128xf32> to vector<256x128xf32>
    %7 = arith.addf %4, %6 : vector<256x128xf32>
    %cst_6 = arith.constant 0.000000e+00 : f32
    %8 = vector.broadcast %cst_6 : f32 to vector<256x128xf32>
    %9 = arith.cmpf oge, %7, %8 : vector<256x128xf32>
    %cst_7 = arith.constant 0.00999999977 : f32
    %10 = vector.broadcast %cst_7 : f32 to vector<256x128xf32>
    %11 = arith.mulf %10, %7 : vector<256x128xf32>
    %12 = arith.select %9, %7, %11 : vector<256x128xi1>, vector<256x128xf32>
    %13 = arith.truncf %12 : vector<256x128xf32> to vector<256x128xbf16>
    %c0_8 = arith.constant 0 : index
    %c0_9 = arith.constant 0 : index
    %14 = vector.load %arg4[%c0_8, %c0_9] : memref<256x128xbf16, #tpu.memory_space<vmem>>, vector<256x128xbf16>
    tpu.vector_store %arg4[%c0_8, %c0_9], %13 {strides = array<i32>} : memref<256x128xbf16, #tpu.memory_space<vmem>>, vector<256x128xbf16>,
    return
  }
  func.func @transform_0(%arg0: i32) -> (i32, i32) {
    %c0_i32 = arith.constant 0 : i32
    %c0_i32_0 = arith.constant 0 : i32
    return %arg0, %c0_i32 : i32, i32
  }
  func.func @transform_1(%arg0: i32) -> (i32, i32) {
    %c0_i32 = arith.constant 0 : i32
    %c0_i32_0 = arith.constant 0 : i32
    %c0_i32_1 = arith.constant 0 : i32
    return %c0_i32, %c0_i32_0 : i32, i32
  }
  func.func @transform_2(%arg0: i32) -> (i32, i32) {
    %c0_i32 = arith.constant 0 : i32
    %c0_i32_0 = arith.constant 0 : i32
    %c0_i32_1 = arith.constant 0 : i32
    return %c0_i32, %c0_i32_0 : i32, i32
  }
  func.func @transform_3(%arg0: i32) -> (i32, i32) {
    %c0_i32 = arith.constant 0 : i32
    %c0_i32_0 = arith.constant 0 : i32
    return %arg0, %c0_i32 : i32, i32
  }
}

module attributes {stable_mosaic.version = 11 : i64} {
  func.func @_conv_pool_kernel(%arg0: i32, %arg1: memref<144x3456xbf16, #tpu.memory_space<vmem>>, %arg2: memref<3456x128xbf16, #tpu.memory_space<vmem>>, %arg3: memref<1x128xf32, #tpu.memory_space<vmem>>, %arg4: memref<18x128xbf16, #tpu.memory_space<vmem>>) attributes {dimension_semantics = [#tpu.dimension_semantics<parallel>], iteration_bounds = array<i64: 1>, scalar_prefetch = 0 : i64, scratch_operands = 0 : i64, tpu.core_type = #tpu.core_type<tc>, window_params = [{transform_indices = @transform_0, window_bounds = array<i64: 144, 3456>}, {pipeline_mode = #tpu.pipeline_mode<synchronous>, transform_indices = @transform_1, window_bounds = array<i64: 3456, 128>}, {pipeline_mode = #tpu.pipeline_mode<synchronous>, transform_indices = @transform_2, window_bounds = array<i64: 1, 128>}, {transform_indices = @transform_3, window_bounds = array<i64: 18, 128>}]} {
    %c0 = arith.constant 0 : index
    %c0_0 = arith.constant 0 : index
    %0 = vector.load %arg1[%c0, %c0_0] : memref<144x3456xbf16, #tpu.memory_space<vmem>>, vector<144x3456xbf16>
    %c0_1 = arith.constant 0 : index
    %c0_2 = arith.constant 0 : index
    %1 = vector.load %arg2[%c0_1, %c0_2] : memref<3456x128xbf16, #tpu.memory_space<vmem>>, vector<3456x128xbf16>
    %cst = arith.constant dense<0.000000e+00> : vector<144x128xf32>
    %2 = tpu.matmul %0, %1, %cst {dimension_numbers = #tpu.dot_dimension_numbers<[1], [0], [0], [1], [0, 0, 1, 1], [], []>} : vector<144x3456xbf16>, vector<3456x128xbf16>, vector<144x128xf32> -> vector<144x128xf32>
    %3 = vector.shape_cast %2 : vector<144x128xf32> to vector<18x8x128xf32>
    %cst_3 = arith.constant dense<0xFF800000> : vector<18x128xf32>
    %4 = vector.multi_reduction <maximumf>, %3, %cst_3 [1] : vector<18x8x128xf32> to vector<18x128xf32>
    %c0_4 = arith.constant 0 : index
    %c0_5 = arith.constant 0 : index
    %5 = vector.load %arg3[%c0_4, %c0_5] : memref<1x128xf32, #tpu.memory_space<vmem>>, vector<1x128xf32>
    %6 = vector.broadcast %5 : vector<1x128xf32> to vector<18x128xf32>
    %7 = arith.addf %4, %6 : vector<18x128xf32>
    %cst_6 = arith.constant 0.000000e+00 : f32
    %8 = vector.broadcast %cst_6 : f32 to vector<18x128xf32>
    %9 = arith.cmpf oge, %7, %8 : vector<18x128xf32>
    %cst_7 = arith.constant 0.00999999977 : f32
    %10 = vector.broadcast %cst_7 : f32 to vector<18x128xf32>
    %11 = arith.mulf %10, %7 : vector<18x128xf32>
    %12 = arith.select %9, %7, %11 : vector<18x128xi1>, vector<18x128xf32>
    %13 = arith.truncf %12 : vector<18x128xf32> to vector<18x128xbf16>
    %c0_8 = arith.constant 0 : index
    %c0_9 = arith.constant 0 : index
    %14 = vector.load %arg4[%c0_8, %c0_9] : memref<18x128xbf16, #tpu.memory_space<vmem>>, vector<18x128xbf16>
    tpu.vector_store %arg4[%c0_8, %c0_9], %13 {strides = array<i32>} : memref<18x128xbf16, #tpu.memory_space<vmem>>, vector<18x128xbf16>,
    return
  }
  func.func @transform_0(%arg0: i32) -> (i32, i32) {
    %c0_i32 = arith.constant 0 : i32
    %c0_i32_0 = arith.constant 0 : i32
    return %arg0, %c0_i32 : i32, i32
  }
  func.func @transform_1(%arg0: i32) -> (i32, i32) {
    %c0_i32 = arith.constant 0 : i32
    %c0_i32_0 = arith.constant 0 : i32
    %c0_i32_1 = arith.constant 0 : i32
    return %c0_i32, %c0_i32_0 : i32, i32
  }
  func.func @transform_2(%arg0: i32) -> (i32, i32) {
    %c0_i32 = arith.constant 0 : i32
    %c0_i32_0 = arith.constant 0 : i32
    %c0_i32_1 = arith.constant 0 : i32
    return %c0_i32, %c0_i32_0 : i32, i32
  }
  func.func @transform_3(%arg0: i32) -> (i32, i32) {
    %c0_i32 = arith.constant 0 : i32
    %c0_i32_0 = arith.constant 0 : i32
    return %arg0, %c0_i32 : i32, i32
  }
}

module attributes {stable_mosaic.version = 11 : i64} {
  func.func @_head_kernel(%arg0: i32, %arg1: memref<2x1152xbf16, #tpu.memory_space<vmem>>, %arg2: memref<1152x128xbf16, #tpu.memory_space<vmem>>, %arg3: memref<1x128xf32, #tpu.memory_space<vmem>>, %arg4: memref<1x128xf32, #tpu.memory_space<vmem>>, %arg5: memref<1x128xf32, #tpu.memory_space<vmem>>, %arg6: memref<1x128xf32, #tpu.memory_space<vmem>>, %arg7: memref<1x128xf32, #tpu.memory_space<vmem>>, %arg8: memref<128x128xbf16, #tpu.memory_space<vmem>>, %arg9: memref<1x128xf32, #tpu.memory_space<vmem>>, %arg10: memref<2x128xf32, #tpu.memory_space<vmem>>) attributes {dimension_semantics = [#tpu.dimension_semantics<arbitrary>], iteration_bounds = array<i64: 1>, scalar_prefetch = 0 : i64, scratch_operands = 0 : i64, tpu.core_type = #tpu.core_type<tc>, window_params = [{pipeline_mode = #tpu.pipeline_mode<synchronous>, transform_indices = @transform_0, window_bounds = array<i64: 2, 1152>}, {pipeline_mode = #tpu.pipeline_mode<synchronous>, transform_indices = @transform_1, window_bounds = array<i64: 1152, 128>}, {pipeline_mode = #tpu.pipeline_mode<synchronous>, transform_indices = @transform_2, window_bounds = array<i64: 1, 128>}, {pipeline_mode = #tpu.pipeline_mode<synchronous>, transform_indices = @transform_3, window_bounds = array<i64: 1, 128>}, {pipeline_mode = #tpu.pipeline_mode<synchronous>, transform_indices = @transform_4, window_bounds = array<i64: 1, 128>}, {pipeline_mode = #tpu.pipeline_mode<synchronous>, transform_indices = @transform_5, window_bounds = array<i64: 1, 128>}, {pipeline_mode = #tpu.pipeline_mode<synchronous>, transform_indices = @transform_6, window_bounds = array<i64: 1, 128>}, {pipeline_mode = #tpu.pipeline_mode<synchronous>, transform_indices = @transform_7, window_bounds = array<i64: 128, 128>}, {pipeline_mode = #tpu.pipeline_mode<synchronous>, transform_indices = @transform_8, window_bounds = array<i64: 1, 128>}, {pipeline_mode = #tpu.pipeline_mode<synchronous>, transform_indices = @transform_9, window_bounds = array<i64: 2, 128>}]} {
    %c0 = arith.constant 0 : index
    %c0_0 = arith.constant 0 : index
    %0 = vector.load %arg1[%c0, %c0_0] : memref<2x1152xbf16, #tpu.memory_space<vmem>>, vector<2x1152xbf16>
    %c0_1 = arith.constant 0 : index
    %c0_2 = arith.constant 0 : index
    %1 = vector.load %arg2[%c0_1, %c0_2] : memref<1152x128xbf16, #tpu.memory_space<vmem>>, vector<1152x128xbf16>
    %cst = arith.constant dense<0.000000e+00> : vector<2x128xf32>
    %2 = tpu.matmul %0, %1, %cst {dimension_numbers = #tpu.dot_dimension_numbers<[1], [0], [0], [1], [0, 0, 1, 1], [], []>} : vector<2x1152xbf16>, vector<1152x128xbf16>, vector<2x128xf32> -> vector<2x128xf32>
    %c0_3 = arith.constant 0 : index
    %c0_4 = arith.constant 0 : index
    %3 = vector.load %arg3[%c0_3, %c0_4] : memref<1x128xf32, #tpu.memory_space<vmem>>, vector<1x128xf32>
    %4 = vector.broadcast %3 : vector<1x128xf32> to vector<2x128xf32>
    %5 = arith.addf %2, %4 : vector<2x128xf32>
    %cst_5 = arith.constant 0.000000e+00 : f32
    %6 = vector.broadcast %cst_5 : f32 to vector<2x128xf32>
    %7 = arith.cmpf oge, %5, %6 : vector<2x128xf32>
    %cst_6 = arith.constant 0.00999999977 : f32
    %8 = vector.broadcast %cst_6 : f32 to vector<2x128xf32>
    %9 = arith.mulf %8, %5 : vector<2x128xf32>
    %10 = arith.select %7, %5, %9 : vector<2x128xi1>, vector<2x128xf32>
    %c0_7 = arith.constant 0 : index
    %c0_8 = arith.constant 0 : index
    %11 = vector.load %arg6[%c0_7, %c0_8] : memref<1x128xf32, #tpu.memory_space<vmem>>, vector<1x128xf32>
    %12 = vector.broadcast %11 : vector<1x128xf32> to vector<2x128xf32>
    %13 = arith.subf %10, %12 : vector<2x128xf32>
    %c0_9 = arith.constant 0 : index
    %c0_10 = arith.constant 0 : index
    %14 = vector.load %arg7[%c0_9, %c0_10] : memref<1x128xf32, #tpu.memory_space<vmem>>, vector<1x128xf32>
    %cst_11 = arith.constant 9.99999974E-6 : f32
    %15 = vector.broadcast %cst_11 : f32 to vector<1x128xf32>
    %16 = arith.addf %14, %15 : vector<1x128xf32>
    %17 = math.rsqrt %16 : vector<1x128xf32>
    %18 = vector.broadcast %17 : vector<1x128xf32> to vector<2x128xf32>
    %19 = arith.mulf %13, %18 : vector<2x128xf32>
    %c0_12 = arith.constant 0 : index
    %c0_13 = arith.constant 0 : index
    %20 = vector.load %arg4[%c0_12, %c0_13] : memref<1x128xf32, #tpu.memory_space<vmem>>, vector<1x128xf32>
    %21 = vector.broadcast %20 : vector<1x128xf32> to vector<2x128xf32>
    %22 = arith.mulf %19, %21 : vector<2x128xf32>
    %c0_14 = arith.constant 0 : index
    %c0_15 = arith.constant 0 : index
    %23 = vector.load %arg5[%c0_14, %c0_15] : memref<1x128xf32, #tpu.memory_space<vmem>>, vector<1x128xf32>
    %24 = vector.broadcast %23 : vector<1x128xf32> to vector<2x128xf32>
    %25 = arith.addf %22, %24 : vector<2x128xf32>
    %26 = arith.truncf %25 : vector<2x128xf32> to vector<2x128xbf16>
    %c0_16 = arith.constant 0 : index
    %c0_17 = arith.constant 0 : index
    %27 = vector.load %arg8[%c0_16, %c0_17] : memref<128x128xbf16, #tpu.memory_space<vmem>>, vector<128x128xbf16>
    %cst_18 = arith.constant dense<0.000000e+00> : vector<2x128xf32>
    %28 = tpu.matmul %26, %27, %cst_18 {dimension_numbers = #tpu.dot_dimension_numbers<[1], [0], [0], [1], [0, 0, 1, 1], [], []>} : vector<2x128xbf16>, vector<128x128xbf16>, vector<2x128xf32> -> vector<2x128xf32>
    %c0_19 = arith.constant 0 : index
    %c0_20 = arith.constant 0 : index
    %29 = vector.load %arg9[%c0_19, %c0_20] : memref<1x128xf32, #tpu.memory_space<vmem>>, vector<1x128xf32>
    %30 = vector.broadcast %29 : vector<1x128xf32> to vector<2x128xf32>
    %31 = arith.addf %28, %30 : vector<2x128xf32>
    %c0_21 = arith.constant 0 : index
    %c0_22 = arith.constant 0 : index
    %32 = vector.load %arg10[%c0_21, %c0_22] : memref<2x128xf32, #tpu.memory_space<vmem>>, vector<2x128xf32>
    tpu.vector_store %arg10[%c0_21, %c0_22], %31 {strides = array<i32>} : memref<2x128xf32, #tpu.memory_space<vmem>>, vector<2x128xf32>,
    return
  }
  func.func @transform_0(%arg0: i32) -> (i32, i32) {
    %c0_i32 = arith.constant 0 : i32
    %c0_i32_0 = arith.constant 0 : i32
    %c0_i32_1 = arith.constant 0 : i32
    return %c0_i32, %c0_i32_0 : i32, i32
  }
  func.func @transform_1(%arg0: i32) -> (i32, i32) {
    %c0_i32 = arith.constant 0 : i32
    %c0_i32_0 = arith.constant 0 : i32
    %c0_i32_1 = arith.constant 0 : i32
    return %c0_i32, %c0_i32_0 : i32, i32
  }
  func.func @transform_2(%arg0: i32) -> (i32, i32) {
    %c0_i32 = arith.constant 0 : i32
    %c0_i32_0 = arith.constant 0 : i32
    %c0_i32_1 = arith.constant 0 : i32
    return %c0_i32, %c0_i32_0 : i32, i32
  }
  func.func @transform_3(%arg0: i32) -> (i32, i32) {
    %c0_i32 = arith.constant 0 : i32
    %c0_i32_0 = arith.constant 0 : i32
    %c0_i32_1 = arith.constant 0 : i32
    return %c0_i32, %c0_i32_0 : i32, i32
  }
  func.func @transform_4(%arg0: i32) -> (i32, i32) {
    %c0_i32 = arith.constant 0 : i32
    %c0_i32_0 = arith.constant 0 : i32
    %c0_i32_1 = arith.constant 0 : i32
    return %c0_i32, %c0_i32_0 : i32, i32
  }
  func.func @transform_5(%arg0: i32) -> (i32, i32) {
    %c0_i32 = arith.constant 0 : i32
    %c0_i32_0 = arith.constant 0 : i32
    %c0_i32_1 = arith.constant 0 : i32
    return %c0_i32, %c0_i32_0 : i32, i32
  }
  func.func @transform_6(%arg0: i32) -> (i32, i32) {
    %c0_i32 = arith.constant 0 : i32
    %c0_i32_0 = arith.constant 0 : i32
    %c0_i32_1 = arith.constant 0 : i32
    return %c0_i32, %c0_i32_0 : i32, i32
  }
  func.func @transform_7(%arg0: i32) -> (i32, i32) {
    %c0_i32 = arith.constant 0 : i32
    %c0_i32_0 = arith.constant 0 : i32
    %c0_i32_1 = arith.constant 0 : i32
    return %c0_i32, %c0_i32_0 : i32, i32
  }
  func.func @transform_8(%arg0: i32) -> (i32, i32) {
    %c0_i32 = arith.constant 0 : i32
    %c0_i32_0 = arith.constant 0 : i32
    %c0_i32_1 = arith.constant 0 : i32
    return %c0_i32, %c0_i32_0 : i32, i32
  }
  func.func @transform_9(%arg0: i32) -> (i32, i32) {
    %c0_i32 = arith.constant 0 : i32
    %c0_i32_0 = arith.constant 0 : i32
    %c0_i32_1 = arith.constant 0 : i32
    return %c0_i32, %c0_i32_0 : i32, i32
  }
}

</mosaic_0001>

<bundles_post_ra>
// kernel: cnn3d_forward.3
= control target key start
LH: loop header
LB: loop body
LE: loop exit
PB: predicated region body
PF: predicated region fallthrough
CT: control target
= control target key end

     0   :  { %s8340_s12 = smov 0   ;;  %s10622_s0 = inlined_call_operand.vmem [shape: bf16[8192,27], index: 0, kind: input, shape index: {}]   ;;  %s10623_s1 = inlined_call_operand.vmem [shape: bf16[27,128], index: 1, kind: input, shape index: {}]   ;;  %s10624_s2 = inlined_call_operand.vmem [shape: f32[1,128], index: 2, kind: input, shape index: {}]   ;;  %s10625_s3 = inlined_call_operand.vmem [shape: bf16[1024,128], index: 3, kind: output, shape index: {}]  }
   0x1 LB: > { %s6989_s13 = sadd.s32 4294967295, %s8317_s12   ;;  %p6993_p0 = scmp.ge.s32.totalorder %s8317_s12, 1  ;;  %s8317_s12 = sphi %s8340_s12, %s13_s12  }
   0x2   : > { %p138_p1 = scmp.lt.s32.totalorder %s8317_s12, 5 }
   0x4   : > { %p139_p2 = pnand %p6993_p0, %p138_p1 }
   0x6   : > { %142 = sbr.rel (%p139_p2) target bundleno = 1134 (0x46e), region = 32 }
   0xd   : > { %v8174_v0 = vld [vmem:[%s10623_s1] sm:$0xff]   ;;  %vm1471_vm0 = vcmask 1044480   ;;  %v8175_v1 = vld [vmem:[%s10623_s1 + $0x8] sm:$0x3f]   ;;  %vm1472_vm1 = vcmask 1045504   ;;  %s6994_s18 = sshll.u32 %s6989_s13, 8 }
   0xe   : > { %7901 = vmatprep.subr.bf16.mxu0 %v8174_v0  ;;  %8161 = vmatprep.subr.bf16.mxu1 %v8174_v0  ;;  %v8319_v2 = vmov 65535   ;;  %p163_p3 = scmp.lt.s32.totalorder %s6994_s18, 1023  ;;  %vm1086_vm2 = vcmask 220160   ;;  %vm6383_vm9 = vcmask 1041409   ;;  %vm6386_vm11 = vcmask 1042434   ;;  %s8809_s25 = sshll.u32 %s6989_s13, 5 }
   0xf   : > { %7902 = vmatpush3.bf16.msra.mxu0 %v8174_v0  ;;  %8163 = vmatpush3.bf16.msra.mxu1 %v8174_v0  ;;  %v1473_v3 = vsel %vm1471_vm0, 4294967295, %v8319_v2  ;;  %vm6389_vm12 = vcmask 1043459   ;;  %vm6392_vm14 = vcmask 1044484   ;;  %p169_p4 = scmp.lt.s32.totalorder %s8809_s25, 127 }
  0x10   : > { %v1474_v4 = vsel %vm1472_vm1, %v1473_v3, 0  ;;  %s10775_s18 = smov (!%p163_p3, %s6994_s18), 1023 }
  0x11   : > { %v1476_v5 = vand.u32 %v8175_v1, %v1474_v4  ;;  %s6995_s19 = sshll.u32 %s10775_s18, 2  ;;  %s10777_s25 = smov (!%p169_p4, %s8809_s25), 127 }
  0x12   : > { %s8359_s22 = scalar_lea.vmem %s10622_s0, %s6995_s19  ;;  %s6997_s26 = sshll.u32 %s10777_s25, 2 }
  0x13   : > { %7903 = vmatprep.subr.bf16.mxu0 %v1476_v5  ;;  %8162 = vmatprep.subr.bf16.mxu1 %v1476_v5  ;;  %v8176_v6 = vld [vmem:[%s8359_s22] sm:$0xff]   ;;  %v8178_v8 = vld [vmem:[%s8359_s22 + $0x8] sm:$0xff]   ;;  %v8180_v10 = vld [vmem:[%s8359_s22 + $0x10] sm:$0xff]   ;;  %s8849_s29 = scalar_lea.vmem %s10625_s3, %s6997_s26 }
  0x14   : > { %7904 = vmatpush3.bf16.msra.mxu0 %v1476_v5  ;;  %8164 = vmatpush3.bf16.msra.mxu1 %v1476_v5  ;;  %v8177_v7 = vld [vmem:[%s8359_s22 + $0x200] sm:$0xff]   ;;  %v8179_v9 = vld [vmem:[%s8359_s22 + $0x208] sm:$0xff]   ;;  %v8181_v11 = vld [vmem:[%s8359_s22 + $0x210] sm:$0xff]  }
  0x15   : > { %7905 = vmatprep.mubr.msk.bf16.mxu0 %vm1086_vm2, %v8176_v6  ;;  %8033 = vmatprep.mubr.msk.bf16.mxu1 %vm1086_vm2, %v8177_v7  ;;  %v8182_v12 = vld [vmem:[%s8359_s22 + $0x18] sm:$0xff]   ;;  %v8184_v14 = vld [vmem:[%s8359_s22 + $0x20] sm:$0xff]   ;;  %v8186_v16 = vld [vmem:[%s8359_s22 + $0x28] sm:$0xff]  }
  0x16   : > { %v8183_v13 = vld [vmem:[%s8359_s22 + $0x218] sm:$0xff]   ;;  %v8185_v15 = vld [vmem:[%s8359_s22 + $0x220] sm:$0xff]   ;;  %v8187_v17 = vld [vmem:[%s8359_s22 + $0x228] sm:$0xff]  }
  0x17   : > { %7906 = vmatmul.mubr.msk.bf16.vlgmr.msra.gmra.mrb[0].mxu0 %vm1086_vm2, %v8178_v8  ;;  %8034 = vmatmul.mubr.msk.bf16.vlgmr.msra.gmra.mrb[0].mxu1 %vm1086_vm2, %v8179_v9  ;;  %v8188_v18 = vld [vmem:[%s8359_s22 + $0x30] sm:$0xff]   ;;  %v8190_v20 = vld [vmem:[%s8359_s22 + $0x38] sm:$0xff]   ;;  %v8192_v22 = vld [vmem:[%s8359_s22 + $0x40] sm:$0xff]  }
  0x18   : > { %7909 = vmatprep.mubr.msk.bf16.mxu0 %vm1086_vm2, %v8180_v10  ;;  %8037 = vmatprep.mubr.msk.bf16.mxu1 %vm1086_vm2, %v8181_v11  ;;  %v8189_v19 = vld [vmem:[%s8359_s22 + $0x230] sm:$0xff]   ;;  %v8191_v21 = vld [vmem:[%s8359_s22 + $0x238] sm:$0xff]   ;;  %v8193_v23 = vld [vmem:[%s8359_s22 + $0x240] sm:$0xff]  }
  0x19   : > { %v8194_v24 = vld [vmem:[%s8359_s22 + $0x48] sm:$0xff]   ;;  %v8196_v26 = vld [vmem:[%s8359_s22 + $0x50] sm:$0xff]   ;;  %v8198_v28 = vld [vmem:[%s8359_s22 + $0x58] sm:$0xff]  }
  0x1a   : > { %v8195_v25 = vld [vmem:[%s8359_s22 + $0x248] sm:$0xff]   ;;  %v8197_v27 = vld [vmem:[%s8359_s22 + $0x250] sm:$0xff]   ;;  %v8199_v29 = vld [vmem:[%s8359_s22 + $0x258] sm:$0xff]  }
  0x1b   : > { %v8200_v30 = vld [vmem:[%s8359_s22 + $0x60] sm:$0xff]   ;;  %v8202_v32 = vld [vmem:[%s8359_s22 + $0x68] sm:$0xff]   ;;  %v8204_v34 = vld [vmem:[%s8359_s22 + $0x70] sm:$0xff]  }
  0x1c   : > { %v8201_v31 = vld [vmem:[%s8359_s22 + $0x260] sm:$0xff]   ;;  %v8203_v33 = vld [vmem:[%s8359_s22 + $0x268] sm:$0xff]   ;;  %v8205_v35 = vld [vmem:[%s8359_s22 + $0x270] sm:$0xff]  }
  0x1d   : > { %v8206_v36 = vld [vmem:[%s8359_s22 + $0x78] sm:$0xff]   ;;  %v8208_v38 = vld [vmem:[%s8359_s22 + $0x80] sm:$0xff]   ;;  %v8210_v40 = vld [vmem:[%s8359_s22 + $0x88] sm:$0xff]  }
  0x1e   : > { %v8207_v37 = vld [vmem:[%s8359_s22 + $0x278] sm:$0xff]   ;;  %v8209_v39 = vld [vmem:[%s8359_s22 + $0x280] sm:$0xff]   ;;  %v8211_v41 = vld [vmem:[%s8359_s22 + $0x288] sm:$0xff]  }
  0x1f   : > { %7910 = vmatmul.mubr.msk.bf16.gmra.mrb[4].mxu0 %vm1086_vm2, %v8182_v12  ;;  %8038 = vmatmul.mubr.msk.bf16.gmra.mrb[4].mxu1 %vm1086_vm2, %v8183_v13  ;;  %v8212_v42 = vld [vmem:[%s8359_s22 + $0x90] sm:$0xff]   ;;  %v8214_v44 = vld [vmem:[%s8359_s22 + $0x98] sm:$0xff]   ;;  %v8216_v46 = vld [vmem:[%s8359_s22 + $0xa0] sm:$0xff]  }
  0x20   : > { %7913 = vmatprep.mubr.msk.bf16.mxu0 %vm1086_vm2, %v8184_v14  ;;  %8041 = vmatprep.mubr.msk.bf16.mxu1 %vm1086_vm2, %v8185_v15  ;;  %v8213_v43 = vld [vmem:[%s8359_s22 + $0x290] sm:$0xff]   ;;  %v8215_v45 = vld [vmem:[%s8359_s22 + $0x298] sm:$0xff]   ;;  %v8217_v47 = vld [vmem:[%s8359_s22 + $0x2a0] sm:$0xff]  }
  0x21   : > { %v8218_v48 = vld [vmem:[%s8359_s22 + $0xa8] sm:$0xff]   ;;  %v8220_v50 = vld [vmem:[%s8359_s22 + $0xb0] sm:$0xff]   ;;  %v8222_v52 = vld [vmem:[%s8359_s22 + $0xb8] sm:$0xff]  }
  0x22   : > { %v8219_v49 = vld [vmem:[%s8359_s22 + $0x2a8] sm:$0xff]   ;;  %v8221_v51 = vld [vmem:[%s8359_s22 + $0x2b0] sm:$0xff]   ;;  %v8223_v53 = vld [vmem:[%s8359_s22 + $0x2b8] sm:$0xff]  }
  0x23   : > { %v8224_v54 = vld [vmem:[%s8359_s22 + $0xc0] sm:$0xff]   ;;  %v8226_v56 = vld [vmem:[%s8359_s22 + $0xc8] sm:$0xff]   ;;  %v8228_v58 = vld [vmem:[%s8359_s22 + $0xd0] sm:$0xff]  }
  0x24   : > { %v8225_v55 = vld [vmem:[%s8359_s22 + $0x2c0] sm:$0xff]   ;;  %v8227_v57 = vld [vmem:[%s8359_s22 + $0x2c8] sm:$0xff]   ;;  %v8229_v59 = vld [vmem:[%s8359_s22 + $0x2d0] sm:$0xff]  }
  0x25   : > { %v8230_v60 = vld [vmem:[%s8359_s22 + $0xd8] sm:$0xff]   ;;  %v8232_v62 = vld [vmem:[%s8359_s22 + $0xe0] sm:$0xff]   ;;  %v8234_v0 = vld [vmem:[%s8359_s22 + $0xe8] sm:$0xff]  }
  0x26   : > { %v8231_v61 = vld [vmem:[%s8359_s22 + $0x2d8] sm:$0xff]   ;;  %v8233_v63 = vld [vmem:[%s8359_s22 + $0x2e0] sm:$0xff]   ;;  %v8235_v1 = vld [vmem:[%s8359_s22 + $0x2e8] sm:$0xff]  }
  0x27   : > { %7914 = vmatmul.mubr.msk.bf16.gmra.mrb[8].mxu0 %vm1086_vm2, %v8186_v16  ;;  %8042 = vmatmul.mubr.msk.bf16.gmra.mrb[8].mxu1 %vm1086_vm2, %v8187_v17  ;;  %v8236_v2 = vld [vmem:[%s8359_s22 + $0xf0] sm:$0xff]   ;;  %v8238_v4 = vld [vmem:[%s8359_s22 + $0xf8] sm:$0xff]   ;;  %v8240_v6 = vld [vmem:[%s8359_s22 + $0x100] sm:$0xff]  }
  0x28   : > { %7917 = vmatprep.mubr.msk.bf16.mxu0 %vm1086_vm2, %v8188_v18  ;;  %8045 = vmatprep.mubr.msk.bf16.mxu1 %vm1086_vm2, %v8189_v19  ;;  %v8237_v3 = vld [vmem:[%s8359_s22 + $0x2f0] sm:$0xff]   ;;  %v8239_v5 = vld [vmem:[%s8359_s22 + $0x2f8] sm:$0xff]   ;;  %v8241_v7 = vld [vmem:[%s8359_s22 + $0x300] sm:$0xff]  }
  0x29   : > { %v8242_v8 = vld [vmem:[%s8359_s22 + $0x108] sm:$0xff]   ;;  %v8244_v10 = vld [vmem:[%s8359_s22 + $0x110] sm:$0xff]   ;;  %v8246_v12 = vld [vmem:[%s8359_s22 + $0x118] sm:$0xff]  }
  0x2a   : > { %v8243_v9 = vld [vmem:[%s8359_s22 + $0x308] sm:$0xff]   ;;  %v8245_v11 = vld [vmem:[%s8359_s22 + $0x310] sm:$0xff]   ;;  %v8247_v13 = vld [vmem:[%s8359_s22 + $0x318] sm:$0xff]  }
  0x2b   : > { %v8248_v14 = vld [vmem:[%s8359_s22 + $0x120] sm:$0xff]   ;;  %v8250_v16 = vld [vmem:[%s8359_s22 + $0x128] sm:$0xff]   ;;  %v8252_v18 = vld [vmem:[%s8359_s22 + $0x130] sm:$0xff]  }
  0x2c   : > { %v8249_v15 = vld [vmem:[%s8359_s22 + $0x320] sm:$0xff]   ;;  %v8251_v17 = vld [vmem:[%s8359_s22 + $0x328] sm:$0xff]   ;;  %v8253_v19 = vld [vmem:[%s8359_s22 + $0x330] sm:$0xff]  }
  0x2f   : > { %7918 = vmatmul.mubr.msk.bf16.gmra.mrb[12].mxu0 %vm1086_vm2, %v8190_v20  ;;  %8046 = vmatmul.mubr.msk.bf16.gmra.mrb[12].mxu1 %vm1086_vm2, %v8191_v21  ;;  %v8254_v20 = vld [vmem:[%s8359_s22 + $0x138] sm:$0xff]  }
  0x30   : > { %7921 = vmatprep.mubr.msk.bf16.mxu0 %vm1086_vm2, %v8192_v22  ;;  %8049 = vmatprep.mubr.msk.bf16.mxu1 %vm1086_vm2, %v8193_v23  ;;  %v8255_v21 = vld [vmem:[%s8359_s22 + $0x338] sm:$0xff]   ;;  %v8256_v22 = vld [vmem:[%s8359_s22 + $0x140] sm:$0xff]  }
  0x31   : > { %v8257_v23 = vld [vmem:[%s8359_s22 + $0x340] sm:$0xff]  }
  0x37   : > { %7922 = vmatmul.mubr.msk.bf16.gmra.mrb[16].mxu0 %vm1086_vm2, %v8194_v24  ;;  %8050 = vmatmul.mubr.msk.bf16.gmra.mrb[16].mxu1 %vm1086_vm2, %v8195_v25  ;;  %v8258_v24 = vld [vmem:[%s8359_s22 + $0x148] sm:$0xff]  }
  0x38   : > { %7925 = vmatprep.mubr.msk.bf16.mxu0 %vm1086_vm2, %v8196_v26  ;;  %8053 = vmatprep.mubr.msk.bf16.mxu1 %vm1086_vm2, %v8197_v27  ;;  %v8259_v25 = vld [vmem:[%s8359_s22 + $0x348] sm:$0xff]   ;;  %v8260_v26 = vld [vmem:[%s8359_s22 + $0x150] sm:$0xff]  }
  0x39   : > { %v8261_v27 = vld [vmem:[%s8359_s22 + $0x350] sm:$0xff]  }
  0x3f   : > { %7926 = vmatmul.mubr.msk.bf16.gmra.mrb[20].mxu0 %vm1086_vm2, %v8198_v28  ;;  %8054 = vmatmul.mubr.msk.bf16.gmra.mrb[20].mxu1 %vm1086_vm2, %v8199_v29  ;;  %v8262_v28 = vld [vmem:[%s8359_s22 + $0x158] sm:$0xff]  }
  0x40   : > { %7929 = vmatprep.mubr.msk.bf16.mxu0 %vm1086_vm2, %v8200_v30  ;;  %8057 = vmatprep.mubr.msk.bf16.mxu1 %vm1086_vm2, %v8201_v31  ;;  %v8263_v29 = vld [vmem:[%s8359_s22 + $0x358] sm:$0xff]   ;;  %v8264_v30 = vld [vmem:[%s8359_s22 + $0x160] sm:$0xff]  }
  0x41   : > { %v8265_v31 = vld [vmem:[%s8359_s22 + $0x360] sm:$0xff]  }
  0x47   : > { %7930 = vmatmul.mubr.msk.bf16.gmra.mrb[24].mxu0 %vm1086_vm2, %v8202_v32  ;;  %8058 = vmatmul.mubr.msk.bf16.gmra.mrb[24].mxu1 %vm1086_vm2, %v8203_v33  ;;  %v8266_v32 = vld [vmem:[%s8359_s22 + $0x168] sm:$0xff]  }
  0x48   : > { %7933 = vmatprep.mubr.msk.bf16.mxu0 %vm1086_vm2, %v8204_v34  ;;  %8061 = vmatprep.mubr.msk.bf16.mxu1 %vm1086_vm2, %v8205_v35  ;;  %v8267_v33 = vld [vmem:[%s8359_s22 + $0x368] sm:$0xff]   ;;  %v8268_v34 = vld [vmem:[%s8359_s22 + $0x170] sm:$0xff]  }
  0x49   : > { %v8269_v35 = vld [vmem:[%s8359_s22 + $0x370] sm:$0xff]  }
  0x4f   : > { %7934 = vmatmul.mubr.msk.bf16.gmra.mrb[28].mxu0 %vm1086_vm2, %v8206_v36  ;;  %8062 = vmatmul.mubr.msk.bf16.gmra.mrb[28].mxu1 %vm1086_vm2, %v8207_v37  ;;  %v8270_v36 = vld [vmem:[%s8359_s22 + $0x178] sm:$0xff]  }
  0x50   : > { %7937 = vmatprep.mubr.msk.bf16.mxu0 %vm1086_vm2, %v8208_v38  ;;  %8065 = vmatprep.mubr.msk.bf16.mxu1 %vm1086_vm2, %v8209_v39  ;;  %v8271_v37 = vld [vmem:[%s8359_s22 + $0x378] sm:$0xff]   ;;  %v8272_v38 = vld [vmem:[%s8359_s22 + $0x180] sm:$0xff]  }
  0x51   : > { %v8273_v39 = vld [vmem:[%s8359_s22 + $0x380] sm:$0xff]  }
  0x57   : > { %7938 = vmatmul.mubr.msk.bf16.gmra.mrb[32].mxu0 %vm1086_vm2, %v8210_v40  ;;  %8066 = vmatmul.mubr.msk.bf16.gmra.mrb[32].mxu1 %vm1086_vm2, %v8211_v41  ;;  %v8274_v40 = vld [vmem:[%s8359_s22 + $0x188] sm:$0xff]  }
  0x58   : > { %7941 = vmatprep.mubr.msk.bf16.mxu0 %vm1086_vm2, %v8212_v42  ;;  %8069 = vmatprep.mubr.msk.bf16.mxu1 %vm1086_vm2, %v8213_v43  ;;  %v8275_v41 = vld [vmem:[%s8359_s22 + $0x388] sm:$0xff]   ;;  %v8276_v42 = vld [vmem:[%s8359_s22 + $0x190] sm:$0xff]  }
  0x59   : > { %v8277_v43 = vld [vmem:[%s8359_s22 + $0x390] sm:$0xff]  }
  0x5f   : > { %7942 = vmatmul.mubr.msk.bf16.gmra.mrb[36].mxu0 %vm1086_vm2, %v8214_v44  ;;  %8070 = vmatmul.mubr.msk.bf16.gmra.mrb[36].mxu1 %vm1086_vm2, %v8215_v45  ;;  %v8278_v44 = vld [vmem:[%s8359_s22 + $0x198] sm:$0xff]  }
  0x60   : > { %7945 = vmatprep.mubr.msk.bf16.mxu0 %vm1086_vm2, %v8216_v46  ;;  %8073 = vmatprep.mubr.msk.bf16.mxu1 %vm1086_vm2, %v8217_v47  ;;  %v8279_v45 = vld [vmem:[%s8359_s22 + $0x398] sm:$0xff]   ;;  %v8280_v46 = vld [vmem:[%s8359_s22 + $0x1a0] sm:$0xff]  }
  0x61   : > { %v8281_v47 = vld [vmem:[%s8359_s22 + $0x3a0] sm:$0xff]  }
  0x67   : > { %7946 = vmatmul.mubr.msk.bf16.gmra.mrb[40].mxu0 %vm1086_vm2, %v8218_v48  ;;  %8074 = vmatmul.mubr.msk.bf16.gmra.mrb[40].mxu1 %vm1086_vm2, %v8219_v49  ;;  %v8282_v48 = vld [vmem:[%s8359_s22 + $0x1a8] sm:$0xff]  }
  0x68   : > { %7949 = vmatprep.mubr.msk.bf16.mxu0 %vm1086_vm2, %v8220_v50  ;;  %8077 = vmatprep.mubr.msk.bf16.mxu1 %vm1086_vm2, %v8221_v51  ;;  %v8283_v49 = vld [vmem:[%s8359_s22 + $0x3a8] sm:$0xff]   ;;  %v8284_v50 = vld [vmem:[%s8359_s22 + $0x1b0] sm:$0xff]  }
  0x69   : > { %v8285_v51 = vld [vmem:[%s8359_s22 + $0x3b0] sm:$0xff]  }
  0x6f   : > { %7950 = vmatmul.mubr.msk.bf16.gmra.mrb[44].mxu0 %vm1086_vm2, %v8222_v52  ;;  %8078 = vmatmul.mubr.msk.bf16.gmra.mrb[44].mxu1 %vm1086_vm2, %v8223_v53 }
  0x70   : > { %7953 = vmatprep.mubr.msk.bf16.mxu0 %vm1086_vm2, %v8224_v54  ;;  %8081 = vmatprep.mubr.msk.bf16.mxu1 %vm1086_vm2, %v8225_v55 }
  0x77   : > { %7954 = vmatmul.mubr.msk.bf16.gmra.mrb[48].mxu0 %vm1086_vm2, %v8226_v56  ;;  %8082 = vmatmul.mubr.msk.bf16.gmra.mrb[48].mxu1 %vm1086_vm2, %v8227_v57  ;;  %v8286_v56 = vld [vmem:[%s8359_s22 + $0x1b8] sm:$0xff]  }
  0x78   : > { %7957 = vmatprep.mubr.msk.bf16.mxu0 %vm1086_vm2, %v8228_v58  ;;  %8085 = vmatprep.mubr.msk.bf16.mxu1 %vm1086_vm2, %v8229_v59 }
  0x7f   : > { %7958 = vmatmul.mubr.msk.bf16.gmra.mrb[52].mxu0 %vm1086_vm2, %v8230_v60  ;;  %8086 = vmatmul.mubr.msk.bf16.gmra.mrb[52].mxu1 %vm1086_vm2, %v8231_v61  ;;  %v8287_v61 = vld [vmem:[%s8359_s22 + $0x3b8] sm:$0xff]  }
  0x80   : > { %7961 = vmatprep.mubr.msk.bf16.mxu0 %vm1086_vm2, %v8232_v62  ;;  %8089 = vmatprep.mubr.msk.bf16.mxu1 %vm1086_vm2, %v8233_v63  ;;  %v8288_v62 = vld [vmem:[%s8359_s22 + $0x1c0] sm:$0xff]  }
  0x87   : > { %7962 = vmatmul.mubr.msk.bf16.gmra.mrb[56].mxu0 %vm1086_vm2, %v8234_v0  ;;  %8090 = vmatmul.mubr.msk.bf16.gmra.mrb[56].mxu1 %vm1086_vm2, %v8235_v1 }
  0x88   : > { %7965 = vmatprep.mubr.msk.bf16.mxu0 %vm1086_vm2, %v8236_v2  ;;  %8093 = vmatprep.mubr.msk.bf16.mxu1 %vm1086_vm2, %v8237_v3 }
  0x8f   : > { %7966 = vmatmul.mubr.msk.bf16.gmra.mrb[60].mxu0 %vm1086_vm2, %v8238_v4  ;;  %8094 = vmatmul.mubr.msk.bf16.gmra.mrb[60].mxu1 %vm1086_vm2, %v8239_v5  ;;  %v8289_v4 = vld [vmem:[%s8359_s22 + $0x3c0] sm:$0xff]  }
  0x90   : > { %7969 = vmatprep.mubr.msk.bf16.mxu0 %vm1086_vm2, %v8240_v6  ;;  %8097 = vmatprep.mubr.msk.bf16.mxu1 %vm1086_vm2, %v8241_v7 }
  0x97   : > { %7970 = vmatmul.mubr.msk.bf16.gmra.mrb[64].mxu0 %vm1086_vm2, %v8242_v8  ;;  %8098 = vmatmul.mubr.msk.bf16.gmra.mrb[64].mxu1 %vm1086_vm2, %v8243_v9 }
  0x98   : > { %7973 = vmatprep.mubr.msk.bf16.mxu0 %vm1086_vm2, %v8244_v10  ;;  %8101 = vmatprep.mubr.msk.bf16.mxu1 %vm1086_vm2, %v8245_v11 }
  0x9f   : > { %7974 = vmatmul.mubr.msk.bf16.gmra.mrb[68].mxu0 %vm1086_vm2, %v8246_v12  ;;  %8102 = vmatmul.mubr.msk.bf16.gmra.mrb[68].mxu1 %vm1086_vm2, %v8247_v13 }
  0xa0   : > { %7977 = vmatprep.mubr.msk.bf16.mxu0 %vm1086_vm2, %v8248_v14  ;;  %8105 = vmatprep.mubr.msk.bf16.mxu1 %vm1086_vm2, %v8249_v15 }
  0xa7   : > { %7978 = vmatmul.mubr.msk.bf16.gmra.mrb[72].mxu0 %vm1086_vm2, %v8250_v16  ;;  %8106 = vmatmul.mubr.msk.bf16.gmra.mrb[72].mxu1 %vm1086_vm2, %v8251_v17 }
  0xa8   : > { %7981 = vmatprep.mubr.msk.bf16.mxu0 %vm1086_vm2, %v8252_v18  ;;  %8109 = vmatprep.mubr.msk.bf16.mxu1 %vm1086_vm2, %v8253_v19 }
  0xaf   : > { %7982 = vmatmul.mubr.msk.bf16.gmra.mrb[76].mxu0 %vm1086_vm2, %v8254_v20  ;;  %8110 = vmatmul.mubr.msk.bf16.gmra.mrb[76].mxu1 %vm1086_vm2, %v8255_v21 }
  0xb0   : > { %7985 = vmatprep.mubr.msk.bf16.mxu0 %vm1086_vm2, %v8256_v22  ;;  %8113 = vmatprep.mubr.msk.bf16.mxu1 %vm1086_vm2, %v8257_v23  ;;  %v8592_v22 = vld [vmem:[%s10624_s2] ss:$0 sm:$0xff] }
  0xb7   : > { %7986 = vmatmul.mubr.msk.bf16.gmra.mrb[80].mxu0 %vm1086_vm2, %v8258_v24  ;;  %8114 = vmatmul.mubr.msk.bf16.gmra.mrb[80].mxu1 %vm1086_vm2, %v8259_v25 }
  0xb8   : > { %7989 = vmatprep.mubr.msk.bf16.mxu0 %vm1086_vm2, %v8260_v26  ;;  %8117 = vmatprep.mubr.msk.bf16.mxu1 %vm1086_vm2, %v8261_v27 }
  0xbf   : > { %7990 = vmatmul.mubr.msk.bf16.gmra.mrb[84].mxu0 %vm1086_vm2, %v8262_v28  ;;  %8118 = vmatmul.mubr.msk.bf16.gmra.mrb[84].mxu1 %vm1086_vm2, %v8263_v29 }
  0xc0   : > { %7993 = vmatprep.mubr.msk.bf16.mxu0 %vm1086_vm2, %v8264_v30  ;;  %8121 = vmatprep.mubr.msk.bf16.mxu1 %vm1086_vm2, %v8265_v31 }
  0xc7   : > { %7994 = vmatmul.mubr.msk.bf16.gmra.mrb[88].mxu0 %vm1086_vm2, %v8266_v32  ;;  %8122 = vmatmul.mubr.msk.bf16.gmra.mrb[88].mxu1 %vm1086_vm2, %v8267_v33 }
  0xc8   : > { %7997 = vmatprep.mubr.msk.bf16.mxu0 %vm1086_vm2, %v8268_v34  ;;  %8125 = vmatprep.mubr.msk.bf16.mxu1 %vm1086_vm2, %v8269_v35  ;;  %v8290_v34 = vld [vmem:[%s8359_s22 + $0x1c8] sm:$0xff]  }
  0xcf   : > { %7998 = vmatmul.mubr.msk.bf16.gmra.mrb[92].mxu0 %vm1086_vm2, %v8270_v36  ;;  %8126 = vmatmul.mubr.msk.bf16.gmra.mrb[92].mxu1 %vm1086_vm2, %v8271_v37 }
  0xd0   : > { %8001 = vmatprep.mubr.msk.bf16.mxu0 %vm1086_vm2, %v8272_v38  ;;  %8129 = vmatprep.mubr.msk.bf16.mxu1 %vm1086_vm2, %v8273_v39 }
  0xd7   : > { %8002 = vmatmul.mubr.msk.bf16.gmra.mrb[96].mxu0 %vm1086_vm2, %v8274_v40  ;;  %8130 = vmatmul.mubr.msk.bf16.gmra.mrb[96].mxu1 %vm1086_vm2, %v8275_v41  ;;  %v8291_v41 = vld [vmem:[%s8359_s22 + $0x3c8] sm:$0xff]  }
  0xd8   : > { %8005 = vmatprep.mubr.msk.bf16.mxu0 %vm1086_vm2, %v8276_v42  ;;  %8133 = vmatprep.mubr.msk.bf16.mxu1 %vm1086_vm2, %v8277_v43 }
  0xdf   : > { %8006 = vmatmul.mubr.msk.bf16.gmra.mrb[100].mxu0 %vm1086_vm2, %v8278_v44  ;;  %8134 = vmatmul.mubr.msk.bf16.gmra.mrb[100].mxu1 %vm1086_vm2, %v8279_v45 }
  0xe0   : > { %8009 = vmatprep.mubr.msk.bf16.mxu0 %vm1086_vm2, %v8280_v46  ;;  %8137 = vmatprep.mubr.msk.bf16.mxu1 %vm1086_vm2, %v8281_v47 }
  0xe7   : > { %8010 = vmatmul.mubr.msk.bf16.gmra.mrb[104].mxu0 %vm1086_vm2, %v8282_v48  ;;  %8138 = vmatmul.mubr.msk.bf16.gmra.mrb[104].mxu1 %vm1086_vm2, %v8283_v49  ;;  %v8292_v48 = vld [vmem:[%s8359_s22 + $0x1d0] sm:$0xff]  }
  0xe8   : > { %8013 = vmatprep.mubr.msk.bf16.mxu0 %vm1086_vm2, %v8284_v50  ;;  %8141 = vmatprep.mubr.msk.bf16.mxu1 %vm1086_vm2, %v8285_v51  ;;  %v8293_v49 = vld [vmem:[%s8359_s22 + $0x3d0] sm:$0xff]  }
  0xea   : > { %v7907_v52 = vpop.f32.mrb[0].mxu0  ;;  %v8035_v54 = vpop.f32.mrb[0].mxu1 }
  0xeb   : > { %v2547_v53 = vrot.slane %v7907_v52, 4  ;;  %v1512_v55 = vpop.f32.mrb[1].mxu0  ;;  %v3315_v57 = vrot.slane %v8035_v54, 4  ;;  %v2024_v59 = vpop.f32.mrb[1].mxu1 }
  0xec   : > { %v2535_v58 = vrot.slane %v1512_v55, 4  ;;  %v7908_v60 = vpop.f32.mrb[2].mxu0  ;;  %v3303_v0 = vrot.slane %v2024_v59, 4  ;;  %v8036_v2 = vpop.f32.mrb[2].mxu1 }
  0xed   : > { %v2548_v63 = vmax.f32 %v7907_v52, %v2547_v53  ;;  %v2553_v1 = vrot.slane %v7908_v60, 4  ;;  %v1515_v3 = vpop.f32.mrb[3].mxu0  ;;  %v3316_v5 = vmax.f32 %v8035_v54, %v3315_v57  ;;  %v3321_v7 = vrot.slane %v8036_v2, 4  ;;  %v2027_v9 = vpop.f32.mrb[3].mxu1 }
  0xee   : > { %v2536_v6 = vmax.f32 %v1512_v55, %v2535_v58  ;;  %v2541_v8 = vrot.slane %v1515_v3, 4  ;;  %v3304_v11 = vmax.f32 %v2024_v59, %v3303_v0  ;;  %v3309_v13 = vrot.slane %v2027_v9, 4 }
  0xef   : > { %v2549_v10 = vrot.slane %v2548_v63, 2  ;;  %v2554_v12 = vmax.f32 %v7908_v60, %v2553_v1  ;;  %8014 = vmatmul.mubr.msk.bf16.gmra.mrb[108].mxu0 %vm1086_vm2, %v8286_v56  ;;  %v3317_v14 = vrot.slane %v3316_v5, 2  ;;  %v3322_v16 = vmax.f32 %v8036_v2, %v3321_v7  ;;  %8142 = vmatmul.mubr.msk.bf16.gmra.mrb[108].mxu1 %vm1086_vm2, %v8287_v61  ;;  %v8294_v2 = vld [vmem:[%s8359_s22 + $0x1d8] sm:$0xff]  }
  0xf0   : > { %v2537_v15 = vrot.slane %v2536_v6, 2  ;;  %v2542_v17 = vmax.f32 %v1515_v3, %v2541_v8  ;;  %8017 = vmatprep.mubr.msk.bf16.mxu0 %vm1086_vm2, %v8288_v62  ;;  %v3305_v19 = vrot.slane %v3304_v11, 2  ;;  %v3310_v21 = vmax.f32 %v2027_v9, %v3309_v13  ;;  %8145 = vmatprep.mubr.msk.bf16.mxu1 %vm1086_vm2, %v8289_v4 }
  0xf1   : > { %v2550_v18 = vmax.f32 %v2548_v63, %v2549_v10  ;;  %v2555_v20 = vrot.slane %v2554_v12, 2  ;;  %v3318_v23 = vmax.f32 %v3316_v5, %v3317_v14  ;;  %v3323_v25 = vrot.slane %v3322_v16, 2 }
  0xf2   : > { %v2538_v24 = vmax.f32 %v2536_v6, %v2537_v15  ;;  %v2543_v26 = vrot.slane %v2542_v17, 2  ;;  %v8594_v27 = vpop.f32.mrb[4].mxu0  ;;  %v3306_v29 = vmax.f32 %v3304_v11, %v3305_v19  ;;  %v3311_v31 = vrot.slane %v3310_v21, 2  ;;  %v8596_v32 = vpop.f32.mrb[4].mxu1  ;;  %v8295_v15 = vld [vmem:[%s8359_s22 + $0x3d8] sm:$0xff]  }
  0xf3   : > { %v2551_v28 = vrot.slane %v2550_v18, 1  ;;  %v2556_v30 = vmax.f32 %v2554_v12, %v2555_v20  ;;  %v8598_v33 = vpop.f32.mrb[5].mxu0  ;;  %v3319_v35 = vrot.slane %v3318_v23, 1  ;;  %v3324_v37 = vmax.f32 %v3322_v16, %v3323_v25  ;;  %v8601_v39 = vpop.f32.mrb[5].mxu1  ;;  %v8296_v16 = vld [vmem:[%s8359_s22 + $0x1e0] sm:$0xff]  }
  0xf4   : > { %v2539_v36 = vrot.slane %v2538_v24, 1  ;;  %v2544_v38 = vmax.f32 %v2542_v17, %v2543_v26  ;;  %v8603_v40 = vpop.f32.mrb[6].mxu0  ;;  %v3307_v43 = vrot.slane %v3306_v29, 1  ;;  %v8606_v45 = vmax.f32 %v3310_v21, %v3311_v31  ;;  %v8608_v46 = vpop.f32.mrb[6].mxu1 }
  0xf5   : > { %v2552_v42 = vmax.f32 %v2550_v18, %v2551_v28  ;;  %v2557_v44 = vrot.slane %v2556_v30, 1  ;;  %v8610_v47 = vpop.f32.mrb[7].mxu0  ;;  %v3320_v50 = vmax.f32 %v3318_v23, %v3319_v35  ;;  %v3325_v52 = vrot.slane %v3324_v37, 1  ;;  %v8614_v54 = vpop.f32.mrb[7].mxu1 }
  0xf6   : > { %v2540_v51 = vmax.f32 %v2538_v24, %v2539_v36  ;;  %v2545_v53 = vrot.slane %v2544_v38, 1  ;;  %v3308_v56 = vmax.f32 %v3306_v29, %v3307_v43  ;;  %v3313_v58 = vrot.slane %v8606_v45, 1  ;;  %v8297_v24 = vld [vmem:[%s8359_s22 + $0x3e0] sm:$0xff]  }
  0xf7   : > { %v4080_v55 = vadd.f32 %v8592_v22, %v2552_v42  ;;  %v2558_v57 = vmax.f32 %v2556_v30, %v2557_v44  ;;  %8018 = vmatmul.mubr.msk.bf16.gmra.mrb[112].mxu0 %vm1086_vm2, %v8290_v34  ;;  %v4208_v59 = vadd.f32 %v8592_v22, %v3320_v50  ;;  %v3326_v61 = vmax.f32 %v3324_v37, %v3325_v52 }
  0xf8   : > { %v4078_v60 = vadd.f32 %v8592_v22, %v2540_v51  ;;  %v2546_v62 = vmax.f32 %v2544_v38, %v2545_v53  ;;  %8146 = vmatmul.mubr.msk.bf16.gmra.mrb[112].mxu1 %vm1086_vm2, %v8291_v41  ;;  %v4206_v0 = vadd.f32 %v8592_v22, %v3308_v56  ;;  %8021 = vmatprep.mubr.msk.bf16.mxu0 %vm1086_vm2, %v8292_v48  ;;  %v2571_v50 = vrot.slane %v8594_v27, 4 }
  0xf9   : > { %vm4336_vm3 = vcmp.ge.f32.partialorder %v4080_v55, 0.0  ;;  %v4592_v63 = vmul.f32 0.01, %v4080_v55  ;;  %v4081_v1 = vadd.f32 %v8592_v22, %v2558_v57  ;;  %8149 = vmatprep.mubr.msk.bf16.mxu1 %vm1086_vm2, %v8293_v49  ;;  %vm4464_vm4 = vcmp.ge.f32.partialorder %v4208_v59, 0.0 }
  0xfa   : > { %v4720_v3 = vmul.f32 0.01, %v4208_v59  ;;  %vm4334_vm5 = vcmp.ge.f32.partialorder %v4078_v60, 0.0  ;;  %v4590_v4 = vmul.f32 0.01, %v4078_v60  ;;  %vm4462_vm6 = vcmp.ge.f32.partialorder %v4206_v0, 0.0 }
  0xfb   : > { %v4848_v5 = vsel %vm4336_vm3, %v4080_v55, %v4592_v63  ;;  %v4718_v6 = vmul.f32 0.01, %v4206_v0  ;;  %vm4337_vm7 = vcmp.ge.f32.partialorder %v4081_v1, 0.0  ;;  %v8627_v7 = vpop.f32.mrb[8].mxu0  ;;  %v8629_v8 = vpop.f32.mrb[8].mxu1  ;;  %v4209_v20 = vadd.f32 %v8592_v22, %v3326_v61 }
  0xfc   : > { %v7517_v9 = vpack.c.bf16 %v4848_v5, %v4848_v5  ;;  %v4976_v10 = vsel %vm4464_vm4, %v4208_v59, %v4720_v3  ;;  %v4846_v11 = vsel %vm4334_vm5, %v4078_v60, %v4590_v4  ;;  %v4593_v12 = vmul.f32 0.01, %v4081_v1  ;;  %v8631_v13 = vpop.f32.mrb[9].mxu0  ;;  %v8633_v14 = vpop.f32.mrb[9].mxu1  ;;  %v8298_v60 = vld [vmem:[%s8359_s22 + $0x1e8] sm:$0xff]   ;;  %v8300_v4 = vld [vmem:[%s8359_s22 + $0x1f0] sm:$0xff]  }
  0xfd   : > { %v7645_v17 = vpack.c.bf16 %v4976_v10, %v4976_v10  ;;  %v7515_v18 = vpack.c.bf16 %v4846_v11, %v4846_v11  ;;  %v4974_v19 = vsel %vm4462_vm6, %v4206_v0, %v4718_v6  ;;  %v8638_v21 = vpop.f32.mrb[10].mxu0  ;;  %v8640_v23 = vpop.f32.mrb[10].mxu1  ;;  %v4079_v29 = vadd.f32 %v8592_v22, %v2546_v62  ;;  %v8299_v3 = vld [vmem:[%s8359_s22 + $0x3e8] sm:$0xff]   ;;  %v8301_v5 = vld [vmem:[%s8359_s22 + $0x3f0] sm:$0xff]  }
  0xfe   : > { %v8643_v25 = vunpack.c.l.b16 %v7517_v9  ;;  %v7643_v26 = vpack.c.bf16 %v4974_v19, %v4974_v19  ;;  %v4849_v28 = vsel %vm4337_vm7, %v4081_v1, %v4593_v12  ;;  %v8647_v30 = vpop.f32.mrb[11].mxu0  ;;  %v8649_v31 = vpop.f32.mrb[11].mxu1  ;;  %vm4465_vm8 = vcmp.ge.f32.partialorder %v4209_v20, 0.0 }
  0xff   : > { %v8651_v34 = vunpack.c.l.b16 %v7645_v17  ;;  %v8653_v35 = vunpack.c.l.b16 %v7515_v18  ;;  %v7518_v36 = vpack.c.bf16 %v4849_v28, %v4849_v28  ;;  %8022 = vmatmul.mubr.msk.bf16.gmra.mrb[116].mxu0 %vm1086_vm2, %v8294_v2  ;;  %v4721_v41 = vmul.f32 0.01, %v4209_v20 }
 0x100   : > { %v6385_v37 = vrot.slane %v8643_v25, 6  ;;  %v8657_v38 = vunpack.c.l.b16 %v7643_v26  ;;  %vm4335_vm10 = vcmp.ge.f32.partialorder %v4079_v29, 0.0  ;;  %8150 = vmatmul.mubr.msk.bf16.gmra.mrb[116].mxu1 %vm1086_vm2, %v8295_v15  ;;  %8025 = vmatprep.mubr.msk.bf16.mxu0 %vm1086_vm2, %v8296_v16  ;;  %v4591_v44 = vmul.f32 0.01, %v4079_v29  ;;  %v8303_v25 = vld [vmem:[%s8359_s22 + $0x3f8] sm:$0xff]  }
 0x101   : > { %v6615_v42 = vrot.slane %v8651_v34, 6  ;;  %v8662_v43 = vunpack.c.l.b16 %v7518_v36  ;;  %v3314_v48 = vmax.f32 %v8606_v45, %v3313_v58  ;;  %8153 = vmatprep.mubr.msk.bf16.mxu1 %vm1086_vm2, %v8297_v24  ;;  %v4977_v49 = vsel %vm4465_vm8, %v4209_v20, %v4721_v41 }
 0x102   : > { %v3339_v51 = vrot.slane %v8596_v32, 4  ;;  %v2559_v52 = vrot.slane %v8598_v33, 4  ;;  %v8670_v53 = vpop.f32.mrb[12].mxu0  ;;  %v7646_v56 = vpack.c.bf16 %v4977_v49, %v4977_v49  ;;  %v4847_v45 = vsel %vm4335_vm10, %v4079_v29, %v4591_v44  ;;  %v8675_v58 = vpop.f32.mrb[12].mxu1 }
 0x103   : > { %v6388_v55 = vrot.slane %v8662_v43, 5  ;;  %v4207_v57 = vadd.f32 %v8592_v22, %v3314_v48  ;;  %v8677_v59 = vpop.f32.mrb[13].mxu0  ;;  %v7516_v61 = vpack.c.bf16 %v4847_v45, %v4847_v45  ;;  %v2572_v62 = vmax.f32 %v8594_v27, %v2571_v50  ;;  %v8683_v1 = vpop.f32.mrb[13].mxu1 }
 0x104   : > { %v3340_v63 = vmax.f32 %v8596_v32, %v3339_v51  ;;  %v2560_v0 = vmax.f32 %v8598_v33, %v2559_v52  ;;  %v8685_v2 = vpop.f32.mrb[14].mxu0  ;;  %v8690_v6 = vunpack.c.l.b16 %v7646_v56  ;;  %v3327_v10 = vrot.slane %v8601_v39, 4  ;;  %v8693_v11 = vpop.f32.mrb[14].mxu1 }
 0x105   : > { %vm4463_vm13 = vcmp.ge.f32.partialorder %v4207_v57, 0.0  ;;  %v4719_v9 = vmul.f32 0.01, %v4207_v57  ;;  %v8695_v27 = vpop.f32.mrb[15].mxu0  ;;  %v6127_v32 = vunpack.c.l.b16 %v7516_v61  ;;  %v2573_v12 = vrot.slane %v2572_v62, 2  ;;  %v8697_v16 = vpop.f32.mrb[15].mxu1 }
 0x106   : > { %v3341_v33 = vrot.slane %v3340_v63, 2  ;;  %v2561_v15 = vrot.slane %v2560_v0, 2  ;;  %v6617_v17 = vrot.slane %v8690_v6, 5  ;;  %v3328_v19 = vmax.f32 %v8601_v39, %v3327_v10  ;;  %v8302_v61 = vld [vmem:[%s8359_s22 + $0x1f8] sm:$0xff]  }
 0x107   : > { %v4975_v18 = vsel %vm4463_vm13, %v4207_v57, %v4719_v9  ;;  %v2577_v20 = vrot.slane %v8603_v40, 4  ;;  %8026 = vmatmul.mubr.msk.bf16.gmra.mrb[120].mxu0 %vm1086_vm2, %v8298_v60  ;;  %v6382_v24 = vrot.slane %v6127_v32, 7  ;;  %v2574_v28 = vmax.f32 %v2572_v62, %v2573_v12 }
 0x108   : > { %v7644_v26 = vpack.c.bf16 %v4975_v18, %v4975_v18  ;;  %v3342_v29 = vmax.f32 %v3340_v63, %v3341_v33  ;;  %8154 = vmatmul.mubr.msk.bf16.gmra.mrb[120].mxu1 %vm1086_vm2, %v8299_v3  ;;  %8029 = vmatprep.mubr.msk.bf16.mxu0 %vm1086_vm2, %v8300_v4  ;;  %v2562_v36 = vmax.f32 %v2560_v0, %v2561_v15  ;;  %v3329_v41 = vrot.slane %v3328_v19, 2 }
 0x109   : > { %v2578_v43 = vmax.f32 %v8603_v40, %v2577_v20  ;;  %v3345_v44 = vrot.slane %v8608_v46, 4  ;;  %8157 = vmatprep.mubr.msk.bf16.mxu1 %vm1086_vm2, %v8301_v5  ;;  %v6384_v39 = vsel %vm6383_vm9, %v6382_v24, %v8653_v35  ;;  %v2575_v49 = vrot.slane %v2574_v28, 1 }
 0x10a   : > { %v6255_v48 = vunpack.c.l.b16 %v7644_v26  ;;  %v3343_v50 = vrot.slane %v3342_v29, 1  ;;  %v8710_v51 = vpop.f32.mrb[16].mxu0  ;;  %v6387_v52 = vsel %vm6386_vm11, %v6385_v37, %v6384_v39  ;;  %v2563_v56 = vrot.slane %v2562_v36, 1  ;;  %v8715_v57 = vpop.f32.mrb[16].mxu1 }
 0x10b   : > { %v3330_v45 = vmax.f32 %v3328_v19, %v3329_v41  ;;  %v2579_v40 = vrot.slane %v2578_v43, 2  ;;  %v8717_v60 = vpop.f32.mrb[17].mxu0  ;;  %v2576_v35 = vmax.f32 %v2574_v28, %v2575_v49  ;;  %v8721_v0 = vsel %vm6389_vm12, %v6388_v55, %v6387_v52  ;;  %v8723_v3 = vpop.f32.mrb[17].mxu1 }
 0x10c   : > { %v6613_v62 = vrot.slane %v6255_v48, 7  ;;  %v3344_v63 = vmax.f32 %v3342_v29, %v3343_v50  ;;  %v8725_v4 = vpop.f32.mrb[18].mxu0  ;;  %v2564_v37 = vmax.f32 %v2562_v36, %v2563_v56  ;;  %v3346_v9 = vmax.f32 %v8608_v46, %v3345_v44  ;;  %v8729_v10 = vpop.f32.mrb[18].mxu1 }
 0x10d   : > { %v3331_v5 = vrot.slane %v3330_v45, 1  ;;  %v2580_v6 = vmax.f32 %v2578_v43, %v2579_v40  ;;  %v8731_v32 = vpop.f32.mrb[19].mxu0  ;;  %v4084_v55 = vadd.f32 %v8592_v22, %v2576_v35  ;;  %v2565_v15 = vrot.slane %v8610_v47, 4  ;;  %v8738_v18 = vpop.f32.mrb[19].mxu1 }
 0x10e   : > { %v6614_v12 = vsel %vm6383_vm9, %v6613_v62, %v8657_v38  ;;  %v4212_v33 = vadd.f32 %v8592_v22, %v3344_v63  ;;  %v4082_v46 = vadd.f32 %v8592_v22, %v2564_v37  ;;  %v3347_v43 = vrot.slane %v3346_v9, 2 }
 0x10f   : > { %v6616_v19 = vsel %vm6386_vm11, %v6615_v42, %v6614_v12  ;;  %v3332_v20 = vmax.f32 %v3330_v45, %v3331_v5  ;;  %v2581_v24 = vrot.slane %v2580_v6, 1  ;;  %8030 = vmatmul.mubr.msk.bf16.gmra.mrb[124].mxu0 %vm1086_vm2, %v8302_v61  ;;  %vm4340_vm15 = vcmp.ge.f32.partialorder %v4084_v55, 0.0 }
 0x110   : > { %v4596_v38 = vmul.f32 0.01, %v4084_v55  ;;  %vm4468_vm0 = vcmp.ge.f32.partialorder %v4212_v33, 0.0  ;;  %v4724_v26 = vmul.f32 0.01, %v4212_v33  ;;  %8158 = vmatmul.mubr.msk.bf16.gmra.mrb[124].mxu1 %vm1086_vm2, %v8303_v25  ;;  %vm4338_vm1 = vcmp.ge.f32.partialorder %v4082_v46, 0.0 }
 0x111   : > { %v4594_v28 = vmul.f32 0.01, %v4082_v46  ;;  %v4210_v29 = vadd.f32 %v8592_v22, %v3332_v20  ;;  %v6618_v34 = vsel %vm6389_vm12, %v6617_v17, %v6616_v19  ;;  %v2582_v41 = vmax.f32 %v2580_v6, %v2581_v24 }
 0x112   : > { %v4852_v42 = vsel %vm4340_vm15, %v4084_v55, %v4596_v38  ;;  %v4980_v36 = vsel %vm4468_vm0, %v4212_v33, %v4724_v26  ;;  %v8748_v44 = vpop.f32.mrb[20].mxu0  ;;  %v8750_v50 = vpop.f32.mrb[20].mxu1  ;;  %v3348_v61 = vmax.f32 %v3346_v9, %v3347_v43  ;;  %v2566_v25 = vmax.f32 %v8610_v47, %v2565_v15 }
 0x113   : > { %v7521_v39 = vpack.c.bf16 %v4852_v42, %v4852_v42  ;;  %v7649_v48 = vpack.c.bf16 %v4980_v36, %v4980_v36  ;;  %v4850_v49 = vsel %vm4338_vm1, %v4082_v46, %v4594_v28  ;;  %vm4466_vm3 = vcmp.ge.f32.partialorder %v4210_v29, 0.0  ;;  %v8752_v52 = vpop.f32.mrb[21].mxu0  ;;  %v8755_v17 = vpop.f32.mrb[21].mxu1 }
 0x114   : > { %v7519_v56 = vpack.c.bf16 %v4850_v49, %v4850_v49  ;;  %v4722_v45 = vmul.f32 0.01, %v4210_v29  ;;  %v4085_v40 = vadd.f32 %v8592_v22, %v2582_v41  ;;  %v8757_v62 = vpop.f32.mrb[22].mxu0  ;;  %v3333_v37 = vrot.slane %v8614_v54, 4  ;;  %v8765_v5 = vpop.f32.mrb[22].mxu1 }
 0x115   : > { %v8759_v35 = vunpack.c.l.b16 %v7521_v39  ;;  %v8761_v63 = vunpack.c.l.b16 %v7649_v48  ;;  %v8767_v6 = vpop.f32.mrb[23].mxu0  ;;  %v8770_v33 = vpop.f32.mrb[23].mxu1  ;;  %v3349_v24 = vrot.slane %v3348_v61, 1  ;;  %v2567_v38 = vrot.slane %v2566_v25, 2 }
 0x116   : > { %v6130_v12 = vunpack.c.l.b16 %v7519_v56  ;;  %v4978_v55 = vsel %vm4466_vm3, %v4210_v29, %v4722_v45  ;;  %vm4341_vm2 = vcmp.ge.f32.partialorder %v4085_v40, 0.0  ;;  %v4597_v9 = vmul.f32 0.01, %v4085_v40 }
 0x117   : > { %v7647_v20 = vpack.c.bf16 %v4978_v55, %v4978_v55  ;;  %v3334_v26 = vmax.f32 %v8614_v54, %v3333_v37  ;;  %v3350_v36 = vmax.f32 %v3348_v61, %v3349_v24  ;;  %v2595_v29 = vrot.slane %v8627_v7, 4 }
 0x118   : > { %v6391_v47 = vrot.slane %v6130_v12, 4  ;;  %v4853_v15 = vsel %vm4341_vm2, %v4085_v40, %v4597_v9  ;;  %v2568_v43 = vmax.f32 %v2566_v25, %v2567_v38  ;;  %v3363_v48 = vrot.slane %v8629_v8, 4 }
 0x119   : > { %v6258_v28 = vunpack.c.l.b16 %v7647_v20  ;;  %v7522_v42 = vpack.c.bf16 %v4853_v15, %v4853_v15  ;;  %v3335_v39 = vrot.slane %v3334_v26, 2  ;;  %v4213_v54 = vadd.f32 %v8592_v22, %v3350_v36 }
 0x11a   : > { %v8778_v41 = vsel %vm6392_vm14, %v6391_v47, %v8721_v0  ;;  %v8781_v49 = vpop.f32.mrb[24].mxu0  ;;  %v2596_v40 = vmax.f32 %v8627_v7, %v2595_v29  ;;  %v8787_v61 = vpop.f32.mrb[24].mxu1  ;;  %v2569_v12 = vrot.slane %v2568_v43, 1  ;;  %v3364_v25 = vmax.f32 %v8629_v8, %v3363_v48 }
 0x11b   : > { %v6619_v56 = vrot.slane %v6258_v28, 4  ;;  %v8783_v45 = vunpack.c.l.b16 %v7522_v42  ;;  %v8789_v37 = vpop.f32.mrb[25].mxu0  ;;  %v3336_v0 = vmax.f32 %v3334_v26, %v3335_v39  ;;  %v2583_v55 = vrot.slane %v8631_v13, 4  ;;  %v8793_v9 = vpop.f32.mrb[25].mxu1 }
 0x11c   : > { %v8795_v20 = vpop.f32.mrb[26].mxu0  ;;  %vm4469_vm4 = vcmp.ge.f32.partialorder %v4213_v54, 0.0  ;;  %v4725_v47 = vmul.f32 0.01, %v4213_v54  ;;  %v8801_v15 = vpop.f32.mrb[26].mxu1  ;;  %v2570_v26 = vmax.f32 %v2568_v43, %v2569_v12  ;;  %v2597_v28 = vrot.slane %v2596_v40, 2 }
 0x11d   : > { %v8798_v24 = vsel %vm6392_vm14, %v6619_v56, %v6618_v34  ;;  %v8803_v38 = vpop.f32.mrb[27].mxu0  ;;  %v3337_v8 = vrot.slane %v3336_v0, 1  ;;  %v3365_v42 = vrot.slane %v3364_v25, 2  ;;  %v8805_v36 = vpop.f32.mrb[27].mxu1  ;;  %v2584_v34 = vmax.f32 %v8631_v13, %v2583_v55 }
 0x11e   : > { %10664 = vst [vmem:[#allocation2_spill] sm:$0xff] %v8803_v38  ;;  %10665 = vst [vmem:[#allocation3_spill] sm:$0xff] %v8805_v36  ;;  %v4981_v29 = vsel %vm4469_vm4, %v4213_v54, %v4725_v47  ;;  %v3351_v39 = vrot.slane %v8633_v14, 4  ;;  %v2601_v48 = vrot.slane %v8638_v21, 4  ;;  %v4083_v46 = vadd.f32 %v8592_v22, %v2570_v26 }
 0x11f   : > { %v7650_v56 = vpack.c.bf16 %v4981_v29, %v4981_v29  ;;  %vm6395_vm5 = vcmask 1045509   ;;  %v3338_v43 = vmax.f32 %v3336_v0, %v3337_v8  ;;  %v2598_v12 = vmax.f32 %v2596_v40, %v2597_v28 }
 0x120   : > { %vm6398_vm6 = vcmask 1046534   ;;  %v3366_v7 = vmax.f32 %v3364_v25, %v3365_v42  ;;  %v2585_v19 = vrot.slane %v2584_v34, 2  ;;  %v3352_v54 = vmax.f32 %v8633_v14, %v3351_v39 }
 0x121   : > { %v2602_v47 = vmax.f32 %v8638_v21, %v2601_v48  ;;  %v8817_v36 = vunpack.c.l.b16 %v7650_v56  ;;  %vm4339_vm7 = vcmp.ge.f32.partialorder %v4083_v46, 0.0  ;;  %v4595_v13 = vmul.f32 0.01, %v4083_v46 }
 0x122   : > { %vm6401_vm8 = vcmask 1047559   ;;  %v4211_v55 = vadd.f32 %v8592_v22, %v3338_v43  ;;  %v2599_v26 = vrot.slane %v2598_v12, 1  ;;  %v3367_v0 = vrot.slane %v3366_v7, 1  ;;  %v8822_v21 = vpop.f32.mrb[28].mxu0  ;;  %v8824_v42 = vpop.f32.mrb[28].mxu1 }
 0x123   : > { %v2586_v40 = vmax.f32 %v2584_v34, %v2585_v19  ;;  %v3353_v8 = vrot.slane %v3352_v54, 2  ;;  %v6625_v25 = vrot.slane %v8817_v36, 1  ;;  %v4851_v28 = vsel %vm4339_vm7, %v4083_v46, %v4595_v13  ;;  %10666 = vst [vmem:[#allocation4_spill] sm:$0xff] %v8822_v21  ;;  %10667 = vst [vmem:[#allocation5_spill] sm:$0xff] %v8824_v42  ;;  %v8826_v43 = vpop.f32.mrb[29].mxu0  ;;  %v8834_v13 = vpop.f32.mrb[29].mxu1 }
 0x124   : > { %vm4467_vm10 = vcmp.ge.f32.partialorder %v4211_v55, 0.0  ;;  %v4723_v14 = vmul.f32 0.01, %v4211_v55  ;;  %v7520_v29 = vpack.c.bf16 %v4851_v28, %v4851_v28  ;;  %v2600_v39 = vmax.f32 %v2598_v12, %v2599_v26  ;;  %10668 = vst [vmem:[#allocation6_spill] sm:$0xff] %v8826_v43 }
 0x125   : > { %v3368_v48 = vmax.f32 %v3366_v7, %v3367_v0  ;;  %v2587_v56 = vrot.slane %v2586_v40, 1  ;;  %v3354_v34 = vmax.f32 %v3352_v54, %v3353_v8  ;;  %v2603_v36 = vrot.slane %v2602_v47, 2 }
 0x126   : > { %v4979_v19 = vsel %vm4467_vm10, %v4211_v55, %v4723_v14  ;;  %v3369_v46 = vrot.slane %v8640_v23, 4  ;;  %v6131_v21 = vunpack.c.l.b16 %v7520_v29  ;;  %v4088_v28 = vadd.f32 %v8592_v22, %v2600_v39 }
 0x127   : > { %v7648_v38 = vpack.c.bf16 %v4979_v19, %v4979_v19  ;;  %v4216_v7 = vadd.f32 %v8592_v22, %v3368_v48  ;;  %v2588_v12 = vmax.f32 %v2586_v40, %v2587_v56  ;;  %v3355_v26 = vrot.slane %v3354_v34, 1 }
 0x128   : > { %v2604_v0 = vmax.f32 %v2602_v47, %v2603_v36  ;;  %v3370_v43 = vmax.f32 %v8640_v23, %v3369_v46  ;;  %v6394_v42 = vrot.slane %v6131_v21, 3  ;;  %vm4344_vm13 = vcmp.ge.f32.partialorder %v4088_v28, 0.0 }
 0x129   : > { %v6259_v55 = vunpack.c.l.b16 %v7648_v38  ;;  %v4600_v54 = vmul.f32 0.01, %v4088_v28  ;;  %vm4472_vm15 = vcmp.ge.f32.partialorder %v4216_v7, 0.0  ;;  %v4728_v8 = vmul.f32 0.01, %v4216_v7 }
 0x12a   : > { %v4086_v14 = vadd.f32 %v8592_v22, %v2588_v12  ;;  %v3356_v29 = vmax.f32 %v3354_v34, %v3355_v26  ;;  %v6396_v39 = vsel %vm6395_vm5, %v6394_v42, %v8778_v41  ;;  %v2605_v40 = vrot.slane %v2604_v0, 1 }
 0x12b   : > { %v6621_v19 = vrot.slane %v6259_v55, 3  ;;  %v4856_v48 = vsel %vm4344_vm13, %v4088_v28, %v4600_v54  ;;  %v10669_v47 = vrot.slane %v8759_v35, 2  ;;  %v4984_v38 = vsel %vm4472_vm15, %v4216_v7, %v4728_v8 }
 0x12c   : > { %v7525_v21 = vpack.c.bf16 %v4856_v48, %v4856_v48  ;;  %vm4342_vm0 = vcmp.ge.f32.partialorder %v4086_v14, 0.0  ;;  %v10670_v56 = vrot.slane %v8783_v45, 1  ;;  %v7653_v34 = vpack.c.bf16 %v4984_v38, %v4984_v38  ;;  %v8868_v48 = vpop.f32.mrb[30].mxu0 }
 0x12d   : > { %v6399_v23 = vsel %vm6398_vm6, %v10669_v47, %v6396_v39  ;;  %v6622_v42 = vsel %vm6395_vm5, %v6621_v19, %v8798_v24  ;;  %v4598_v35 = vmul.f32 0.01, %v4086_v14  ;;  %v10671_v46 = vrot.slane %v8761_v63, 2 }
 0x12e   : > { %v6402_v41 = vsel %vm6401_vm8, %v10670_v56, %v6399_v23  ;;  %v8859_v7 = vunpack.c.l.b16 %v7525_v21  ;;  %v4214_v12 = vadd.f32 %v8592_v22, %v3356_v29  ;;  %v2606_v55 = vmax.f32 %v2604_v0, %v2605_v40 }
 0x12f   : > { %v6837_v36 = vpack.c.b16 %v6402_v41, %v6402_v41  ;;  %v6624_v28 = vsel %vm6398_vm6, %v10671_v46, %v6622_v42  ;;  %v4854_v26 = vsel %vm4342_vm0, %v4086_v14, %v4598_v35  ;;  %v8864_v8 = vunpack.c.l.b16 %v7653_v34  ;;  %v8874_v14 = vpop.f32.mrb[30].mxu1 }
 0x130   : > { %v6626_v45 = vsel %vm6401_vm8, %v6625_v25, %v6624_v28  ;;  %vm4470_vm1 = vcmp.ge.f32.partialorder %v4214_v12, 0.0  ;;  %v4726_v39 = vmul.f32 0.01, %v4214_v12  ;;  %v4089_v63 = vadd.f32 %v8592_v22, %v2606_v55 }
 0x131   : > { %6901 = vst [vmem:[%s8849_s29] sm:$0xf] %v6837_v36  ;;  %v6853_v54 = vpack.c.b16 %v6626_v45, %v6626_v45  ;;  %v3371_v19 = vrot.slane %v3370_v43, 2  ;;  %v7523_v47 = vpack.c.bf16 %v4854_v26, %v4854_v26  ;;  %v2589_v29 = vrot.slane %v8647_v30, 4 }
 0x132   : > { %v3357_v25 = vrot.slane %v8649_v31, 4  ;;  %v2619_v0 = vrot.slane %v8670_v53, 4  ;;  %v4982_v40 = vsel %vm4470_vm1, %v4214_v12, %v4726_v39  ;;  %vm4345_vm3 = vcmp.ge.f32.partialorder %v4089_v63, 0.0 }
 0x133   : > { %6917 = vst [vmem:[%s8849_s29 + $0x40] sm:$0xf] %v6853_v54  ;;  %v4601_v23 = vmul.f32 0.01, %v4089_v63  ;;  %v3372_v21 = vmax.f32 %v3370_v43, %v3371_v19  ;;  %v7651_v38 = vpack.c.bf16 %v4982_v40, %v4982_v40  ;;  %v2590_v56 = vmax.f32 %v8647_v30, %v2589_v29  ;;  %v8886_v54 = vpop.f32.mrb[31].mxu0 }
 0x134   : > { %v3358_v41 = vmax.f32 %v8649_v31, %v3357_v25  ;;  %v2620_v42 = vmax.f32 %v8670_v53, %v2619_v0  ;;  %v3387_v36 = vrot.slane %v8675_v58, 4  ;;  %v2607_v46 = vrot.slane %v8677_v59, 4  ;;  %10672 = vst [vmem:[#allocation7_spill] sm:$0xff] %v8886_v54 }
 0x135   : > { %v3373_v35 = vrot.slane %v3372_v21, 1  ;;  %v8882_v28 = vunpack.c.l.b16 %v7523_v47  ;;  %v4857_v12 = vsel %vm4345_vm3, %v4089_v63, %v4601_v23  ;;  %v2591_v45 = vrot.slane %v2590_v56, 2 }
 0x136   : > { %v3359_v26 = vrot.slane %v3358_v41, 2  ;;  %v2621_v55 = vrot.slane %v2620_v42, 2  ;;  %v3388_v30 = vmax.f32 %v8675_v58, %v3387_v36  ;;  %v2608_v31 = vmax.f32 %v8677_v59, %v2607_v46 }
 0x137   : > { %v3374_v43 = vmax.f32 %v3372_v21, %v3373_v35  ;;  %v8888_v53 = vunpack.c.l.b16 %v7651_v38  ;;  %v2592_v39 = vmax.f32 %v2590_v56, %v2591_v45  ;;  %v3375_v29 = vrot.slane %v8683_v1, 4  ;;  %v8893_v35 = vpop.f32.mrb[31].mxu1 }
 0x138   : > { %v3360_v19 = vmax.f32 %v3358_v41, %v3359_v26  ;;  %v2622_v25 = vmax.f32 %v2620_v42, %v2621_v55  ;;  %v3389_v63 = vrot.slane %v3388_v30, 2  ;;  %v2609_v0 = vrot.slane %v2608_v31, 2  ;;  %10673 = vst [vmem:[#allocation8_spill] sm:$0xff] %v8893_v35 }
 0x139   : > { %v4217_v47 = vadd.f32 %v8592_v22, %v3374_v43  ;;  %v7526_v40 = vpack.c.bf16 %v4857_v12, %v4857_v12  ;;  %v2593_v23 = vrot.slane %v2592_v39, 1  ;;  %v3376_v58 = vmax.f32 %v8683_v1, %v3375_v29 }
 0x13a   : > { %v3361_v21 = vrot.slane %v3360_v19, 1  ;;  %v2623_v38 = vrot.slane %v2622_v25, 1  ;;  %v3390_v36 = vmax.f32 %v3388_v30, %v3389_v63  ;;  %v2610_v46 = vmax.f32 %v2608_v31, %v2609_v0  ;;  %v8901_v31 = vpop.f32.mrb[32].mxu1 }
 0x13b   : > { %vm4473_vm2 = vcmp.ge.f32.partialorder %v4217_v47, 0.0  ;;  %v4729_v59 = vmul.f32 0.01, %v4217_v47  ;;  %v2594_v56 = vmax.f32 %v2592_v39, %v2593_v23  ;;  %v3377_v45 = vrot.slane %v3376_v58, 2  ;;  %v8899_v39 = vpop.f32.mrb[32].mxu0  ;;  %10674 = vst [vmem:[#allocation9_spill] sm:$0xff] %v8901_v31 }
 0x13c   : > { %v3362_v41 = vmax.f32 %v3360_v19, %v3361_v21  ;;  %v2624_v43 = vmax.f32 %v2622_v25, %v2623_v38  ;;  %v3391_v42 = vrot.slane %v3390_v36, 1  ;;  %v2625_v55 = vrot.slane %v8685_v2, 4  ;;  %v8904_v25 = vpop.f32.mrb[33].mxu0 }
 0x13d   : > { %v4985_v26 = vsel %vm4473_vm2, %v4217_v47, %v4729_v59  ;;  %v4087_v34 = vadd.f32 %v8592_v22, %v2594_v56  ;;  %v2611_v29 = vrot.slane %v2610_v46, 1  ;;  %v6137_v24 = vunpack.c.l.b16 %v7526_v40  ;;  %10675 = vst [vmem:[#allocation10_spill] sm:$0xff] %v8904_v25 }
 0x13e   : > { %v7654_v12 = vpack.c.bf16 %v4985_v26, %v4985_v26  ;;  %v4215_v1 = vadd.f32 %v8592_v22, %v3362_v41  ;;  %v4092_v35 = vadd.f32 %v8592_v22, %v2624_v43  ;;  %v3392_v54 = vmax.f32 %v3390_v36, %v3391_v42 }
 0x13f   : > { %v3378_v30 = vmax.f32 %v3376_v58, %v3377_v45  ;;  %vm4343_vm4 = vcmp.ge.f32.partialorder %v4087_v34, 0.0  ;;  %v4599_v19 = vmul.f32 0.01, %v4087_v34  ;;  %v2626_v47 = vmax.f32 %v8685_v2, %v2625_v55 }
 0x140   : > { %vm4471_vm7 = vcmp.ge.f32.partialorder %v4215_v1, 0.0  ;;  %v4727_v63 = vmul.f32 0.01, %v4215_v1  ;;  %vm4348_vm10 = vcmp.ge.f32.partialorder %v4092_v35, 0.0  ;;  %v4604_v0 = vmul.f32 0.01, %v4092_v35 }
 0x141   : > { %v4220_v40 = vadd.f32 %v8592_v22, %v3392_v54  ;;  %v6265_v23 = vunpack.c.l.b16 %v7654_v12  ;;  %v4855_v21 = vsel %vm4343_vm4, %v4087_v34, %v4599_v19  ;;  %v2612_v59 = vmax.f32 %v2610_v46, %v2611_v29  ;;  %v8909_v34 = vpop.f32.mrb[33].mxu1 }
 0x142   : > { %v3379_v58 = vrot.slane %v3378_v30, 1  ;;  %v7524_v38 = vpack.c.bf16 %v4855_v21, %v4855_v21  ;;  %v4983_v36 = vsel %vm4471_vm7, %v4215_v1, %v4727_v63  ;;  %v4860_v56 = vsel %vm4348_vm10, %v4092_v35, %v4604_v0 }
 0x143   : > { %vm4476_vm13 = vcmp.ge.f32.partialorder %v4220_v40, 0.0  ;;  %v7652_v41 = vpack.c.bf16 %v4983_v36, %v4983_v36  ;;  %v7529_v45 = vpack.c.bf16 %v4860_v56, %v4860_v56  ;;  %v4732_v26 = vmul.f32 0.01, %v4220_v40 }
 0x144   : > { %v4090_v2 = vadd.f32 %v8592_v22, %v2612_v59  ;;  %v6135_v43 = vunpack.c.l.b16 %v7524_v38  ;;  %v3380_v42 = vmax.f32 %v3378_v30, %v3379_v58  ;;  %v2627_v55 = vrot.slane %v2626_v47, 2 }
 0x145   : > { %v3393_v25 = vrot.slane %v8693_v11, 4  ;;  %v6407_v31 = vrot.slane %v6137_v24, 5  ;;  %v6263_v54 = vunpack.c.l.b16 %v7652_v41  ;;  %v4988_v12 = vsel %vm4476_vm13, %v4220_v40, %v4732_v26 }
 0x146   : > { %vm4346_vm15 = vcmp.ge.f32.partialorder %v4090_v2, 0.0  ;;  %v6403_v46 = vrot.slane %v6135_v43, 7  ;;  %v8911_v1 = vunpack.c.l.b16 %v7529_v45  ;;  %v4602_v35 = vmul.f32 0.01, %v4090_v2 }
 0x147   : > { %v4218_v29 = vadd.f32 %v8592_v22, %v3380_v42  ;;  %v6631_v19 = vrot.slane %v6265_v23, 5  ;;  %v6627_v63 = vrot.slane %v6263_v54, 7  ;;  %v2628_v0 = vmax.f32 %v2626_v47, %v2627_v55  ;;  %v8932_v55 = vpop.f32.mrb[34].mxu1 }
 0x148   : > { %v3394_v30 = vmax.f32 %v8693_v11, %v3393_v25  ;;  %v6404_v21 = vsel %vm6383_vm9, %v6403_v46, %v8882_v28  ;;  %v7657_v24 = vpack.c.bf16 %v4988_v12, %v4988_v12  ;;  %v4858_v59 = vsel %vm4346_vm15, %v4090_v2, %v4602_v35  ;;  %v8928_v2 = vpop.f32.mrb[34].mxu0 }
 0x149   : > { %vm4474_vm0 = vcmp.ge.f32.partialorder %v4218_v29, 0.0  ;;  %v10676_v40 = vrot.slane %v8859_v7, 6  ;;  %v6628_v38 = vsel %vm6383_vm9, %v6627_v63, %v8888_v53  ;;  %v7527_v36 = vpack.c.bf16 %v4858_v59, %v4858_v59 }
 0x14a   : > { %v4730_v56 = vmul.f32 0.01, %v4218_v29  ;;  %v10677_v23 = vrot.slane %v8864_v8, 6  ;;  %v2629_v25 = vrot.slane %v2628_v0, 1  ;;  %v3395_v26 = vrot.slane %v3394_v30, 2 }
 0x14b   : > { %v6406_v58 = vsel %vm6386_vm11, %v10676_v40, %v6404_v21  ;;  %v6138_v41 = vunpack.c.l.b16 %v7527_v36  ;;  %v2613_v42 = vrot.slane %v8695_v27, 4  ;;  %v3381_v8 = vrot.slane %v8697_v16, 4 }
 0x14c   : > { %v6630_v47 = vsel %vm6386_vm11, %v10677_v23, %v6628_v38  ;;  %v6408_v28 = vsel %vm6389_vm12, %v6407_v31, %v6406_v58  ;;  %v4986_v45 = vsel %vm4474_vm0, %v4218_v29, %v4730_v56  ;;  %v2630_v53 = vmax.f32 %v2628_v0, %v2629_v25 }
 0x14d   : > { %v6632_v7 = vsel %vm6389_vm12, %v6631_v19, %v6630_v47  ;;  %v7655_v43 = vpack.c.bf16 %v4986_v45, %v4986_v45  ;;  %v6409_v54 = vrot.slane %v6138_v41, 4  ;;  %v3396_v12 = vmax.f32 %v3394_v30, %v3395_v26  ;;  %v8948_v41 = vpop.f32.mrb[35].mxu0 }
 0x14e   : > { %v2643_v31 = vrot.slane %v8710_v51, 4  ;;  %v3411_v46 = vrot.slane %v8715_v57, 4  ;;  %v4093_v29 = vadd.f32 %v8592_v22, %v2630_v53  ;;  %v2614_v19 = vmax.f32 %v8695_v27, %v2613_v42 }
 0x14f   : > { %v6266_v35 = vunpack.c.l.b16 %v7655_v43  ;;  %v3382_v63 = vmax.f32 %v8697_v16, %v3381_v8  ;;  %v8940_v0 = vsel %vm6392_vm14, %v6409_v54, %v6408_v28  ;;  %v3397_v21 = vrot.slane %v3396_v12, 1 }
 0x150   : > { %v2644_v59 = vmax.f32 %v8710_v51, %v2643_v31  ;;  %v3412_v40 = vmax.f32 %v8715_v57, %v3411_v46  ;;  %vm4349_vm1 = vcmp.ge.f32.partialorder %v4093_v29, 0.0  ;;  %v4605_v58 = vmul.f32 0.01, %v4093_v29  ;;  %v8955_v31 = vpop.f32.mrb[35].mxu1 }
 0x151   : > { %v6633_v30 = vrot.slane %v6266_v35, 4  ;;  %v2615_v38 = vrot.slane %v2614_v19, 2  ;;  %v3398_v36 = vmax.f32 %v3396_v12, %v3397_v21  ;;  %v3383_v56 = vrot.slane %v3382_v63, 2 }
 0x152   : > { %v2645_v23 = vrot.slane %v2644_v59, 2  ;;  %v3413_v47 = vrot.slane %v3412_v40, 2  ;;  %v4861_v16 = vsel %vm4349_vm1, %v4093_v29, %v4605_v58  ;;  %v2631_v28 = vrot.slane %v8717_v60, 4 }
 0x153   : > { %v8945_v27 = vsel %vm6392_vm14, %v6633_v30, %v6632_v7  ;;  %v2616_v25 = vmax.f32 %v2614_v19, %v2615_v38  ;;  %v8950_v51 = vunpack.c.l.b16 %v7657_v24  ;;  %v4221_v57 = vadd.f32 %v8592_v22, %v3398_v36 }
 0x154   : > { %v3384_v45 = vmax.f32 %v3382_v63, %v3383_v56  ;;  %v2646_v26 = vmax.f32 %v2644_v59, %v2645_v23  ;;  %v3414_v53 = vmax.f32 %v3412_v40, %v3413_v47  ;;  %v2632_v42 = vmax.f32 %v8717_v60, %v2631_v28  ;;  %v8962_v60 = vld [vmem:[%s10624_s2] ss:$0 sm:$0xff] }
 0x155   : > { %v2617_v43 = vrot.slane %v2616_v25, 1  ;;  %v3399_v8 = vrot.slane %v8723_v3, 4  ;;  %v7530_v7 = vpack.c.bf16 %v4861_v16, %v4861_v16  ;;  %vm4477_vm3 = vcmp.ge.f32.partialorder %v4221_v57, 0.0 }
 0x156   : > { %v4733_v54 = vmul.f32 0.01, %v4221_v57  ;;  %v3385_v12 = vrot.slane %v3384_v45, 1  ;;  %v2647_v35 = vrot.slane %v2646_v26, 1  ;;  %v3415_v24 = vrot.slane %v3414_v53, 1 }
 0x157   : > { %v2618_v46 = vmax.f32 %v2616_v25, %v2617_v43  ;;  %v2633_v29 = vrot.slane %v2632_v42, 2  ;;  %v3400_v21 = vmax.f32 %v8723_v3, %v3399_v8  ;;  %v6141_v38 = vunpack.c.l.b16 %v7530_v7 }
 0x158   : > { %v4989_v19 = vsel %vm4477_vm3, %v4221_v57, %v4733_v54  ;;  %v3386_v63 = vmax.f32 %v3384_v45, %v3385_v12  ;;  %v2648_v30 = vmax.f32 %v2646_v26, %v2647_v35  ;;  %v3416_v58 = vmax.f32 %v3414_v53, %v3415_v24  ;;  %v8969_v45 = vpop.f32.mrb[36].mxu0  ;;  %v8971_v26 = vpop.f32.mrb[36].mxu1 }
 0x159   : > { %v7658_v59 = vpack.c.bf16 %v4989_v19, %v4989_v19  ;;  %v4091_v40 = vadd.f32 %v8962_v60, %v2618_v46  ;;  %v2634_v56 = vmax.f32 %v2632_v42, %v2633_v29  ;;  %v3401_v23 = vrot.slane %v3400_v21, 2  ;;  %v8973_v8 = vpop.f32.mrb[37].mxu0  ;;  %v8976_v22 = vpop.f32.mrb[37].mxu1 }
 0x15a   : > { %v4219_v36 = vadd.f32 %v8962_v60, %v3386_v63  ;;  %v4096_v16 = vadd.f32 %v8962_v60, %v2648_v30  ;;  %v2649_v3 = vrot.slane %v8725_v4, 4  ;;  %v4224_v28 = vadd.f32 %v8962_v60, %v3416_v58 }
 0x15b   : > { %vm4347_vm2 = vcmp.ge.f32.partialorder %v4091_v40, 0.0  ;;  %v4603_v47 = vmul.f32 0.01, %v4091_v40  ;;  %v2635_v57 = vrot.slane %v2634_v56, 1  ;;  %v6269_v43 = vunpack.c.l.b16 %v7658_v59 }
 0x15c   : > { %vm4475_vm4 = vcmp.ge.f32.partialorder %v4219_v36, 0.0  ;;  %v4731_v25 = vmul.f32 0.01, %v4219_v36  ;;  %vm4352_vm7 = vcmp.ge.f32.partialorder %v4096_v16, 0.0  ;;  %v4608_v42 = vmul.f32 0.01, %v4096_v16 }
 0x15d   : > { %v4859_v53 = vsel %vm4347_vm2, %v4091_v40, %v4603_v47  ;;  %vm4480_vm10 = vcmp.ge.f32.partialorder %v4224_v28, 0.0  ;;  %v4736_v12 = vmul.f32 0.01, %v4224_v28  ;;  %v2636_v24 = vmax.f32 %v2634_v56, %v2635_v57 }
 0x15e   : > { %v7528_v7 = vpack.c.bf16 %v4859_v53, %v4859_v53  ;;  %v4987_v54 = vsel %vm4475_vm4, %v4219_v36, %v4731_v25  ;;  %v4864_v35 = vsel %vm4352_vm7, %v4096_v16, %v4608_v42  ;;  %v3402_v29 = vmax.f32 %v3400_v21, %v3401_v23 }
 0x15f   : > { %v7656_v46 = vpack.c.bf16 %v4987_v54, %v4987_v54  ;;  %v7533_v63 = vpack.c.bf16 %v4864_v35, %v4864_v35  ;;  %v4992_v30 = vsel %vm4480_vm10, %v4224_v28, %v4736_v12  ;;  %v2650_v58 = vmax.f32 %v8725_v4, %v2649_v3 }
 0x160   : > { %v6139_v19 = vunpack.c.l.b16 %v7528_v7  ;;  %v7661_v40 = vpack.c.bf16 %v4992_v30, %v4992_v30  ;;  %v4094_v47 = vadd.f32 %v8962_v60, %v2636_v24  ;;  %v3403_v11 = vrot.slane %v3402_v29, 1 }
 0x161   : > { %v6267_v59 = vunpack.c.l.b16 %v7656_v46  ;;  %v6415_v53 = vrot.slane %v6141_v38, 1  ;;  %v8979_v25 = vunpack.c.l.b16 %v7533_v63  ;;  %v2651_v54 = vrot.slane %v2650_v58, 2  ;;  %v8991_v46 = vpop.f32.mrb[38].mxu0 }
 0x162   : > { %v6411_v36 = vrot.slane %v6139_v19, 3  ;;  %vm4350_vm13 = vcmp.ge.f32.partialorder %v4094_v47, 0.0  ;;  %v4606_v21 = vmul.f32 0.01, %v4094_v47  ;;  %v3417_v56 = vrot.slane %v8729_v10, 4 }
 0x163   : > { %v6635_v16 = vrot.slane %v6267_v59, 3  ;;  %v8984_v23 = vunpack.c.l.b16 %v7661_v40  ;;  %v3404_v3 = vmax.f32 %v3402_v29, %v3403_v11  ;;  %v2652_v28 = vmax.f32 %v2650_v58, %v2651_v54 }
 0x164   : > { %v6412_v4 = vsel %vm6395_vm5, %v6411_v36, %v8940_v0  ;;  %v6639_v57 = vrot.slane %v6269_v43, 1  ;;  %v10678_v42 = vrot.slane %v8911_v1, 2  ;;  %v4862_v12 = vsel %vm4350_vm13, %v4094_v47, %v4606_v21 }
 0x165   : > { %v6636_v7 = vsel %vm6395_vm5, %v6635_v16, %v8945_v27  ;;  %v10679_v0 = vrot.slane %v8950_v51, 2  ;;  %v7531_v11 = vpack.c.bf16 %v4862_v12, %v4862_v12  ;;  %v4222_v43 = vadd.f32 %v8962_v60, %v3404_v3  ;;  %v9013_v3 = vpop.f32.mrb[38].mxu1 }
 0x166   : > { %v6414_v38 = vsel %vm6398_vm6, %v10678_v42, %v6412_v4  ;;  %v2653_v19 = vrot.slane %v2652_v28, 1  ;;  %v3418_v63 = vmax.f32 %v8729_v10, %v3417_v56  ;;  %v2637_v47 = vrot.slane %v8731_v32, 4 }
 0x167   : > { %v6416_v35 = vsel %vm6401_vm8, %v6415_v53, %v6414_v38  ;;  %v6638_v24 = vsel %vm6398_vm6, %v10679_v0, %v6636_v7  ;;  %v4734_v59 = vmul.f32 0.01, %v4222_v43  ;;  %v3405_v53 = vrot.slane %v8738_v18, 4  ;;  %v9019_v0 = vpop.f32.mrb[39].mxu0 }
 0x168   : > { %v6838_v1 = vpack.c.b16 %v6416_v35, %v6416_v35  ;;  %v6640_v29 = vsel %vm6401_vm8, %v6639_v57, %v6638_v24  ;;  %v2654_v51 = vmax.f32 %v2652_v28, %v2653_v19  ;;  %v3419_v40 = vrot.slane %v3418_v63, 2 }
 0x169   : > { %v6854_v27 = vpack.c.b16 %v6640_v29, %v6640_v29  ;;  %vm4478_vm15 = vcmp.ge.f32.partialorder %v4222_v43, 0.0  ;;  %v2667_v36 = vrot.slane %v8748_v44, 4  ;;  %v3435_v54 = vrot.slane %v8750_v50, 4 }
 0x16a   : > { %6902 = vst [vmem:[%s8849_s29 + $0x4] sm:$0xf] %v6838_v1  ;;  %v2655_v10 = vrot.slane %v8752_v52, 4  ;;  %v9009_v16 = vunpack.c.l.b16 %v7531_v11  ;;  %v4097_v21 = vadd.f32 %v8962_v60, %v2654_v51  ;;  %v3420_v56 = vmax.f32 %v3418_v63, %v3419_v40 }
 0x16b   : > { %6918 = vst [vmem:[%s8849_s29 + $0x44] sm:$0xf] %v6854_v27  ;;  %v2638_v4 = vmax.f32 %v8731_v32, %v2637_v47  ;;  %v3406_v28 = vmax.f32 %v8738_v18, %v3405_v53  ;;  %v2668_v57 = vmax.f32 %v8748_v44, %v2667_v36  ;;  %v3436_v42 = vmax.f32 %v8750_v50, %v3435_v54 }
 0x16c   : > { %v2656_v38 = vmax.f32 %v8752_v52, %v2655_v10  ;;  %v4990_v7 = vsel %vm4478_vm15, %v4222_v43, %v4734_v59  ;;  %vm4353_vm0 = vcmp.ge.f32.partialorder %v4097_v21, 0.0  ;;  %v4609_v12 = vmul.f32 0.01, %v4097_v21  ;;  %v9022_v52 = vpop.f32.mrb[39].mxu1 }
 0x16d   : > { %v3421_v35 = vrot.slane %v3420_v56, 1  ;;  %v2639_v24 = vrot.slane %v2638_v4, 2  ;;  %v3407_v11 = vrot.slane %v3406_v28, 2  ;;  %v2669_v1 = vrot.slane %v2668_v57, 2 }
 0x16e   : > { %v3437_v32 = vrot.slane %v3436_v42, 2  ;;  %v4865_v29 = vsel %vm4353_vm0, %v4097_v21, %v4609_v12  ;;  %v2657_v63 = vrot.slane %v2656_v38, 2  ;;  %v3423_v18 = vrot.slane %v8755_v17, 4 }
 0x16f   : > { %v3422_v19 = vmax.f32 %v3420_v56, %v3421_v35  ;;  %v7659_v44 = vpack.c.bf16 %v4990_v7, %v4990_v7  ;;  %v2640_v27 = vmax.f32 %v2638_v4, %v2639_v24  ;;  %v3408_v50 = vmax.f32 %v3406_v28, %v3407_v11 }
 0x170   : > { %v2670_v51 = vmax.f32 %v2668_v57, %v2669_v1  ;;  %v3438_v59 = vmax.f32 %v3436_v42, %v3437_v32  ;;  %v2658_v40 = vmax.f32 %v2656_v38, %v2657_v63  ;;  %v3424_v47 = vmax.f32 %v8755_v17, %v3423_v18 }
 0x171   : > { %v4225_v43 = vadd.f32 %v8962_v60, %v3422_v19  ;;  %v7534_v53 = vpack.c.bf16 %v4865_v29, %v4865_v29  ;;  %v2641_v36 = vrot.slane %v2640_v27, 1  ;;  %v3409_v54 = vrot.slane %v3408_v50, 1 }
 0x172   : > { %v2671_v10 = vrot.slane %v2670_v51, 1  ;;  %v3439_v56 = vrot.slane %v3438_v59, 1  ;;  %v2659_v12 = vrot.slane %v2658_v40, 1  ;;  %v6270_v7 = vunpack.c.l.b16 %v7659_v44  ;;  %v9031_v44 = vpop.f32.mrb[40].mxu0 }
 0x173   : > { %vm4481_vm1 = vcmp.ge.f32.partialorder %v4225_v43, 0.0  ;;  %v4737_v21 = vmul.f32 0.01, %v4225_v43  ;;  %v2642_v4 = vmax.f32 %v2640_v27, %v2641_v36  ;;  %v3410_v28 = vmax.f32 %v3408_v50, %v3409_v54  ;;  %v9033_v27 = vpop.f32.mrb[40].mxu1 }
 0x174   : > { %v2672_v57 = vmax.f32 %v2670_v51, %v2671_v10  ;;  %v3440_v24 = vmax.f32 %v3438_v59, %v3439_v56  ;;  %v2660_v11 = vmax.f32 %v2658_v40, %v2659_v12  ;;  %v3425_v1 = vrot.slane %v3424_v47, 2 }
 0x175   : > { %v4993_v35 = vsel %vm4481_vm1, %v4225_v43, %v4737_v21  ;;  %v4095_v38 = vadd.f32 %v8962_v60, %v2642_v4  ;;  %v4223_v17 = vadd.f32 %v8962_v60, %v3410_v28  ;;  %v6145_v29 = vunpack.c.l.b16 %v7534_v53  ;;  %v9036_v43 = vpop.f32.mrb[41].mxu0 }
 0x176   : > { %v7662_v42 = vpack.c.bf16 %v4993_v35, %v4993_v35  ;;  %v4100_v32 = vadd.f32 %v8962_v60, %v2672_v57  ;;  %v4228_v19 = vadd.f32 %v8962_v60, %v3440_v24  ;;  %v4098_v63 = vadd.f32 %v8962_v60, %v2660_v11  ;;  %10680 = vst [vmem:[#allocation11_spill] sm:$0xff] %v9036_v43  ;;  %v9038_v35 = vpop.f32.mrb[41].mxu1 }
 0x177   : > { %v3426_v18 = vmax.f32 %v3424_v47, %v3425_v1  ;;  %vm4351_vm3 = vcmp.ge.f32.partialorder %v4095_v38, 0.0  ;;  %v4607_v50 = vmul.f32 0.01, %v4095_v38  ;;  %vm4479_vm2 = vcmp.ge.f32.partialorder %v4223_v17, 0.0 }
 0x178   : > { %v2673_v51 = vrot.slane %v8757_v62, 4  ;;  %v4735_v59 = vmul.f32 0.01, %v4223_v17  ;;  %vm4356_vm4 = vcmp.ge.f32.partialorder %v4100_v32, 0.0  ;;  %v4612_v40 = vmul.f32 0.01, %v4100_v32 }
 0x179   : > { %vm4484_vm7 = vcmp.ge.f32.partialorder %v4228_v19, 0.0  ;;  %v6273_v53 = vunpack.c.l.b16 %v7662_v42  ;;  %v4863_v36 = vsel %vm4351_vm3, %v4095_v38, %v4607_v50  ;;  %v4740_v54 = vmul.f32 0.01, %v4228_v19 }
 0x17a   : > { %vm4354_vm10 = vcmp.ge.f32.partialorder %v4098_v63, 0.0  ;;  %v7532_v47 = vpack.c.bf16 %v4863_v36, %v4863_v36  ;;  %v4991_v10 = vsel %vm4479_vm2, %v4223_v17, %v4735_v59  ;;  %v4868_v21 = vsel %vm4356_vm4, %v4100_v32, %v4612_v40 }
 0x17b   : > { %v4610_v56 = vmul.f32 0.01, %v4098_v63  ;;  %v7660_v12 = vpack.c.bf16 %v4991_v10, %v4991_v10  ;;  %v7537_v4 = vpack.c.bf16 %v4868_v21, %v4868_v21  ;;  %v4996_v28 = vsel %vm4484_vm7, %v4228_v19, %v4740_v54 }
 0x17c   : > { %v3427_v57 = vrot.slane %v3426_v18, 1  ;;  %v6143_v24 = vunpack.c.l.b16 %v7532_v47  ;;  %v7665_v11 = vpack.c.bf16 %v4996_v28, %v4996_v28  ;;  %v2674_v58 = vmax.f32 %v8757_v62, %v2673_v51 }
 0x17d   : > { %v4866_v1 = vsel %vm4354_vm10, %v4098_v63, %v4610_v56  ;;  %v6421_v30 = vrot.slane %v6145_v29, 5  ;;  %v6271_v42 = vunpack.c.l.b16 %v7660_v12  ;;  %v6645_v43 = vrot.slane %v6273_v53, 5 }
 0x17e   : > { %v7535_v38 = vpack.c.bf16 %v4866_v1, %v4866_v1  ;;  %v3428_v50 = vmax.f32 %v3426_v18, %v3427_v57  ;;  %v6417_v36 = vrot.slane %v6143_v24, 7  ;;  %v2675_v17 = vrot.slane %v2674_v58, 2  ;;  %v9063_v57 = vpop.f32.mrb[42].mxu0  ;;  %v9067_v1 = vpop.f32.mrb[42].mxu1 }
 0x17f   : > { %v3441_v32 = vrot.slane %v8765_v5, 4  ;;  %v6641_v59 = vrot.slane %v6271_v42, 7  ;;  %v9042_v40 = vunpack.c.l.b16 %v7537_v4  ;;  %v9047_v47 = vunpack.c.l.b16 %v7665_v11 }
 0x180   : > { %v6146_v19 = vunpack.c.l.b16 %v7535_v38  ;;  %v4226_v54 = vadd.f32 %v8962_v60, %v3428_v50  ;;  %v6418_v63 = vsel %vm6383_vm9, %v6417_v36, %v9009_v16  ;;  %v2676_v62 = vmax.f32 %v2674_v58, %v2675_v17 }
 0x181   : > { %v3442_v29 = vmax.f32 %v8765_v5, %v3441_v32  ;;  %v10681_v18 = vrot.slane %v8979_v25, 6  ;;  %v6642_v53 = vsel %vm6383_vm9, %v6641_v59, %v6270_v7  ;;  %v10682_v21 = vrot.slane %v8984_v23, 6 }
 0x182   : > { %v6423_v10 = vrot.slane %v6146_v19, 4  ;;  %vm4482_vm13 = vcmp.ge.f32.partialorder %v4226_v54, 0.0  ;;  %v4738_v16 = vmul.f32 0.01, %v4226_v54  ;;  %v2677_v4 = vrot.slane %v2676_v62, 1 }
 0x183   : > { %v6420_v51 = vsel %vm6386_vm11, %v10681_v18, %v6418_v63  ;;  %v6644_v56 = vsel %vm6386_vm11, %v10682_v21, %v6642_v53  ;;  %v3443_v25 = vrot.slane %v3442_v29, 2  ;;  %v2661_v28 = vrot.slane %v8767_v6, 4 }
 0x184   : > { %v6422_v12 = vsel %vm6389_vm12, %v6421_v30, %v6420_v51  ;;  %v6646_v5 = vsel %vm6389_vm12, %v6645_v43, %v6644_v56  ;;  %v4994_v7 = vsel %vm4482_vm13, %v4226_v54, %v4738_v16  ;;  %v2678_v24 = vmax.f32 %v2676_v62, %v2677_v4 }
 0x185   : > { %v9059_v58 = vsel %vm6392_vm14, %v6423_v10, %v6422_v12  ;;  %v3429_v23 = vrot.slane %v8770_v33, 4  ;;  %v2691_v11 = vrot.slane %v8781_v49, 4  ;;  %v7663_v30 = vpack.c.bf16 %v4994_v7, %v4994_v7  ;;  %v9077_v12 = vpop.f32.mrb[43].mxu0 }
 0x186   : > { %v3444_v42 = vmax.f32 %v3442_v29, %v3443_v25  ;;  %v2662_v38 = vmax.f32 %v8767_v6, %v2661_v28  ;;  %v3459_v50 = vrot.slane %v8787_v61, 4  ;;  %v4101_v43 = vadd.f32 %v8962_v60, %v2678_v24  ;;  %v9084_v28 = vpop.f32.mrb[43].mxu1 }
 0x187   : > { %v3430_v36 = vmax.f32 %v8770_v33, %v3429_v23  ;;  %v2692_v17 = vmax.f32 %v8781_v49, %v2691_v11  ;;  %v2679_v32 = vrot.slane %v8789_v37, 4  ;;  %v6274_v59 = vunpack.c.l.b16 %v7663_v30 }
 0x188   : > { %v3445_v19 = vrot.slane %v3444_v42, 1  ;;  %v2663_v54 = vrot.slane %v2662_v38, 2  ;;  %v3460_v63 = vmax.f32 %v8787_v61, %v3459_v50  ;;  %vm4357_vm15 = vcmp.ge.f32.partialorder %v4101_v43, 0.0 }
 0x189   : > { %v4613_v62 = vmul.f32 0.01, %v4101_v43  ;;  %v3431_v29 = vrot.slane %v3430_v36, 2  ;;  %v2693_v18 = vrot.slane %v2692_v17, 2  ;;  %v6647_v6 = vrot.slane %v6274_v59, 4 }
 0x18a   : > { %v3446_v51 = vmax.f32 %v3444_v42, %v3445_v19  ;;  %v2664_v53 = vmax.f32 %v2662_v38, %v2663_v54  ;;  %v3461_v10 = vrot.slane %v3460_v63, 2  ;;  %v2680_v49 = vmax.f32 %v8789_v37, %v2679_v32 }
 0x18b   : > { %v4869_v21 = vsel %vm4357_vm15, %v4101_v43, %v4613_v62  ;;  %v3432_v56 = vmax.f32 %v3430_v36, %v3431_v29  ;;  %v2694_v33 = vmax.f32 %v2692_v17, %v2693_v18  ;;  %v6427_v16 = vrot.slane %v9042_v40, 2 }
 0x18c   : > { %v9081_v4 = vsel %vm6392_vm14, %v6647_v6, %v6646_v5  ;;  %v4229_v61 = vadd.f32 %v8962_v60, %v3446_v51  ;;  %v2665_v25 = vrot.slane %v2664_v53, 1  ;;  %v3462_v23 = vmax.f32 %v3460_v63, %v3461_v10  ;;  %v9092_v51 = vpop.f32.mrb[44].mxu0 }
 0x18d   : > { %v3433_v7 = vrot.slane %v3432_v56, 1  ;;  %v2695_v24 = vrot.slane %v2694_v33, 1  ;;  %v2681_v11 = vrot.slane %v2680_v49, 2  ;;  %v7538_v30 = vpack.c.bf16 %v4869_v21, %v4869_v21  ;;  %v9096_v21 = vpop.f32.mrb[45].mxu0 }
 0x18e   : > { %vm4485_vm0 = vcmp.ge.f32.partialorder %v4229_v61, 0.0  ;;  %v4741_v42 = vmul.f32 0.01, %v4229_v61  ;;  %v2666_v37 = vmax.f32 %v2664_v53, %v2665_v25  ;;  %v3463_v43 = vrot.slane %v3462_v23, 1  ;;  %v9094_v53 = vpop.f32.mrb[44].mxu1 }
 0x18f   : > { %v3434_v38 = vmax.f32 %v3432_v56, %v3433_v7  ;;  %v2696_v50 = vmax.f32 %v2694_v33, %v2695_v24  ;;  %v2682_v36 = vmax.f32 %v2680_v49, %v2681_v11  ;;  %v6651_v5 = vrot.slane %v9047_v47, 2 }
 0x190   : > { %v4997_v17 = vsel %vm4485_vm0, %v4229_v61, %v4741_v42  ;;  %v4099_v32 = vadd.f32 %v8962_v60, %v2666_v37  ;;  %v3447_v59 = vrot.slane %v8793_v9, 4  ;;  %v3464_v62 = vmax.f32 %v3462_v23, %v3463_v43 }
 0x191   : > { %v7666_v19 = vpack.c.bf16 %v4997_v17, %v4997_v17  ;;  %v4227_v54 = vadd.f32 %v8962_v60, %v3434_v38  ;;  %v4104_v63 = vadd.f32 %v8962_v60, %v2696_v50  ;;  %v2683_v18 = vrot.slane %v2682_v36, 1 }
 0x192   : > { %vm4355_vm1 = vcmp.ge.f32.partialorder %v4099_v32, 0.0  ;;  %v4611_v29 = vmul.f32 0.01, %v4099_v32  ;;  %v3448_v6 = vmax.f32 %v8793_v9, %v3447_v59  ;;  %v6149_v47 = vunpack.c.l.b16 %v7538_v30 }
 0x193   : > { %vm4483_vm3 = vcmp.ge.f32.partialorder %v4227_v54, 0.0  ;;  %v4739_v10 = vmul.f32 0.01, %v4227_v54  ;;  %vm4360_vm2 = vcmp.ge.f32.partialorder %v4104_v63, 0.0  ;;  %v4616_v33 = vmul.f32 0.01, %v4104_v63 }
 0x194   : > { %v4867_v56 = vsel %vm4355_vm1, %v4099_v32, %v4611_v29  ;;  %v4232_v49 = vadd.f32 %v8962_v60, %v3464_v62  ;;  %v2684_v61 = vmax.f32 %v2682_v36, %v2683_v18  ;;  %v6277_v25 = vunpack.c.l.b16 %v7666_v19  ;;  %v9102_v36 = vpop.f32.mrb[45].mxu1 }
 0x195   : > { %v7536_v7 = vpack.c.bf16 %v4867_v56, %v4867_v56  ;;  %v4995_v24 = vsel %vm4483_vm3, %v4227_v54, %v4739_v10  ;;  %v3449_v23 = vrot.slane %v3448_v6, 2  ;;  %v4872_v11 = vsel %vm4360_vm2, %v4104_v63, %v4616_v33 }
 0x196   : > { %v7664_v9 = vpack.c.bf16 %v4995_v24, %v4995_v24  ;;  %vm4488_vm4 = vcmp.ge.f32.partialorder %v4232_v49, 0.0  ;;  %v4744_v42 = vmul.f32 0.01, %v4232_v49  ;;  %v7541_v30 = vpack.c.bf16 %v4872_v11, %v4872_v11 }
 0x197   : > { %v6147_v37 = vunpack.c.l.b16 %v7536_v7  ;;  %v4102_v38 = vadd.f32 %v8962_v60, %v2684_v61  ;;  %v3450_v50 = vmax.f32 %v3448_v6, %v3449_v23  ;;  %v2697_v32 = vrot.slane %v8795_v20, 4 }
 0x198   : > { %v6275_v43 = vunpack.c.l.b16 %v7664_v9  ;;  %v5000_v17 = vsel %vm4488_vm4, %v4232_v49, %v4744_v42  ;;  %v3465_v59 = vrot.slane %v8801_v15, 4  ;;  %v6429_v19 = vrot.slane %v6149_v47, 1 }
 0x199   : > { %v6425_v54 = vrot.slane %v6147_v37, 3  ;;  %v7669_v62 = vpack.c.bf16 %v5000_v17, %v5000_v17  ;;  %vm4358_vm7 = vcmp.ge.f32.partialorder %v4102_v38, 0.0  ;;  %v4614_v29 = vmul.f32 0.01, %v4102_v38 }
 0x19a   : > { %v6649_v63 = vrot.slane %v6275_v43, 3  ;;  %v3451_v18 = vrot.slane %v3450_v50, 1  ;;  %v2698_v10 = vmax.f32 %v8795_v20, %v2697_v32  ;;  %v6653_v56 = vrot.slane %v6277_v25, 1 }
 0x19b   : > { %v6426_v6 = vsel %vm6395_vm5, %v6425_v54, %v9059_v58  ;;  %v9107_v33 = vunpack.c.l.b16 %v7541_v30  ;;  %v3466_v49 = vmax.f32 %v8801_v15, %v3465_v59  ;;  %v9115_v7 = vunpack.c.l.b16 %v7669_v62  ;;  %v9123_v30 = vpop.f32.mrb[46].mxu0  ;;  %v10686_v62 = vld [vmem:[#allocation5_spill] sm:$0xff] }
 0x19c   : > { %v6428_v47 = vsel %vm6398_vm6, %v6427_v16, %v6426_v6  ;;  %v6650_v61 = vsel %vm6395_vm5, %v6649_v63, %v9081_v4  ;;  %v3452_v24 = vmax.f32 %v3450_v50, %v3451_v18  ;;  %v4870_v58 = vsel %vm4358_vm7, %v4102_v38, %v4614_v29  ;;  %v10683_v4 = vld [vmem:[#allocation2_spill] sm:$0xff]  ;;  %v10684_v38 = vld [vmem:[#allocation3_spill] sm:$0xff]  ;;  %v9132_v29 = vpop.f32.mrb[46].mxu1 }
 0x19d   : > { %v6430_v20 = vsel %vm6401_vm8, %v6429_v19, %v6428_v47  ;;  %v6652_v25 = vsel %vm6398_vm6, %v6651_v5, %v6650_v61  ;;  %v2699_v9 = vrot.slane %v2698_v10, 2  ;;  %v3467_v42 = vrot.slane %v3466_v49, 2  ;;  %v10685_v19 = vld [vmem:[#allocation4_spill] sm:$0xff]  ;;  %v10687_v6 = vld [vmem:[#allocation6_spill] sm:$0xff] }
 0x19e   : > { %v6839_v23 = vpack.c.b16 %v6430_v20, %v6430_v20  ;;  %v6654_v15 = vsel %vm6401_vm8, %v6653_v56, %v6652_v25  ;;  %v4230_v40 = vadd.f32 %v8962_v60, %v3452_v24  ;;  %v2685_v37 = vrot.slane %v10683_v4, 4 }
 0x19f   : > { %v6855_v16 = vpack.c.b16 %v6654_v15, %v6654_v15  ;;  %v7539_v5 = vpack.c.bf16 %v4870_v58, %v4870_v58  ;;  %v2700_v43 = vmax.f32 %v2698_v10, %v2699_v9  ;;  %v3453_v17 = vrot.slane %v10684_v38, 4 }
 0x1a0   : > { %6903 = vst [vmem:[%s8849_s29 + $0x8] sm:$0xf] %v6839_v23  ;;  %v3468_v32 = vmax.f32 %v3466_v49, %v3467_v42  ;;  %v2686_v59 = vmax.f32 %v10683_v4, %v2685_v37  ;;  %v2715_v54 = vrot.slane %v10685_v19, 4  ;;  %v3483_v63 = vrot.slane %v10686_v62, 4 }
 0x1a1   : > { %6919 = vst [vmem:[%s8849_s29 + $0x48] sm:$0xf] %v6855_v16  ;;  %vm4486_vm10 = vcmp.ge.f32.partialorder %v4230_v40, 0.0  ;;  %v2701_v18 = vrot.slane %v2700_v43, 1  ;;  %v3454_v56 = vmax.f32 %v10684_v38, %v3453_v17  ;;  %v2703_v47 = vrot.slane %v10687_v6, 4 }
 0x1a2   : > { %v4742_v61 = vmul.f32 0.01, %v4230_v40  ;;  %v3469_v10 = vrot.slane %v3468_v32, 1  ;;  %v2687_v24 = vrot.slane %v2686_v59, 2  ;;  %v2716_v20 = vmax.f32 %v10685_v19, %v2715_v54 }
 0x1a3   : > { %v2702_v49 = vmax.f32 %v2700_v43, %v2701_v18  ;;  %v3455_v25 = vrot.slane %v3454_v56, 2  ;;  %v3484_v58 = vmax.f32 %v10686_v62, %v3483_v63  ;;  %v2704_v23 = vmax.f32 %v10687_v6, %v2703_v47  ;;  %v9144_v18 = vpop.f32.mrb[47].mxu0 }
 0x1a4   : > { %v9139_v15 = vunpack.c.l.b16 %v7539_v5  ;;  %v3470_v9 = vmax.f32 %v3468_v32, %v3469_v10  ;;  %v2688_v16 = vmax.f32 %v2686_v59, %v2687_v24  ;;  %v2717_v42 = vrot.slane %v2716_v20, 2  ;;  %v9146_v32 = vpop.f32.mrb[47].mxu1 }
 0x1a5   : > { %v4105_v4 = vadd.f32 %v8962_v60, %v2702_v49  ;;  %v3456_v37 = vmax.f32 %v3454_v56, %v3455_v25  ;;  %v3485_v38 = vrot.slane %v3484_v58, 2  ;;  %v2705_v17 = vrot.slane %v2704_v23, 2  ;;  %10688 = vst [vmem:[#allocation2_spill] sm:$0xff] %v9146_v32 }
 0x1a6   : > { %v4998_v50 = vsel %vm4486_vm10, %v4230_v40, %v4742_v61  ;;  %v4233_v19 = vadd.f32 %v8962_v60, %v3470_v9  ;;  %v2689_v43 = vrot.slane %v2688_v16, 1  ;;  %v2718_v54 = vmax.f32 %v2716_v20, %v2717_v42 }
 0x1a7   : > { %vm4361_vm13 = vcmp.ge.f32.partialorder %v4105_v4, 0.0  ;;  %v4617_v62 = vmul.f32 0.01, %v4105_v4  ;;  %v3457_v5 = vrot.slane %v3456_v37, 1  ;;  %v3486_v63 = vmax.f32 %v3484_v58, %v3485_v38 }
 0x1a8   : > { %vm4489_vm15 = vcmp.ge.f32.partialorder %v4233_v19, 0.0  ;;  %v4745_v59 = vmul.f32 0.01, %v4233_v19  ;;  %v2690_v6 = vmax.f32 %v2688_v16, %v2689_v43  ;;  %v2719_v56 = vrot.slane %v2718_v54, 1 }
 0x1a9   : > { %v4873_v47 = vsel %vm4361_vm13, %v4105_v4, %v4617_v62  ;;  %v3458_v10 = vmax.f32 %v3456_v37, %v3457_v5  ;;  %v3487_v24 = vrot.slane %v3486_v63, 1  ;;  %v2706_v40 = vmax.f32 %v2704_v23, %v2705_v17  ;;  %v9153_v17 = vpop.f32.mrb[48].mxu0 }
 0x1aa   : > { %v7542_v61 = vpack.c.bf16 %v4873_v47, %v4873_v47  ;;  %v5001_v49 = vsel %vm4489_vm15, %v4233_v19, %v4745_v59  ;;  %v4103_v20 = vadd.f32 %v8962_v60, %v2690_v6  ;;  %v2720_v25 = vmax.f32 %v2718_v54, %v2719_v56  ;;  %v9155_v19 = vpop.f32.mrb[48].mxu1  ;;  %v9157_v62 = vpop.f32.mrb[49].mxu0 }
 0x1ab   : > { %v7667_v9 = vpack.c.bf16 %v4998_v50, %v4998_v50  ;;  %v7670_v42 = vpack.c.bf16 %v5001_v49, %v5001_v49  ;;  %v4231_v11 = vadd.f32 %v8962_v60, %v3458_v10  ;;  %v3488_v58 = vmax.f32 %v3486_v63, %v3487_v24  ;;  %10689 = vst [vmem:[#allocation3_spill] sm:$0xff] %v9155_v19 }
 0x1ac   : > { %vm4359_vm0 = vcmp.ge.f32.partialorder %v4103_v20, 0.0  ;;  %v4615_v38 = vmul.f32 0.01, %v4103_v20  ;;  %v4108_v32 = vadd.f32 %v8962_v60, %v2720_v25  ;;  %v2707_v16 = vrot.slane %v2706_v40, 1  ;;  %10690 = vst [vmem:[#allocation4_spill] sm:$0xff] %v9157_v62 }
 0x1ad   : > { %vm4487_vm1 = vcmp.ge.f32.partialorder %v4231_v11, 0.0  ;;  %v4743_v4 = vmul.f32 0.01, %v4231_v11  ;;  %v4236_v37 = vadd.f32 %v8962_v60, %v3488_v58  ;;  %v3471_v23 = vrot.slane %v8834_v13, 4 }
 0x1ae   : > { %v6153_v50 = vunpack.c.l.b16 %v7542_v61  ;;  %v4871_v43 = vsel %vm4359_vm0, %v4103_v20, %v4615_v38  ;;  %vm4364_vm3 = vcmp.ge.f32.partialorder %v4108_v32, 0.0  ;;  %v4620_v54 = vmul.f32 0.01, %v4108_v32 }
 0x1af   : > { %v6281_v5 = vunpack.c.l.b16 %v7670_v42  ;;  %v7540_v63 = vpack.c.bf16 %v4871_v43, %v4871_v43  ;;  %v4999_v59 = vsel %vm4487_vm1, %v4231_v11, %v4743_v4  ;;  %vm4492_vm2 = vcmp.ge.f32.partialorder %v4236_v37, 0.0  ;;  %v9166_v43 = vpop.f32.mrb[49].mxu1 }
 0x1b0   : > { %v7668_v6 = vpack.c.bf16 %v4999_v59, %v4999_v59  ;;  %v4876_v56 = vsel %vm4364_vm3, %v4108_v32, %v4620_v54  ;;  %v4748_v47 = vmul.f32 0.01, %v4236_v37  ;;  %v2708_v10 = vmax.f32 %v2706_v40, %v2707_v16 }
 0x1b1   : > { %v6151_v24 = vunpack.c.l.b16 %v7540_v63  ;;  %v7545_v49 = vpack.c.bf16 %v4876_v56, %v4876_v56  ;;  %v3472_v25 = vmax.f32 %v8834_v13, %v3471_v23  ;;  %v2721_v58 = vrot.slane %v8868_v48, 4 }
 0x1b2   : > { %v6278_v61 = vunpack.c.l.b16 %v7667_v9  ;;  %v6435_v20 = vrot.slane %v6153_v50, 5  ;;  %v6279_v38 = vunpack.c.l.b16 %v7668_v6  ;;  %v4106_v19 = vadd.f32 %v8962_v60, %v2708_v10 }
 0x1b3   : > { %v6431_v62 = vrot.slane %v6151_v24, 7  ;;  %v9162_v42 = vsel %vm4492_vm2, %v4236_v37, %v4748_v47  ;;  %v3473_v11 = vrot.slane %v3472_v25, 2  ;;  %v3489_v4 = vrot.slane %v8874_v14, 4 }
 0x1b4   : > { %v6655_v32 = vrot.slane %v6279_v38, 7  ;;  %vm4362_vm4 = vcmp.ge.f32.partialorder %v4106_v19, 0.0  ;;  %v4618_v40 = vmul.f32 0.01, %v4106_v19  ;;  %v2722_v16 = vmax.f32 %v8868_v48, %v2721_v58  ;;  %v10694_v58 = vld [vmem:[#allocation8_spill] sm:$0xff] }
 0x1b5   : > { %v6659_v13 = vrot.slane %v6281_v5, 5  ;;  %v6432_v9 = vsel %vm6383_vm9, %v6431_v62, %v9139_v15  ;;  %v9170_v23 = vunpack.c.l.b16 %v7545_v49  ;;  %v3474_v50 = vmax.f32 %v3472_v25, %v3473_v11 }
 0x1b6   : > { %v10691_v37 = vrot.slane %v9107_v33, 6  ;;  %v6656_v63 = vsel %vm6383_vm9, %v6655_v32, %v6278_v61  ;;  %v4874_v59 = vsel %vm4362_vm4, %v4106_v19, %v4618_v40  ;;  %v2723_v6 = vrot.slane %v2722_v16, 2  ;;  %v10693_v19 = vld [vmem:[#allocation7_spill] sm:$0xff]  ;;  %v10695_v40 = vld [vmem:[#allocation9_spill] sm:$0xff] }
 0x1b7   : > { %v10692_v56 = vrot.slane %v9115_v7, 6  ;;  %v7543_v47 = vpack.c.bf16 %v4874_v59, %v4874_v59  ;;  %v3475_v62 = vrot.slane %v3474_v50, 1  ;;  %v3490_v24 = vmax.f32 %v8874_v14, %v3489_v4  ;;  %v9195_v4 = vpop.f32.mrb[50].mxu1 }
 0x1b8   : > { %v6434_v54 = vsel %vm6386_vm11, %v10691_v37, %v6432_v9  ;;  %v2724_v33 = vmax.f32 %v2722_v16, %v2723_v6  ;;  %v2709_v25 = vrot.slane %v10693_v19, 4  ;;  %v3477_v7 = vrot.slane %v10694_v58, 4  ;;  %10696 = vst [vmem:[#allocation5_spill] sm:$0xff] %v9195_v4 }
 0x1b9   : > { %v6658_v48 = vsel %vm6386_vm11, %v10692_v56, %v6656_v63  ;;  %v6436_v15 = vsel %vm6389_vm12, %v6435_v20, %v6434_v54  ;;  %v6154_v49 = vunpack.c.l.b16 %v7543_v47  ;;  %v2739_v61 = vrot.slane %v8899_v39, 4  ;;  %v9190_v20 = vpop.f32.mrb[50].mxu0 }
 0x1ba   : > { %v9183_v10 = vsel %vm6389_vm12, %v6659_v13, %v6658_v48  ;;  %v3476_v38 = vmax.f32 %v3474_v50, %v3475_v62  ;;  %v2725_v11 = vrot.slane %v2724_v33, 1  ;;  %v3491_v32 = vrot.slane %v3490_v24, 2 }
 0x1bb   : > { %v3507_v9 = vrot.slane %v10695_v40, 4  ;;  %v6437_v37 = vrot.slane %v6154_v49, 4  ;;  %v2710_v13 = vmax.f32 %v10693_v19, %v2709_v25  ;;  %v3478_v16 = vmax.f32 %v10694_v58, %v3477_v7 }
 0x1bc   : > { %v2740_v14 = vmax.f32 %v8899_v39, %v2739_v61  ;;  %v4234_v54 = vadd.f32 %v8962_v60, %v3476_v38  ;;  %v2726_v63 = vmax.f32 %v2724_v33, %v2725_v11  ;;  %v3492_v59 = vmax.f32 %v3490_v24, %v3491_v32 }
 0x1bd   : > { %v3508_v50 = vmax.f32 %v10695_v40, %v3507_v9  ;;  %v9200_v6 = vsel %vm6392_vm14, %v6437_v37, %v6436_v15  ;;  %v2711_v56 = vrot.slane %v2710_v13, 2  ;;  %v3479_v48 = vrot.slane %v3478_v16, 2  ;;  %v9203_v40 = vpop.f32.mrb[51].mxu0 }
 0x1be   : > { %v2741_v47 = vrot.slane %v2740_v14, 2  ;;  %vm4490_vm7 = vcmp.ge.f32.partialorder %v4234_v54, 0.0  ;;  %v4746_v62 = vmul.f32 0.01, %v4234_v54  ;;  %v4109_v49 = vadd.f32 %v8962_v60, %v2726_v63  ;;  %v10697_v63 = vld [vmem:[#allocation10_spill] sm:$0xff] }
 0x1bf   : > { %v3493_v19 = vrot.slane %v3492_v59, 1  ;;  %v2712_v39 = vmax.f32 %v2710_v13, %v2711_v56  ;;  %v3480_v25 = vmax.f32 %v3478_v16, %v3479_v48  ;;  %v3509_v7 = vrot.slane %v3508_v50, 2 }
 0x1c0   : > { %v2742_v58 = vmax.f32 %v2740_v14, %v2741_v47  ;;  %v5002_v61 = vsel %vm4490_vm7, %v4234_v54, %v4746_v62  ;;  %vm4365_vm10 = vcmp.ge.f32.partialorder %v4109_v49, 0.0  ;;  %v4621_v33 = vmul.f32 0.01, %v4109_v49  ;;  %v9208_v47 = vpop.f32.mrb[51].mxu1 }
 0x1c1   : > { %v3494_v24 = vmax.f32 %v3492_v59, %v3493_v19  ;;  %v7671_v38 = vpack.c.bf16 %v5002_v61, %v5002_v61  ;;  %v2713_v11 = vrot.slane %v2712_v39, 1  ;;  %v3481_v15 = vrot.slane %v3480_v25, 1 }
 0x1c2   : > { %v2743_v32 = vrot.slane %v2742_v58, 1  ;;  %v4877_v9 = vsel %vm4365_vm10, %v4109_v49, %v4621_v33  ;;  %v3510_v5 = vmax.f32 %v3508_v50, %v3509_v7  ;;  %v2727_v4 = vrot.slane %v10697_v63, 4 }
 0x1c3   : > { %v4237_v37 = vadd.f32 %v8962_v60, %v3494_v24  ;;  %v6282_v16 = vunpack.c.l.b16 %v7671_v38  ;;  %v2714_v14 = vmax.f32 %v2712_v39, %v2713_v11  ;;  %v3482_v54 = vmax.f32 %v3480_v25, %v3481_v15 }
 0x1c4   : > { %v2744_v59 = vmax.f32 %v2742_v58, %v2743_v32  ;;  %v3511_v48 = vrot.slane %v3510_v5, 1  ;;  %v7546_v19 = vpack.c.bf16 %v4877_v9, %v4877_v9  ;;  %v2728_v24 = vmax.f32 %v10697_v63, %v2727_v4 }
 0x1c5   : > { %vm4493_vm13 = vcmp.ge.f32.partialorder %v4237_v37, 0.0  ;;  %v4749_v56 = vmul.f32 0.01, %v4237_v37  ;;  %v6661_v62 = vrot.slane %v6282_v16, 4  ;;  %v4107_v49 = vadd.f32 %v8962_v60, %v2714_v14  ;;  %v9222_v14 = vpop.f32.mrb[52].mxu0 }
 0x1c6   : > { %v4235_v61 = vadd.f32 %v8962_v60, %v3482_v54  ;;  %v4112_v7 = vadd.f32 %v8962_v60, %v2744_v59  ;;  %v3512_v33 = vmax.f32 %v3510_v5, %v3511_v48  ;;  %v10698_v39 = vpack.c.bf16 %v9162_v42, %v9162_v42 }
 0x1c7   : > { %v5005_v50 = vsel %vm4493_vm13, %v4237_v37, %v4749_v56  ;;  %v6662_v58 = vsel %vm6392_vm14, %v6661_v62, %v9183_v10  ;;  %vm4363_vm15 = vcmp.ge.f32.partialorder %v4107_v49, 0.0  ;;  %v4619_v11 = vmul.f32 0.01, %v4107_v49  ;;  %v9224_v10 = vpop.f32.mrb[52].mxu1  ;;  %v9226_v62 = vpop.f32.mrb[53].mxu0 }
 0x1c8   : > { %v6284_v25 = vunpack.c.l.b16 %v10698_v39  ;;  %v7674_v38 = vpack.c.bf16 %v5005_v50, %v5005_v50  ;;  %vm4491_vm0 = vcmp.ge.f32.partialorder %v4235_v61, 0.0  ;;  %v4747_v15 = vmul.f32 0.01, %v4235_v61  ;;  %10699 = vst [vmem:[#allocation6_spill] sm:$0xff] %v9226_v62 }
 0x1c9   : > { %vm4368_vm1 = vcmp.ge.f32.partialorder %v4112_v7, 0.0  ;;  %v6157_v32 = vunpack.c.l.b16 %v7546_v19  ;;  %v4624_v9 = vmul.f32 0.01, %v4112_v7  ;;  %v4240_v37 = vadd.f32 %v8962_v60, %v3512_v33 }
 0x1ca   : > { %v2729_v5 = vrot.slane %v2728_v24, 2  ;;  %v4875_v16 = vsel %vm4363_vm15, %v4107_v49, %v4619_v11  ;;  %v5003_v4 = vsel %vm4491_vm0, %v4235_v61, %v4747_v15  ;;  %v3495_v63 = vrot.slane %v8909_v34, 4 }
 0x1cb   : > { %v2745_v42 = vrot.slane %v8928_v2, 4  ;;  %v6285_v54 = vunpack.c.l.b16 %v7674_v38  ;;  %v7544_v56 = vpack.c.bf16 %v4875_v16, %v4875_v16  ;;  %v7672_v59 = vpack.c.bf16 %v5003_v4, %v5003_v4  ;;  %v9231_v16 = vpop.f32.mrb[53].mxu1 }
 0x1cc   : > { %v4880_v48 = vsel %vm4368_vm1, %v4112_v7, %v4624_v9  ;;  %vm4496_vm3 = vcmp.ge.f32.partialorder %v4240_v37, 0.0  ;;  %v4752_v60 = vmul.f32 0.01, %v4240_v37  ;;  %v2730_v50 = vmax.f32 %v2728_v24, %v2729_v5 }
 0x1cd   : > { %v7549_v19 = vpack.c.bf16 %v4880_v48, %v4880_v48  ;;  %v6155_v49 = vunpack.c.l.b16 %v7544_v56  ;;  %v6283_v61 = vunpack.c.l.b16 %v7672_v59  ;;  %v3496_v33 = vmax.f32 %v8909_v34, %v3495_v63 }
 0x1ce   : > { %v2746_v39 = vmax.f32 %v8928_v2, %v2745_v42  ;;  %v6665_v11 = vrot.slane %v6284_v25, 2  ;;  %v6443_v15 = vrot.slane %v6157_v32, 1  ;;  %v2731_v13 = vrot.slane %v2730_v50, 1 }
 0x1cf   : > { %v3513_v38 = vrot.slane %v8932_v55, 4  ;;  %v6667_v7 = vrot.slane %v6285_v54, 1  ;;  %v6439_v9 = vrot.slane %v6155_v49, 3  ;;  %v6663_v4 = vrot.slane %v6283_v61, 3 }
 0x1d0   : > { %v3497_v48 = vrot.slane %v3496_v33, 2  ;;  %v9233_v62 = vunpack.c.l.b16 %v7549_v19  ;;  %v5008_v24 = vsel %vm4496_vm3, %v4240_v37, %v4752_v60  ;;  %v2732_v5 = vmax.f32 %v2730_v50, %v2731_v13  ;;  %v9247_v37 = vld [vmem:[%s10624_s2] ss:$0 sm:$0xff]  ;;  %v9252_v19 = vpop.f32.mrb[54].mxu0 }
 0x1d1   : > { %v2747_v56 = vrot.slane %v2746_v39, 2  ;;  %v6440_v34 = vsel %vm6395_vm5, %v6439_v9, %v9200_v6  ;;  %v6664_v2 = vsel %vm6395_vm5, %v6663_v4, %v6662_v58  ;;  %v3514_v32 = vmax.f32 %v8932_v55, %v3513_v38 }
 0x1d2   : > { %v3498_v25 = vmax.f32 %v3496_v33, %v3497_v48  ;;  %v10700_v63 = vrot.slane %v9170_v23, 2  ;;  %v6666_v54 = vsel %vm6398_vm6, %v6665_v11, %v6664_v2  ;;  %v4110_v13 = vadd.f32 %v9247_v37, %v2732_v5 }
 0x1d3   : > { %v2748_v6 = vmax.f32 %v2746_v39, %v2747_v56  ;;  %v6668_v55 = vsel %vm6401_vm8, %v6667_v7, %v6666_v54  ;;  %v7677_v59 = vpack.c.bf16 %v5008_v24, %v5008_v24  ;;  %v3515_v11 = vrot.slane %v3514_v32, 2 }
 0x1d4   : > { %v6442_v42 = vsel %vm6398_vm6, %v10700_v63, %v6440_v34  ;;  %v3499_v23 = vrot.slane %v3498_v25, 1  ;;  %v6856_v50 = vpack.c.b16 %v6668_v55, %v6668_v55  ;;  %vm4366_vm2 = vcmp.ge.f32.partialorder %v4110_v13, 0.0 }
 0x1d5   : > { %v6444_v58 = vsel %vm6401_vm8, %v6443_v15, %v6442_v42  ;;  %v4622_v49 = vmul.f32 0.01, %v4110_v13  ;;  %v2749_v33 = vrot.slane %v2748_v6, 1  ;;  %v2733_v38 = vrot.slane %v8948_v41, 4 }
 0x1d6   : > { %v6840_v60 = vpack.c.b16 %v6444_v58, %v6444_v58  ;;  %v3500_v61 = vmax.f32 %v3498_v25, %v3499_v23  ;;  %6920 = vst [vmem:[%s8849_s29 + $0x4c] sm:$0xf] %v6856_v50  ;;  %v3501_v15 = vrot.slane %v8955_v31, 4  ;;  %v2763_v7 = vrot.slane %v8969_v45, 4  ;;  %v9269_v58 = vpop.f32.mrb[54].mxu1  ;;  %v9271_v23 = vpop.f32.mrb[55].mxu0 }
 0x1d7   : > { %v4878_v39 = vsel %vm4366_vm2, %v4110_v13, %v4622_v49  ;;  %v3531_v9 = vrot.slane %v8971_v26, 4  ;;  %v9260_v4 = vunpack.c.l.b16 %v7677_v59  ;;  %v2750_v24 = vmax.f32 %v2748_v6, %v2749_v33  ;;  %10701 = vst [vmem:[#allocation7_spill] sm:$0xff] %v9271_v23 }
 0x1d8   : > { %6904 = vst [vmem:[%s8849_s29 + $0xc] sm:$0xf] %v6840_v60  ;;  %v4238_v48 = vadd.f32 %v9247_v37, %v3500_v61  ;;  %v3516_v5 = vmax.f32 %v3514_v32, %v3515_v11  ;;  %v2734_v56 = vmax.f32 %v8948_v41, %v2733_v38  ;;  %v3502_v34 = vmax.f32 %v8955_v31, %v3501_v15 }
 0x1d9   : > { %v2764_v2 = vmax.f32 %v8969_v45, %v2763_v7  ;;  %v3532_v25 = vmax.f32 %v8971_v26, %v3531_v9  ;;  %v7547_v42 = vpack.c.bf16 %v4878_v39, %v4878_v39  ;;  %v4113_v13 = vadd.f32 %v9247_v37, %v2750_v24  ;;  %v9278_v9 = vpop.f32.mrb[55].mxu1 }
 0x1da   : > { %v4750_v54 = vmul.f32 0.01, %v4238_v48  ;;  %v3517_v55 = vrot.slane %v3516_v5, 1  ;;  %v2735_v59 = vrot.slane %v2734_v56, 2  ;;  %v3503_v6 = vrot.slane %v3502_v34, 2 }
 0x1db   : > { %v2765_v32 = vrot.slane %v2764_v2, 2  ;;  %vm4494_vm4 = vcmp.ge.f32.partialorder %v4238_v48, 0.0  ;;  %vm4369_vm7 = vcmp.ge.f32.partialorder %v4113_v13, 0.0  ;;  %v4625_v41 = vmul.f32 0.01, %v4113_v13 }
 0x1dc   : > { %v3533_v31 = vrot.slane %v3532_v25, 2  ;;  %v3518_v26 = vmax.f32 %v3516_v5, %v3517_v55  ;;  %v2736_v60 = vmax.f32 %v2734_v56, %v2735_v59  ;;  %v3504_v50 = vmax.f32 %v3502_v34, %v3503_v6 }
 0x1dd   : > { %v4881_v49 = vsel %vm4369_vm7, %v4113_v13, %v4625_v41  ;;  %v2766_v61 = vmax.f32 %v2764_v2, %v2765_v32  ;;  %v2751_v11 = vrot.slane %v8973_v8, 4  ;;  %v9275_v38 = vunpack.c.l.b16 %v7547_v42 }
 0x1de   : > { %v3534_v33 = vmax.f32 %v3532_v25, %v3533_v31  ;;  %v5006_v39 = vsel %vm4494_vm4, %v4238_v48, %v4750_v54  ;;  %v4241_v15 = vadd.f32 %v9247_v37, %v3518_v26  ;;  %v2737_v7 = vrot.slane %v2736_v60, 1 }
 0x1df   : > { %v3505_v24 = vrot.slane %v3504_v50, 1  ;;  %v2767_v63 = vrot.slane %v2766_v61, 1  ;;  %v2752_v5 = vmax.f32 %v8973_v8, %v2751_v11  ;;  %v7550_v56 = vpack.c.bf16 %v4881_v49, %v4881_v49  ;;  %v9287_v49 = vpop.f32.mrb[56].mxu0 }
 0x1e0   : > { %v3535_v23 = vrot.slane %v3534_v33, 1  ;;  %vm4497_vm10 = vcmp.ge.f32.partialorder %v4241_v15, 0.0  ;;  %v4753_v34 = vmul.f32 0.01, %v4241_v15  ;;  %v2738_v2 = vmax.f32 %v2736_v60, %v2737_v7 }
 0x1e1   : > { %v3506_v25 = vmax.f32 %v3504_v50, %v3505_v24  ;;  %v2768_v13 = vmax.f32 %v2766_v61, %v2767_v63  ;;  %v2753_v42 = vrot.slane %v2752_v5, 2  ;;  %v7675_v59 = vpack.c.bf16 %v5006_v39, %v5006_v39  ;;  %v9289_v61 = vpop.f32.mrb[56].mxu1 }
 0x1e2   : > { %v3536_v55 = vmax.f32 %v3534_v33, %v3535_v23  ;;  %v5009_v48 = vsel %vm4497_vm10, %v4241_v15, %v4753_v34  ;;  %v4111_v54 = vadd.f32 %v9247_v37, %v2738_v2  ;;  %v3519_v6 = vrot.slane %v8976_v22, 4  ;;  %v9291_v15 = vpop.f32.mrb[57].mxu0 }
 0x1e3   : > { %v7678_v32 = vpack.c.bf16 %v5009_v48, %v5009_v48  ;;  %v4239_v41 = vadd.f32 %v9247_v37, %v3506_v25  ;;  %v4116_v31 = vadd.f32 %v9247_v37, %v2768_v13  ;;  %v2754_v60 = vmax.f32 %v2752_v5, %v2753_v42  ;;  %10702 = vst [vmem:[#allocation8_spill] sm:$0xff] %v9291_v15  ;;  %v9297_v15 = vpop.f32.mrb[57].mxu1 }
 0x1e4   : > { %v4244_v8 = vadd.f32 %v9247_v37, %v3536_v55  ;;  %vm4367_vm13 = vcmp.ge.f32.partialorder %v4111_v54, 0.0  ;;  %v4623_v26 = vmul.f32 0.01, %v4111_v54  ;;  %v3520_v63 = vmax.f32 %v8976_v22, %v3519_v6 }
 0x1e5   : > { %v6161_v23 = vunpack.c.l.b16 %v7550_v56  ;;  %vm4495_vm15 = vcmp.ge.f32.partialorder %v4239_v41, 0.0  ;;  %v4751_v50 = vmul.f32 0.01, %v4239_v41  ;;  %vm4372_vm0 = vcmp.ge.f32.partialorder %v4116_v31, 0.0 }
 0x1e6   : > { %v4879_v33 = vsel %vm4367_vm13, %v4111_v54, %v4623_v26  ;;  %v4628_v11 = vmul.f32 0.01, %v4116_v31  ;;  %vm4500_vm1 = vcmp.ge.f32.partialorder %v4244_v8, 0.0  ;;  %v4756_v39 = vmul.f32 0.01, %v4244_v8 }
 0x1e7   : > { %v6289_v7 = vunpack.c.l.b16 %v7678_v32  ;;  %v7548_v24 = vpack.c.bf16 %v4879_v33, %v4879_v33  ;;  %v5007_v34 = vsel %vm4495_vm15, %v4239_v41, %v4751_v50  ;;  %v2755_v5 = vrot.slane %v2754_v60, 1 }
 0x1e8   : > { %v6286_v2 = vunpack.c.l.b16 %v7675_v59  ;;  %v7676_v22 = vpack.c.bf16 %v5007_v34, %v5007_v34  ;;  %v4884_v56 = vsel %vm4372_vm0, %v4116_v31, %v4628_v11  ;;  %v3521_v25 = vrot.slane %v3520_v63, 2 }
 0x1e9   : > { %v6159_v13 = vunpack.c.l.b16 %v7548_v24  ;;  %v7553_v55 = vpack.c.bf16 %v4884_v56, %v4884_v56  ;;  %v9293_v42 = vsel %vm4500_vm1, %v4244_v8, %v4756_v39  ;;  %v2756_v48 = vmax.f32 %v2754_v60, %v2755_v5 }
 0x1ea   : > { %v6287_v6 = vunpack.c.l.b16 %v7676_v22  ;;  %v3522_v54 = vmax.f32 %v3520_v63, %v3521_v25  ;;  %v2769_v26 = vrot.slane %v8991_v46, 4  ;;  %v3537_v45 = vrot.slane %v9013_v3, 4 }
 0x1eb   : > { %v6449_v32 = vrot.slane %v6161_v23, 5  ;;  %v6673_v41 = vrot.slane %v6289_v7, 5  ;;  %v6445_v50 = vrot.slane %v6159_v13, 7  ;;  %v4114_v59 = vadd.f32 %v9247_v37, %v2756_v48 }
 0x1ec   : > { %v6669_v31 = vrot.slane %v6287_v6, 7  ;;  %v3523_v33 = vrot.slane %v3522_v54, 1  ;;  %v2770_v11 = vmax.f32 %v8991_v46, %v2769_v26  ;;  %v3538_v8 = vmax.f32 %v9013_v3, %v3537_v45 }
 0x1ed   : > { %v6446_v60 = vsel %vm6383_vm9, %v6445_v50, %v9275_v38  ;;  %v9304_v63 = vunpack.c.l.b16 %v7553_v55  ;;  %v7681_v39 = vpack.c.bf16 %v9293_v42, %v9293_v42  ;;  %vm4370_vm3 = vcmp.ge.f32.partialorder %v4114_v59, 0.0 }
 0x1ee   : > { %v10703_v23 = vrot.slane %v9233_v62, 6  ;;  %v6670_v24 = vsel %vm6383_vm9, %v6669_v31, %v6286_v2  ;;  %v4626_v34 = vmul.f32 0.01, %v4114_v59  ;;  %v3524_v5 = vmax.f32 %v3522_v54, %v3523_v33  ;;  %v9325_v33 = vpop.f32.mrb[58].mxu1 }
 0x1ef   : > { %v10704_v46 = vrot.slane %v9260_v4, 6  ;;  %v2771_v38 = vrot.slane %v2770_v11, 2  ;;  %v3539_v22 = vrot.slane %v3538_v8, 2  ;;  %v2757_v62 = vrot.slane %v9019_v0, 4 }
 0x1f0   : > { %v6448_v7 = vsel %vm6386_vm11, %v10703_v23, %v6446_v60  ;;  %v4882_v56 = vsel %vm4370_vm3, %v4114_v59, %v4626_v34  ;;  %v4242_v25 = vadd.f32 %v9247_v37, %v3524_v5  ;;  %v3525_v6 = vrot.slane %v9022_v52, 4 }
 0x1f1   : > { %v6672_v3 = vsel %vm6386_vm11, %v10704_v46, %v6670_v24  ;;  %v6450_v45 = vsel %vm6389_vm12, %v6449_v32, %v6448_v7  ;;  %v7551_v55 = vpack.c.bf16 %v4882_v56, %v4882_v56  ;;  %v2772_v48 = vmax.f32 %v2770_v11, %v2771_v38  ;;  %v9322_v32 = vpop.f32.mrb[58].mxu0 }
 0x1f2   : > { %v6674_v13 = vsel %vm6389_vm12, %v6673_v41, %v6672_v3  ;;  %v3540_v2 = vmax.f32 %v3538_v8, %v3539_v22  ;;  %vm4498_vm2 = vcmp.ge.f32.partialorder %v4242_v25, 0.0  ;;  %v4754_v4 = vmul.f32 0.01, %v4242_v25 }
 0x1f3   : > { %v2758_v54 = vmax.f32 %v9019_v0, %v2757_v62  ;;  %v2787_v26 = vrot.slane %v9031_v44, 4  ;;  %v6162_v50 = vunpack.c.l.b16 %v7551_v55  ;;  %v2773_v59 = vrot.slane %v2772_v48, 1 }
 0x1f4   : > { %v3541_v31 = vrot.slane %v3540_v2, 1  ;;  %v3526_v41 = vmax.f32 %v9022_v52, %v3525_v6  ;;  %v5010_v60 = vsel %vm4498_vm2, %v4242_v25, %v4754_v4  ;;  %v3555_v23 = vrot.slane %v9033_v27, 4 }
 0x1f5   : > { %v2759_v11 = vrot.slane %v2758_v54, 2  ;;  %v2788_v8 = vmax.f32 %v9031_v44, %v2787_v26  ;;  %v6451_v7 = vrot.slane %v6162_v50, 4  ;;  %v7679_v24 = vpack.c.bf16 %v5010_v60, %v5010_v60  ;;  %v9337_v50 = vpop.f32.mrb[59].mxu1 }
 0x1f6   : > { %v2774_v0 = vmax.f32 %v2772_v48, %v2773_v59  ;;  %v3542_v34 = vmax.f32 %v3540_v2, %v3541_v31  ;;  %v3527_v46 = vrot.slane %v3526_v41, 2  ;;  %v3556_v38 = vmax.f32 %v9033_v27, %v3555_v23  ;;  %v9335_v2 = vpop.f32.mrb[59].mxu0 }
 0x1f7   : > { %v2760_v5 = vmax.f32 %v2758_v54, %v2759_v11  ;;  %v2789_v3 = vrot.slane %v2788_v8, 2  ;;  %v9331_v22 = vsel %vm6392_vm14, %v6451_v7, %v6450_v45  ;;  %v6290_v52 = vunpack.c.l.b16 %v7679_v24 }
 0x1f8   : > { %v4117_v56 = vadd.f32 %v9247_v37, %v2774_v0  ;;  %v4245_v25 = vadd.f32 %v9247_v37, %v3542_v34  ;;  %v3528_v62 = vmax.f32 %v3526_v41, %v3527_v46  ;;  %v3557_v6 = vrot.slane %v3556_v38, 2  ;;  %v10705_v41 = vld [vmem:[#allocation11_spill] sm:$0xff] }
 0x1f9   : > { %v2761_v44 = vrot.slane %v2760_v5, 1  ;;  %v2790_v55 = vmax.f32 %v2788_v8, %v2789_v3  ;;  %v6675_v4 = vrot.slane %v6290_v52, 4  ;;  %v2775_v11 = vrot.slane %v10705_v41, 4 }
 0x1fa   : > { %vm4373_vm4 = vcmp.ge.f32.partialorder %v4117_v56, 0.0  ;;  %v4629_v48 = vmul.f32 0.01, %v4117_v56  ;;  %vm4501_vm7 = vcmp.ge.f32.partialorder %v4245_v25, 0.0  ;;  %v4757_v54 = vmul.f32 0.01, %v4245_v25 }
 0x1fb   : > { %v2762_v27 = vmax.f32 %v2760_v5, %v2761_v44  ;;  %v3529_v26 = vrot.slane %v3528_v62, 1  ;;  %v2791_v45 = vrot.slane %v2790_v55, 1  ;;  %v9340_v59 = vsel %vm6392_vm14, %v6675_v4, %v6674_v13  ;;  %v9351_v4 = vpop.f32.mrb[60].mxu0 }
 0x1fc   : > { %v4885_v31 = vsel %vm4373_vm4, %v4117_v56, %v4629_v48  ;;  %v3558_v60 = vmax.f32 %v3556_v38, %v3557_v6  ;;  %v5013_v23 = vsel %vm4501_vm7, %v4245_v25, %v4757_v54  ;;  %v2776_v5 = vmax.f32 %v10705_v41, %v2775_v11  ;;  %v9353_v48 = vpop.f32.mrb[60].mxu1 }
 0x1fd   : > { %v7554_v8 = vpack.c.bf16 %v4885_v31, %v4885_v31  ;;  %v4115_v7 = vadd.f32 %v9247_v37, %v2762_v27  ;;  %v3530_v24 = vmax.f32 %v3528_v62, %v3529_v26  ;;  %v7682_v0 = vpack.c.bf16 %v5013_v23, %v5013_v23  ;;  %v9355_v27 = vpop.f32.mrb[61].mxu0 }
 0x1fe   : > { %v2792_v34 = vmax.f32 %v2790_v55, %v2791_v45  ;;  %v3559_v46 = vrot.slane %v3558_v60, 1  ;;  %v6292_v3 = vunpack.c.l.b16 %v7681_v39  ;;  %v6455_v52 = vrot.slane %v9304_v63, 2 }
 0x1ff   : > { %vm4371_vm10 = vcmp.ge.f32.partialorder %v4115_v7, 0.0  ;;  %v4627_v13 = vmul.f32 0.01, %v4115_v7  ;;  %v4243_v38 = vadd.f32 %v9247_v37, %v3530_v24  ;;  %v2777_v44 = vrot.slane %v2776_v5, 2 }
 0x200   : > { %v4120_v56 = vadd.f32 %v9247_v37, %v2792_v34  ;;  %v3560_v25 = vmax.f32 %v3558_v60, %v3559_v46  ;;  %v6165_v62 = vunpack.c.l.b16 %v7554_v8  ;;  %v6293_v42 = vunpack.c.l.b16 %v7682_v0 }
 0x201   : > { %v4883_v6 = vsel %vm4371_vm10, %v4115_v7, %v4627_v13  ;;  %vm4499_vm13 = vcmp.ge.f32.partialorder %v4243_v38, 0.0  ;;  %v4755_v55 = vmul.f32 0.01, %v4243_v38  ;;  %v2778_v45 = vmax.f32 %v2776_v5, %v2777_v44 }
 0x202   : > { %v7552_v39 = vpack.c.bf16 %v4883_v6, %v4883_v6  ;;  %vm4376_vm15 = vcmp.ge.f32.partialorder %v4120_v56, 0.0  ;;  %v4632_v54 = vmul.f32 0.01, %v4120_v56  ;;  %v4248_v63 = vadd.f32 %v9247_v37, %v3560_v25  ;;  %v9364_v6 = vpop.f32.mrb[61].mxu1 }
 0x203   : > { %v5011_v26 = vsel %vm4499_vm13, %v4243_v38, %v4755_v55  ;;  %v3543_v31 = vrot.slane %v9038_v35, 4  ;;  %v2793_v8 = vrot.slane %v9063_v57, 4  ;;  %v2779_v24 = vrot.slane %v2778_v45, 1 }
 0x204   : > { %v6163_v60 = vunpack.c.l.b16 %v7552_v39  ;;  %v7680_v41 = vpack.c.bf16 %v5011_v26, %v5011_v26  ;;  %v4888_v11 = vsel %vm4376_vm15, %v4120_v56, %v4632_v54  ;;  %vm4504_vm0 = vcmp.ge.f32.partialorder %v4248_v63, 0.0 }
 0x205   : > { %v7557_v23 = vpack.c.bf16 %v4888_v11, %v4888_v11  ;;  %v4760_v7 = vmul.f32 0.01, %v4248_v63  ;;  %v3544_v46 = vmax.f32 %v9038_v35, %v3543_v31  ;;  %v2794_v13 = vmax.f32 %v9063_v57, %v2793_v8 }
 0x206   : > { %v6453_v0 = vrot.slane %v6163_v60, 3  ;;  %v6291_v34 = vunpack.c.l.b16 %v7680_v41  ;;  %v6679_v38 = vrot.slane %v6292_v3, 2  ;;  %v6457_v25 = vrot.slane %v6165_v62, 1 }
 0x207   : > { %v9362_v5 = vunpack.c.l.b16 %v7557_v23  ;;  %v2780_v44 = vmax.f32 %v2778_v45, %v2779_v24  ;;  %v5016_v39 = vsel %vm4504_vm0, %v4248_v63, %v4760_v7  ;;  %v3545_v54 = vrot.slane %v3544_v46, 2 }
 0x208   : > { %v6454_v56 = vsel %vm6395_vm5, %v6453_v0, %v9331_v22  ;;  %v6677_v55 = vrot.slane %v6291_v34, 3  ;;  %v2795_v31 = vrot.slane %v2794_v13, 2  ;;  %v3561_v57 = vrot.slane %v9067_v1, 4 }
 0x209   : > { %v6456_v26 = vsel %vm6398_vm6, %v6455_v52, %v6454_v56  ;;  %v4118_v35 = vadd.f32 %v9247_v37, %v2780_v44  ;;  %v6681_v3 = vrot.slane %v6293_v42, 1  ;;  %v3546_v60 = vmax.f32 %v3544_v46, %v3545_v54 }
 0x20a   : > { %v6458_v62 = vsel %vm6401_vm8, %v6457_v25, %v6456_v26  ;;  %v6678_v45 = vsel %vm6395_vm5, %v6677_v55, %v9340_v59  ;;  %v7685_v11 = vpack.c.bf16 %v5016_v39, %v5016_v39  ;;  %v2796_v23 = vmax.f32 %v2794_v13, %v2795_v31  ;;  %v9381_v25 = vpop.f32.mrb[62].mxu0 }
 0x20b   : > { %v6841_v41 = vpack.c.b16 %v6458_v62, %v6458_v62  ;;  %v6680_v22 = vsel %vm6398_vm6, %v6679_v38, %v6678_v45  ;;  %vm4374_vm1 = vcmp.ge.f32.partialorder %v4118_v35, 0.0  ;;  %v4630_v63 = vmul.f32 0.01, %v4118_v35 }
 0x20c   : > { %v6682_v52 = vsel %vm6401_vm8, %v6681_v3, %v6680_v22  ;;  %v3547_v8 = vrot.slane %v3546_v60, 1  ;;  %v3562_v24 = vmax.f32 %v9067_v1, %v3561_v57  ;;  %v2781_v59 = vrot.slane %v9077_v12, 4 }
 0x20d   : > { %6905 = vst [vmem:[%s8849_s29 + $0x10] sm:$0xf] %v6841_v41  ;;  %v6857_v7 = vpack.c.b16 %v6682_v52, %v6682_v52  ;;  %v4886_v0 = vsel %vm4374_vm1, %v4118_v35, %v4630_v63  ;;  %v2797_v46 = vrot.slane %v2796_v23, 1  ;;  %v3549_v38 = vrot.slane %v9084_v28, 4  ;;  %v9391_v35 = vpop.f32.mrb[62].mxu1 }
 0x20e   : > { %v3548_v34 = vmax.f32 %v3546_v60, %v3547_v8  ;;  %v3563_v44 = vrot.slane %v3562_v24, 2  ;;  %v2782_v56 = vmax.f32 %v9077_v12, %v2781_v59  ;;  %v2811_v13 = vrot.slane %v9092_v51, 4 }
 0x20f   : > { %6921 = vst [vmem:[%s8849_s29 + $0x50] sm:$0xf] %v6857_v7  ;;  %v3579_v55 = vrot.slane %v9094_v53, 4  ;;  %v9387_v39 = vunpack.c.l.b16 %v7685_v11  ;;  %v2798_v54 = vmax.f32 %v2796_v23, %v2797_v46  ;;  %v3550_v26 = vmax.f32 %v9084_v28, %v3549_v38  ;;  %v9398_v46 = vpop.f32.mrb[63].mxu0 }
 0x210   : > { %v4246_v1 = vadd.f32 %v9247_v37, %v3548_v34  ;;  %v3564_v31 = vmax.f32 %v3562_v24, %v3563_v44  ;;  %v2783_v57 = vrot.slane %v2782_v56, 2  ;;  %v2812_v3 = vmax.f32 %v9092_v51, %v2811_v13 }
 0x211   : > { %v3580_v62 = vmax.f32 %v9094_v53, %v3579_v55  ;;  %v7555_v12 = vpack.c.bf16 %v4886_v0, %v4886_v0  ;;  %v4121_v60 = vadd.f32 %v9247_v37, %v2798_v54  ;;  %v3551_v41 = vrot.slane %v3550_v26, 2  ;;  %v9401_v55 = vpop.f32.mrb[63].mxu1 }
 0x212   : > { %v4758_v45 = vmul.f32 0.01, %v4246_v1  ;;  %v3565_v22 = vrot.slane %v3564_v31, 1  ;;  %v2784_v63 = vmax.f32 %v2782_v56, %v2783_v57  ;;  %v2813_v52 = vrot.slane %v2812_v3, 2 }
 0x213   : > { %v3581_v11 = vrot.slane %v3580_v62, 2  ;;  %vm4502_vm3 = vcmp.ge.f32.partialorder %v4246_v1, 0.0  ;;  %vm4377_vm2 = vcmp.ge.f32.partialorder %v4121_v60, 0.0  ;;  %v4633_v28 = vmul.f32 0.01, %v4121_v60 }
 0x214   : > { %v3552_v8 = vmax.f32 %v3550_v26, %v3551_v41  ;;  %v3566_v7 = vmax.f32 %v3564_v31, %v3565_v22  ;;  %v2785_v24 = vrot.slane %v2784_v63, 1  ;;  %v2814_v51 = vmax.f32 %v2812_v3, %v2813_v52 }
 0x215   : > { %v4889_v59 = vsel %vm4377_vm2, %v4121_v60, %v4633_v28  ;;  %v3582_v0 = vmax.f32 %v3580_v62, %v3581_v11  ;;  %v2799_v34 = vrot.slane %v9096_v21, 4  ;;  %v6166_v38 = vunpack.c.l.b16 %v7555_v12 }
 0x216   : > { %v3553_v53 = vrot.slane %v3552_v8, 1  ;;  %v5014_v44 = vsel %vm4502_vm3, %v4246_v1, %v4758_v45  ;;  %v4249_v56 = vadd.f32 %v9247_v37, %v3566_v7  ;;  %v2786_v13 = vmax.f32 %v2784_v63, %v2785_v24 }
 0x217   : > { %v2815_v26 = vrot.slane %v2814_v51, 1  ;;  %v3583_v57 = vrot.slane %v3582_v0, 1  ;;  %v2800_v31 = vmax.f32 %v9096_v21, %v2799_v34  ;;  %v7558_v3 = vpack.c.bf16 %v4889_v59, %v4889_v59 }
 0x218   : > { %v3554_v54 = vmax.f32 %v3552_v8, %v3553_v53  ;;  %vm4505_vm4 = vcmp.ge.f32.partialorder %v4249_v56, 0.0  ;;  %v4761_v60 = vmul.f32 0.01, %v4249_v56  ;;  %v4119_v62 = vadd.f32 %v9247_v37, %v2786_v13  ;;  %v9409_v53 = vpop.f32.mrb[64].mxu0 }
 0x219   : > { %v2816_v22 = vmax.f32 %v2814_v51, %v2815_v26  ;;  %v3584_v12 = vmax.f32 %v3582_v0, %v3583_v57  ;;  %v2801_v1 = vrot.slane %v2800_v31, 2  ;;  %v7683_v45 = vpack.c.bf16 %v5014_v44, %v5014_v44  ;;  %v9411_v51 = vpop.f32.mrb[64].mxu1 }
 0x21a   : > { %v4247_v41 = vadd.f32 %v9247_v37, %v3554_v54  ;;  %v5017_v52 = vsel %vm4505_vm4, %v4249_v56, %v4761_v60  ;;  %vm4375_vm7 = vcmp.ge.f32.partialorder %v4119_v62, 0.0  ;;  %v4631_v63 = vmul.f32 0.01, %v4119_v62  ;;  %v9413_v56 = vpop.f32.mrb[65].mxu0 }
 0x21b   : > { %v7686_v11 = vpack.c.bf16 %v5017_v52, %v5017_v52  ;;  %v4124_v8 = vadd.f32 %v9247_v37, %v2816_v22  ;;  %v4252_v7 = vadd.f32 %v9247_v37, %v3584_v12  ;;  %v2802_v24 = vmax.f32 %v2800_v31, %v2801_v1 }
 0x21c   : > { %vm4503_vm10 = vcmp.ge.f32.partialorder %v4247_v41, 0.0  ;;  %v4759_v28 = vmul.f32 0.01, %v4247_v41  ;;  %v4887_v21 = vsel %vm4375_vm7, %v4119_v62, %v4631_v63  ;;  %v3567_v59 = vrot.slane %v9102_v36, 4 }
 0x21d   : > { %v6169_v0 = vunpack.c.l.b16 %v7558_v3  ;;  %v7556_v34 = vpack.c.bf16 %v4887_v21, %v4887_v21  ;;  %vm4380_vm13 = vcmp.ge.f32.partialorder %v4124_v8, 0.0  ;;  %v6297_v13 = vunpack.c.l.b16 %v7686_v11 }
 0x21e   : > { %v5015_v44 = vsel %vm4503_vm10, %v4247_v41, %v4759_v28  ;;  %v4636_v26 = vmul.f32 0.01, %v4124_v8  ;;  %v4764_v57 = vmul.f32 0.01, %v4252_v7  ;;  %vm4508_vm15 = vcmp.ge.f32.partialorder %v4252_v7, 0.0 }
 0x21f   : > { %v7684_v54 = vpack.c.bf16 %v5015_v44, %v5015_v44  ;;  %v6167_v60 = vunpack.c.l.b16 %v7556_v34  ;;  %v2803_v62 = vrot.slane %v2802_v24, 1  ;;  %v3568_v31 = vmax.f32 %v9102_v36, %v3567_v59 }
 0x220   : > { %v6294_v22 = vunpack.c.l.b16 %v7683_v45  ;;  %v4892_v1 = vsel %vm4380_vm13, %v4124_v8, %v4636_v26  ;;  %v2817_v52 = vrot.slane %v9123_v30, 4  ;;  %v6463_v3 = vrot.slane %v6169_v0, 5  ;;  %v9423_v8 = vpop.f32.mrb[65].mxu1 }
 0x221   : > { %v6295_v12 = vunpack.c.l.b16 %v7684_v54  ;;  %v6459_v63 = vrot.slane %v6167_v60, 7  ;;  %v7561_v41 = vpack.c.bf16 %v4892_v1, %v4892_v1  ;;  %v2804_v28 = vmax.f32 %v2802_v24, %v2803_v62 }
 0x222   : > { %v9417_v23 = vsel %vm4508_vm15, %v4252_v7, %v4764_v57  ;;  %v3569_v11 = vrot.slane %v3568_v31, 2  ;;  %v2818_v44 = vmax.f32 %v9123_v30, %v2817_v52  ;;  %v6687_v34 = vrot.slane %v6297_v13, 5 }
 0x223   : > { %v6683_v21 = vrot.slane %v6295_v12, 7  ;;  %v6460_v42 = vsel %vm6383_vm9, %v6459_v63, %v6166_v38  ;;  %v4122_v36 = vadd.f32 %v9247_v37, %v2804_v28  ;;  %v3585_v45 = vrot.slane %v9132_v29, 4 }
 0x224   : > { %v10706_v59 = vrot.slane %v9362_v5, 6  ;;  %v3570_v7 = vmax.f32 %v3568_v31, %v3569_v11  ;;  %v2819_v54 = vrot.slane %v2818_v44, 2  ;;  %v10707_v26 = vrot.slane %v9387_v39, 6  ;;  %v10708_v39 = vld [vmem:[#allocation2_spill] sm:$0xff] }
 0x225   : > { %v6684_v24 = vsel %vm6383_vm9, %v6683_v21, %v6294_v22  ;;  %v9432_v13 = vunpack.c.l.b16 %v7561_v41  ;;  %v7689_v38 = vpack.c.bf16 %v9417_v23, %v9417_v23  ;;  %vm4378_vm0 = vcmp.ge.f32.partialorder %v4122_v36, 0.0  ;;  %v10709_v41 = vld [vmem:[#allocation3_spill] sm:$0xff] }
 0x226   : > { %v6462_v0 = vsel %vm6386_vm11, %v10706_v59, %v6460_v42  ;;  %v6686_v30 = vsel %vm6386_vm11, %v10707_v26, %v6684_v24  ;;  %v4634_v57 = vmul.f32 0.01, %v4122_v36  ;;  %v3571_v5 = vrot.slane %v3570_v7, 1  ;;  %v9444_v59 = vpop.f32.mrb[66].mxu0 }
 0x227   : > { %v6464_v60 = vsel %vm6389_vm12, %v6463_v3, %v6462_v0  ;;  %v6688_v42 = vsel %vm6389_vm12, %v6687_v34, %v6686_v30  ;;  %v2820_v62 = vmax.f32 %v2818_v44, %v2819_v54  ;;  %v3586_v31 = vmax.f32 %v9132_v29, %v3585_v45  ;;  %v9450_v45 = vpop.f32.mrb[66].mxu1 }
 0x228   : > { %v2805_v22 = vrot.slane %v9144_v18, 4  ;;  %v3573_v12 = vrot.slane %v10708_v39, 4  ;;  %v4890_v1 = vsel %vm4378_vm0, %v4122_v36, %v4634_v57  ;;  %v3572_v52 = vmax.f32 %v3570_v7, %v3571_v5  ;;  %10710 = vst [vmem:[#allocation9_spill] sm:$0xff] %v9450_v45 }
 0x229   : > { %v2835_v63 = vrot.slane %v9153_v17, 4  ;;  %v3603_v23 = vrot.slane %v10709_v41, 4  ;;  %v7559_v28 = vpack.c.bf16 %v4890_v1, %v4890_v1  ;;  %v2821_v21 = vrot.slane %v2820_v62, 1 }
 0x22a   : > { %v3587_v11 = vrot.slane %v3586_v31, 2  ;;  %v2806_v3 = vmax.f32 %v9144_v18, %v2805_v22  ;;  %v4250_v44 = vadd.f32 %v9247_v37, %v3572_v52  ;;  %v3574_v29 = vmax.f32 %v10708_v39, %v3573_v12 }
 0x22b   : > { %v2836_v34 = vmax.f32 %v9153_v17, %v2835_v63  ;;  %v3604_v36 = vmax.f32 %v10709_v41, %v3603_v23  ;;  %v6170_v0 = vunpack.c.l.b16 %v7559_v28  ;;  %v2822_v24 = vmax.f32 %v2820_v62, %v2821_v21 }
 0x22c   : > { %v3588_v7 = vmax.f32 %v3586_v31, %v3587_v11  ;;  %v2807_v54 = vrot.slane %v2806_v3, 2  ;;  %vm4506_vm1 = vcmp.ge.f32.partialorder %v4250_v44, 0.0  ;;  %v4762_v26 = vmul.f32 0.01, %v4250_v44  ;;  %v9456_v11 = vpop.f32.mrb[67].mxu0 }
 0x22d   : > { %v3575_v30 = vrot.slane %v3574_v29, 2  ;;  %v2837_v18 = vrot.slane %v2836_v34, 2  ;;  %v6465_v57 = vrot.slane %v6170_v0, 4  ;;  %v4125_v5 = vadd.f32 %v9247_v37, %v2822_v24 }
 0x22e   : > { %v3589_v22 = vrot.slane %v3588_v7, 1  ;;  %v2808_v1 = vmax.f32 %v2806_v3, %v2807_v54  ;;  %v5018_v39 = vsel %vm4506_vm1, %v4250_v44, %v4762_v26  ;;  %v3605_v52 = vrot.slane %v3604_v36, 2  ;;  %v10711_v3 = vld [vmem:[#allocation4_spill] sm:$0xff] }
 0x22f   : > { %v3576_v12 = vmax.f32 %v3574_v29, %v3575_v30  ;;  %v2838_v17 = vmax.f32 %v2836_v34, %v2837_v18  ;;  %v9454_v63 = vsel %vm6392_vm14, %v6465_v57, %v6464_v60  ;;  %v7687_v41 = vpack.c.bf16 %v5018_v39, %v5018_v39  ;;  %v9462_v57 = vpop.f32.mrb[67].mxu1 }
 0x230   : > { %vm4381_vm3 = vcmp.ge.f32.partialorder %v4125_v5, 0.0  ;;  %v4637_v62 = vmul.f32 0.01, %v4125_v5  ;;  %v3590_v31 = vmax.f32 %v3588_v7, %v3589_v22  ;;  %v2809_v23 = vrot.slane %v2808_v1, 1 }
 0x231   : > { %v3577_v28 = vrot.slane %v3576_v12, 1  ;;  %v2839_v21 = vrot.slane %v2838_v17, 1  ;;  %v6298_v0 = vunpack.c.l.b16 %v7687_v41  ;;  %v3606_v45 = vmax.f32 %v3604_v36, %v3605_v52 }
 0x232   : > { %v4893_v24 = vsel %vm4381_vm3, %v4125_v5, %v4637_v62  ;;  %v2823_v44 = vrot.slane %v10711_v3, 4  ;;  %v4253_v34 = vadd.f32 %v9247_v37, %v3590_v31  ;;  %v2810_v54 = vmax.f32 %v2808_v1, %v2809_v23 }
 0x233   : > { %v7562_v29 = vpack.c.bf16 %v4893_v24, %v4893_v24  ;;  %v3578_v60 = vmax.f32 %v3576_v12, %v3577_v28  ;;  %v9460_v26 = vunpack.c.l.b16 %v7689_v38  ;;  %v6689_v30 = vrot.slane %v6298_v0, 4 }
 0x234   : > { %v2840_v18 = vmax.f32 %v2838_v17, %v2839_v21  ;;  %v3607_v7 = vrot.slane %v3606_v45, 1  ;;  %vm4509_vm2 = vcmp.ge.f32.partialorder %v4253_v34, 0.0  ;;  %v4765_v22 = vmul.f32 0.01, %v4253_v34 }
 0x235   : > { %v4123_v39 = vadd.f32 %v9247_v37, %v2810_v54  ;;  %v2824_v36 = vmax.f32 %v10711_v3, %v2823_v44  ;;  %v6690_v5 = vsel %vm6392_vm14, %v6689_v30, %v6688_v42  ;;  %v4251_v52 = vadd.f32 %v9247_v37, %v3578_v60  ;;  %v9471_v54 = vpop.f32.mrb[68].mxu0 }
 0x236   : > { %v4128_v1 = vadd.f32 %v9247_v37, %v2840_v18  ;;  %v3608_v12 = vmax.f32 %v3606_v45, %v3607_v7  ;;  %v6173_v38 = vunpack.c.l.b16 %v7562_v29  ;;  %v5021_v41 = vsel %vm4509_vm2, %v4253_v34, %v4765_v22  ;;  %v9473_v45 = vpop.f32.mrb[68].mxu1  ;;  %v9476_v18 = vpop.f32.mrb[69].mxu0 }
 0x237   : > { %vm4379_vm4 = vcmp.ge.f32.partialorder %v4123_v39, 0.0  ;;  %v4635_v17 = vmul.f32 0.01, %v4123_v39  ;;  %v7690_v62 = vpack.c.bf16 %v5021_v41, %v5021_v41  ;;  %vm4507_vm7 = vcmp.ge.f32.partialorder %v4251_v52, 0.0  ;;  %10712 = vst [vmem:[#allocation10_spill] sm:$0xff] %v9476_v18 }
 0x238   : > { %v4763_v31 = vmul.f32 0.01, %v4251_v52  ;;  %vm4384_vm10 = vcmp.ge.f32.partialorder %v4128_v1, 0.0  ;;  %v4640_v28 = vmul.f32 0.01, %v4128_v1  ;;  %v4256_v21 = vadd.f32 %v9247_v37, %v3608_v12 }
 0x239   : > { %v4891_v23 = vsel %vm4379_vm4, %v4123_v39, %v4635_v17  ;;  %v2825_v0 = vrot.slane %v2824_v36, 2  ;;  %v6301_v24 = vunpack.c.l.b16 %v7690_v62  ;;  %v3591_v44 = vrot.slane %v9166_v43, 4 }
 0x23a   : > { %v7560_v42 = vpack.c.bf16 %v4891_v23, %v4891_v23  ;;  %v5019_v3 = vsel %vm4507_vm7, %v4251_v52, %v4763_v31  ;;  %v6469_v29 = vrot.slane %v9432_v13, 2  ;;  %v4896_v60 = vsel %vm4384_vm10, %v4128_v1, %v4640_v28 }
 0x23b   : > { %v7688_v34 = vpack.c.bf16 %v5019_v3, %v5019_v3  ;;  %v4768_v30 = vmul.f32 0.01, %v4256_v21  ;;  %v7565_v22 = vpack.c.bf16 %v4896_v60, %v4896_v60  ;;  %vm4512_vm13 = vcmp.ge.f32.partialorder %v4256_v21, 0.0  ;;  %v9481_v3 = vpop.f32.mrb[69].mxu1 }
 0x23c   : > { %v6171_v7 = vunpack.c.l.b16 %v7560_v42  ;;  %v2826_v39 = vmax.f32 %v2824_v36, %v2825_v0  ;;  %v6693_v12 = vrot.slane %v9460_v26, 2  ;;  %v3592_v41 = vmax.f32 %v9166_v43, %v3591_v44  ;;  %v10713_v43 = vld [vmem:[#allocation5_spill] sm:$0xff] }
 0x23d   : > { %v6299_v52 = vunpack.c.l.b16 %v7688_v34  ;;  %v2841_v17 = vrot.slane %v9190_v20, 4  ;;  %v6471_v62 = vrot.slane %v6173_v38, 1  ;;  %v6695_v31 = vrot.slane %v6301_v24, 1 }
 0x23e   : > { %v6467_v23 = vrot.slane %v6171_v7, 3  ;;  %v2827_v13 = vrot.slane %v2826_v39, 1  ;;  %v5024_v28 = vsel %vm4512_vm13, %v4256_v21, %v4768_v30  ;;  %v3593_v18 = vrot.slane %v3592_v41, 2 }
 0x23f   : > { %v6691_v1 = vrot.slane %v6299_v52, 3  ;;  %v2842_v42 = vmax.f32 %v9190_v20, %v2841_v17  ;;  %v9486_v26 = vunpack.c.l.b16 %v7565_v22  ;;  %v3609_v44 = vrot.slane %v10713_v43, 4  ;;  %v9495_v17 = vpop.f32.mrb[70].mxu0 }
 0x240   : > { %v6468_v36 = vsel %vm6395_vm5, %v6467_v23, %v9454_v63  ;;  %v2828_v0 = vmax.f32 %v2826_v39, %v2827_v13  ;;  %v3594_v34 = vmax.f32 %v3592_v41, %v3593_v18  ;;  %v7693_v20 = vpack.c.bf16 %v5024_v28, %v5024_v28  ;;  %10714 = vst [vmem:[#allocation11_spill] sm:$0xff] %v9495_v17 }
 0x241   : > { %v6470_v38 = vsel %vm6398_vm6, %v6469_v29, %v6468_v36  ;;  %v6692_v24 = vsel %vm6395_vm5, %v6691_v1, %v6690_v5  ;;  %v2843_v60 = vrot.slane %v2842_v42, 2  ;;  %v3610_v18 = vmax.f32 %v10713_v43, %v3609_v44 }
 0x242   : > { %v6472_v21 = vsel %vm6401_vm8, %v6471_v62, %v6470_v38  ;;  %v6694_v30 = vsel %vm6398_vm6, %v6693_v12, %v6692_v24  ;;  %v4126_v63 = vadd.f32 %v9247_v37, %v2828_v0  ;;  %v3595_v39 = vrot.slane %v3594_v34, 1 }
 0x243   : > { %v6842_v7 = vpack.c.b16 %v6472_v21, %v6472_v21  ;;  %v6696_v22 = vsel %vm6401_vm8, %v6695_v31, %v6694_v30  ;;  %v2844_v52 = vmax.f32 %v2842_v42, %v2843_v60  ;;  %v2829_v12 = vrot.slane %v9203_v40, 4 }
 0x244   : > { %v6858_v29 = vpack.c.b16 %v6696_v22, %v6696_v22  ;;  %vm4382_vm15 = vcmp.ge.f32.partialorder %v4126_v63, 0.0  ;;  %v4638_v5 = vmul.f32 0.01, %v4126_v63  ;;  %v3596_v41 = vmax.f32 %v3594_v34, %v3595_v39  ;;  %v9520_v39 = vpop.f32.mrb[71].mxu0 }
 0x245   : > { %6906 = vst [vmem:[%s8849_s29 + $0x14] sm:$0xf] %v6842_v7  ;;  %v2845_v62 = vrot.slane %v2844_v52, 1  ;;  %v3597_v23 = vrot.slane %v9208_v47, 4  ;;  %v3611_v1 = vrot.slane %v3610_v18, 2  ;;  %v2859_v31 = vrot.slane %v9222_v14, 4 }
 0x246   : > { %6922 = vst [vmem:[%s8849_s29 + $0x54] sm:$0xf] %v6858_v29  ;;  %v4894_v13 = vsel %vm4382_vm15, %v4126_v63, %v4638_v5  ;;  %v3627_v28 = vrot.slane %v9224_v10, 4  ;;  %v9504_v42 = vunpack.c.l.b16 %v7693_v20  ;;  %v4254_v36 = vadd.f32 %v9247_v37, %v3596_v41  ;;  %v9515_v20 = vld [vmem:[%s10624_s2] ss:$0 sm:$0xff]  ;;  %v9518_v63 = vpop.f32.mrb[70].mxu1 }
 0x247   : > { %v2846_v0 = vmax.f32 %v2844_v52, %v2845_v62  ;;  %v2830_v43 = vmax.f32 %v9203_v40, %v2829_v12  ;;  %v3612_v44 = vmax.f32 %v3610_v18, %v3611_v1  ;;  %v3598_v38 = vmax.f32 %v9208_v47, %v3597_v23  ;;  %10715 = vst [vmem:[#allocation2_spill] sm:$0xff] %v9518_v63  ;;  %v10717_v23 = vld [vmem:[#allocation6_spill] sm:$0xff]  ;;  %v9527_v60 = vpop.f32.mrb[71].mxu1 }
 0x248   : > { %v2860_v24 = vmax.f32 %v9222_v14, %v2859_v31  ;;  %v3628_v34 = vmax.f32 %v9224_v10, %v3627_v28  ;;  %v7563_v21 = vpack.c.bf16 %v4894_v13, %v4894_v13  ;;  %v4766_v30 = vmul.f32 0.01, %v4254_v36  ;;  %10716 = vst [vmem:[#allocation3_spill] sm:$0xff] %v9520_v39 }
 0x249   : > { %v4129_v37 = vadd.f32 %v9515_v20, %v2846_v0  ;;  %v3613_v40 = vrot.slane %v3612_v44, 1  ;;  %v2831_v7 = vrot.slane %v2830_v43, 2  ;;  %v3599_v47 = vrot.slane %v3598_v38, 2 }
 0x24a   : > { %v2861_v22 = vrot.slane %v2860_v24, 2  ;;  %vm4510_vm0 = vcmp.ge.f32.partialorder %v4254_v36, 0.0  ;;  %v3629_v10 = vrot.slane %v3628_v34, 2  ;;  %v2847_v13 = vrot.slane %v10717_v23, 4 }
 0x24b   : > { %vm4385_vm1 = vcmp.ge.f32.partialorder %v4129_v37, 0.0  ;;  %v4641_v14 = vmul.f32 0.01, %v4129_v37  ;;  %v3614_v29 = vmax.f32 %v3612_v44, %v3613_v40  ;;  %v2832_v5 = vmax.f32 %v2830_v43, %v2831_v7 }
 0x24c   : > { %v3600_v18 = vmax.f32 %v3598_v38, %v3599_v47  ;;  %v2862_v62 = vmax.f32 %v2860_v24, %v2861_v22  ;;  %v3630_v12 = vmax.f32 %v3628_v34, %v3629_v10  ;;  %v9524_v1 = vunpack.c.l.b16 %v7563_v21 }
 0x24d   : > { %v4897_v41 = vsel %vm4385_vm1, %v4129_v37, %v4641_v14  ;;  %v5022_v31 = vsel %vm4510_vm0, %v4254_v36, %v4766_v30  ;;  %v4257_v28 = vadd.f32 %v9515_v20, %v3614_v29  ;;  %v2833_v0 = vrot.slane %v2832_v5, 1 }
 0x24e   : > { %v3601_v63 = vrot.slane %v3600_v18, 1  ;;  %v2863_v39 = vrot.slane %v2862_v62, 1  ;;  %v3631_v17 = vrot.slane %v3630_v12, 1  ;;  %v2848_v44 = vmax.f32 %v10717_v23, %v2847_v13 }
 0x24f   : > { %v7566_v43 = vpack.c.bf16 %v4897_v41, %v4897_v41  ;;  %vm4513_vm3 = vcmp.ge.f32.partialorder %v4257_v28, 0.0  ;;  %v4769_v38 = vmul.f32 0.01, %v4257_v28  ;;  %v2834_v24 = vmax.f32 %v2832_v5, %v2833_v0 }
 0x250   : > { %v3602_v34 = vmax.f32 %v3600_v18, %v3601_v63  ;;  %v2864_v37 = vmax.f32 %v2862_v62, %v2863_v39  ;;  %v3632_v40 = vmax.f32 %v3630_v12, %v3631_v17  ;;  %v2849_v21 = vrot.slane %v2848_v44, 2  ;;  %v9536_v18 = vpop.f32.mrb[72].mxu0  ;;  %v9538_v62 = vpop.f32.mrb[72].mxu1 }
 0x251   : > { %v7691_v7 = vpack.c.bf16 %v5022_v31, %v5022_v31  ;;  %v5025_v36 = vsel %vm4513_vm3, %v4257_v28, %v4769_v38  ;;  %v4127_v30 = vadd.f32 %v9515_v20, %v2834_v24  ;;  %v3615_v47 = vrot.slane %v9231_v16, 4  ;;  %v9540_v31 = vpop.f32.mrb[73].mxu0 }
 0x252   : > { %v7694_v22 = vpack.c.bf16 %v5025_v36, %v5025_v36  ;;  %v4255_v14 = vadd.f32 %v9515_v20, %v3602_v34  ;;  %v4132_v10 = vadd.f32 %v9515_v20, %v2864_v37  ;;  %v4260_v29 = vadd.f32 %v9515_v20, %v3632_v40  ;;  %10718 = vst [vmem:[#allocation4_spill] sm:$0xff] %v9540_v31  ;;  %v9546_v31 = vpop.f32.mrb[73].mxu1 }
 0x253   : > { %vm4383_vm2 = vcmp.ge.f32.partialorder %v4127_v30, 0.0  ;;  %v4639_v41 = vmul.f32 0.01, %v4127_v30  ;;  %v2850_v5 = vmax.f32 %v2848_v44, %v2849_v21  ;;  %v3616_v63 = vmax.f32 %v9231_v16, %v3615_v47 }
 0x254   : > { %v6177_v17 = vunpack.c.l.b16 %v7566_v43  ;;  %vm4511_vm4 = vcmp.ge.f32.partialorder %v4255_v14, 0.0  ;;  %v4767_v39 = vmul.f32 0.01, %v4255_v14  ;;  %vm4388_vm7 = vcmp.ge.f32.partialorder %v4132_v10, 0.0 }
 0x255   : > { %v4895_v12 = vsel %vm4383_vm2, %v4127_v30, %v4639_v41  ;;  %v4644_v23 = vmul.f32 0.01, %v4132_v10  ;;  %vm4516_vm10 = vcmp.ge.f32.partialorder %v4260_v29, 0.0  ;;  %v4772_v13 = vmul.f32 0.01, %v4260_v29 }
 0x256   : > { %v6305_v28 = vunpack.c.l.b16 %v7694_v22  ;;  %v7564_v0 = vpack.c.bf16 %v4895_v12, %v4895_v12  ;;  %v5023_v38 = vsel %vm4511_vm4, %v4255_v14, %v4767_v39  ;;  %v2851_v44 = vrot.slane %v2850_v5, 1 }
 0x257   : > { %v6302_v24 = vunpack.c.l.b16 %v7691_v7  ;;  %v7692_v16 = vpack.c.bf16 %v5023_v38, %v5023_v38  ;;  %v4900_v43 = vsel %vm4388_vm7, %v4132_v10, %v4644_v23  ;;  %v3617_v34 = vrot.slane %v3616_v63, 2 }
 0x258   : > { %v6175_v37 = vunpack.c.l.b16 %v7564_v0  ;;  %v7569_v40 = vpack.c.bf16 %v4900_v43, %v4900_v43  ;;  %v9542_v21 = vsel %vm4516_vm10, %v4260_v29, %v4772_v13  ;;  %v2852_v36 = vmax.f32 %v2850_v5, %v2851_v44 }
 0x259   : > { %v6303_v47 = vunpack.c.l.b16 %v7692_v16  ;;  %v3618_v30 = vmax.f32 %v3616_v63, %v3617_v34  ;;  %v2865_v41 = vrot.slane %v9252_v19, 4  ;;  %v3633_v52 = vrot.slane %v9269_v58, 4 }
 0x25a   : > { %v6477_v22 = vrot.slane %v6177_v17, 5  ;;  %v6701_v14 = vrot.slane %v6305_v28, 5  ;;  %v6473_v39 = vrot.slane %v6175_v37, 7  ;;  %v4130_v7 = vadd.f32 %v9515_v20, %v2852_v36 }
 0x25b   : > { %v6697_v10 = vrot.slane %v6303_v47, 7  ;;  %v3619_v12 = vrot.slane %v3618_v30, 1  ;;  %v2866_v23 = vmax.f32 %v9252_v19, %v2865_v41  ;;  %v3634_v29 = vmax.f32 %v9269_v58, %v3633_v52 }
 0x25c   : > { %v6474_v5 = vsel %vm6383_vm9, %v6473_v39, %v9524_v1  ;;  %v9553_v63 = vunpack.c.l.b16 %v7569_v40  ;;  %v7697_v13 = vpack.c.bf16 %v9542_v21, %v9542_v21  ;;  %vm4386_vm13 = vcmp.ge.f32.partialorder %v4130_v7, 0.0  ;;  %v9571_v39 = vpop.f32.mrb[74].mxu0 }
 0x25d   : > { %v10719_v17 = vrot.slane %v9486_v26, 6  ;;  %v6698_v0 = vsel %vm6383_vm9, %v6697_v10, %v6302_v24  ;;  %v4642_v38 = vmul.f32 0.01, %v4130_v7  ;;  %v3620_v44 = vmax.f32 %v3618_v30, %v3619_v12  ;;  %v10721_v26 = vld [vmem:[#allocation7_spill] sm:$0xff] }
 0x25e   : > { %v10720_v19 = vrot.slane %v9504_v42, 6  ;;  %v2867_v1 = vrot.slane %v2866_v23, 2  ;;  %v3635_v16 = vrot.slane %v3634_v29, 2  ;;  %v2853_v40 = vrot.slane %v10721_v26, 4 }
 0x25f   : > { %v6476_v28 = vsel %vm6386_vm11, %v10719_v17, %v6474_v5  ;;  %v4898_v43 = vsel %vm4386_vm13, %v4130_v7, %v4642_v38  ;;  %v4258_v34 = vadd.f32 %v9515_v20, %v3620_v44  ;;  %v3621_v30 = vrot.slane %v9278_v9, 4  ;;  %v9574_v5 = vpop.f32.mrb[74].mxu1 }
 0x260   : > { %v6700_v58 = vsel %vm6386_vm11, %v10720_v19, %v6698_v0  ;;  %v6478_v52 = vsel %vm6389_vm12, %v6477_v22, %v6476_v28  ;;  %v7567_v36 = vpack.c.bf16 %v4898_v43, %v4898_v43  ;;  %v2868_v47 = vmax.f32 %v2866_v23, %v2867_v1 }
 0x261   : > { %v6702_v37 = vsel %vm6389_vm12, %v6701_v14, %v6700_v58  ;;  %v3636_v24 = vmax.f32 %v3634_v29, %v3635_v16  ;;  %vm4514_vm15 = vcmp.ge.f32.partialorder %v4258_v34, 0.0  ;;  %v4770_v42 = vmul.f32 0.01, %v4258_v34 }
 0x262   : > { %v2854_v41 = vmax.f32 %v10721_v26, %v2853_v40  ;;  %v2883_v22 = vrot.slane %v9287_v49, 4  ;;  %v6178_v7 = vunpack.c.l.b16 %v7567_v36  ;;  %v2869_v10 = vrot.slane %v2868_v47, 1 }
 0x263   : > { %v3637_v12 = vrot.slane %v3636_v24, 1  ;;  %v3622_v14 = vmax.f32 %v9278_v9, %v3621_v30  ;;  %v5026_v17 = vsel %vm4514_vm15, %v4258_v34, %v4770_v42  ;;  %v3651_v28 = vrot.slane %v9289_v61, 4 }
 0x264   : > { %v2855_v23 = vrot.slane %v2854_v41, 2  ;;  %v2884_v29 = vmax.f32 %v9287_v49, %v2883_v22  ;;  %v6479_v0 = vrot.slane %v6178_v7, 4  ;;  %v7695_v38 = vpack.c.bf16 %v5026_v17, %v5026_v17 }
 0x265   : > { %v2870_v44 = vmax.f32 %v2868_v47, %v2869_v10  ;;  %v3638_v19 = vmax.f32 %v3636_v24, %v3637_v12  ;;  %v3623_v1 = vrot.slane %v3622_v14, 2  ;;  %v3652_v43 = vmax.f32 %v9289_v61, %v3651_v28  ;;  %v9584_v24 = vpop.f32.mrb[75].mxu0  ;;  %v9586_v10 = vpop.f32.mrb[75].mxu1 }
 0x266   : > { %v2856_v58 = vmax.f32 %v2854_v41, %v2855_v23  ;;  %v2885_v16 = vrot.slane %v2884_v29, 2  ;;  %v9580_v26 = vsel %vm6392_vm14, %v6479_v0, %v6478_v52  ;;  %v6306_v9 = vunpack.c.l.b16 %v7695_v38 }
 0x267   : > { %v4133_v34 = vadd.f32 %v9515_v20, %v2870_v44  ;;  %v4261_v40 = vadd.f32 %v9515_v20, %v3638_v19  ;;  %v3624_v36 = vmax.f32 %v3622_v14, %v3623_v1  ;;  %v3653_v42 = vrot.slane %v3652_v43, 2  ;;  %v10722_v14 = vld [vmem:[#allocation8_spill] sm:$0xff] }
 0x268   : > { %v2857_v49 = vrot.slane %v2856_v58, 1  ;;  %v2886_v30 = vmax.f32 %v2884_v29, %v2885_v16  ;;  %v6703_v22 = vrot.slane %v6306_v9, 4  ;;  %v2871_v29 = vrot.slane %v10722_v14, 4 }
 0x269   : > { %vm4389_vm0 = vcmp.ge.f32.partialorder %v4133_v34, 0.0  ;;  %v4645_v47 = vmul.f32 0.01, %v4133_v34  ;;  %vm4517_vm1 = vcmp.ge.f32.partialorder %v4261_v40, 0.0  ;;  %v4773_v41 = vmul.f32 0.01, %v4261_v40 }
 0x26a   : > { %v2858_v61 = vmax.f32 %v2856_v58, %v2857_v49  ;;  %v3625_v7 = vrot.slane %v3624_v36, 1  ;;  %v2887_v52 = vrot.slane %v2886_v30, 1  ;;  %v9589_v12 = vsel %vm6392_vm14, %v6703_v22, %v6702_v37 }
 0x26b   : > { %v4901_v17 = vsel %vm4389_vm0, %v4133_v34, %v4645_v47  ;;  %v3654_v23 = vmax.f32 %v3652_v43, %v3653_v42  ;;  %v5029_v0 = vsel %vm4517_vm1, %v4261_v40, %v4773_v41  ;;  %v2872_v58 = vmax.f32 %v10722_v14, %v2871_v29  ;;  %v9600_v47 = vpop.f32.mrb[76].mxu0  ;;  %v9602_v41 = vpop.f32.mrb[76].mxu1 }
 0x26c   : > { %v7570_v28 = vpack.c.bf16 %v4901_v17, %v4901_v17  ;;  %v4131_v38 = vadd.f32 %v9515_v20, %v2858_v61  ;;  %v3626_v44 = vmax.f32 %v3624_v36, %v3625_v7  ;;  %v7698_v19 = vpack.c.bf16 %v5029_v0, %v5029_v0  ;;  %v9604_v7 = vpop.f32.mrb[77].mxu0 }
 0x26d   : > { %v2888_v1 = vmax.f32 %v2886_v30, %v2887_v52  ;;  %v3655_v16 = vrot.slane %v3654_v23, 1  ;;  %v6308_v9 = vunpack.c.l.b16 %v7697_v13  ;;  %v6483_v34 = vrot.slane %v9553_v63, 2 }
 0x26e   : > { %vm4387_vm3 = vcmp.ge.f32.partialorder %v4131_v38, 0.0  ;;  %v4643_v37 = vmul.f32 0.01, %v4131_v38  ;;  %v4259_v43 = vadd.f32 %v9515_v20, %v3626_v44  ;;  %v2873_v42 = vrot.slane %v2872_v58, 2 }
 0x26f   : > { %v4136_v40 = vadd.f32 %v9515_v20, %v2888_v1  ;;  %v3656_v49 = vmax.f32 %v3654_v23, %v3655_v16  ;;  %v6181_v36 = vunpack.c.l.b16 %v7570_v28  ;;  %v6309_v21 = vunpack.c.l.b16 %v7698_v19 }
 0x270   : > { %v4899_v22 = vsel %vm4387_vm3, %v4131_v38, %v4643_v37  ;;  %vm4515_vm2 = vcmp.ge.f32.partialorder %v4259_v43, 0.0  ;;  %v4771_v30 = vmul.f32 0.01, %v4259_v43  ;;  %v2874_v17 = vmax.f32 %v2872_v58, %v2873_v42 }
 0x271   : > { %v7568_v13 = vpack.c.bf16 %v4899_v22, %v4899_v22  ;;  %vm4392_vm4 = vcmp.ge.f32.partialorder %v4136_v40, 0.0  ;;  %v4648_v61 = vmul.f32 0.01, %v4136_v40  ;;  %v4264_v63 = vadd.f32 %v9515_v20, %v3656_v49 }
 0x272   : > { %v5027_v52 = vsel %vm4515_vm2, %v4259_v43, %v4771_v30  ;;  %v3639_v23 = vrot.slane %v9297_v15, 4  ;;  %v2889_v0 = vrot.slane %v9322_v32, 4  ;;  %v2875_v19 = vrot.slane %v2874_v17, 1  ;;  %v9613_v30 = vpop.f32.mrb[77].mxu1 }
 0x273   : > { %v6179_v14 = vunpack.c.l.b16 %v7568_v13  ;;  %v7696_v29 = vpack.c.bf16 %v5027_v52, %v5027_v52  ;;  %v4904_v28 = vsel %vm4392_vm4, %v4136_v40, %v4648_v61  ;;  %vm4520_vm7 = vcmp.ge.f32.partialorder %v4264_v63, 0.0 }
 0x274   : > { %v7573_v38 = vpack.c.bf16 %v4904_v28, %v4904_v28  ;;  %v4776_v44 = vmul.f32 0.01, %v4264_v63  ;;  %v3640_v37 = vmax.f32 %v9297_v15, %v3639_v23  ;;  %v2890_v43 = vmax.f32 %v9322_v32, %v2889_v0 }
 0x275   : > { %v6481_v1 = vrot.slane %v6179_v14, 3  ;;  %v6307_v16 = vunpack.c.l.b16 %v7696_v29  ;;  %v6707_v22 = vrot.slane %v6308_v9, 2  ;;  %v6485_v49 = vrot.slane %v6181_v36, 1 }
 0x276   : > { %v9611_v58 = vunpack.c.l.b16 %v7573_v38  ;;  %v2876_v42 = vmax.f32 %v2874_v17, %v2875_v19  ;;  %v5032_v61 = vsel %vm4520_vm7, %v4264_v63, %v4776_v44  ;;  %v3641_v52 = vrot.slane %v3640_v37, 2 }
 0x277   : > { %v6482_v40 = vsel %vm6395_vm5, %v6481_v1, %v9580_v26  ;;  %v6705_v13 = vrot.slane %v6307_v16, 3  ;;  %v2891_v23 = vrot.slane %v2890_v43, 2  ;;  %v3657_v32 = vrot.slane %v9325_v33, 4 }
 0x278   : > { %v6484_v14 = vsel %vm6398_vm6, %v6483_v34, %v6482_v40  ;;  %v4134_v15 = vadd.f32 %v9515_v20, %v2876_v42  ;;  %v6709_v9 = vrot.slane %v6309_v21, 1  ;;  %v3642_v29 = vmax.f32 %v3640_v37, %v3641_v52  ;;  %v9630_v42 = vpop.f32.mrb[78].mxu0 }
 0x279   : > { %v6486_v36 = vsel %vm6401_vm8, %v6485_v49, %v6484_v14  ;;  %v6706_v17 = vsel %vm6395_vm5, %v6705_v13, %v9589_v12  ;;  %v7701_v0 = vpack.c.bf16 %v5032_v61, %v5032_v61  ;;  %v2892_v44 = vmax.f32 %v2890_v43, %v2891_v23  ;;  %v9640_v23 = vpop.f32.mrb[78].mxu1 }
 0x27a   : > { %v6843_v28 = vpack.c.b16 %v6486_v36, %v6486_v36  ;;  %v6708_v26 = vsel %vm6398_vm6, %v6707_v22, %v6706_v17  ;;  %vm4390_vm10 = vcmp.ge.f32.partialorder %v4134_v15, 0.0  ;;  %v4646_v63 = vmul.f32 0.01, %v4134_v15 }
 0x27b   : > { %v6710_v34 = vsel %vm6401_vm8, %v6709_v9, %v6708_v26  ;;  %v3643_v38 = vrot.slane %v3642_v29, 1  ;;  %v3658_v1 = vmax.f32 %v9325_v33, %v3657_v32  ;;  %v2877_v12 = vrot.slane %v9335_v2, 4 }
 0x27c   : > { %6907 = vst [vmem:[%s8849_s29 + $0x18] sm:$0xf] %v6843_v28  ;;  %v6859_v19 = vpack.c.b16 %v6710_v34, %v6710_v34  ;;  %v4902_v16 = vsel %vm4390_vm10, %v4134_v15, %v4646_v63  ;;  %v2893_v49 = vrot.slane %v2892_v44, 1  ;;  %v3645_v22 = vrot.slane %v9337_v50, 4 }
 0x27d   : > { %v3644_v37 = vmax.f32 %v3642_v29, %v3643_v38  ;;  %v3659_v40 = vrot.slane %v3658_v1, 2  ;;  %v2878_v13 = vmax.f32 %v9335_v2, %v2877_v12  ;;  %v2907_v43 = vrot.slane %v9351_v4, 4 }
 0x27e   : > { %6923 = vst [vmem:[%s8849_s29 + $0x58] sm:$0xf] %v6859_v19  ;;  %v3675_v61 = vrot.slane %v9353_v48, 4  ;;  %v9636_v52 = vunpack.c.l.b16 %v7701_v0  ;;  %v2894_v14 = vmax.f32 %v2892_v44, %v2893_v49  ;;  %v3646_v15 = vmax.f32 %v9337_v50, %v3645_v22  ;;  %v9647_v22 = vpop.f32.mrb[79].mxu0 }
 0x27f   : > { %v4262_v33 = vadd.f32 %v9515_v20, %v3644_v37  ;;  %v3660_v32 = vmax.f32 %v3658_v1, %v3659_v40  ;;  %v2879_v9 = vrot.slane %v2878_v13, 2  ;;  %v2908_v36 = vmax.f32 %v9351_v4, %v2907_v43 }
 0x280   : > { %v3676_v17 = vmax.f32 %v9353_v48, %v3675_v61  ;;  %v7571_v2 = vpack.c.bf16 %v4902_v16, %v4902_v16  ;;  %v4137_v28 = vadd.f32 %v9515_v20, %v2894_v14  ;;  %v3647_v26 = vrot.slane %v3646_v15, 2  ;;  %v9650_v14 = vpop.f32.mrb[79].mxu1 }
 0x281   : > { %v4774_v29 = vmul.f32 0.01, %v4262_v33  ;;  %v3661_v63 = vrot.slane %v3660_v32, 1  ;;  %v2880_v34 = vmax.f32 %v2878_v13, %v2879_v9  ;;  %v2909_v0 = vrot.slane %v2908_v36, 2 }
 0x282   : > { %v3677_v38 = vrot.slane %v3676_v17, 2  ;;  %vm4518_vm13 = vcmp.ge.f32.partialorder %v4262_v33, 0.0  ;;  %vm4393_vm15 = vcmp.ge.f32.partialorder %v4137_v28, 0.0  ;;  %v4649_v50 = vmul.f32 0.01, %v4137_v28 }
 0x283   : > { %v3648_v44 = vmax.f32 %v3646_v15, %v3647_v26  ;;  %v3662_v1 = vmax.f32 %v3660_v32, %v3661_v63  ;;  %v2881_v12 = vrot.slane %v2880_v34, 1  ;;  %v2910_v4 = vmax.f32 %v2908_v36, %v2909_v0 }
 0x284   : > { %v4905_v37 = vsel %vm4393_vm15, %v4137_v28, %v4649_v50  ;;  %v3678_v16 = vmax.f32 %v3676_v17, %v3677_v38  ;;  %v2895_v49 = vrot.slane %v9355_v27, 4  ;;  %v6182_v40 = vunpack.c.l.b16 %v7571_v2 }
 0x285   : > { %v3649_v48 = vrot.slane %v3648_v44, 1  ;;  %v5030_v13 = vsel %vm4518_vm13, %v4262_v33, %v4774_v29  ;;  %v4265_v43 = vadd.f32 %v9515_v20, %v3662_v1  ;;  %v2882_v61 = vmax.f32 %v2880_v34, %v2881_v12 }
 0x286   : > { %v2911_v9 = vrot.slane %v2910_v4, 1  ;;  %v3679_v26 = vrot.slane %v3678_v16, 1  ;;  %v2896_v32 = vmax.f32 %v9355_v27, %v2895_v49  ;;  %v7574_v36 = vpack.c.bf16 %v4905_v37, %v4905_v37  ;;  %v9658_v49 = vpop.f32.mrb[80].mxu0 }
 0x287   : > { %v3650_v15 = vmax.f32 %v3648_v44, %v3649_v48  ;;  %vm4521_vm0 = vcmp.ge.f32.partialorder %v4265_v43, 0.0  ;;  %v4777_v28 = vmul.f32 0.01, %v4265_v43  ;;  %v4135_v17 = vadd.f32 %v9515_v20, %v2882_v61  ;;  %v9662_v61 = vpop.f32.mrb[81].mxu0 }
 0x288   : > { %v2912_v0 = vmax.f32 %v2910_v4, %v2911_v9  ;;  %v3680_v2 = vmax.f32 %v3678_v16, %v3679_v26  ;;  %v2897_v33 = vrot.slane %v2896_v32, 2  ;;  %v7699_v29 = vpack.c.bf16 %v5030_v13, %v5030_v13  ;;  %v9660_v4 = vpop.f32.mrb[80].mxu1  ;;  %10723 = vst [vmem:[#allocation5_spill] sm:$0xff] %v9662_v61 }
 0x289   : > { %v4263_v63 = vadd.f32 %v9515_v20, %v3650_v15  ;;  %v5033_v38 = vsel %vm4521_vm0, %v4265_v43, %v4777_v28  ;;  %vm4391_vm1 = vcmp.ge.f32.partialorder %v4135_v17, 0.0  ;;  %v4647_v34 = vmul.f32 0.01, %v4135_v17 }
 0x28a   : > { %v7702_v50 = vpack.c.bf16 %v5033_v38, %v5033_v38  ;;  %v4140_v1 = vadd.f32 %v9515_v20, %v2912_v0  ;;  %v4268_v12 = vadd.f32 %v9515_v20, %v3680_v2  ;;  %v2898_v37 = vmax.f32 %v2896_v32, %v2897_v33 }
 0x28b   : > { %vm4519_vm3 = vcmp.ge.f32.partialorder %v4263_v63, 0.0  ;;  %v4775_v44 = vmul.f32 0.01, %v4263_v63  ;;  %v4903_v27 = vsel %vm4391_vm1, %v4135_v17, %v4647_v34  ;;  %v3663_v48 = vrot.slane %v9364_v6, 4 }
 0x28c   : > { %v6185_v16 = vunpack.c.l.b16 %v7574_v36  ;;  %v7572_v13 = vpack.c.bf16 %v4903_v27, %v4903_v27  ;;  %vm4396_vm2 = vcmp.ge.f32.partialorder %v4140_v1, 0.0  ;;  %v6313_v15 = vunpack.c.l.b16 %v7702_v50 }
 0x28d   : > { %v5031_v43 = vsel %vm4519_vm3, %v4263_v63, %v4775_v44  ;;  %v4652_v26 = vmul.f32 0.01, %v4140_v1  ;;  %v4780_v28 = vmul.f32 0.01, %v4268_v12  ;;  %vm4524_vm4 = vcmp.ge.f32.partialorder %v4268_v12, 0.0 }
 0x28e   : > { %v7700_v9 = vpack.c.bf16 %v5031_v43, %v5031_v43  ;;  %v6183_v17 = vunpack.c.l.b16 %v7572_v13  ;;  %v2899_v0 = vrot.slane %v2898_v37, 1  ;;  %v3664_v32 = vmax.f32 %v9364_v6, %v3663_v48 }
 0x28f   : > { %v6310_v2 = vunpack.c.l.b16 %v7699_v29  ;;  %v4908_v38 = vsel %vm4396_vm2, %v4140_v1, %v4652_v26  ;;  %v2913_v34 = vrot.slane %v9381_v25, 4  ;;  %v6491_v36 = vrot.slane %v6185_v16, 5  ;;  %v9672_v1 = vpop.f32.mrb[81].mxu1 }
 0x290   : > { %v6311_v33 = vunpack.c.l.b16 %v7700_v9  ;;  %v6487_v27 = vrot.slane %v6183_v17, 7  ;;  %v7577_v63 = vpack.c.bf16 %v4908_v38, %v4908_v38  ;;  %v2900_v44 = vmax.f32 %v2898_v37, %v2899_v0 }
 0x291   : > { %v9666_v21 = vsel %vm4524_vm4, %v4268_v12, %v4780_v28  ;;  %v3665_v50 = vrot.slane %v3664_v32, 2  ;;  %v2914_v43 = vmax.f32 %v9381_v25, %v2913_v34  ;;  %v6715_v13 = vrot.slane %v6313_v15, 5 }
 0x292   : > { %v6711_v19 = vrot.slane %v6311_v33, 7  ;;  %v6488_v61 = vsel %vm6383_vm9, %v6487_v27, %v6182_v40  ;;  %v4138_v6 = vadd.f32 %v9515_v20, %v2900_v44  ;;  %v3681_v29 = vrot.slane %v9391_v35, 4  ;;  %v9693_v44 = vpop.f32.mrb[82].mxu0 }
 0x293   : > { %v10724_v48 = vrot.slane %v9611_v58, 6  ;;  %v3666_v12 = vmax.f32 %v3664_v32, %v3665_v50  ;;  %v2915_v9 = vrot.slane %v2914_v43, 2  ;;  %v10725_v26 = vrot.slane %v9636_v52, 6 }
 0x294   : > { %v6712_v37 = vsel %vm6383_vm9, %v6711_v19, %v6310_v2  ;;  %v9681_v15 = vunpack.c.l.b16 %v7577_v63  ;;  %v7705_v40 = vpack.c.bf16 %v9666_v21, %v9666_v21  ;;  %vm4394_vm7 = vcmp.ge.f32.partialorder %v4138_v6, 0.0 }
 0x295   : > { %v6490_v16 = vsel %vm6386_vm11, %v10724_v48, %v6488_v61  ;;  %v6714_v25 = vsel %vm6386_vm11, %v10725_v26, %v6712_v37  ;;  %v4650_v28 = vmul.f32 0.01, %v4138_v6  ;;  %v3667_v58 = vrot.slane %v3666_v12, 1 }
 0x296   : > { %v6492_v17 = vsel %vm6389_vm12, %v6491_v36, %v6490_v16  ;;  %v6716_v61 = vsel %vm6389_vm12, %v6715_v13, %v6714_v25  ;;  %v2916_v0 = vmax.f32 %v2914_v43, %v2915_v9  ;;  %v3682_v19 = vmax.f32 %v9391_v35, %v3681_v29 }
 0x297   : > { %v2901_v32 = vrot.slane %v9398_v46, 4  ;;  %v3669_v52 = vrot.slane %v9401_v55, 4  ;;  %v4906_v2 = vsel %vm4394_vm7, %v4138_v6, %v4650_v28  ;;  %v3668_v33 = vmax.f32 %v3666_v12, %v3667_v58  ;;  %v9699_v6 = vpop.f32.mrb[82].mxu1 }
 0x298   : > { %v2931_v38 = vrot.slane %v9409_v53, 4  ;;  %v3699_v21 = vrot.slane %v9411_v51, 4  ;;  %v7575_v34 = vpack.c.bf16 %v4906_v2, %v4906_v2  ;;  %v2917_v27 = vrot.slane %v2916_v0, 1 }
 0x299   : > { %v3683_v63 = vrot.slane %v3682_v19, 2  ;;  %v2902_v36 = vmax.f32 %v9398_v46, %v2901_v32  ;;  %v4266_v50 = vadd.f32 %v9515_v20, %v3668_v33  ;;  %v3670_v35 = vmax.f32 %v9401_v55, %v3669_v52 }
 0x29a   : > { %v2932_v43 = vmax.f32 %v9409_v53, %v2931_v38  ;;  %v3700_v13 = vmax.f32 %v9411_v51, %v3699_v21  ;;  %v6186_v29 = vunpack.c.l.b16 %v7575_v34  ;;  %v2918_v48 = vmax.f32 %v2916_v0, %v2917_v27  ;;  %v9705_v34 = vpop.f32.mrb[83].mxu0 }
 0x29b   : > { %v3684_v16 = vmax.f32 %v3682_v19, %v3683_v63  ;;  %v2903_v37 = vrot.slane %v2902_v36, 2  ;;  %vm4522_vm10 = vcmp.ge.f32.partialorder %v4266_v50, 0.0  ;;  %v4778_v12 = vmul.f32 0.01, %v4266_v50 }
 0x29c   : > { %v3671_v9 = vrot.slane %v3670_v35, 2  ;;  %v2933_v46 = vrot.slane %v2932_v43, 2  ;;  %v6493_v26 = vrot.slane %v6186_v29, 4  ;;  %v4141_v25 = vadd.f32 %v9515_v20, %v2918_v48 }
 0x29d   : > { %v3685_v28 = vrot.slane %v3684_v16, 1  ;;  %v2904_v58 = vmax.f32 %v2902_v36, %v2903_v37  ;;  %v5034_v55 = vsel %vm4522_vm10, %v4266_v50, %v4778_v12  ;;  %v3701_v52 = vrot.slane %v3700_v13, 2 }
 0x29e   : > { %v3672_v32 = vmax.f32 %v3670_v35, %v3671_v9  ;;  %v2934_v53 = vmax.f32 %v2932_v43, %v2933_v46  ;;  %v9703_v51 = vsel %vm6392_vm14, %v6493_v26, %v6492_v17  ;;  %v7703_v2 = vpack.c.bf16 %v5034_v55, %v5034_v55  ;;  %v9711_v9 = vpop.f32.mrb[83].mxu1 }
 0x29f   : > { %vm4397_vm13 = vcmp.ge.f32.partialorder %v4141_v25, 0.0  ;;  %v4653_v0 = vmul.f32 0.01, %v4141_v25  ;;  %v3686_v19 = vmax.f32 %v3684_v16, %v3685_v28  ;;  %v2905_v33 = vrot.slane %v2904_v58, 1 }
 0x2a0   : > { %v3673_v38 = vrot.slane %v3672_v32, 1  ;;  %v2935_v21 = vrot.slane %v2934_v53, 1  ;;  %v6314_v27 = vunpack.c.l.b16 %v7703_v2  ;;  %v3702_v29 = vmax.f32 %v3700_v13, %v3701_v52 }
 0x2a1   : > { %v4909_v63 = vsel %vm4397_vm13, %v4141_v25, %v4653_v0  ;;  %v2919_v36 = vrot.slane %v9413_v56, 4  ;;  %v4269_v35 = vadd.f32 %v9515_v20, %v3686_v19  ;;  %v2906_v43 = vmax.f32 %v2904_v58, %v2905_v33 }
 0x2a2   : > { %v7578_v50 = vpack.c.bf16 %v4909_v63, %v4909_v63  ;;  %v3674_v17 = vmax.f32 %v3672_v32, %v3673_v38  ;;  %v9709_v48 = vunpack.c.l.b16 %v7705_v40  ;;  %v6717_v37 = vrot.slane %v6314_v27, 4  ;;  %v9720_v63 = vpop.f32.mrb[84].mxu0 }
 0x2a3   : > { %v2936_v12 = vmax.f32 %v2934_v53, %v2935_v21  ;;  %v3703_v16 = vrot.slane %v3702_v29, 1  ;;  %vm4525_vm15 = vcmp.ge.f32.partialorder %v4269_v35, 0.0  ;;  %v4781_v46 = vmul.f32 0.01, %v4269_v35 }
 0x2a4   : > { %v4139_v26 = vadd.f32 %v9515_v20, %v2906_v43  ;;  %v2920_v13 = vmax.f32 %v9413_v56, %v2919_v36  ;;  %v6718_v25 = vsel %vm6392_vm14, %v6717_v37, %v6716_v61  ;;  %v4267_v28 = vadd.f32 %v9515_v20, %v3674_v17  ;;  %v9725_v17 = vpop.f32.mrb[85].mxu0 }
 0x2a5   : > { %v4144_v58 = vadd.f32 %v9515_v20, %v2936_v12  ;;  %v3704_v55 = vmax.f32 %v3702_v29, %v3703_v16  ;;  %v6189_v40 = vunpack.c.l.b16 %v7578_v50  ;;  %v5037_v32 = vsel %vm4525_vm15, %v4269_v35, %v4781_v46  ;;  %v9722_v29 = vpop.f32.mrb[84].mxu1 }
 0x2a6   : > { %vm4395_vm0 = vcmp.ge.f32.partialorder %v4139_v26, 0.0  ;;  %v4651_v53 = vmul.f32 0.01, %v4139_v26  ;;  %v7706_v52 = vpack.c.bf16 %v5037_v32, %v5037_v32  ;;  %vm4523_vm1 = vcmp.ge.f32.partialorder %v4267_v28, 0.0 }
 0x2a7   : > { %v4779_v2 = vmul.f32 0.01, %v4267_v28  ;;  %vm4400_vm3 = vcmp.ge.f32.partialorder %v4144_v58, 0.0  ;;  %v4656_v19 = vmul.f32 0.01, %v4144_v58  ;;  %v4272_v33 = vadd.f32 %v9515_v20, %v3704_v55 }
 0x2a8   : > { %v4907_v0 = vsel %vm4395_vm0, %v4139_v26, %v4651_v53  ;;  %v2921_v56 = vrot.slane %v2920_v13, 2  ;;  %v6317_v38 = vunpack.c.l.b16 %v7706_v52  ;;  %v3687_v27 = vrot.slane %v9423_v8, 4 }
 0x2a9   : > { %v7576_v61 = vpack.c.bf16 %v4907_v0, %v4907_v0  ;;  %v5035_v21 = vsel %vm4523_vm1, %v4267_v28, %v4779_v2  ;;  %v6497_v36 = vrot.slane %v9681_v15, 2  ;;  %v4912_v35 = vsel %vm4400_vm3, %v4144_v58, %v4656_v19  ;;  %v9730_v2 = vpop.f32.mrb[85].mxu1 }
 0x2aa   : > { %v7704_v50 = vpack.c.bf16 %v5035_v21, %v5035_v21  ;;  %v4784_v43 = vmul.f32 0.01, %v4272_v33  ;;  %v7581_v12 = vpack.c.bf16 %v4912_v35, %v4912_v35  ;;  %vm4528_vm2 = vcmp.ge.f32.partialorder %v4272_v33, 0.0 }
 0x2ab   : > { %v6187_v37 = vunpack.c.l.b16 %v7576_v61  ;;  %v2922_v16 = vmax.f32 %v2920_v13, %v2921_v56  ;;  %v6721_v46 = vrot.slane %v9709_v48, 2  ;;  %v3688_v28 = vmax.f32 %v9423_v8, %v3687_v27  ;;  %v10726_v8 = vld [vmem:[#allocation9_spill] sm:$0xff] }
 0x2ac   : > { %v6315_v26 = vunpack.c.l.b16 %v7704_v50  ;;  %v2937_v55 = vrot.slane %v9444_v59, 4  ;;  %v6499_v32 = vrot.slane %v6189_v40, 1  ;;  %v6723_v53 = vrot.slane %v6317_v38, 1 }
 0x2ad   : > { %v6495_v52 = vrot.slane %v6187_v37, 3  ;;  %v2923_v15 = vrot.slane %v2922_v16, 1  ;;  %v5040_v0 = vsel %vm4528_vm2, %v4272_v33, %v4784_v43  ;;  %v3689_v19 = vrot.slane %v3688_v28, 2 }
 0x2ae   : > { %v6719_v58 = vrot.slane %v6315_v26, 3  ;;  %v2938_v61 = vmax.f32 %v9444_v59, %v2937_v55  ;;  %v9735_v48 = vunpack.c.l.b16 %v7581_v12  ;;  %v3705_v21 = vrot.slane %v10726_v8, 4  ;;  %v9744_v26 = vpop.f32.mrb[86].mxu0 }
 0x2af   : > { %v6496_v13 = vsel %vm6395_vm5, %v6495_v52, %v9703_v51  ;;  %v2924_v56 = vmax.f32 %v2922_v16, %v2923_v15  ;;  %v3690_v27 = vmax.f32 %v3688_v28, %v3689_v19  ;;  %v7709_v59 = vpack.c.bf16 %v5040_v0, %v5040_v0 }
 0x2b0   : > { %v6498_v40 = vsel %vm6398_vm6, %v6497_v36, %v6496_v13  ;;  %v6720_v38 = vsel %vm6395_vm5, %v6719_v58, %v6718_v25  ;;  %v2939_v50 = vrot.slane %v2938_v61, 2  ;;  %v3706_v28 = vmax.f32 %v10726_v8, %v3705_v21 }
 0x2b1   : > { %v6500_v33 = vsel %vm6401_vm8, %v6499_v32, %v6498_v40  ;;  %v6722_v35 = vsel %vm6398_vm6, %v6721_v46, %v6720_v38  ;;  %v4142_v51 = vadd.f32 %v9515_v20, %v2924_v56  ;;  %v3691_v12 = vrot.slane %v3690_v27, 1 }
 0x2b2   : > { %v6844_v43 = vpack.c.b16 %v6500_v33, %v6500_v33  ;;  %v6724_v37 = vsel %vm6401_vm8, %v6723_v53, %v6722_v35  ;;  %v2940_v16 = vmax.f32 %v2938_v61, %v2939_v50  ;;  %v2925_v46 = vrot.slane %v9456_v11, 4 }
 0x2b3   : > { %v6860_v36 = vpack.c.b16 %v6724_v37, %v6724_v37  ;;  %vm4398_vm4 = vcmp.ge.f32.partialorder %v4142_v51, 0.0  ;;  %v4654_v25 = vmul.f32 0.01, %v4142_v51  ;;  %v3692_v55 = vmax.f32 %v3690_v27, %v3691_v12 }
 0x2b4   : > { %6908 = vst [vmem:[%s8849_s29 + $0x1c] sm:$0xf] %v6844_v43  ;;  %v2941_v32 = vrot.slane %v2940_v16, 1  ;;  %v3693_v52 = vrot.slane %v9462_v57, 4  ;;  %v3707_v58 = vrot.slane %v3706_v28, 2  ;;  %v2955_v53 = vrot.slane %v9471_v54, 4 }
 0x2b5   : > { %6924 = vst [vmem:[%s8849_s29 + $0x5c] sm:$0xf] %v6860_v36  ;;  %v4910_v15 = vsel %vm4398_vm4, %v4142_v51, %v4654_v25  ;;  %v3723_v0 = vrot.slane %v9473_v45, 4  ;;  %v9753_v19 = vunpack.c.l.b16 %v7709_v59  ;;  %v4270_v61 = vadd.f32 %v9515_v20, %v3692_v55  ;;  %v9762_v59 = vpop.f32.mrb[86].mxu1 }
 0x2b6   : > { %v2942_v13 = vmax.f32 %v2940_v16, %v2941_v32  ;;  %v2926_v56 = vmax.f32 %v9456_v11, %v2925_v46  ;;  %v3708_v8 = vmax.f32 %v3706_v28, %v3707_v58  ;;  %v3694_v21 = vmax.f32 %v9462_v57, %v3693_v52  ;;  %10727 = vst [vmem:[#allocation6_spill] sm:$0xff] %v9762_v59  ;;  %v9764_v16 = vpop.f32.mrb[87].mxu0  ;;  %v10729_v46 = vld [vmem:[#allocation10_spill] sm:$0xff] }
 0x2b7   : > { %v2956_v40 = vmax.f32 %v9471_v54, %v2955_v53  ;;  %v3724_v38 = vmax.f32 %v9473_v45, %v3723_v0  ;;  %v7579_v50 = vpack.c.bf16 %v4910_v15, %v4910_v15  ;;  %v4782_v33 = vmul.f32 0.01, %v4270_v61  ;;  %10728 = vst [vmem:[#allocation7_spill] sm:$0xff] %v9764_v16 }
 0x2b8   : > { %v4145_v35 = vadd.f32 %v9515_v20, %v2942_v13  ;;  %v3709_v51 = vrot.slane %v3708_v8, 1  ;;  %v2927_v43 = vrot.slane %v2926_v56, 2  ;;  %v3695_v37 = vrot.slane %v3694_v21, 2  ;;  %v9771_v13 = vpop.f32.mrb[87].mxu1 }
 0x2b9   : > { %v2957_v12 = vrot.slane %v2956_v40, 2  ;;  %vm4526_vm7 = vcmp.ge.f32.partialorder %v4270_v61, 0.0  ;;  %v3725_v57 = vrot.slane %v3724_v38, 2  ;;  %v2943_v52 = vrot.slane %v10729_v46, 4 }
 0x2ba   : > { %vm4401_vm10 = vcmp.ge.f32.partialorder %v4145_v35, 0.0  ;;  %v4657_v11 = vmul.f32 0.01, %v4145_v35  ;;  %v3710_v45 = vmax.f32 %v3708_v8, %v3709_v51  ;;  %v2928_v36 = vmax.f32 %v2926_v56, %v2927_v43 }
 0x2bb   : > { %v3696_v25 = vmax.f32 %v3694_v21, %v3695_v37  ;;  %v2958_v55 = vmax.f32 %v2956_v40, %v2957_v12  ;;  %v3726_v32 = vmax.f32 %v3724_v38, %v3725_v57  ;;  %v9768_v15 = vunpack.c.l.b16 %v7579_v50 }
 0x2bc   : > { %v4913_v28 = vsel %vm4401_vm10, %v4145_v35, %v4657_v11  ;;  %v5038_v58 = vsel %vm4526_vm7, %v4270_v61, %v4782_v33  ;;  %v4273_v53 = vadd.f32 %v9515_v20, %v3710_v45  ;;  %v2929_v0 = vrot.slane %v2928_v36, 1  ;;  %v9777_v20 = vld [vmem:[%s10624_s2] ss:$0 sm:$0xff] }
 0x2bd   : > { %v3697_v27 = vrot.slane %v3696_v25, 1  ;;  %v2959_v16 = vrot.slane %v2958_v55, 1  ;;  %v3727_v59 = vrot.slane %v3726_v32, 1  ;;  %v2944_v8 = vmax.f32 %v10729_v46, %v2943_v52 }
 0x2be   : > { %v7582_v56 = vpack.c.bf16 %v4913_v28, %v4913_v28  ;;  %vm4529_vm13 = vcmp.ge.f32.partialorder %v4273_v53, 0.0  ;;  %v4785_v21 = vmul.f32 0.01, %v4273_v53  ;;  %v2930_v40 = vmax.f32 %v2928_v36, %v2929_v0  ;;  %v9785_v28 = vpop.f32.mrb[88].mxu0 }
 0x2bf   : > { %v3698_v38 = vmax.f32 %v3696_v25, %v3697_v27  ;;  %v2960_v35 = vmax.f32 %v2958_v55, %v2959_v16  ;;  %v3728_v51 = vmax.f32 %v3726_v32, %v3727_v59  ;;  %v2945_v50 = vrot.slane %v2944_v8, 2  ;;  %10730 = vst [vmem:[#allocation8_spill] sm:$0xff] %v9785_v28  ;;  %v9787_v55 = vpop.f32.mrb[88].mxu1 }
 0x2c0   : > { %v7707_v43 = vpack.c.bf16 %v5038_v58, %v5038_v58  ;;  %v5041_v61 = vsel %vm4529_vm13, %v4273_v53, %v4785_v21  ;;  %v4143_v33 = vadd.f32 %v9777_v20, %v2930_v40  ;;  %v3711_v37 = vrot.slane %v9481_v3, 4  ;;  %10731 = vst [vmem:[#allocation9_spill] sm:$0xff] %v9787_v55  ;;  %v9789_v58 = vpop.f32.mrb[89].mxu0  ;;  %v10734_v55 = vld [vmem:[#allocation2_spill] sm:$0xff] }
 0x2c1   : > { %v7710_v12 = vpack.c.bf16 %v5041_v61, %v5041_v61  ;;  %v4271_v11 = vadd.f32 %v9777_v20, %v3698_v38  ;;  %v4148_v57 = vadd.f32 %v9777_v20, %v2960_v35  ;;  %v4276_v27 = vadd.f32 %v9777_v20, %v3728_v51  ;;  %10732 = vst [vmem:[#allocation10_spill] sm:$0xff] %v9789_v58  ;;  %v9795_v58 = vpop.f32.mrb[89].mxu1 }
 0x2c2   : > { %vm4399_vm15 = vcmp.ge.f32.partialorder %v4143_v33, 0.0  ;;  %v4655_v59 = vmul.f32 0.01, %v4143_v33  ;;  %v2946_v16 = vmax.f32 %v2944_v8, %v2945_v50  ;;  %v3712_v45 = vmax.f32 %v9481_v3, %v3711_v37 }
 0x2c3   : > { %v6193_v36 = vunpack.c.l.b16 %v7582_v56  ;;  %vm4527_vm0 = vcmp.ge.f32.partialorder %v4271_v11, 0.0  ;;  %v4783_v25 = vmul.f32 0.01, %v4271_v11  ;;  %vm4404_vm1 = vcmp.ge.f32.partialorder %v4148_v57, 0.0 }
 0x2c4   : > { %v4911_v32 = vsel %vm4399_vm15, %v4143_v33, %v4655_v59  ;;  %v4660_v46 = vmul.f32 0.01, %v4148_v57  ;;  %vm4532_vm3 = vcmp.ge.f32.partialorder %v4276_v27, 0.0  ;;  %v4788_v52 = vmul.f32 0.01, %v4276_v27  ;;  %v10733_v59 = vld [vmem:[#allocation11_spill] sm:$0xff] }
 0x2c5   : > { %v6321_v53 = vunpack.c.l.b16 %v7710_v12  ;;  %v7580_v0 = vpack.c.bf16 %v4911_v32, %v4911_v32  ;;  %v5039_v21 = vsel %vm4527_vm0, %v4271_v11, %v4783_v25  ;;  %v2947_v8 = vrot.slane %v2946_v16, 1 }
 0x2c6   : > { %v6318_v40 = vunpack.c.l.b16 %v7707_v43  ;;  %v7708_v3 = vpack.c.bf16 %v5039_v21, %v5039_v21  ;;  %v4916_v56 = vsel %vm4404_vm1, %v4148_v57, %v4660_v46  ;;  %v3713_v38 = vrot.slane %v3712_v45, 2 }
 0x2c7   : > { %v6191_v35 = vunpack.c.l.b16 %v7580_v0  ;;  %v7585_v51 = vpack.c.bf16 %v4916_v56, %v4916_v56  ;;  %v9791_v50 = vsel %vm4532_vm3, %v4276_v27, %v4788_v52  ;;  %v2948_v61 = vmax.f32 %v2946_v16, %v2947_v8 }
 0x2c8   : > { %v6319_v37 = vunpack.c.l.b16 %v7708_v3  ;;  %v3714_v33 = vmax.f32 %v3712_v45, %v3713_v38  ;;  %v2961_v54 = vrot.slane %v10733_v59, 4  ;;  %v3729_v28 = vrot.slane %v10734_v55, 4 }
 0x2c9   : > { %v6505_v12 = vrot.slane %v6193_v36, 5  ;;  %v6729_v11 = vrot.slane %v6321_v53, 5  ;;  %v6501_v25 = vrot.slane %v6191_v35, 7  ;;  %v4146_v43 = vadd.f32 %v9777_v20, %v2948_v61 }
 0x2ca   : > { %v6725_v57 = vrot.slane %v6319_v37, 7  ;;  %v3715_v32 = vrot.slane %v3714_v33, 1  ;;  %v2962_v46 = vmax.f32 %v10733_v59, %v2961_v54  ;;  %v3730_v27 = vmax.f32 %v10734_v55, %v3729_v28 }
 0x2cb   : > { %v6502_v16 = vsel %vm6383_vm9, %v6501_v25, %v9768_v15  ;;  %v9802_v45 = vunpack.c.l.b16 %v7585_v51  ;;  %v7713_v52 = vpack.c.bf16 %v9791_v50, %v9791_v50  ;;  %vm4402_vm2 = vcmp.ge.f32.partialorder %v4146_v43, 0.0  ;;  %v9820_v25 = vpop.f32.mrb[90].mxu0 }
 0x2cc   : > { %v10735_v36 = vrot.slane %v9735_v48, 6  ;;  %v6726_v0 = vsel %vm6383_vm9, %v6725_v57, %v6318_v40  ;;  %v4658_v21 = vmul.f32 0.01, %v4146_v43  ;;  %v3716_v8 = vmax.f32 %v3714_v33, %v3715_v32  ;;  %v10737_v48 = vld [vmem:[#allocation3_spill] sm:$0xff] }
 0x2cd   : > { %v10736_v54 = vrot.slane %v9753_v19, 6  ;;  %v2963_v55 = vrot.slane %v2962_v46, 2  ;;  %v3731_v3 = vrot.slane %v3730_v27, 2  ;;  %v2949_v51 = vrot.slane %v10737_v48, 4 }
 0x2ce   : > { %v6504_v53 = vsel %vm6386_vm11, %v10735_v36, %v6502_v16  ;;  %v4914_v56 = vsel %vm4402_vm2, %v4146_v43, %v4658_v21  ;;  %v4274_v38 = vadd.f32 %v9777_v20, %v3716_v8  ;;  %v3717_v33 = vrot.slane %v9527_v60, 4  ;;  %v9823_v16 = vpop.f32.mrb[90].mxu1 }
 0x2cf   : > { %v6728_v28 = vsel %vm6386_vm11, %v10736_v54, %v6726_v0  ;;  %v6506_v15 = vsel %vm6389_vm12, %v6505_v12, %v6504_v53  ;;  %v7583_v61 = vpack.c.bf16 %v4914_v56, %v4914_v56  ;;  %v2964_v37 = vmax.f32 %v2962_v46, %v2963_v55 }
 0x2d0   : > { %v6730_v35 = vsel %vm6389_vm12, %v6729_v11, %v6728_v28  ;;  %v3732_v40 = vmax.f32 %v3730_v27, %v3731_v3  ;;  %vm4530_vm4 = vcmp.ge.f32.partialorder %v4274_v38, 0.0  ;;  %v4786_v19 = vmul.f32 0.01, %v4274_v38 }
 0x2d1   : > { %v2950_v59 = vmax.f32 %v10737_v48, %v2949_v51  ;;  %v2979_v12 = vrot.slane %v9536_v18, 4  ;;  %v6194_v43 = vunpack.c.l.b16 %v7583_v61  ;;  %v2965_v57 = vrot.slane %v2964_v37, 1 }
 0x2d2   : > { %v3733_v32 = vrot.slane %v3732_v40, 1  ;;  %v3718_v11 = vmax.f32 %v9527_v60, %v3717_v33  ;;  %v5042_v36 = vsel %vm4530_vm4, %v4274_v38, %v4786_v19  ;;  %v3747_v53 = vrot.slane %v9538_v62, 4 }
 0x2d3   : > { %v2951_v46 = vrot.slane %v2950_v59, 2  ;;  %v2980_v27 = vmax.f32 %v9536_v18, %v2979_v12  ;;  %v6507_v0 = vrot.slane %v6194_v43, 4  ;;  %v7711_v21 = vpack.c.bf16 %v5042_v36, %v5042_v36 }
 0x2d4   : > { %v2966_v8 = vmax.f32 %v2964_v37, %v2965_v57  ;;  %v3734_v54 = vmax.f32 %v3732_v40, %v3733_v32  ;;  %v3719_v55 = vrot.slane %v3718_v11, 2  ;;  %v3748_v56 = vmax.f32 %v9538_v62, %v3747_v53  ;;  %v9833_v40 = vpop.f32.mrb[91].mxu0  ;;  %v9835_v57 = vpop.f32.mrb[91].mxu1 }
 0x2d5   : > { %v2952_v28 = vmax.f32 %v2950_v59, %v2951_v46  ;;  %v2981_v3 = vrot.slane %v2980_v27, 2  ;;  %v9829_v48 = vsel %vm6392_vm14, %v6507_v0, %v6506_v15  ;;  %v6322_v60 = vunpack.c.l.b16 %v7711_v21 }
 0x2d6   : > { %v4149_v38 = vadd.f32 %v9777_v20, %v2966_v8  ;;  %v4277_v51 = vadd.f32 %v9777_v20, %v3734_v54  ;;  %v3720_v61 = vmax.f32 %v3718_v11, %v3719_v55  ;;  %v3749_v19 = vrot.slane %v3748_v56, 2  ;;  %v10738_v11 = vld [vmem:[#allocation4_spill] sm:$0xff] }
 0x2d7   : > { %v2953_v18 = vrot.slane %v2952_v28, 1  ;;  %v2982_v33 = vmax.f32 %v2980_v27, %v2981_v3  ;;  %v6731_v12 = vrot.slane %v6322_v60, 4  ;;  %v2967_v27 = vrot.slane %v10738_v11, 4 }
 0x2d8   : > { %vm4405_vm7 = vcmp.ge.f32.partialorder %v4149_v38, 0.0  ;;  %v4661_v37 = vmul.f32 0.01, %v4149_v38  ;;  %vm4533_vm10 = vcmp.ge.f32.partialorder %v4277_v51, 0.0  ;;  %v4789_v59 = vmul.f32 0.01, %v4277_v51 }
 0x2d9   : > { %v2954_v62 = vmax.f32 %v2952_v28, %v2953_v18  ;;  %v3721_v43 = vrot.slane %v3720_v61, 1  ;;  %v2983_v15 = vrot.slane %v2982_v33, 1  ;;  %v9838_v32 = vsel %vm6392_vm14, %v6731_v12, %v6730_v35 }
 0x2da   : > { %v4917_v36 = vsel %vm4405_vm7, %v4149_v38, %v4661_v37  ;;  %v3750_v46 = vmax.f32 %v3748_v56, %v3749_v19  ;;  %v5045_v0 = vsel %vm4533_vm10, %v4277_v51, %v4789_v59  ;;  %v2968_v28 = vmax.f32 %v10738_v11, %v2967_v27  ;;  %v9849_v37 = vpop.f32.mrb[92].mxu0  ;;  %v9851_v59 = vpop.f32.mrb[92].mxu1 }
 0x2db   : > { %v7586_v53 = vpack.c.bf16 %v4917_v36, %v4917_v36  ;;  %v4147_v21 = vadd.f32 %v9777_v20, %v2954_v62  ;;  %v3722_v8 = vmax.f32 %v3720_v61, %v3721_v43  ;;  %v7714_v54 = vpack.c.bf16 %v5045_v0, %v5045_v0  ;;  %v9853_v43 = vpop.f32.mrb[93].mxu0 }
 0x2dc   : > { %v2984_v55 = vmax.f32 %v2982_v33, %v2983_v15  ;;  %v3751_v3 = vrot.slane %v3750_v46, 1  ;;  %v6324_v60 = vunpack.c.l.b16 %v7713_v52  ;;  %v6511_v38 = vrot.slane %v9802_v45, 2 }
 0x2dd   : > { %vm4403_vm13 = vcmp.ge.f32.partialorder %v4147_v21, 0.0  ;;  %v4659_v35 = vmul.f32 0.01, %v4147_v21  ;;  %v4275_v56 = vadd.f32 %v9777_v20, %v3722_v8  ;;  %v2969_v19 = vrot.slane %v2968_v28, 2 }
 0x2de   : > { %v4152_v51 = vadd.f32 %v9777_v20, %v2984_v55  ;;  %v3752_v18 = vmax.f32 %v3750_v46, %v3751_v3  ;;  %v6197_v61 = vunpack.c.l.b16 %v7586_v53  ;;  %v6325_v50 = vunpack.c.l.b16 %v7714_v54 }
 0x2df   : > { %v4915_v12 = vsel %vm4403_vm13, %v4147_v21, %v4659_v35  ;;  %vm4531_vm15 = vcmp.ge.f32.partialorder %v4275_v56, 0.0  ;;  %v4787_v33 = vmul.f32 0.01, %v4275_v56  ;;  %v2970_v36 = vmax.f32 %v2968_v28, %v2969_v19 }
 0x2e0   : > { %v7584_v52 = vpack.c.bf16 %v4915_v12, %v4915_v12  ;;  %vm4408_vm0 = vcmp.ge.f32.partialorder %v4152_v51, 0.0  ;;  %v4664_v62 = vmul.f32 0.01, %v4152_v51  ;;  %v4280_v45 = vadd.f32 %v9777_v20, %v3752_v18 }
 0x2e1   : > { %v5043_v15 = vsel %vm4531_vm15, %v4275_v56, %v4787_v33  ;;  %v3735_v46 = vrot.slane %v9546_v31, 4  ;;  %v2985_v0 = vrot.slane %v9571_v39, 4  ;;  %v2971_v54 = vrot.slane %v2970_v36, 1  ;;  %v9862_v33 = vpop.f32.mrb[93].mxu1 }
 0x2e2   : > { %v6195_v11 = vunpack.c.l.b16 %v7584_v52  ;;  %v7712_v27 = vpack.c.bf16 %v5043_v15, %v5043_v15  ;;  %v4920_v53 = vsel %vm4408_vm0, %v4152_v51, %v4664_v62  ;;  %vm4536_vm1 = vcmp.ge.f32.partialorder %v4280_v45, 0.0 }
 0x2e3   : > { %v7589_v21 = vpack.c.bf16 %v4920_v53, %v4920_v53  ;;  %v4792_v8 = vmul.f32 0.01, %v4280_v45  ;;  %v3736_v35 = vmax.f32 %v9546_v31, %v3735_v46  ;;  %v2986_v56 = vmax.f32 %v9571_v39, %v2985_v0 }
 0x2e4   : > { %v6509_v55 = vrot.slane %v6195_v11, 3  ;;  %v6323_v3 = vunpack.c.l.b16 %v7712_v27  ;;  %v6735_v12 = vrot.slane %v6324_v60, 2  ;;  %v6513_v18 = vrot.slane %v6197_v61, 1 }
 0x2e5   : > { %v9860_v28 = vunpack.c.l.b16 %v7589_v21  ;;  %v2972_v19 = vmax.f32 %v2970_v36, %v2971_v54  ;;  %v5048_v62 = vsel %vm4536_vm1, %v4280_v45, %v4792_v8  ;;  %v3737_v15 = vrot.slane %v3736_v35, 2 }
 0x2e6   : > { %v6510_v51 = vsel %vm6395_vm5, %v6509_v55, %v9829_v48  ;;  %v6733_v52 = vrot.slane %v6323_v3, 3  ;;  %v2987_v46 = vrot.slane %v2986_v56, 2  ;;  %v3753_v39 = vrot.slane %v9574_v5, 4 }
 0x2e7   : > { %v6512_v11 = vsel %vm6398_vm6, %v6511_v38, %v6510_v51  ;;  %v4150_v31 = vadd.f32 %v9777_v20, %v2972_v19  ;;  %v6737_v60 = vrot.slane %v6325_v50, 1  ;;  %v3738_v27 = vmax.f32 %v3736_v35, %v3737_v15  ;;  %v9879_v19 = vpop.f32.mrb[94].mxu0 }
 0x2e8   : > { %v6514_v61 = vsel %vm6401_vm8, %v6513_v18, %v6512_v11  ;;  %v6734_v36 = vsel %vm6395_vm5, %v6733_v52, %v9838_v32  ;;  %v7717_v0 = vpack.c.bf16 %v5048_v62, %v5048_v62  ;;  %v2988_v8 = vmax.f32 %v2986_v56, %v2987_v46  ;;  %v9889_v46 = vpop.f32.mrb[94].mxu1 }
 0x2e9   : > { %v6845_v53 = vpack.c.b16 %v6514_v61, %v6514_v61  ;;  %v6736_v48 = vsel %vm6398_vm6, %v6735_v12, %v6734_v36  ;;  %vm4406_vm3 = vcmp.ge.f32.partialorder %v4150_v31, 0.0  ;;  %v4662_v45 = vmul.f32 0.01, %v4150_v31 }
 0x2ea   : > { %v6738_v38 = vsel %vm6401_vm8, %v6737_v60, %v6736_v48  ;;  %v3739_v21 = vrot.slane %v3738_v27, 1  ;;  %v3754_v55 = vmax.f32 %v9574_v5, %v3753_v39  ;;  %v2973_v32 = vrot.slane %v9584_v24, 4 }
 0x2eb   : > { %6909 = vst [vmem:[%s8849_s29 + $0x20] sm:$0xf] %v6845_v53  ;;  %v6861_v54 = vpack.c.b16 %v6738_v38, %v6738_v38  ;;  %v4918_v3 = vsel %vm4406_vm3, %v4150_v31, %v4662_v45  ;;  %v2989_v18 = vrot.slane %v2988_v8, 1  ;;  %v3741_v12 = vrot.slane %v9586_v10, 4 }
 0x2ec   : > { %v3740_v35 = vmax.f32 %v3738_v27, %v3739_v21  ;;  %v3755_v51 = vrot.slane %v3754_v55, 2  ;;  %v2974_v52 = vmax.f32 %v9584_v24, %v2973_v32  ;;  %v3003_v56 = vrot.slane %v9600_v47, 4 }
 0x2ed   : > { %6925 = vst [vmem:[%s8849_s29 + $0x60] sm:$0xf] %v6861_v54  ;;  %v3771_v62 = vrot.slane %v9602_v41, 4  ;;  %v9885_v15 = vunpack.c.l.b16 %v7717_v0  ;;  %v2990_v11 = vmax.f32 %v2988_v8, %v2989_v18  ;;  %v3742_v31 = vmax.f32 %v9586_v10, %v3741_v12  ;;  %v9896_v12 = vpop.f32.mrb[95].mxu0 }
 0x2ee   : > { %v4278_v5 = vadd.f32 %v9777_v20, %v3740_v35  ;;  %v3756_v39 = vmax.f32 %v3754_v55, %v3755_v51  ;;  %v2975_v60 = vrot.slane %v2974_v52, 2  ;;  %v3004_v61 = vmax.f32 %v9600_v47, %v3003_v56 }
 0x2ef   : > { %v3772_v36 = vmax.f32 %v9602_v41, %v3771_v62  ;;  %v7587_v24 = vpack.c.bf16 %v4918_v3, %v4918_v3  ;;  %v4153_v53 = vadd.f32 %v9777_v20, %v2990_v11  ;;  %v3743_v48 = vrot.slane %v3742_v31, 2  ;;  %v9899_v11 = vpop.f32.mrb[95].mxu1 }
 0x2f0   : > { %v4790_v27 = vmul.f32 0.01, %v4278_v5  ;;  %v3757_v45 = vrot.slane %v3756_v39, 1  ;;  %v2976_v38 = vmax.f32 %v2974_v52, %v2975_v60  ;;  %v3005_v0 = vrot.slane %v3004_v61, 2 }
 0x2f1   : > { %v3773_v21 = vrot.slane %v3772_v36, 2  ;;  %vm4534_vm2 = vcmp.ge.f32.partialorder %v4278_v5, 0.0  ;;  %vm4409_vm4 = vcmp.ge.f32.partialorder %v4153_v53, 0.0  ;;  %v4665_v10 = vmul.f32 0.01, %v4153_v53 }
 0x2f2   : > { %v3744_v8 = vmax.f32 %v3742_v31, %v3743_v48  ;;  %v3758_v55 = vmax.f32 %v3756_v39, %v3757_v45  ;;  %v2977_v32 = vrot.slane %v2976_v38, 1  ;;  %v3006_v47 = vmax.f32 %v3004_v61, %v3005_v0 }
 0x2f3   : > { %v4921_v35 = vsel %vm4409_vm4, %v4153_v53, %v4665_v10  ;;  %v3774_v3 = vmax.f32 %v3772_v36, %v3773_v21  ;;  %v2991_v18 = vrot.slane %v9604_v7, 4  ;;  %v6198_v51 = vunpack.c.l.b16 %v7587_v24 }
 0x2f4   : > { %v3745_v41 = vrot.slane %v3744_v8, 1  ;;  %v5046_v52 = vsel %vm4534_vm2, %v4278_v5, %v4790_v27  ;;  %v4281_v56 = vadd.f32 %v9777_v20, %v3758_v55  ;;  %v2978_v62 = vmax.f32 %v2976_v38, %v2977_v32 }
 0x2f5   : > { %v3007_v60 = vrot.slane %v3006_v47, 1  ;;  %v3775_v48 = vrot.slane %v3774_v3, 1  ;;  %v2992_v39 = vmax.f32 %v9604_v7, %v2991_v18  ;;  %v7590_v61 = vpack.c.bf16 %v4921_v35, %v4921_v35  ;;  %v9907_v18 = vpop.f32.mrb[96].mxu0 }
 0x2f6   : > { %v3746_v31 = vmax.f32 %v3744_v8, %v3745_v41  ;;  %vm4537_vm7 = vcmp.ge.f32.partialorder %v4281_v56, 0.0  ;;  %v4793_v53 = vmul.f32 0.01, %v4281_v56  ;;  %v4151_v36 = vadd.f32 %v9777_v20, %v2978_v62  ;;  %v9911_v62 = vpop.f32.mrb[97].mxu0 }
 0x2f7   : > { %v3008_v0 = vmax.f32 %v3006_v47, %v3007_v60  ;;  %v3776_v24 = vmax.f32 %v3774_v3, %v3775_v48  ;;  %v2993_v5 = vrot.slane %v2992_v39, 2  ;;  %v7715_v27 = vpack.c.bf16 %v5046_v52, %v5046_v52  ;;  %v9909_v47 = vpop.f32.mrb[96].mxu1  ;;  %10739 = vst [vmem:[#allocation11_spill] sm:$0xff] %v9911_v62 }
 0x2f8   : > { %v4279_v45 = vadd.f32 %v9777_v20, %v3746_v31  ;;  %v5049_v21 = vsel %vm4537_vm7, %v4281_v56, %v4793_v53  ;;  %vm4407_vm10 = vcmp.ge.f32.partialorder %v4151_v36, 0.0  ;;  %v4663_v38 = vmul.f32 0.01, %v4151_v36 }
 0x2f9   : > { %v7718_v10 = vpack.c.bf16 %v5049_v21, %v5049_v21  ;;  %v4156_v55 = vadd.f32 %v9777_v20, %v3008_v0  ;;  %v4284_v32 = vadd.f32 %v9777_v20, %v3776_v24  ;;  %v2994_v35 = vmax.f32 %v2992_v39, %v2993_v5 }
 0x2fa   : > { %vm4535_vm13 = vcmp.ge.f32.partialorder %v4279_v45, 0.0  ;;  %v4791_v8 = vmul.f32 0.01, %v4279_v45  ;;  %v4919_v7 = vsel %vm4407_vm10, %v4151_v36, %v4663_v38  ;;  %v3759_v41 = vrot.slane %v9613_v30, 4 }
 0x2fb   : > { %v6201_v3 = vunpack.c.l.b16 %v7590_v61  ;;  %v7588_v52 = vpack.c.bf16 %v4919_v7, %v4919_v7  ;;  %vm4412_vm15 = vcmp.ge.f32.partialorder %v4156_v55, 0.0  ;;  %v6329_v31 = vunpack.c.l.b16 %v7718_v10 }
 0x2fc   : > { %v5047_v56 = vsel %vm4535_vm13, %v4279_v45, %v4791_v8  ;;  %v4668_v48 = vmul.f32 0.01, %v4156_v55  ;;  %v4796_v53 = vmul.f32 0.01, %v4284_v32  ;;  %vm4540_vm0 = vcmp.ge.f32.partialorder %v4284_v32, 0.0 }
 0x2fd   : > { %v7716_v60 = vpack.c.bf16 %v5047_v56, %v5047_v56  ;;  %v6199_v36 = vunpack.c.l.b16 %v7588_v52  ;;  %v2995_v0 = vrot.slane %v2994_v35, 1  ;;  %v3760_v39 = vmax.f32 %v9613_v30, %v3759_v41 }
 0x2fe   : > { %v6326_v24 = vunpack.c.l.b16 %v7715_v27  ;;  %v4924_v21 = vsel %vm4412_vm15, %v4156_v55, %v4668_v48  ;;  %v3009_v38 = vrot.slane %v9630_v42, 4  ;;  %v6519_v61 = vrot.slane %v6201_v3, 5  ;;  %v9921_v55 = vpop.f32.mrb[97].mxu1 }
 0x2ff   : > { %v6327_v5 = vunpack.c.l.b16 %v7716_v60  ;;  %v6515_v7 = vrot.slane %v6199_v36, 7  ;;  %v7593_v45 = vpack.c.bf16 %v4924_v21, %v4924_v21  ;;  %v2996_v8 = vmax.f32 %v2994_v35, %v2995_v0 }
 0x300   : > { %v9915_v50 = vsel %vm4540_vm0, %v4284_v32, %v4796_v53  ;;  %v3761_v10 = vrot.slane %v3760_v39, 2  ;;  %v3010_v56 = vmax.f32 %v9630_v42, %v3009_v38  ;;  %v6743_v52 = vrot.slane %v6329_v31, 5 }
 0x301   : > { %v6739_v54 = vrot.slane %v6327_v5, 7  ;;  %v6516_v62 = vsel %vm6383_vm9, %v6515_v7, %v6198_v51  ;;  %v4154_v30 = vadd.f32 %v9777_v20, %v2996_v8  ;;  %v3777_v27 = vrot.slane %v9640_v23, 4  ;;  %v9942_v8 = vpop.f32.mrb[98].mxu0 }
 0x302   : > { %v10740_v41 = vrot.slane %v9860_v28, 6  ;;  %v3762_v32 = vmax.f32 %v3760_v39, %v3761_v10  ;;  %v3011_v60 = vrot.slane %v3010_v56, 2  ;;  %v10741_v48 = vrot.slane %v9885_v15, 6 }
 0x303   : > { %v6740_v35 = vsel %vm6383_vm9, %v6739_v54, %v6326_v24  ;;  %v9930_v31 = vunpack.c.l.b16 %v7593_v45  ;;  %v7721_v51 = vpack.c.bf16 %v9915_v50, %v9915_v50  ;;  %vm4410_vm1 = vcmp.ge.f32.partialorder %v4154_v30, 0.0 }
 0x304   : > { %v6518_v3 = vsel %vm6386_vm11, %v10740_v41, %v6516_v62  ;;  %v6742_v42 = vsel %vm6386_vm11, %v10741_v48, %v6740_v35  ;;  %v4666_v53 = vmul.f32 0.01, %v4154_v30  ;;  %v3763_v28 = vrot.slane %v3762_v32, 1 }
 0x305   : > { %v6520_v36 = vsel %vm6389_vm12, %v6519_v61, %v6518_v3  ;;  %v6744_v62 = vsel %vm6389_vm12, %v6743_v52, %v6742_v42  ;;  %v3012_v0 = vmax.f32 %v3010_v56, %v3011_v60  ;;  %v3778_v54 = vmax.f32 %v9640_v23, %v3777_v27 }
 0x306   : > { %v2997_v39 = vrot.slane %v9647_v22, 4  ;;  %v3765_v15 = vrot.slane %v9650_v14, 4  ;;  %v4922_v24 = vsel %vm4410_vm1, %v4154_v30, %v4666_v53  ;;  %v3764_v5 = vmax.f32 %v3762_v32, %v3763_v28  ;;  %v9948_v30 = vpop.f32.mrb[98].mxu1 }
 0x307   : > { %v3027_v21 = vrot.slane %v9658_v49, 4  ;;  %v3795_v50 = vrot.slane %v9660_v4, 4  ;;  %v7591_v38 = vpack.c.bf16 %v4922_v24, %v4922_v24  ;;  %v3013_v7 = vrot.slane %v3012_v0, 1 }
 0x308   : > { %v3779_v45 = vrot.slane %v3778_v54, 2  ;;  %v2998_v61 = vmax.f32 %v9647_v22, %v2997_v39  ;;  %v4282_v10 = vadd.f32 %v9777_v20, %v3764_v5  ;;  %v3766_v23 = vmax.f32 %v9650_v14, %v3765_v15 }
 0x309   : > { %v3028_v56 = vmax.f32 %v9658_v49, %v3027_v21  ;;  %v3796_v52 = vmax.f32 %v9660_v4, %v3795_v50  ;;  %v6202_v27 = vunpack.c.l.b16 %v7591_v38  ;;  %v3014_v41 = vmax.f32 %v3012_v0, %v3013_v7  ;;  %v9954_v38 = vpop.f32.mrb[99].mxu0 }
 0x30a   : > { %v3780_v3 = vmax.f32 %v3778_v54, %v3779_v45  ;;  %v2999_v35 = vrot.slane %v2998_v61, 2  ;;  %vm4538_vm3 = vcmp.ge.f32.partialorder %v4282_v10, 0.0  ;;  %v4794_v32 = vmul.f32 0.01, %v4282_v10 }
 0x30b   : > { %v3767_v60 = vrot.slane %v3766_v23, 2  ;;  %v3029_v22 = vrot.slane %v3028_v56, 2  ;;  %v6521_v48 = vrot.slane %v6202_v27, 4  ;;  %v4157_v42 = vadd.f32 %v9777_v20, %v3014_v41 }
 0x30c   : > { %v3781_v53 = vrot.slane %v3780_v3, 1  ;;  %v3000_v28 = vmax.f32 %v2998_v61, %v2999_v35  ;;  %v5050_v14 = vsel %vm4538_vm3, %v4282_v10, %v4794_v32  ;;  %v3797_v15 = vrot.slane %v3796_v52, 2  ;;  %v10742_v61 = vld [vmem:[#allocation5_spill] sm:$0xff] }
 0x30d   : > { %v3768_v39 = vmax.f32 %v3766_v23, %v3767_v60  ;;  %v3030_v49 = vmax.f32 %v3028_v56, %v3029_v22  ;;  %v9952_v4 = vsel %vm6392_vm14, %v6521_v48, %v6520_v36  ;;  %v7719_v24 = vpack.c.bf16 %v5050_v14, %v5050_v14  ;;  %v9960_v22 = vpop.f32.mrb[99].mxu1 }
 0x30e   : > { %vm4413_vm2 = vcmp.ge.f32.partialorder %v4157_v42, 0.0  ;;  %v4669_v0 = vmul.f32 0.01, %v4157_v42  ;;  %v3782_v54 = vmax.f32 %v3780_v3, %v3781_v53  ;;  %v3001_v5 = vrot.slane %v3000_v28, 1 }
 0x30f   : > { %v3769_v21 = vrot.slane %v3768_v39, 1  ;;  %v3031_v50 = vrot.slane %v3030_v49, 1  ;;  %v6330_v7 = vunpack.c.l.b16 %v7719_v24  ;;  %v3798_v27 = vmax.f32 %v3796_v52, %v3797_v15 }
 0x310   : > { %v4925_v45 = vsel %vm4413_vm2, %v4157_v42, %v4669_v0  ;;  %v3015_v10 = vrot.slane %v10742_v61, 4  ;;  %v4285_v56 = vadd.f32 %v9777_v20, %v3782_v54  ;;  %v3002_v41 = vmax.f32 %v3000_v28, %v3001_v5 }
 0x311   : > { %v7594_v23 = vpack.c.bf16 %v4925_v45, %v4925_v45  ;;  %v3770_v36 = vmax.f32 %v3768_v39, %v3769_v21  ;;  %v9958_v35 = vunpack.c.l.b16 %v7721_v51  ;;  %v6745_v32 = vrot.slane %v6330_v7, 4 }
 0x312   : > { %v3032_v60 = vmax.f32 %v3030_v49, %v3031_v50  ;;  %v3799_v3 = vrot.slane %v3798_v27, 1  ;;  %vm4541_vm4 = vcmp.ge.f32.partialorder %v4285_v56, 0.0  ;;  %v4797_v48 = vmul.f32 0.01, %v4285_v56 }
 0x313   : > { %v4155_v53 = vadd.f32 %v9777_v20, %v3002_v41  ;;  %v3016_v52 = vmax.f32 %v10742_v61, %v3015_v10  ;;  %v6746_v42 = vsel %vm6392_vm14, %v6745_v32, %v6744_v62  ;;  %v4283_v14 = vadd.f32 %v9777_v20, %v3770_v36  ;;  %v9969_v10 = vpop.f32.mrb[100].mxu0 }
 0x314   : > { %v4160_v28 = vadd.f32 %v9777_v20, %v3032_v60  ;;  %v3800_v39 = vmax.f32 %v3798_v27, %v3799_v3  ;;  %v6205_v51 = vunpack.c.l.b16 %v7594_v23  ;;  %v5053_v15 = vsel %vm4541_vm4, %v4285_v56, %v4797_v48  ;;  %v9971_v27 = vpop.f32.mrb[100].mxu1  ;;  %v9974_v32 = vpop.f32.mrb[101].mxu0 }
 0x315   : > { %vm4411_vm7 = vcmp.ge.f32.partialorder %v4155_v53, 0.0  ;;  %v4667_v49 = vmul.f32 0.01, %v4155_v53  ;;  %v7722_v24 = vpack.c.bf16 %v5053_v15, %v5053_v15  ;;  %vm4539_vm10 = vcmp.ge.f32.partialorder %v4283_v14, 0.0 }
 0x316   : > { %v4795_v0 = vmul.f32 0.01, %v4283_v14  ;;  %vm4416_vm13 = vcmp.ge.f32.partialorder %v4160_v28, 0.0  ;;  %v4672_v5 = vmul.f32 0.01, %v4160_v28  ;;  %v4288_v21 = vadd.f32 %v9777_v20, %v3800_v39 }
 0x317   : > { %v4923_v54 = vsel %vm4411_vm7, %v4155_v53, %v4667_v49  ;;  %v3017_v50 = vrot.slane %v3016_v52, 2  ;;  %v6333_v7 = vunpack.c.l.b16 %v7722_v24  ;;  %v3783_v61 = vrot.slane %v9672_v1, 4 }
 0x318   : > { %v7592_v62 = vpack.c.bf16 %v4923_v54, %v4923_v54  ;;  %v5051_v45 = vsel %vm4539_vm10, %v4283_v14, %v4795_v0  ;;  %v6525_v23 = vrot.slane %v9930_v31, 2  ;;  %v4928_v41 = vsel %vm4416_vm13, %v4160_v28, %v4672_v5  ;;  %v9979_v54 = vpop.f32.mrb[101].mxu1 }
 0x319   : > { %v7720_v56 = vpack.c.bf16 %v5051_v45, %v5051_v45  ;;  %v4800_v36 = vmul.f32 0.01, %v4288_v21  ;;  %v7597_v3 = vpack.c.bf16 %v4928_v41, %v4928_v41  ;;  %vm4544_vm15 = vcmp.ge.f32.partialorder %v4288_v21, 0.0 }
 0x31a   : > { %v6203_v60 = vunpack.c.l.b16 %v7592_v62  ;;  %v3018_v48 = vmax.f32 %v3016_v52, %v3017_v50  ;;  %v6749_v53 = vrot.slane %v9958_v35, 2  ;;  %v3784_v39 = vmax.f32 %v9672_v1, %v3783_v61 }
 0x31b   : > { %v6331_v14 = vunpack.c.l.b16 %v7720_v56  ;;  %v3033_v15 = vrot.slane %v9693_v44, 4  ;;  %v6527_v49 = vrot.slane %v6205_v51, 1  ;;  %v6751_v24 = vrot.slane %v6333_v7, 1 }
 0x31c   : > { %v6523_v0 = vrot.slane %v6203_v60, 3  ;;  %v3019_v31 = vrot.slane %v3018_v48, 1  ;;  %v5056_v5 = vsel %vm4544_vm15, %v4288_v21, %v4800_v36  ;;  %v3785_v45 = vrot.slane %v3784_v39, 2 }
 0x31d   : > { %v6747_v28 = vrot.slane %v6331_v14, 3  ;;  %v3034_v62 = vmax.f32 %v9693_v44, %v3033_v15  ;;  %v9984_v35 = vunpack.c.l.b16 %v7597_v3  ;;  %v3801_v1 = vrot.slane %v9699_v6, 4  ;;  %v9993_v14 = vpop.f32.mrb[102].mxu0 }
 0x31e   : > { %v6524_v52 = vsel %vm6395_vm5, %v6523_v0, %v9952_v4  ;;  %v3020_v50 = vmax.f32 %v3018_v48, %v3019_v31  ;;  %v3786_v61 = vmax.f32 %v3784_v39, %v3785_v45  ;;  %v7725_v44 = vpack.c.bf16 %v5056_v5, %v5056_v5 }
 0x31f   : > { %v6526_v51 = vsel %vm6398_vm6, %v6525_v23, %v6524_v52  ;;  %v6748_v7 = vsel %vm6395_vm5, %v6747_v28, %v6746_v42  ;;  %v3035_v56 = vrot.slane %v3034_v62, 2  ;;  %v3802_v39 = vmax.f32 %v9699_v6, %v3801_v1 }
 0x320   : > { %v6528_v21 = vsel %vm6401_vm8, %v6527_v49, %v6526_v51  ;;  %v6750_v41 = vsel %vm6398_vm6, %v6749_v53, %v6748_v7  ;;  %v4158_v4 = vadd.f32 %v9777_v20, %v3020_v50  ;;  %v3787_v3 = vrot.slane %v3786_v61, 1 }
 0x321   : > { %v6846_v36 = vpack.c.b16 %v6528_v21, %v6528_v21  ;;  %v6752_v60 = vsel %vm6401_vm8, %v6751_v24, %v6750_v41  ;;  %v3036_v48 = vmax.f32 %v3034_v62, %v3035_v56  ;;  %v3021_v53 = vrot.slane %v9705_v34, 4 }
 0x322   : > { %v6862_v23 = vpack.c.b16 %v6752_v60, %v6752_v60  ;;  %vm4414_vm0 = vcmp.ge.f32.partialorder %v4158_v4, 0.0  ;;  %v4670_v42 = vmul.f32 0.01, %v4158_v4  ;;  %v3788_v15 = vmax.f32 %v3786_v61, %v3787_v3 }
 0x323   : > { %6910 = vst [vmem:[%s8849_s29 + $0x24] sm:$0xf] %v6846_v36  ;;  %v3037_v49 = vrot.slane %v3036_v48, 1  ;;  %v3789_v0 = vrot.slane %v9711_v9, 4  ;;  %v3803_v28 = vrot.slane %v3802_v39, 2  ;;  %v3051_v24 = vrot.slane %v9720_v63, 4 }
 0x324   : > { %6926 = vst [vmem:[%s8849_s29 + $0x64] sm:$0xf] %v6862_v23  ;;  %v4926_v31 = vsel %vm4414_vm0, %v4158_v4, %v4670_v42  ;;  %v3819_v5 = vrot.slane %v9722_v29, 4  ;;  %v10002_v45 = vunpack.c.l.b16 %v7725_v44  ;;  %v4286_v62 = vadd.f32 %v9777_v20, %v3788_v15  ;;  %v10011_v44 = vpop.f32.mrb[102].mxu1 }
 0x325   : > { %v3038_v52 = vmax.f32 %v3036_v48, %v3037_v49  ;;  %v3022_v6 = vmax.f32 %v9705_v34, %v3021_v53  ;;  %v3804_v50 = vmax.f32 %v3802_v39, %v3803_v28  ;;  %v3790_v1 = vmax.f32 %v9711_v9, %v3789_v0  ;;  %v10013_v48 = vpop.f32.mrb[103].mxu0 }
 0x326   : > { %v3052_v51 = vmax.f32 %v9720_v63, %v3051_v24  ;;  %v3820_v7 = vmax.f32 %v9722_v29, %v3819_v5  ;;  %v7595_v56 = vpack.c.bf16 %v4926_v31, %v4926_v31  ;;  %v4798_v21 = vmul.f32 0.01, %v4286_v62  ;;  %10743 = vst [vmem:[#allocation2_spill] sm:$0xff] %v10013_v48  ;;  %v10020_v5 = vpop.f32.mrb[103].mxu1 }
 0x327   : > { %v4161_v41 = vadd.f32 %v9777_v20, %v3038_v52  ;;  %v3805_v4 = vrot.slane %v3804_v50, 1  ;;  %v3023_v36 = vrot.slane %v3022_v6, 2  ;;  %v3791_v60 = vrot.slane %v3790_v1, 2 }
 0x328   : > { %v3053_v3 = vrot.slane %v3052_v51, 2  ;;  %vm4542_vm1 = vcmp.ge.f32.partialorder %v4286_v62, 0.0  ;;  %v3821_v9 = vrot.slane %v3820_v7, 2  ;;  %v3039_v53 = vrot.slane %v9725_v17, 4 }
 0x329   : > { %vm4417_vm3 = vcmp.ge.f32.partialorder %v4161_v41, 0.0  ;;  %v4673_v34 = vmul.f32 0.01, %v4161_v41  ;;  %v3806_v29 = vmax.f32 %v3804_v50, %v3805_v4  ;;  %v3024_v23 = vmax.f32 %v3022_v6, %v3023_v36 }
 0x32a   : > { %v3792_v42 = vmax.f32 %v3790_v1, %v3791_v60  ;;  %v3054_v15 = vmax.f32 %v3052_v51, %v3053_v3  ;;  %v3822_v49 = vmax.f32 %v3820_v7, %v3821_v9  ;;  %v10017_v0 = vunpack.c.l.b16 %v7595_v56 }
 0x32b   : > { %v4929_v39 = vsel %vm4417_vm3, %v4161_v41, %v4673_v34  ;;  %v5054_v31 = vsel %vm4542_vm1, %v4286_v62, %v4798_v21  ;;  %v4289_v28 = vadd.f32 %v9777_v20, %v3806_v29  ;;  %v3025_v24 = vrot.slane %v3024_v23, 1 }
 0x32c   : > { %v3793_v52 = vrot.slane %v3792_v42, 1  ;;  %v3055_v61 = vrot.slane %v3054_v15, 1  ;;  %v3823_v48 = vrot.slane %v3822_v49, 1  ;;  %v3040_v50 = vmax.f32 %v9725_v17, %v3039_v53 }
 0x32d   : > { %v7598_v6 = vpack.c.bf16 %v4929_v39, %v4929_v39  ;;  %vm4545_vm2 = vcmp.ge.f32.partialorder %v4289_v28, 0.0  ;;  %v4801_v1 = vmul.f32 0.01, %v4289_v28  ;;  %v3026_v51 = vmax.f32 %v3024_v23, %v3025_v24  ;;  %v10029_v39 = vpop.f32.mrb[104].mxu0 }
 0x32e   : > { %v3794_v7 = vmax.f32 %v3792_v42, %v3793_v52  ;;  %v3056_v41 = vmax.f32 %v3054_v15, %v3055_v61  ;;  %v3824_v4 = vmax.f32 %v3822_v49, %v3823_v48  ;;  %v3041_v56 = vrot.slane %v3040_v50, 2  ;;  %v10031_v15 = vpop.f32.mrb[104].mxu1 }
 0x32f   : > { %v7723_v36 = vpack.c.bf16 %v5054_v31, %v5054_v31  ;;  %v5057_v62 = vsel %vm4545_vm2, %v4289_v28, %v4801_v1  ;;  %v4159_v21 = vadd.f32 %v9777_v20, %v3026_v51  ;;  %v3807_v60 = vrot.slane %v9730_v2, 4  ;;  %v10033_v28 = vpop.f32.mrb[105].mxu0 }
 0x330   : > { %v7726_v3 = vpack.c.bf16 %v5057_v62, %v5057_v62  ;;  %v4287_v34 = vadd.f32 %v9777_v20, %v3794_v7  ;;  %v4164_v9 = vadd.f32 %v9777_v20, %v3056_v41  ;;  %v4292_v17 = vadd.f32 %v9777_v20, %v3824_v4  ;;  %10744 = vst [vmem:[#allocation3_spill] sm:$0xff] %v10033_v28  ;;  %v10039_v28 = vpop.f32.mrb[105].mxu1 }
 0x331   : > { %vm4415_vm4 = vcmp.ge.f32.partialorder %v4159_v21, 0.0  ;;  %v4671_v29 = vmul.f32 0.01, %v4159_v21  ;;  %v3042_v23 = vmax.f32 %v3040_v50, %v3041_v56  ;;  %v3808_v61 = vmax.f32 %v9730_v2, %v3807_v60 }
 0x332   : > { %v6209_v48 = vunpack.c.l.b16 %v7598_v6  ;;  %vm4543_vm7 = vcmp.ge.f32.partialorder %v4287_v34, 0.0  ;;  %v4799_v42 = vmul.f32 0.01, %v4287_v34  ;;  %vm4420_vm10 = vcmp.ge.f32.partialorder %v4164_v9, 0.0 }
 0x333   : > { %v4927_v49 = vsel %vm4415_vm4, %v4159_v21, %v4671_v29  ;;  %v4676_v53 = vmul.f32 0.01, %v4164_v9  ;;  %vm4548_vm13 = vcmp.ge.f32.partialorder %v4292_v17, 0.0  ;;  %v4804_v31 = vmul.f32 0.01, %v4292_v17  ;;  %v10745_v29 = vld [vmem:[#allocation6_spill] sm:$0xff] }
 0x334   : > { %v6337_v20 = vunpack.c.l.b16 %v7726_v3  ;;  %v7596_v24 = vpack.c.bf16 %v4927_v49, %v4927_v49  ;;  %v5055_v52 = vsel %vm4543_vm7, %v4287_v34, %v4799_v42  ;;  %v3043_v50 = vrot.slane %v3042_v23, 1 }
 0x335   : > { %v6334_v1 = vunpack.c.l.b16 %v7723_v36  ;;  %v7724_v2 = vpack.c.bf16 %v5055_v52, %v5055_v52  ;;  %v4932_v6 = vsel %vm4420_vm10, %v4164_v9, %v4676_v53  ;;  %v3809_v51 = vrot.slane %v3808_v61, 2  ;;  %v10044_v36 = vld [vmem:[%s10624_s2] ss:$0 sm:$0xff] }
 0x336   : > { %v6207_v7 = vunpack.c.l.b16 %v7596_v24  ;;  %v7601_v41 = vpack.c.bf16 %v4932_v6, %v4932_v6  ;;  %v10035_v4 = vsel %vm4548_vm13, %v4292_v17, %v4804_v31  ;;  %v3044_v56 = vmax.f32 %v3042_v23, %v3043_v50 }
 0x337   : > { %v6335_v62 = vunpack.c.l.b16 %v7724_v2  ;;  %v3810_v21 = vmax.f32 %v3808_v61, %v3809_v51  ;;  %v3057_v60 = vrot.slane %v9744_v26, 4  ;;  %v3825_v63 = vrot.slane %v10745_v29, 4 }
 0x338   : > { %v6533_v3 = vrot.slane %v6209_v48, 5  ;;  %v6757_v34 = vrot.slane %v6337_v20, 5  ;;  %v6529_v42 = vrot.slane %v6207_v7, 7  ;;  %v4162_v9 = vadd.f32 %v10044_v36, %v3044_v56 }
 0x339   : > { %v6753_v17 = vrot.slane %v6335_v62, 7  ;;  %v3811_v23 = vrot.slane %v3810_v21, 1  ;;  %v3058_v61 = vmax.f32 %v9744_v26, %v3057_v60  ;;  %v3826_v49 = vmax.f32 %v10745_v29, %v3825_v63 }
 0x33a   : > { %v6530_v53 = vsel %vm6383_vm9, %v6529_v42, %v10017_v0  ;;  %v10051_v31 = vunpack.c.l.b16 %v7601_v41  ;;  %vm4418_vm15 = vcmp.ge.f32.partialorder %v4162_v9, 0.0  ;;  %v10746_v20 = vrot.slane %v9984_v35, 6  ;;  %v10748_v35 = vld [vmem:[#allocation7_spill] sm:$0xff] }
 0x33b   : > { %v6754_v52 = vsel %vm6383_vm9, %v6753_v17, %v6334_v1  ;;  %v4674_v50 = vmul.f32 0.01, %v4162_v9  ;;  %v3812_v2 = vmax.f32 %v3810_v21, %v3811_v23  ;;  %v10747_v26 = vrot.slane %v10002_v45, 6  ;;  %v10749_v17 = vld [vmem:[#allocation8_spill] sm:$0xff]  ;;  %v10069_v23 = vpop.f32.mrb[106].mxu0 }
 0x33c   : > { %v6532_v24 = vsel %vm6386_vm11, %v10746_v20, %v6530_v53  ;;  %v3059_v6 = vrot.slane %v3058_v61, 2  ;;  %v3827_v51 = vrot.slane %v3826_v49, 2  ;;  %v3045_v62 = vrot.slane %v10748_v35, 4 }
 0x33d   : > { %v6756_v63 = vsel %vm6386_vm11, %v10747_v26, %v6754_v52  ;;  %v6534_v0 = vsel %vm6389_vm12, %v6533_v3, %v6532_v24  ;;  %v4930_v7 = vsel %vm4418_vm15, %v4162_v9, %v4674_v50  ;;  %v4290_v41 = vadd.f32 %v10044_v36, %v3812_v2  ;;  %v10072_v24 = vpop.f32.mrb[106].mxu1  ;;  %v10750_v50 = vld [vmem:[#allocation9_spill] sm:$0xff] }
 0x33e   : > { %v6758_v56 = vsel %vm6389_vm12, %v6757_v34, %v6756_v63  ;;  %v7599_v60 = vpack.c.bf16 %v4930_v7, %v4930_v7  ;;  %v3060_v29 = vmax.f32 %v3058_v61, %v3059_v6  ;;  %v3828_v1 = vmax.f32 %v3826_v49, %v3827_v51 }
 0x33f   : > { %v3813_v21 = vrot.slane %v9771_v13, 4  ;;  %vm4546_vm0 = vcmp.ge.f32.partialorder %v4290_v41, 0.0  ;;  %v4802_v45 = vmul.f32 0.01, %v4290_v41  ;;  %v3046_v42 = vmax.f32 %v10748_v35, %v3045_v62 }
 0x340   : > { %v3075_v3 = vrot.slane %v10749_v17, 4  ;;  %v6210_v9 = vunpack.c.l.b16 %v7599_v60  ;;  %v3061_v53 = vrot.slane %v3060_v29, 1  ;;  %v3829_v20 = vrot.slane %v3828_v1, 1 }
 0x341   : > { %v3814_v34 = vmax.f32 %v9771_v13, %v3813_v21  ;;  %v5058_v52 = vsel %vm4546_vm0, %v4290_v41, %v4802_v45  ;;  %v3047_v61 = vrot.slane %v3046_v42, 2  ;;  %v3843_v2 = vrot.slane %v10750_v50, 4 }
 0x342   : > { %v3076_v49 = vmax.f32 %v10749_v17, %v3075_v3  ;;  %v6535_v26 = vrot.slane %v6210_v9, 4  ;;  %v7727_v63 = vpack.c.bf16 %v5058_v52, %v5058_v52  ;;  %v3062_v6 = vmax.f32 %v3060_v29, %v3061_v53 }
 0x343   : > { %v3830_v51 = vmax.f32 %v3828_v1, %v3829_v20  ;;  %v3048_v7 = vmax.f32 %v3046_v42, %v3047_v61  ;;  %v3815_v35 = vrot.slane %v3814_v34, 2  ;;  %v3844_v60 = vmax.f32 %v10750_v50, %v3843_v2  ;;  %v10082_v1 = vpop.f32.mrb[107].mxu0  ;;  %v10084_v61 = vpop.f32.mrb[107].mxu1 }
 0x344   : > { %v3077_v62 = vrot.slane %v3076_v49, 2  ;;  %v10078_v48 = vsel %vm6392_vm14, %v6535_v26, %v6534_v0  ;;  %v6338_v13 = vunpack.c.l.b16 %v7727_v63  ;;  %v4165_v41 = vadd.f32 %v10044_v36, %v3062_v6  ;;  %10751 = vst [vmem:[#allocation4_spill] sm:$0xff] %v10082_v1  ;;  %10752 = vst [vmem:[#allocation5_spill] sm:$0xff] %v10084_v61 }
 0x345   : > { %v4293_v21 = vadd.f32 %v10044_v36, %v3830_v51  ;;  %v3049_v45 = vrot.slane %v3048_v7, 1  ;;  %v3816_v17 = vmax.f32 %v3814_v34, %v3815_v35  ;;  %v3845_v9 = vrot.slane %v3844_v60, 2  ;;  %v10753_v34 = vld [vmem:[#allocation10_spill] sm:$0xff] }
 0x346   : > { %v3078_v3 = vmax.f32 %v3076_v49, %v3077_v62  ;;  %v6759_v52 = vrot.slane %v6338_v13, 4  ;;  %vm4421_vm1 = vcmp.ge.f32.partialorder %v4165_v41, 0.0  ;;  %v4677_v29 = vmul.f32 0.01, %v4165_v41 }
 0x347   : > { %vm4549_vm3 = vcmp.ge.f32.partialorder %v4293_v21, 0.0  ;;  %v4805_v42 = vmul.f32 0.01, %v4293_v21  ;;  %v3050_v53 = vmax.f32 %v3048_v7, %v3049_v45  ;;  %v3817_v20 = vrot.slane %v3816_v17, 1 }
 0x348   : > { %v3079_v0 = vrot.slane %v3078_v3, 1  ;;  %v10087_v50 = vsel %vm6392_vm14, %v6759_v52, %v6758_v56  ;;  %v4933_v2 = vsel %vm4421_vm1, %v4165_v41, %v4677_v29  ;;  %v3846_v26 = vmax.f32 %v3844_v60, %v3845_v9 }
 0x349   : > { %v3063_v49 = vrot.slane %v10753_v34, 4  ;;  %v7602_v63 = vpack.c.bf16 %v4933_v2, %v4933_v2  ;;  %v5061_v6 = vsel %vm4549_vm3, %v4293_v21, %v4805_v42  ;;  %v4163_v51 = vadd.f32 %v10044_v36, %v3050_v53  ;;  %v10098_v42 = vpop.f32.mrb[108].mxu0  ;;  %v10100_v53 = vpop.f32.mrb[108].mxu1 }
 0x34a   : > { %v3818_v35 = vmax.f32 %v3816_v17, %v3817_v20  ;;  %v7730_v62 = vpack.c.bf16 %v5061_v6, %v5061_v6  ;;  %v3080_v13 = vmax.f32 %v3078_v3, %v3079_v0  ;;  %v3847_v1 = vrot.slane %v3846_v26, 1  ;;  %v10102_v2 = vpop.f32.mrb[109].mxu0 }
 0x34b   : > { %v3064_v7 = vmax.f32 %v10753_v34, %v3063_v49  ;;  %v10754_v45 = vpack.c.bf16 %v10035_v4, %v10035_v4  ;;  %vm4419_vm2 = vcmp.ge.f32.partialorder %v4163_v51, 0.0  ;;  %v4675_v56 = vmul.f32 0.01, %v4163_v51 }
 0x34c   : > { %v4291_v60 = vadd.f32 %v10044_v36, %v3818_v35  ;;  %v6539_v41 = vrot.slane %v10051_v31, 2  ;;  %v4168_v21 = vadd.f32 %v10044_v36, %v3080_v13  ;;  %v3848_v9 = vmax.f32 %v3846_v26, %v3847_v1 }
 0x34d   : > { %v6340_v61 = vunpack.c.l.b16 %v10754_v45  ;;  %v3065_v52 = vrot.slane %v3064_v7, 2  ;;  %v6213_v17 = vunpack.c.l.b16 %v7602_v63  ;;  %v4931_v29 = vsel %vm4419_vm2, %v4163_v51, %v4675_v56 }
 0x34e   : > { %vm4547_vm4 = vcmp.ge.f32.partialorder %v4291_v60, 0.0  ;;  %v4803_v3 = vmul.f32 0.01, %v4291_v60  ;;  %v6341_v4 = vunpack.c.l.b16 %v7730_v62  ;;  %v7600_v20 = vpack.c.bf16 %v4931_v29, %v4931_v29 }
 0x34f   : > { %vm4424_vm7 = vcmp.ge.f32.partialorder %v4168_v21, 0.0  ;;  %v4680_v0 = vmul.f32 0.01, %v4168_v21  ;;  %v4296_v31 = vadd.f32 %v10044_v36, %v3848_v9  ;;  %v3066_v49 = vmax.f32 %v3064_v7, %v3065_v52 }
 0x350   : > { %v5059_v34 = vsel %vm4547_vm4, %v4291_v60, %v4803_v3  ;;  %v3831_v1 = vrot.slane %v9795_v58, 4  ;;  %v6211_v26 = vunpack.c.l.b16 %v7600_v20  ;;  %v3081_v51 = vrot.slane %v9820_v25, 4  ;;  %v10111_v20 = vpop.f32.mrb[109].mxu1 }
 0x351   : > { %v7728_v63 = vpack.c.bf16 %v5059_v34, %v5059_v34  ;;  %v4936_v6 = vsel %vm4424_vm7, %v4168_v21, %v4680_v0  ;;  %vm4552_vm10 = vcmp.ge.f32.partialorder %v4296_v31, 0.0  ;;  %v4808_v13 = vmul.f32 0.01, %v4296_v31 }
 0x352   : > { %v7605_v35 = vpack.c.bf16 %v4936_v6, %v4936_v6  ;;  %v3067_v62 = vrot.slane %v3066_v49, 1  ;;  %v6537_v45 = vrot.slane %v6211_v26, 3  ;;  %v3832_v29 = vmax.f32 %v9795_v58, %v3831_v1 }
 0x353   : > { %v6339_v56 = vunpack.c.l.b16 %v7728_v63  ;;  %v3082_v60 = vmax.f32 %v9820_v25, %v3081_v51  ;;  %v6763_v3 = vrot.slane %v6340_v61, 2  ;;  %v6541_v9 = vrot.slane %v6213_v17, 1 }
 0x354   : > { %v10109_v7 = vunpack.c.l.b16 %v7605_v35  ;;  %v3068_v52 = vmax.f32 %v3066_v49, %v3067_v62  ;;  %v6538_v21 = vsel %vm6395_vm5, %v6537_v45, %v10078_v48  ;;  %v5064_v34 = vsel %vm4552_vm10, %v4296_v31, %v4808_v13 }
 0x355   : > { %v6761_v0 = vrot.slane %v6339_v56, 3  ;;  %v3833_v6 = vrot.slane %v3832_v29, 2  ;;  %v6540_v26 = vsel %vm6398_vm6, %v6539_v41, %v6538_v21  ;;  %v3083_v1 = vrot.slane %v3082_v60, 2  ;;  %v10128_v21 = vpop.f32.mrb[110].mxu0 }
 0x356   : > { %v4166_v58 = vadd.f32 %v10044_v36, %v3068_v52  ;;  %v3849_v25 = vrot.slane %v9823_v16, 4  ;;  %v6765_v61 = vrot.slane %v6341_v4, 1  ;;  %v6542_v17 = vsel %vm6401_vm8, %v6541_v9, %v6540_v26 }
 0x357   : > { %v6762_v49 = vsel %vm6395_vm5, %v6761_v0, %v10087_v50  ;;  %v3834_v63 = vmax.f32 %v3832_v29, %v3833_v6  ;;  %v6847_v51 = vpack.c.b16 %v6542_v17, %v6542_v17  ;;  %v7733_v35 = vpack.c.bf16 %v5064_v34, %v5064_v34 }
 0x358   : > { %v6764_v48 = vsel %vm6398_vm6, %v6763_v3, %v6762_v49  ;;  %vm4422_vm13 = vcmp.ge.f32.partialorder %v4166_v58, 0.0  ;;  %v4678_v31 = vmul.f32 0.01, %v4166_v58  ;;  %v3084_v62 = vmax.f32 %v3082_v60, %v3083_v1 }
 0x359   : > { %v6766_v41 = vsel %vm6401_vm8, %v6765_v61, %v6764_v48  ;;  %v3835_v13 = vrot.slane %v3834_v63, 1  ;;  %6911 = vst [vmem:[%s8849_s29 + $0x28] sm:$0xf] %v6847_v51  ;;  %v3850_v56 = vmax.f32 %v9823_v16, %v3849_v25  ;;  %v3069_v50 = vrot.slane %v9833_v40, 4  ;;  %v10138_v25 = vpop.f32.mrb[110].mxu1 }
 0x35a   : > { %v6863_v45 = vpack.c.b16 %v6766_v41, %v6766_v41  ;;  %v4934_v29 = vsel %vm4422_vm13, %v4166_v58, %v4678_v31  ;;  %v3085_v52 = vrot.slane %v3084_v62, 1  ;;  %v3837_v3 = vrot.slane %v9835_v57, 4 }
 0x35b   : > { %v3836_v9 = vmax.f32 %v3834_v63, %v3835_v13  ;;  %v3851_v0 = vrot.slane %v3850_v56, 2  ;;  %v3070_v34 = vmax.f32 %v9833_v40, %v3069_v50  ;;  %v3099_v60 = vrot.slane %v9849_v37, 4 }
 0x35c   : > { %6927 = vst [vmem:[%s8849_s29 + $0x68] sm:$0xf] %v6863_v45  ;;  %v3867_v6 = vrot.slane %v9851_v59, 4  ;;  %v10134_v26 = vunpack.c.l.b16 %v7733_v35  ;;  %v3086_v1 = vmax.f32 %v3084_v62, %v3085_v52  ;;  %v3838_v58 = vmax.f32 %v9835_v57, %v3837_v3 }
 0x35d   : > { %v4294_v16 = vadd.f32 %v10044_v36, %v3836_v9  ;;  %v3852_v61 = vmax.f32 %v3850_v56, %v3851_v0  ;;  %v3071_v17 = vrot.slane %v3070_v34, 2  ;;  %v3100_v49 = vmax.f32 %v9849_v37, %v3099_v60  ;;  %v10145_v0 = vpop.f32.mrb[111].mxu0 }
 0x35e   : > { %v3868_v63 = vmax.f32 %v9851_v59, %v3867_v6  ;;  %v7603_v40 = vpack.c.bf16 %v4934_v29, %v4934_v29  ;;  %v4169_v48 = vadd.f32 %v10044_v36, %v3086_v1  ;;  %v3839_v31 = vrot.slane %v3838_v58, 2 }
 0x35f   : > { %v4806_v51 = vmul.f32 0.01, %v4294_v16  ;;  %v3853_v41 = vrot.slane %v3852_v61, 1  ;;  %v3072_v35 = vmax.f32 %v3070_v34, %v3071_v17  ;;  %v3101_v13 = vrot.slane %v3100_v49, 2  ;;  %v10148_v17 = vpop.f32.mrb[111].mxu1 }
 0x360   : > { %v3869_v45 = vrot.slane %v3868_v63, 2  ;;  %vm4550_vm15 = vcmp.ge.f32.partialorder %v4294_v16, 0.0  ;;  %vm4425_vm0 = vcmp.ge.f32.partialorder %v4169_v48, 0.0  ;;  %v4681_v57 = vmul.f32 0.01, %v4169_v48 }
 0x361   : > { %v3840_v62 = vmax.f32 %v3838_v58, %v3839_v31  ;;  %v3854_v50 = vmax.f32 %v3852_v61, %v3853_v41  ;;  %v3073_v9 = vrot.slane %v3072_v35, 1  ;;  %v3102_v37 = vmax.f32 %v3100_v49, %v3101_v13 }
 0x362   : > { %v4937_v52 = vsel %vm4425_vm0, %v4169_v48, %v4681_v57  ;;  %v3870_v29 = vmax.f32 %v3868_v63, %v3869_v45  ;;  %v3087_v3 = vrot.slane %v9853_v43, 4  ;;  %v6214_v60 = vunpack.c.l.b16 %v7603_v40 }
 0x363   : > { %v3841_v59 = vrot.slane %v3840_v62, 1  ;;  %v5062_v34 = vsel %vm4550_vm15, %v4294_v16, %v4806_v51  ;;  %v4297_v6 = vadd.f32 %v10044_v36, %v3854_v50  ;;  %v3074_v1 = vmax.f32 %v3072_v35, %v3073_v9 }
 0x364   : > { %v3103_v31 = vrot.slane %v3102_v37, 1  ;;  %v3871_v56 = vrot.slane %v3870_v29, 1  ;;  %v3088_v61 = vmax.f32 %v9853_v43, %v3087_v3  ;;  %v7606_v49 = vpack.c.bf16 %v4937_v52, %v4937_v52  ;;  %v10156_v3 = vpop.f32.mrb[112].mxu0 }
 0x365   : > { %v3842_v58 = vmax.f32 %v3840_v62, %v3841_v59  ;;  %vm4553_vm1 = vcmp.ge.f32.partialorder %v4297_v6, 0.0  ;;  %v4809_v48 = vmul.f32 0.01, %v4297_v6  ;;  %v4167_v63 = vadd.f32 %v10044_v36, %v3074_v1 }
 0x366   : > { %v3104_v13 = vmax.f32 %v3102_v37, %v3103_v31  ;;  %v3872_v40 = vmax.f32 %v3870_v29, %v3871_v56  ;;  %v3089_v16 = vrot.slane %v3088_v61, 2  ;;  %v7731_v51 = vpack.c.bf16 %v5062_v34, %v5062_v34  ;;  %v10158_v37 = vpop.f32.mrb[112].mxu1 }
 0x367   : > { %v4295_v41 = vadd.f32 %v10044_v36, %v3842_v58  ;;  %v5065_v45 = vsel %vm4553_vm1, %v4297_v6, %v4809_v48  ;;  %vm4423_vm3 = vcmp.ge.f32.partialorder %v4167_v63, 0.0  ;;  %v4679_v35 = vmul.f32 0.01, %v4167_v63  ;;  %10755 = vst [vmem:[#allocation6_spill] sm:$0xff] %v10158_v37  ;;  %v10160_v6 = vpop.f32.mrb[113].mxu0 }
 0x368   : > { %v7734_v57 = vpack.c.bf16 %v5065_v45, %v5065_v45  ;;  %v4172_v50 = vadd.f32 %v10044_v36, %v3104_v13  ;;  %v4300_v9 = vadd.f32 %v10044_v36, %v3872_v40  ;;  %v3090_v52 = vmax.f32 %v3088_v61, %v3089_v16  ;;  %10756 = vst [vmem:[#allocation7_spill] sm:$0xff] %v10160_v6 }
 0x369   : > { %vm4551_vm2 = vcmp.ge.f32.partialorder %v4295_v41, 0.0  ;;  %v4807_v62 = vmul.f32 0.01, %v4295_v41  ;;  %v4935_v43 = vsel %vm4423_vm3, %v4167_v63, %v4679_v35  ;;  %v3855_v59 = vrot.slane %v9862_v33, 4 }
 0x36a   : > { %v6217_v56 = vunpack.c.l.b16 %v7606_v49  ;;  %v7604_v29 = vpack.c.bf16 %v4935_v43, %v4935_v43  ;;  %vm4428_vm4 = vcmp.ge.f32.partialorder %v4172_v50, 0.0  ;;  %v6345_v1 = vunpack.c.l.b16 %v7734_v57 }
 0x36b   : > { %v5063_v34 = vsel %vm4551_vm2, %v4295_v41, %v4807_v62  ;;  %v4684_v31 = vmul.f32 0.01, %v4172_v50  ;;  %v4812_v48 = vmul.f32 0.01, %v4300_v9  ;;  %vm4556_vm7 = vcmp.ge.f32.partialorder %v4300_v9, 0.0 }
 0x36c   : > { %v7732_v58 = vpack.c.bf16 %v5063_v34, %v5063_v34  ;;  %v6215_v63 = vunpack.c.l.b16 %v7604_v29  ;;  %v3091_v13 = vrot.slane %v3090_v52, 1  ;;  %v3856_v61 = vmax.f32 %v9862_v33, %v3855_v59 }
 0x36d   : > { %v6342_v40 = vunpack.c.l.b16 %v7731_v51  ;;  %v4940_v45 = vsel %vm4428_vm4, %v4172_v50, %v4684_v31  ;;  %v3105_v35 = vrot.slane %v9879_v19, 4  ;;  %v6547_v49 = vrot.slane %v6217_v56, 5  ;;  %v10170_v50 = vpop.f32.mrb[113].mxu1 }
 0x36e   : > { %v6343_v16 = vunpack.c.l.b16 %v7732_v58  ;;  %v6543_v43 = vrot.slane %v6215_v63, 7  ;;  %v7609_v41 = vpack.c.bf16 %v4940_v45, %v4940_v45  ;;  %v3092_v62 = vmax.f32 %v3090_v52, %v3091_v13 }
 0x36f   : > { %v10164_v6 = vsel %vm4556_vm7, %v4300_v9, %v4812_v48  ;;  %v3857_v57 = vrot.slane %v3856_v61, 2  ;;  %v3106_v34 = vmax.f32 %v9879_v19, %v3105_v35  ;;  %v6771_v29 = vrot.slane %v6345_v1, 5 }
 0x370   : > { %v6767_v4 = vrot.slane %v6343_v16, 7  ;;  %v6544_v37 = vsel %vm6383_vm9, %v6543_v43, %v6214_v60  ;;  %v4170_v33 = vadd.f32 %v10044_v36, %v3092_v62  ;;  %v3873_v51 = vrot.slane %v9889_v46, 4  ;;  %v10191_v62 = vpop.f32.mrb[114].mxu0 }
 0x371   : > { %v10757_v59 = vrot.slane %v10109_v7, 6  ;;  %v3858_v9 = vmax.f32 %v3856_v61, %v3857_v57  ;;  %v3107_v58 = vrot.slane %v3106_v34, 2  ;;  %v10758_v31 = vrot.slane %v10134_v26, 6 }
 0x372   : > { %v6768_v52 = vsel %vm6383_vm9, %v6767_v4, %v6342_v40  ;;  %v10179_v1 = vunpack.c.l.b16 %v7609_v41  ;;  %v7737_v60 = vpack.c.bf16 %v10164_v6, %v10164_v6  ;;  %vm4426_vm10 = vcmp.ge.f32.partialorder %v4170_v33, 0.0 }
 0x373   : > { %v6546_v56 = vsel %vm6386_vm11, %v10757_v59, %v6544_v37  ;;  %v6770_v19 = vsel %vm6386_vm11, %v10758_v31, %v6768_v52  ;;  %v4682_v48 = vmul.f32 0.01, %v4170_v33  ;;  %v3859_v7 = vrot.slane %v3858_v9, 1 }
 0x374   : > { %v6548_v63 = vsel %vm6389_vm12, %v6547_v49, %v6546_v56  ;;  %v6772_v37 = vsel %vm6389_vm12, %v6771_v29, %v6770_v19  ;;  %v3108_v13 = vmax.f32 %v3106_v34, %v3107_v58  ;;  %v3874_v4 = vmax.f32 %v9889_v46, %v3873_v51 }
 0x375   : > { %v3093_v61 = vrot.slane %v9896_v12, 4  ;;  %v3861_v26 = vrot.slane %v9899_v11, 4  ;;  %v4938_v40 = vsel %vm4426_vm10, %v4170_v33, %v4682_v48  ;;  %v3860_v16 = vmax.f32 %v3858_v9, %v3859_v7  ;;  %v10197_v33 = vpop.f32.mrb[114].mxu1 }
 0x376   : > { %v3123_v45 = vrot.slane %v9907_v18, 4  ;;  %v3891_v6 = vrot.slane %v9909_v47, 4  ;;  %v7607_v35 = vpack.c.bf16 %v4938_v40, %v4938_v40  ;;  %v3109_v43 = vrot.slane %v3108_v13, 1 }
 0x377   : > { %v3875_v41 = vrot.slane %v3874_v4, 2  ;;  %v3094_v49 = vmax.f32 %v9896_v12, %v3093_v61  ;;  %v4298_v57 = vadd.f32 %v10044_v36, %v3860_v16  ;;  %v3862_v46 = vmax.f32 %v9899_v11, %v3861_v26 }
 0x378   : > { %v3124_v34 = vmax.f32 %v9907_v18, %v3123_v45  ;;  %v3892_v29 = vmax.f32 %v9909_v47, %v3891_v6  ;;  %v6218_v51 = vunpack.c.l.b16 %v7607_v35  ;;  %v3110_v59 = vmax.f32 %v3108_v13, %v3109_v43  ;;  %v10203_v35 = vpop.f32.mrb[115].mxu0 }
 0x379   : > { %v3876_v56 = vmax.f32 %v3874_v4, %v3875_v41  ;;  %v3095_v52 = vrot.slane %v3094_v49, 2  ;;  %vm4554_vm13 = vcmp.ge.f32.partialorder %v4298_v57, 0.0  ;;  %v4810_v9 = vmul.f32 0.01, %v4298_v57 }
 0x37a   : > { %v3863_v58 = vrot.slane %v3862_v46, 2  ;;  %v3125_v12 = vrot.slane %v3124_v34, 2  ;;  %v6549_v31 = vrot.slane %v6218_v51, 4  ;;  %v4173_v19 = vadd.f32 %v10044_v36, %v3110_v59 }
 0x37b   : > { %v3877_v48 = vrot.slane %v3876_v56, 1  ;;  %v3096_v7 = vmax.f32 %v3094_v49, %v3095_v52  ;;  %v5066_v11 = vsel %vm4554_vm13, %v4298_v57, %v4810_v9  ;;  %v3893_v26 = vrot.slane %v3892_v29, 2  ;;  %v10759_v49 = vld [vmem:[#allocation11_spill] sm:$0xff] }
 0x37c   : > { %v3864_v61 = vmax.f32 %v3862_v46, %v3863_v58  ;;  %v3126_v18 = vmax.f32 %v3124_v34, %v3125_v12  ;;  %v10201_v47 = vsel %vm6392_vm14, %v6549_v31, %v6548_v63  ;;  %v7735_v40 = vpack.c.bf16 %v5066_v11, %v5066_v11  ;;  %v10209_v12 = vpop.f32.mrb[115].mxu1 }
 0x37d   : > { %vm4429_vm15 = vcmp.ge.f32.partialorder %v4173_v19, 0.0  ;;  %v4685_v13 = vmul.f32 0.01, %v4173_v19  ;;  %v3878_v4 = vmax.f32 %v3876_v56, %v3877_v48  ;;  %v3097_v16 = vrot.slane %v3096_v7, 1 }
 0x37e   : > { %v3865_v45 = vrot.slane %v3864_v61, 1  ;;  %v3127_v6 = vrot.slane %v3126_v18, 1  ;;  %v6346_v43 = vunpack.c.l.b16 %v7735_v40  ;;  %v3894_v51 = vmax.f32 %v3892_v29, %v3893_v26 }
 0x37f   : > { %v4941_v41 = vsel %vm4429_vm15, %v4173_v19, %v4685_v13  ;;  %v3111_v57 = vrot.slane %v10759_v49, 4  ;;  %v4301_v34 = vadd.f32 %v10044_v36, %v3878_v4  ;;  %v3098_v59 = vmax.f32 %v3096_v7, %v3097_v16 }
 0x380   : > { %v7610_v46 = vpack.c.bf16 %v4941_v41, %v4941_v41  ;;  %v3866_v63 = vmax.f32 %v3864_v61, %v3865_v45  ;;  %v10207_v52 = vunpack.c.l.b16 %v7737_v60  ;;  %v6773_v9 = vrot.slane %v6346_v43, 4 }
 0x381   : > { %v3128_v58 = vmax.f32 %v3126_v18, %v3127_v6  ;;  %v3895_v56 = vrot.slane %v3894_v51, 1  ;;  %vm4557_vm0 = vcmp.ge.f32.partialorder %v4301_v34, 0.0  ;;  %v4813_v31 = vmul.f32 0.01, %v4301_v34 }
 0x382   : > { %v4171_v48 = vadd.f32 %v10044_v36, %v3098_v59  ;;  %v3112_v29 = vmax.f32 %v10759_v49, %v3111_v57  ;;  %v6774_v19 = vsel %vm6392_vm14, %v6773_v9, %v6772_v37  ;;  %v4299_v11 = vadd.f32 %v10044_v36, %v3866_v63  ;;  %v10218_v57 = vpop.f32.mrb[116].mxu0 }
 0x383   : > { %v4176_v7 = vadd.f32 %v10044_v36, %v3128_v58  ;;  %v3896_v61 = vmax.f32 %v3894_v51, %v3895_v56  ;;  %v6221_v60 = vunpack.c.l.b16 %v7610_v46  ;;  %v5069_v26 = vsel %vm4557_vm0, %v4301_v34, %v4813_v31  ;;  %v10220_v51 = vpop.f32.mrb[116].mxu1  ;;  %v10223_v9 = vpop.f32.mrb[117].mxu0 }
 0x384   : > { %vm4427_vm1 = vcmp.ge.f32.partialorder %v4171_v48, 0.0  ;;  %v4683_v18 = vmul.f32 0.01, %v4171_v48  ;;  %v7738_v40 = vpack.c.bf16 %v5069_v26, %v5069_v26  ;;  %vm4555_vm3 = vcmp.ge.f32.partialorder %v4299_v11, 0.0 }
 0x385   : > { %v4811_v13 = vmul.f32 0.01, %v4299_v11  ;;  %vm4432_vm2 = vcmp.ge.f32.partialorder %v4176_v7, 0.0  ;;  %v4688_v16 = vmul.f32 0.01, %v4176_v7  ;;  %v4304_v45 = vadd.f32 %v10044_v36, %v3896_v61 }
 0x386   : > { %v4939_v4 = vsel %vm4427_vm1, %v4171_v48, %v4683_v18  ;;  %v3113_v6 = vrot.slane %v3112_v29, 2  ;;  %v6349_v43 = vunpack.c.l.b16 %v7738_v40  ;;  %v3879_v49 = vrot.slane %v9921_v55, 4 }
 0x387   : > { %v7608_v37 = vpack.c.bf16 %v4939_v4, %v4939_v4  ;;  %v5067_v41 = vsel %vm4555_vm3, %v4299_v11, %v4811_v13  ;;  %v6553_v46 = vrot.slane %v10179_v1, 2  ;;  %v4944_v59 = vsel %vm4432_vm2, %v4176_v7, %v4688_v16  ;;  %v10228_v4 = vpop.f32.mrb[117].mxu1 }
 0x388   : > { %v7736_v34 = vpack.c.bf16 %v5067_v41, %v5067_v41  ;;  %v4816_v63 = vmul.f32 0.01, %v4304_v45  ;;  %v7613_v56 = vpack.c.bf16 %v4944_v59, %v4944_v59  ;;  %vm4560_vm4 = vcmp.ge.f32.partialorder %v4304_v45, 0.0 }
 0x389   : > { %v6219_v58 = vunpack.c.l.b16 %v7608_v37  ;;  %v3114_v31 = vmax.f32 %v3112_v29, %v3113_v6  ;;  %v6777_v48 = vrot.slane %v10207_v52, 2  ;;  %v3880_v61 = vmax.f32 %v9921_v55, %v3879_v49 }
 0x38a   : > { %v6347_v11 = vunpack.c.l.b16 %v7736_v34  ;;  %v3129_v26 = vrot.slane %v9942_v8, 4  ;;  %v6555_v18 = vrot.slane %v6221_v60, 1  ;;  %v6779_v40 = vrot.slane %v6349_v43, 1 }
 0x38b   : > { %v6551_v13 = vrot.slane %v6219_v58, 3  ;;  %v3115_v1 = vrot.slane %v3114_v31, 1  ;;  %v5072_v16 = vsel %vm4560_vm4, %v4304_v45, %v4816_v63  ;;  %v3881_v41 = vrot.slane %v3880_v61, 2 }
 0x38c   : > { %v6775_v7 = vrot.slane %v6347_v11, 3  ;;  %v3130_v37 = vmax.f32 %v9942_v8, %v3129_v26  ;;  %v10233_v52 = vunpack.c.l.b16 %v7613_v56  ;;  %v3897_v55 = vrot.slane %v9948_v30, 4  ;;  %v10242_v11 = vpop.f32.mrb[118].mxu0 }
 0x38d   : > { %v6552_v29 = vsel %vm6395_vm5, %v6551_v13, %v10201_v47  ;;  %v3116_v6 = vmax.f32 %v3114_v31, %v3115_v1  ;;  %v3882_v49 = vmax.f32 %v3880_v61, %v3881_v41  ;;  %v7741_v8 = vpack.c.bf16 %v5072_v16, %v5072_v16 }
 0x38e   : > { %v6554_v60 = vsel %vm6398_vm6, %v6553_v46, %v6552_v29  ;;  %v6776_v43 = vsel %vm6395_vm5, %v6775_v7, %v6774_v19  ;;  %v3131_v34 = vrot.slane %v3130_v37, 2  ;;  %v3898_v61 = vmax.f32 %v9948_v30, %v3897_v55 }
 0x38f   : > { %v6556_v45 = vsel %vm6401_vm8, %v6555_v18, %v6554_v60  ;;  %v6778_v59 = vsel %vm6398_vm6, %v6777_v48, %v6776_v43  ;;  %v4174_v47 = vadd.f32 %v10044_v36, %v3116_v6  ;;  %v3883_v56 = vrot.slane %v3882_v49, 1 }
 0x390   : > { %v6848_v63 = vpack.c.b16 %v6556_v45, %v6556_v45  ;;  %v6780_v58 = vsel %vm6401_vm8, %v6779_v40, %v6778_v59  ;;  %v3132_v31 = vmax.f32 %v3130_v37, %v3131_v34  ;;  %v3117_v48 = vrot.slane %v9954_v38, 4 }
 0x391   : > { %v6864_v46 = vpack.c.b16 %v6780_v58, %v6780_v58  ;;  %vm4430_vm7 = vcmp.ge.f32.partialorder %v4174_v47, 0.0  ;;  %v4686_v19 = vmul.f32 0.01, %v4174_v47  ;;  %v3884_v26 = vmax.f32 %v3882_v49, %v3883_v56 }
 0x392   : > { %6912 = vst [vmem:[%s8849_s29 + $0x2c] sm:$0xf] %v6848_v63  ;;  %v3133_v18 = vrot.slane %v3132_v31, 1  ;;  %v3885_v13 = vrot.slane %v9960_v22, 4  ;;  %v3899_v7 = vrot.slane %v3898_v61, 2  ;;  %v3147_v40 = vrot.slane %v9969_v10, 4 }
 0x393   : > { %6928 = vst [vmem:[%s8849_s29 + $0x6c] sm:$0xf] %v6864_v46  ;;  %v4942_v1 = vsel %vm4430_vm7, %v4174_v47, %v4686_v19  ;;  %v3915_v16 = vrot.slane %v9971_v27, 4  ;;  %v10251_v41 = vunpack.c.l.b16 %v7741_v8  ;;  %v4302_v37 = vadd.f32 %v10044_v36, %v3884_v26  ;;  %v10260_v8 = vpop.f32.mrb[118].mxu1 }
 0x394   : > { %v3134_v29 = vmax.f32 %v3132_v31, %v3133_v18  ;;  %v3118_v30 = vmax.f32 %v9954_v38, %v3117_v48  ;;  %v3900_v6 = vmax.f32 %v3898_v61, %v3899_v7  ;;  %v3886_v55 = vmax.f32 %v9960_v22, %v3885_v13  ;;  %v10262_v31 = vpop.f32.mrb[119].mxu0 }
 0x395   : > { %v3148_v60 = vmax.f32 %v9969_v10, %v3147_v40  ;;  %v3916_v43 = vmax.f32 %v9971_v27, %v3915_v16  ;;  %v7611_v34 = vpack.c.bf16 %v4942_v1, %v4942_v1  ;;  %v4814_v45 = vmul.f32 0.01, %v4302_v37  ;;  %10760 = vst [vmem:[#allocation8_spill] sm:$0xff] %v10262_v31  ;;  %v10269_v16 = vpop.f32.mrb[119].mxu1 }
 0x396   : > { %v4177_v59 = vadd.f32 %v10044_v36, %v3134_v29  ;;  %v3901_v47 = vrot.slane %v3900_v6, 1  ;;  %v3119_v63 = vrot.slane %v3118_v30, 2  ;;  %v3887_v58 = vrot.slane %v3886_v55, 2 }
 0x397   : > { %v3149_v56 = vrot.slane %v3148_v60, 2  ;;  %vm4558_vm10 = vcmp.ge.f32.partialorder %v4302_v37, 0.0  ;;  %v3917_v22 = vrot.slane %v3916_v43, 2  ;;  %v3135_v48 = vrot.slane %v9974_v32, 4 }
 0x398   : > { %vm4433_vm13 = vcmp.ge.f32.partialorder %v4177_v59, 0.0  ;;  %v4689_v38 = vmul.f32 0.01, %v4177_v59  ;;  %v3902_v27 = vmax.f32 %v3900_v6, %v3901_v47  ;;  %v3120_v46 = vmax.f32 %v3118_v30, %v3119_v63 }
 0x399   : > { %v3888_v19 = vmax.f32 %v3886_v55, %v3887_v58  ;;  %v3150_v26 = vmax.f32 %v3148_v60, %v3149_v56  ;;  %v3918_v18 = vmax.f32 %v3916_v43, %v3917_v22  ;;  %v10266_v13 = vunpack.c.l.b16 %v7611_v34 }
 0x39a   : > { %v4945_v61 = vsel %vm4433_vm13, %v4177_v59, %v4689_v38  ;;  %v5070_v1 = vsel %vm4558_vm10, %v4302_v37, %v4814_v45  ;;  %v4305_v7 = vadd.f32 %v10044_v36, %v3902_v27  ;;  %v3121_v40 = vrot.slane %v3120_v46, 1 }
 0x39b   : > { %v3889_v29 = vrot.slane %v3888_v19, 1  ;;  %v3151_v49 = vrot.slane %v3150_v26, 1  ;;  %v3919_v31 = vrot.slane %v3918_v18, 1  ;;  %v3136_v6 = vmax.f32 %v9974_v32, %v3135_v48 }
 0x39c   : > { %v7614_v30 = vpack.c.bf16 %v4945_v61, %v4945_v61  ;;  %vm4561_vm15 = vcmp.ge.f32.partialorder %v4305_v7, 0.0  ;;  %v4817_v55 = vmul.f32 0.01, %v4305_v7  ;;  %v3122_v60 = vmax.f32 %v3120_v46, %v3121_v40  ;;  %v10278_v61 = vpop.f32.mrb[120].mxu0 }
 0x39d   : > { %v3890_v43 = vmax.f32 %v3888_v19, %v3889_v29  ;;  %v3152_v59 = vmax.f32 %v3150_v26, %v3151_v49  ;;  %v3920_v47 = vmax.f32 %v3918_v18, %v3919_v31  ;;  %v3137_v34 = vrot.slane %v3136_v6, 2  ;;  %v10280_v26 = vpop.f32.mrb[120].mxu1 }
 0x39e   : > { %v7739_v63 = vpack.c.bf16 %v5070_v1, %v5070_v1  ;;  %v5073_v37 = vsel %vm4561_vm15, %v4305_v7, %v4817_v55  ;;  %v4175_v45 = vadd.f32 %v10044_v36, %v3122_v60  ;;  %v3903_v58 = vrot.slane %v9979_v54, 4  ;;  %v10282_v7 = vpop.f32.mrb[121].mxu0 }
 0x39f   : > { %v7742_v56 = vpack.c.bf16 %v5073_v37, %v5073_v37  ;;  %v4303_v38 = vadd.f32 %v10044_v36, %v3890_v43  ;;  %v4180_v22 = vadd.f32 %v10044_v36, %v3152_v59  ;;  %v4308_v32 = vadd.f32 %v10044_v36, %v3920_v47  ;;  %10761 = vst [vmem:[#allocation9_spill] sm:$0xff] %v10282_v7  ;;  %v10288_v7 = vpop.f32.mrb[121].mxu1 }
 0x3a0   : > { %vm4431_vm0 = vcmp.ge.f32.partialorder %v4175_v45, 0.0  ;;  %v4687_v27 = vmul.f32 0.01, %v4175_v45  ;;  %v3138_v46 = vmax.f32 %v3136_v6, %v3137_v34  ;;  %v3904_v49 = vmax.f32 %v9979_v54, %v3903_v58 }
 0x3a1   : > { %v6225_v31 = vunpack.c.l.b16 %v7614_v30  ;;  %vm4559_vm1 = vcmp.ge.f32.partialorder %v4303_v38, 0.0  ;;  %v4815_v19 = vmul.f32 0.01, %v4303_v38  ;;  %vm4436_vm3 = vcmp.ge.f32.partialorder %v4180_v22, 0.0 }
 0x3a2   : > { %v4943_v18 = vsel %vm4431_vm0, %v4175_v45, %v4687_v27  ;;  %v4692_v48 = vmul.f32 0.01, %v4180_v22  ;;  %vm4564_vm2 = vcmp.ge.f32.partialorder %v4308_v32, 0.0  ;;  %v4820_v1 = vmul.f32 0.01, %v4308_v32 }
 0x3a3   : > { %v6353_v40 = vunpack.c.l.b16 %v7742_v56  ;;  %v7612_v29 = vpack.c.bf16 %v4943_v18, %v4943_v18  ;;  %v5071_v55 = vsel %vm4559_vm1, %v4303_v38, %v4815_v19  ;;  %v3139_v6 = vrot.slane %v3138_v46, 1 }
 0x3a4   : > { %v6350_v60 = vunpack.c.l.b16 %v7739_v63  ;;  %v7740_v54 = vpack.c.bf16 %v5071_v55, %v5071_v55  ;;  %v4948_v30 = vsel %vm4436_vm3, %v4180_v22, %v4692_v48  ;;  %v3905_v43 = vrot.slane %v3904_v49, 2 }
 0x3a5   : > { %v6223_v59 = vunpack.c.l.b16 %v7612_v29  ;;  %v7617_v47 = vpack.c.bf16 %v4948_v30, %v4948_v30  ;;  %v10284_v34 = vsel %vm4564_vm2, %v4308_v32, %v4820_v1  ;;  %v3140_v37 = vmax.f32 %v3138_v46, %v3139_v6 }
 0x3a6   : > { %v6351_v58 = vunpack.c.l.b16 %v7740_v54  ;;  %v3906_v45 = vmax.f32 %v3904_v49, %v3905_v43  ;;  %v3153_v27 = vrot.slane %v9993_v14, 4  ;;  %v3921_v10 = vrot.slane %v10011_v44, 4 }
 0x3a7   : > { %v6561_v56 = vrot.slane %v6225_v31, 5  ;;  %v6785_v38 = vrot.slane %v6353_v40, 5  ;;  %v6557_v19 = vrot.slane %v6223_v59, 7  ;;  %v4178_v63 = vadd.f32 %v10044_v36, %v3140_v37 }
 0x3a8   : > { %v6781_v22 = vrot.slane %v6351_v58, 7  ;;  %v3907_v18 = vrot.slane %v3906_v45, 1  ;;  %v3154_v48 = vmax.f32 %v9993_v14, %v3153_v27  ;;  %v3922_v32 = vmax.f32 %v10011_v44, %v3921_v10 }
 0x3a9   : > { %v6558_v46 = vsel %vm6383_vm9, %v6557_v19, %v10266_v13  ;;  %v10295_v49 = vunpack.c.l.b16 %v7617_v47  ;;  %v7745_v1 = vpack.c.bf16 %v10284_v34, %v10284_v34  ;;  %vm4434_vm4 = vcmp.ge.f32.partialorder %v4178_v63, 0.0  ;;  %v10313_v19 = vpop.f32.mrb[122].mxu0 }
 0x3aa   : > { %v10762_v31 = vrot.slane %v10233_v52, 6  ;;  %v6782_v29 = vsel %vm6383_vm9, %v6781_v22, %v6350_v60  ;;  %v4690_v55 = vmul.f32 0.01, %v4178_v63  ;;  %v3908_v6 = vmax.f32 %v3906_v45, %v3907_v18  ;;  %v10764_v52 = vld [vmem:[#allocation2_spill] sm:$0xff]  ;;  %v10316_v18 = vpop.f32.mrb[122].mxu1 }
 0x3ab   : > { %v10763_v14 = vrot.slane %v10251_v41, 6  ;;  %v3155_v13 = vrot.slane %v3154_v48, 2  ;;  %v3923_v54 = vrot.slane %v3922_v32, 2  ;;  %v3141_v47 = vrot.slane %v10764_v52, 4 }
 0x3ac   : > { %v6560_v40 = vsel %vm6386_vm11, %v10762_v31, %v6558_v46  ;;  %v4946_v30 = vsel %vm4434_vm4, %v4178_v63, %v4690_v55  ;;  %v4306_v43 = vadd.f32 %v10044_v36, %v3908_v6  ;;  %v3909_v45 = vrot.slane %v10020_v5, 4 }
 0x3ad   : > { %v6784_v44 = vsel %vm6386_vm11, %v10763_v14, %v6782_v29  ;;  %v6562_v10 = vsel %vm6389_vm12, %v6561_v56, %v6560_v40  ;;  %v7615_v37 = vpack.c.bf16 %v4946_v30, %v4946_v30  ;;  %v3156_v58 = vmax.f32 %v3154_v48, %v3155_v13 }
 0x3ae   : > { %v6786_v59 = vsel %vm6389_vm12, %v6785_v38, %v6784_v44  ;;  %v3924_v60 = vmax.f32 %v3922_v32, %v3923_v54  ;;  %vm4562_vm7 = vcmp.ge.f32.partialorder %v4306_v43, 0.0  ;;  %v4818_v41 = vmul.f32 0.01, %v4306_v43 }
 0x3af   : > { %v3142_v27 = vmax.f32 %v10764_v52, %v3141_v47  ;;  %v3171_v56 = vrot.slane %v10029_v39, 4  ;;  %v6226_v63 = vunpack.c.l.b16 %v7615_v37  ;;  %v3157_v22 = vrot.slane %v3156_v58, 1 }
 0x3b0   : > { %v3925_v36 = vrot.slane %v3924_v60, 1  ;;  %v3910_v38 = vmax.f32 %v10020_v5, %v3909_v45  ;;  %v5074_v46 = vsel %vm4562_vm7, %v4306_v43, %v4818_v41  ;;  %v3939_v31 = vrot.slane %v10031_v15, 4  ;;  %v10327_v43 = vld [vmem:[%s10624_s2] ss:$0 sm:$0xff] }
 0x3b1   : > { %v3143_v48 = vrot.slane %v3142_v27, 2  ;;  %v3172_v32 = vmax.f32 %v10029_v39, %v3171_v56  ;;  %v6563_v40 = vrot.slane %v6226_v63, 4  ;;  %v7743_v29 = vpack.c.bf16 %v5074_v46, %v5074_v46 }
 0x3b2   : > { %v3158_v55 = vmax.f32 %v3156_v58, %v3157_v22  ;;  %v3926_v6 = vmax.f32 %v3924_v60, %v3925_v36  ;;  %v3911_v44 = vrot.slane %v3910_v38, 2  ;;  %v3940_v54 = vmax.f32 %v10031_v15, %v3939_v31  ;;  %v10333_v22 = vpop.f32.mrb[123].mxu1 }
 0x3b3   : > { %v3144_v14 = vmax.f32 %v3142_v27, %v3143_v48  ;;  %v3173_v13 = vrot.slane %v3172_v32, 2  ;;  %v10322_v30 = vsel %vm6392_vm14, %v6563_v40, %v6562_v10  ;;  %v6354_v5 = vunpack.c.l.b16 %v7743_v29  ;;  %v10331_v10 = vpop.f32.mrb[123].mxu0 }
 0x3b4   : > { %v4181_v39 = vadd.f32 %v10327_v43, %v3158_v55  ;;  %v4309_v52 = vadd.f32 %v10327_v43, %v3926_v6  ;;  %v3912_v37 = vmax.f32 %v3910_v38, %v3911_v44  ;;  %v3941_v60 = vrot.slane %v3940_v54, 2  ;;  %v10765_v38 = vld [vmem:[#allocation3_spill] sm:$0xff] }
 0x3b5   : > { %v3145_v47 = vrot.slane %v3144_v14, 1  ;;  %v3174_v58 = vmax.f32 %v3172_v32, %v3173_v13  ;;  %v6787_v45 = vrot.slane %v6354_v5, 4  ;;  %v3159_v32 = vrot.slane %v10765_v38, 4 }
 0x3b6   : > { %vm4437_vm10 = vcmp.ge.f32.partialorder %v4181_v39, 0.0  ;;  %v4693_v15 = vmul.f32 0.01, %v4181_v39  ;;  %vm4565_vm13 = vcmp.ge.f32.partialorder %v4309_v52, 0.0  ;;  %v4821_v41 = vmul.f32 0.01, %v4309_v52 }
 0x3b7   : > { %v3146_v27 = vmax.f32 %v3144_v14, %v3145_v47  ;;  %v3913_v56 = vrot.slane %v3912_v37, 1  ;;  %v3175_v63 = vrot.slane %v3174_v58, 1  ;;  %v10336_v36 = vsel %vm6392_vm14, %v6787_v45, %v6786_v59 }
 0x3b8   : > { %v4949_v46 = vsel %vm4437_vm10, %v4181_v39, %v4693_v15  ;;  %v3942_v48 = vmax.f32 %v3940_v54, %v3941_v60  ;;  %v5077_v40 = vsel %vm4565_vm13, %v4309_v52, %v4821_v41  ;;  %v3160_v14 = vmax.f32 %v10765_v38, %v3159_v32  ;;  %v10347_v15 = vpop.f32.mrb[124].mxu0  ;;  %v10349_v41 = vpop.f32.mrb[124].mxu1 }
 0x3b9   : > { %v7618_v31 = vpack.c.bf16 %v4949_v46, %v4949_v46  ;;  %v4179_v29 = vadd.f32 %v10327_v43, %v3146_v27  ;;  %v3914_v55 = vmax.f32 %v3912_v37, %v3913_v56  ;;  %v7746_v6 = vpack.c.bf16 %v5077_v40, %v5077_v40  ;;  %v10351_v56 = vpop.f32.mrb[125].mxu0 }
 0x3ba   : > { %v3176_v44 = vmax.f32 %v3174_v58, %v3175_v63  ;;  %v3943_v13 = vrot.slane %v3942_v48, 1  ;;  %v6356_v5 = vunpack.c.l.b16 %v7745_v1  ;;  %v6567_v39 = vrot.slane %v10295_v49, 2 }
 0x3bb   : > { %vm4435_vm15 = vcmp.ge.f32.partialorder %v4179_v29, 0.0  ;;  %v4691_v59 = vmul.f32 0.01, %v4179_v29  ;;  %v4307_v54 = vadd.f32 %v10327_v43, %v3914_v55  ;;  %v3161_v60 = vrot.slane %v3160_v14, 2 }
 0x3bc   : > { %v4184_v52 = vadd.f32 %v10327_v43, %v3176_v44  ;;  %v3944_v47 = vmax.f32 %v3942_v48, %v3943_v13  ;;  %v6229_v37 = vunpack.c.l.b16 %v7618_v31  ;;  %v6357_v34 = vunpack.c.l.b16 %v7746_v6 }
 0x3bd   : > { %v4947_v45 = vsel %vm4435_vm15, %v4179_v29, %v4691_v59  ;;  %vm4563_vm0 = vcmp.ge.f32.partialorder %v4307_v54, 0.0  ;;  %v4819_v58 = vmul.f32 0.01, %v4307_v54  ;;  %v3162_v46 = vmax.f32 %v3160_v14, %v3161_v60 }
 0x3be   : > { %v7616_v1 = vpack.c.bf16 %v4947_v45, %v4947_v45  ;;  %vm4440_vm1 = vcmp.ge.f32.partialorder %v4184_v52, 0.0  ;;  %v4696_v27 = vmul.f32 0.01, %v4184_v52  ;;  %v4312_v49 = vadd.f32 %v10327_v43, %v3944_v47 }
 0x3bf   : > { %v5075_v63 = vsel %vm4563_vm0, %v4307_v54, %v4819_v58  ;;  %v3927_v48 = vrot.slane %v10039_v28, 4  ;;  %v3177_v40 = vrot.slane %v10069_v23, 4  ;;  %v3163_v6 = vrot.slane %v3162_v46, 1  ;;  %v10360_v58 = vpop.f32.mrb[125].mxu1 }
 0x3c0   : > { %v6227_v38 = vunpack.c.l.b16 %v7616_v1  ;;  %v7744_v32 = vpack.c.bf16 %v5075_v63, %v5075_v63  ;;  %v4952_v31 = vsel %vm4440_vm1, %v4184_v52, %v4696_v27  ;;  %vm4568_vm3 = vcmp.ge.f32.partialorder %v4312_v49, 0.0 }
 0x3c1   : > { %v7621_v29 = vpack.c.bf16 %v4952_v31, %v4952_v31  ;;  %v4824_v55 = vmul.f32 0.01, %v4312_v49  ;;  %v3928_v59 = vmax.f32 %v10039_v28, %v3927_v48  ;;  %v3178_v54 = vmax.f32 %v10069_v23, %v3177_v40 }
 0x3c2   : > { %v6565_v44 = vrot.slane %v6227_v38, 3  ;;  %v6355_v13 = vunpack.c.l.b16 %v7744_v32  ;;  %v6791_v45 = vrot.slane %v6356_v5, 2  ;;  %v6569_v47 = vrot.slane %v6229_v37, 1 }
 0x3c3   : > { %v10358_v14 = vunpack.c.l.b16 %v7621_v29  ;;  %v3164_v60 = vmax.f32 %v3162_v46, %v3163_v6  ;;  %v5080_v27 = vsel %vm4568_vm3, %v4312_v49, %v4824_v55  ;;  %v3929_v63 = vrot.slane %v3928_v59, 2 }
 0x3c4   : > { %v6566_v52 = vsel %vm6395_vm5, %v6565_v44, %v10322_v30  ;;  %v6789_v1 = vrot.slane %v6355_v13, 3  ;;  %v3179_v48 = vrot.slane %v3178_v54, 2  ;;  %v3945_v23 = vrot.slane %v10072_v24, 4  ;;  %v10766_v44 = vld [vmem:[#allocation4_spill] sm:$0xff] }
 0x3c5   : > { %v6568_v38 = vsel %vm6398_vm6, %v6567_v39, %v6566_v52  ;;  %v4182_v28 = vadd.f32 %v10327_v43, %v3164_v60  ;;  %v6793_v5 = vrot.slane %v6357_v34, 1  ;;  %v3930_v32 = vmax.f32 %v3928_v59, %v3929_v63  ;;  %v10767_v60 = vld [vmem:[#allocation5_spill] sm:$0xff]  ;;  %v10377_v52 = vpop.f32.mrb[126].mxu0 }
 0x3c6   : > { %v6570_v37 = vsel %vm6401_vm8, %v6569_v47, %v6568_v38  ;;  %v6790_v46 = vsel %vm6395_vm5, %v6789_v1, %v10336_v36  ;;  %v7749_v49 = vpack.c.bf16 %v5080_v27, %v5080_v27  ;;  %v3180_v55 = vmax.f32 %v3178_v54, %v3179_v48 }
 0x3c7   : > { %v6849_v31 = vpack.c.b16 %v6570_v37, %v6570_v37  ;;  %v6792_v30 = vsel %vm6398_vm6, %v6791_v45, %v6790_v46  ;;  %v3931_v29 = vrot.slane %v3930_v32, 1  ;;  %vm4438_vm2 = vcmp.ge.f32.partialorder %v4182_v28, 0.0 }
 0x3c8   : > { %v6794_v40 = vsel %vm6401_vm8, %v6793_v5, %v6792_v30  ;;  %v3946_v34 = vmax.f32 %v10072_v24, %v3945_v23  ;;  %v3165_v13 = vrot.slane %v10766_v44, 4  ;;  %v4694_v36 = vmul.f32 0.01, %v4182_v28  ;;  %v10387_v5 = vpop.f32.mrb[126].mxu1 }
 0x3c9   : > { %6913 = vst [vmem:[%s8849_s29 + $0x30] sm:$0xf] %v6849_v31  ;;  %v6865_v6 = vpack.c.b16 %v6794_v40, %v6794_v40  ;;  %v3932_v59 = vmax.f32 %v3930_v32, %v3931_v29  ;;  %v3181_v47 = vrot.slane %v3180_v55, 1  ;;  %v3933_v45 = vrot.slane %v10767_v60, 4  ;;  %v10398_v39 = vpop.f32.mrb[127].mxu1 }
 0x3ca   : > { %v3947_v1 = vrot.slane %v3946_v34, 2  ;;  %v3166_v27 = vmax.f32 %v10766_v44, %v3165_v13  ;;  %v3195_v54 = vrot.slane %v10098_v42, 4  ;;  %v3963_v63 = vrot.slane %v10100_v53, 4 }
 0x3cb   : > { %6929 = vst [vmem:[%s8849_s29 + $0x70] sm:$0xf] %v6865_v6  ;;  %v10383_v38 = vunpack.c.l.b16 %v7749_v49  ;;  %v4310_v24 = vadd.f32 %v10327_v43, %v3932_v59  ;;  %v3182_v48 = vmax.f32 %v3180_v55, %v3181_v47  ;;  %v3934_v23 = vmax.f32 %v10767_v60, %v3933_v45 }
 0x3cc   : > { %v3948_v37 = vmax.f32 %v3946_v34, %v3947_v1  ;;  %v3167_v46 = vrot.slane %v3166_v27, 2  ;;  %v3196_v32 = vmax.f32 %v10098_v42, %v3195_v54  ;;  %v3964_v31 = vmax.f32 %v10100_v53, %v3963_v63  ;;  %v10395_v54 = vpop.f32.mrb[127].mxu0 }
 0x3cd   : > { %v4950_v30 = vsel %vm4438_vm2, %v4182_v28, %v4694_v36  ;;  %v4822_v40 = vmul.f32 0.01, %v4310_v24  ;;  %v4185_v29 = vadd.f32 %v10327_v43, %v3182_v48  ;;  %v3935_v49 = vrot.slane %v3934_v23, 2 }
 0x3ce   : > { %v3949_v6 = vrot.slane %v3948_v37, 1  ;;  %v3168_v44 = vmax.f32 %v3166_v27, %v3167_v46  ;;  %v3197_v13 = vrot.slane %v3196_v32, 2  ;;  %v3965_v55 = vrot.slane %v3964_v31, 2 }
 0x3cf   : > { %vm4566_vm4 = vcmp.ge.f32.partialorder %v4310_v24, 0.0  ;;  %vm4441_vm7 = vcmp.ge.f32.partialorder %v4185_v29, 0.0  ;;  %v4697_v59 = vmul.f32 0.01, %v4185_v29  ;;  %v3936_v47 = vmax.f32 %v3934_v23, %v3935_v49 }
 0x3d0   : > { %v3950_v60 = vmax.f32 %v3948_v37, %v3949_v6  ;;  %v3169_v42 = vrot.slane %v3168_v44, 1  ;;  %v3198_v45 = vmax.f32 %v3196_v32, %v3197_v13  ;;  %v3966_v28 = vmax.f32 %v3964_v31, %v3965_v55 }
 0x3d1   : > { %v4953_v53 = vsel %vm4441_vm7, %v4185_v29, %v4697_v59  ;;  %v3937_v1 = vrot.slane %v3936_v47, 1  ;;  %v3183_v36 = vrot.slane %v10102_v2, 4  ;;  %v7619_v63 = vpack.c.bf16 %v4950_v30, %v4950_v30 }
 0x3d2   : > { %v5078_v27 = vsel %vm4566_vm4, %v4310_v24, %v4822_v40  ;;  %v4313_v48 = vadd.f32 %v10327_v43, %v3950_v60  ;;  %v3170_v46 = vmax.f32 %v3168_v44, %v3169_v42  ;;  %v3199_v49 = vrot.slane %v3198_v45, 1 }
 0x3d3   : > { %v3938_v23 = vmax.f32 %v3936_v47, %v3937_v1  ;;  %v3967_v34 = vrot.slane %v3966_v28, 1  ;;  %v3184_v37 = vmax.f32 %v10102_v2, %v3183_v36  ;;  %v7622_v32 = vpack.c.bf16 %v4953_v53, %v4953_v53 }
 0x3d4   : > { %vm4569_vm10 = vcmp.ge.f32.partialorder %v4313_v48, 0.0  ;;  %v4825_v29 = vmul.f32 0.01, %v4313_v48  ;;  %v4183_v31 = vadd.f32 %v10327_v43, %v3170_v46  ;;  %v3200_v13 = vmax.f32 %v3198_v45, %v3199_v49 }
 0x3d5   : > { %v4311_v6 = vadd.f32 %v10327_v43, %v3938_v23  ;;  %v3968_v30 = vmax.f32 %v3966_v28, %v3967_v34  ;;  %v3185_v24 = vrot.slane %v3184_v37, 2  ;;  %v7747_v40 = vpack.c.bf16 %v5078_v27, %v5078_v27 }
 0x3d6   : > { %v5081_v55 = vsel %vm4569_vm10, %v4313_v48, %v4825_v29  ;;  %vm4439_vm13 = vcmp.ge.f32.partialorder %v4183_v31, 0.0  ;;  %v4695_v44 = vmul.f32 0.01, %v4183_v31  ;;  %v4188_v60 = vadd.f32 %v10327_v43, %v3200_v13 }
 0x3d7   : > { %v7750_v59 = vpack.c.bf16 %v5081_v55, %v5081_v55  ;;  %vm4567_vm15 = vcmp.ge.f32.partialorder %v4311_v6, 0.0  ;;  %v4823_v47 = vmul.f32 0.01, %v4311_v6  ;;  %v4316_v42 = vadd.f32 %v10327_v43, %v3968_v30 }
 0x3d8   : > { %v4951_v2 = vsel %vm4439_vm13, %v4183_v31, %v4695_v44  ;;  %v3186_v53 = vmax.f32 %v3184_v37, %v3185_v24  ;;  %v3951_v1 = vrot.slane %v10111_v20, 4  ;;  %v6233_v36 = vunpack.c.l.b16 %v7622_v32 }
 0x3d9   : > { %v6361_v46 = vunpack.c.l.b16 %v7750_v59  ;;  %v7620_v45 = vpack.c.bf16 %v4951_v2, %v4951_v2  ;;  %v5079_v34 = vsel %vm4567_vm15, %v4311_v6, %v4823_v47  ;;  %vm4444_vm0 = vcmp.ge.f32.partialorder %v4188_v60, 0.0 }
 0x3da   : > { %v7748_v28 = vpack.c.bf16 %v5079_v34, %v5079_v34  ;;  %v4700_v27 = vmul.f32 0.01, %v4188_v60  ;;  %v4828_v48 = vmul.f32 0.01, %v4316_v42  ;;  %vm4572_vm1 = vcmp.ge.f32.partialorder %v4316_v42, 0.0 }
 0x3db   : > { %v6231_v23 = vunpack.c.l.b16 %v7620_v45  ;;  %v3187_v49 = vrot.slane %v3186_v53, 1  ;;  %v3952_v29 = vmax.f32 %v10111_v20, %v3951_v1  ;;  %v6230_v13 = vunpack.c.l.b16 %v7619_v63 }
 0x3dc   : > { %v6358_v31 = vunpack.c.l.b16 %v7747_v40  ;;  %v6359_v55 = vunpack.c.l.b16 %v7748_v28  ;;  %v3201_v37 = vrot.slane %v10128_v21, 4  ;;  %v6575_v30 = vrot.slane %v6233_v36, 5 }
 0x3dd   : > { %v6571_v24 = vrot.slane %v6231_v23, 7  ;;  %v10408_v32 = vsel %vm4444_vm0, %v4188_v60, %v4700_v27  ;;  %v3188_v44 = vmax.f32 %v3186_v53, %v3187_v49  ;;  %v10410_v59 = vsel %vm4572_vm1, %v4316_v42, %v4828_v48 }
 0x3de   : > { %v6795_v6 = vrot.slane %v6359_v55, 7  ;;  %v3953_v47 = vrot.slane %v3952_v29, 2  ;;  %v3202_v2 = vmax.f32 %v10128_v21, %v3201_v37  ;;  %v6799_v45 = vrot.slane %v6361_v46, 5 }
 0x3df   : > { %v6572_v34 = vsel %vm6383_vm9, %v6571_v24, %v6230_v13  ;;  %v4186_v20 = vadd.f32 %v10327_v43, %v3188_v44  ;;  %v3969_v63 = vrot.slane %v10138_v25, 4  ;;  %v10768_v40 = vrot.slane %v10358_v14, 6  ;;  %v10770_v24 = vld [vmem:[#allocation6_spill] sm:$0xff] }
 0x3e0   : > { %v6796_v60 = vsel %vm6383_vm9, %v6795_v6, %v6358_v31  ;;  %v3954_v53 = vmax.f32 %v3952_v29, %v3953_v47  ;;  %v3203_v36 = vrot.slane %v3202_v2, 2  ;;  %v10769_v42 = vrot.slane %v10383_v38, 6 }
 0x3e1   : > { %v6574_v1 = vsel %vm6386_vm11, %v10768_v40, %v6572_v34  ;;  %v7625_v21 = vpack.c.bf16 %v10408_v32, %v10408_v32  ;;  %v7753_v46 = vpack.c.bf16 %v10410_v59, %v10410_v59  ;;  %vm4442_vm3 = vcmp.ge.f32.partialorder %v4186_v20, 0.0 }
 0x3e2   : > { %v6798_v28 = vsel %vm6386_vm11, %v10769_v42, %v6796_v60  ;;  %v4698_v27 = vmul.f32 0.01, %v4186_v20  ;;  %v6576_v14 = vsel %vm6389_vm12, %v6575_v30, %v6574_v1  ;;  %v3955_v48 = vrot.slane %v3954_v53, 1 }
 0x3e3   : > { %v6800_v23 = vsel %vm6389_vm12, %v6799_v45, %v6798_v28  ;;  %v3204_v49 = vmax.f32 %v3202_v2, %v3203_v36  ;;  %v3970_v29 = vmax.f32 %v10138_v25, %v3969_v63  ;;  %v3189_v38 = vrot.slane %v10145_v0, 4 }
 0x3e4   : > { %v3957_v13 = vrot.slane %v10148_v17, 4  ;;  %v4954_v31 = vsel %vm4442_vm3, %v4186_v20, %v4698_v27  ;;  %v3956_v55 = vmax.f32 %v3954_v53, %v3955_v48  ;;  %v3219_v37 = vrot.slane %v10156_v3, 4 }
 0x3e5   : > { %v3987_v32 = vrot.slane %v10770_v24, 4  ;;  %v7623_v44 = vpack.c.bf16 %v4954_v31, %v4954_v31  ;;  %v3205_v6 = vrot.slane %v3204_v49, 1  ;;  %v3971_v47 = vrot.slane %v3970_v29, 2 }
 0x3e6   : > { %v3190_v30 = vmax.f32 %v10145_v0, %v3189_v38  ;;  %v4314_v45 = vadd.f32 %v10327_v43, %v3956_v55  ;;  %v3958_v2 = vmax.f32 %v10148_v17, %v3957_v13  ;;  %v3220_v25 = vmax.f32 %v10156_v3, %v3219_v37 }
 0x3e7   : > { %v3988_v34 = vmax.f32 %v10770_v24, %v3987_v32  ;;  %v6234_v63 = vunpack.c.l.b16 %v7623_v44  ;;  %v3206_v20 = vmax.f32 %v3204_v49, %v3205_v6  ;;  %v3972_v40 = vmax.f32 %v3970_v29, %v3971_v47  ;;  %v10771_v47 = vld [vmem:[#allocation7_spill] sm:$0xff] }
 0x3e8   : > { %v3191_v1 = vrot.slane %v3190_v30, 2  ;;  %vm4570_vm2 = vcmp.ge.f32.partialorder %v4314_v45, 0.0  ;;  %v4826_v60 = vmul.f32 0.01, %v4314_v45  ;;  %v3959_v53 = vrot.slane %v3958_v2, 2 }
 0x3e9   : > { %v3221_v36 = vrot.slane %v3220_v25, 2  ;;  %v6577_v42 = vrot.slane %v6234_v63, 4  ;;  %v4189_v28 = vadd.f32 %v10327_v43, %v3206_v20  ;;  %v3973_v0 = vrot.slane %v3972_v40, 1 }
 0x3ea   : > { %v3192_v27 = vmax.f32 %v3190_v30, %v3191_v1  ;;  %v5082_v48 = vsel %vm4570_vm2, %v4314_v45, %v4826_v60  ;;  %v3960_v38 = vmax.f32 %v3958_v2, %v3959_v53  ;;  %v3989_v13 = vrot.slane %v3988_v34, 2 }
 0x3eb   : > { %v3222_v17 = vmax.f32 %v3220_v25, %v3221_v36  ;;  %v10441_v3 = vsel %vm6392_vm14, %v6577_v42, %v6576_v14  ;;  %v7751_v31 = vpack.c.bf16 %v5082_v48, %v5082_v48  ;;  %vm4445_vm4 = vcmp.ge.f32.partialorder %v4189_v28, 0.0 }
 0x3ec   : > { %v4701_v49 = vmul.f32 0.01, %v4189_v28  ;;  %v3974_v29 = vmax.f32 %v3972_v40, %v3973_v0  ;;  %v3193_v55 = vrot.slane %v3192_v27, 1  ;;  %v3961_v37 = vrot.slane %v3960_v38, 1 }
 0x3ed   : > { %v3223_v24 = vrot.slane %v3222_v17, 1  ;;  %v6362_v32 = vunpack.c.l.b16 %v7751_v31  ;;  %v3990_v6 = vmax.f32 %v3988_v34, %v3989_v13  ;;  %v3207_v63 = vrot.slane %v10771_v47, 4 }
 0x3ee   : > { %v4957_v44 = vsel %vm4445_vm4, %v4189_v28, %v4701_v49  ;;  %v6236_v30 = vunpack.c.l.b16 %v7625_v21  ;;  %v4317_v45 = vadd.f32 %v10327_v43, %v3974_v29  ;;  %v3194_v2 = vmax.f32 %v3192_v27, %v3193_v55 }
 0x3ef   : > { %v3962_v25 = vmax.f32 %v3960_v38, %v3961_v37  ;;  %v6801_v20 = vrot.slane %v6362_v32, 4  ;;  %v7626_v14 = vpack.c.bf16 %v4957_v44, %v4957_v44  ;;  %v3224_v1 = vmax.f32 %v3222_v17, %v3223_v24 }
 0x3f0   : > { %v3991_v60 = vrot.slane %v3990_v6, 1  ;;  %vm4573_vm7 = vcmp.ge.f32.partialorder %v4317_v45, 0.0  ;;  %v4829_v53 = vmul.f32 0.01, %v4317_v45  ;;  %v4187_v40 = vadd.f32 %v10327_v43, %v3194_v2 }
 0x3f1   : > { %v3208_v36 = vmax.f32 %v10771_v47, %v3207_v63  ;;  %v6802_v42 = vsel %vm6392_vm14, %v6801_v20, %v6800_v23  ;;  %v4315_v34 = vadd.f32 %v10327_v43, %v3962_v25  ;;  %v4192_v21 = vadd.f32 %v10327_v43, %v3224_v1 }
 0x3f2   : > { %v3992_v28 = vmax.f32 %v3990_v6, %v3991_v60  ;;  %v6364_v0 = vunpack.c.l.b16 %v7753_v46  ;;  %v5085_v27 = vsel %vm4573_vm7, %v4317_v45, %v4829_v53  ;;  %vm4443_vm10 = vcmp.ge.f32.partialorder %v4187_v40, 0.0 }
 0x3f3   : > { %v4699_v48 = vmul.f32 0.01, %v4187_v40  ;;  %v7754_v38 = vpack.c.bf16 %v5085_v27, %v5085_v27  ;;  %vm4571_vm13 = vcmp.ge.f32.partialorder %v4315_v34, 0.0  ;;  %v4827_v17 = vmul.f32 0.01, %v4315_v34 }
 0x3f4   : > { %vm4448_vm15 = vcmp.ge.f32.partialorder %v4192_v21, 0.0  ;;  %v4704_v31 = vmul.f32 0.01, %v4192_v21  ;;  %v4320_v23 = vadd.f32 %v10327_v43, %v3992_v28  ;;  %v3209_v49 = vrot.slane %v3208_v36, 2 }
 0x3f5   : > { %v4955_v13 = vsel %vm4443_vm10, %v4187_v40, %v4699_v48  ;;  %v6237_v29 = vunpack.c.l.b16 %v7626_v14  ;;  %v5083_v37 = vsel %vm4571_vm13, %v4315_v34, %v4827_v17  ;;  %v3975_v24 = vrot.slane %v10170_v50, 4 }
 0x3f6   : > { %v7624_v55 = vpack.c.bf16 %v4955_v13, %v4955_v13  ;;  %v6581_v32 = vrot.slane %v6236_v30, 2  ;;  %v6365_v59 = vunpack.c.l.b16 %v7754_v38  ;;  %v7752_v46 = vpack.c.bf16 %v5083_v37, %v5083_v37 }
 0x3f7   : > { %v4960_v44 = vsel %vm4448_vm15, %v4192_v21, %v4704_v31  ;;  %v6805_v6 = vrot.slane %v6364_v0, 2  ;;  %v4832_v63 = vmul.f32 0.01, %v4320_v23  ;;  %v3210_v45 = vmax.f32 %v3208_v36, %v3209_v49 }
 0x3f8   : > { %v6235_v47 = vunpack.c.l.b16 %v7624_v55  ;;  %v6363_v2 = vunpack.c.l.b16 %v7752_v46  ;;  %vm4576_vm0 = vcmp.ge.f32.partialorder %v4320_v23, 0.0  ;;  %v3976_v25 = vmax.f32 %v10170_v50, %v3975_v24 }
 0x3f9   : > { %v3225_v20 = vrot.slane %v10191_v62, 4  ;;  %v6583_v1 = vrot.slane %v6237_v29, 1  ;;  %v7629_v60 = vpack.c.bf16 %v4960_v44, %v4960_v44  ;;  %v3211_v53 = vrot.slane %v3210_v45, 1 }
 0x3fa   : > { %v6579_v14 = vrot.slane %v6235_v47, 3  ;;  %v6807_v40 = vrot.slane %v6365_v59, 1  ;;  %v6803_v34 = vrot.slane %v6363_v2, 3  ;;  %v3977_v30 = vrot.slane %v3976_v25, 2 }
 0x3fb   : > { %v3226_v28 = vmax.f32 %v10191_v62, %v3225_v20  ;;  %v5088_v0 = vsel %vm4576_vm0, %v4320_v23, %v4832_v63  ;;  %v3212_v36 = vmax.f32 %v3210_v45, %v3211_v53  ;;  %v3993_v27 = vrot.slane %v10197_v33, 4 }
 0x3fc   : > { %v6580_v21 = vsel %vm6395_vm5, %v6579_v14, %v10441_v3  ;;  %v6804_v48 = vsel %vm6395_vm5, %v6803_v34, %v6802_v42  ;;  %v3978_v38 = vmax.f32 %v3976_v25, %v3977_v30  ;;  %v10465_v62 = vunpack.c.l.b16 %v7629_v60 }
 0x3fd   : > { %v6582_v50 = vsel %vm6398_vm6, %v6581_v32, %v6580_v21  ;;  %v3227_v17 = vrot.slane %v3226_v28, 2  ;;  %v6806_v31 = vsel %vm6398_vm6, %v6805_v6, %v6804_v48  ;;  %v7757_v37 = vpack.c.bf16 %v5088_v0, %v5088_v0 }
 0x3fe   : > { %v6584_v13 = vsel %vm6401_vm8, %v6583_v1, %v6582_v50  ;;  %v6808_v3 = vsel %vm6401_vm8, %v6807_v40, %v6806_v31  ;;  %v3979_v23 = vrot.slane %v3978_v38, 1  ;;  %v4190_v24 = vadd.f32 %v10327_v43, %v3212_v36 }
 0x3ff   : > { %v6850_v49 = vpack.c.b16 %v6584_v13, %v6584_v13  ;;  %v3228_v29 = vmax.f32 %v3226_v28, %v3227_v17  ;;  %v6866_v55 = vpack.c.b16 %v6808_v3, %v6808_v3  ;;  %v3994_v42 = vmax.f32 %v10197_v33, %v3993_v27 }
 0x400   : > { %v3980_v32 = vmax.f32 %v3978_v38, %v3979_v23  ;;  %v3213_v46 = vrot.slane %v10203_v35, 4  ;;  %v3981_v44 = vrot.slane %v10209_v12, 4  ;;  %v3243_v47 = vrot.slane %v10218_v57, 4 }
 0x401   : > { %6914 = vst [vmem:[%s8849_s29 + $0x34] sm:$0xf] %v6850_v49  ;;  %v3229_v59 = vrot.slane %v3228_v29, 1  ;;  %6930 = vst [vmem:[%s8849_s29 + $0x74] sm:$0xf] %v6866_v55  ;;  %v3995_v6 = vrot.slane %v3994_v42, 2  ;;  %v10482_v53 = vunpack.c.l.b16 %v7757_v37 }
 0x402   : > { %v4011_v63 = vrot.slane %v10220_v51, 4  ;;  %v4318_v45 = vadd.f32 %v10327_v43, %v3980_v32  ;;  %v3214_v25 = vmax.f32 %v10203_v35, %v3213_v46  ;;  %v3982_v33 = vmax.f32 %v10209_v12, %v3981_v44 }
 0x403   : > { %v3230_v2 = vmax.f32 %v3228_v29, %v3229_v59  ;;  %v3996_v20 = vmax.f32 %v3994_v42, %v3995_v6  ;;  %v3244_v1 = vmax.f32 %v10218_v57, %v3243_v47  ;;  %v6587_v60 = vrot.slane %v10465_v62, 6 }
 0x404   : > { %v4012_v14 = vmax.f32 %v10220_v51, %v4011_v63  ;;  %v4702_v40 = vmul.f32 0.01, %v4190_v24  ;;  %v3215_v28 = vrot.slane %v3214_v25, 2  ;;  %v3983_v21 = vrot.slane %v3982_v33, 2 }
 0x405   : > { %v4193_v34 = vadd.f32 %v10327_v43, %v3230_v2  ;;  %v3997_v30 = vrot.slane %v3996_v20, 1  ;;  %v3245_v0 = vrot.slane %v3244_v1, 2  ;;  %vm4446_vm1 = vcmp.ge.f32.partialorder %v4190_v24, 0.0 }
 0x406   : > { %v4013_v36 = vrot.slane %v4012_v14, 2  ;;  %v4830_v12 = vmul.f32 0.01, %v4318_v45  ;;  %v3216_v57 = vmax.f32 %v3214_v25, %v3215_v28  ;;  %v3984_v50 = vmax.f32 %v3982_v33, %v3983_v21 }
 0x407   : > { %vm4449_vm3 = vcmp.ge.f32.partialorder %v4193_v34, 0.0  ;;  %v4705_v35 = vmul.f32 0.01, %v4193_v34  ;;  %v3998_v27 = vmax.f32 %v3996_v20, %v3997_v30  ;;  %vm4574_vm2 = vcmp.ge.f32.partialorder %v4318_v45, 0.0 }
 0x408   : > { %v3246_v51 = vmax.f32 %v3244_v1, %v3245_v0  ;;  %v4014_v48 = vmax.f32 %v4012_v14, %v4013_v36  ;;  %v3231_v38 = vrot.slane %v10223_v9, 4  ;;  %v4958_v17 = vsel %vm4446_vm1, %v4190_v24, %v4702_v40 }
 0x409   : > { %v4961_v13 = vsel %vm4449_vm3, %v4193_v34, %v4705_v35  ;;  %v4321_v31 = vadd.f32 %v10327_v43, %v3998_v27  ;;  %v3217_v49 = vrot.slane %v3216_v57, 1  ;;  %v3985_v3 = vrot.slane %v3984_v50, 1 }
 0x40a   : > { %v3247_v23 = vrot.slane %v3246_v51, 1  ;;  %v4015_v29 = vrot.slane %v4014_v48, 1  ;;  %v3232_v55 = vmax.f32 %v10223_v9, %v3231_v38  ;;  %v5086_v37 = vsel %vm4574_vm2, %v4318_v45, %v4830_v12 }
 0x40b   : > { %vm4577_vm4 = vcmp.ge.f32.partialorder %v4321_v31, 0.0  ;;  %v4833_v42 = vmul.f32 0.01, %v4321_v31  ;;  %v3218_v32 = vmax.f32 %v3216_v57, %v3217_v49  ;;  %v7627_v59 = vpack.c.bf16 %v4958_v17, %v4958_v17 }
 0x40c   : > { %v3986_v46 = vmax.f32 %v3984_v50, %v3985_v3  ;;  %v3248_v44 = vmax.f32 %v3246_v51, %v3247_v23  ;;  %v3233_v6 = vrot.slane %v3232_v55, 2  ;;  %v7630_v47 = vpack.c.bf16 %v4961_v13, %v4961_v13 }
 0x40d   : > { %v5089_v63 = vsel %vm4577_vm4, %v4321_v31, %v4833_v42  ;;  %v4191_v24 = vadd.f32 %v10327_v43, %v3218_v32  ;;  %v3999_v2 = vrot.slane %v10228_v4, 4  ;;  %v7755_v25 = vpack.c.bf16 %v5086_v37, %v5086_v37 }
 0x40e   : > { %v4319_v20 = vadd.f32 %v10327_v43, %v3986_v46  ;;  %v4196_v33 = vadd.f32 %v10327_v43, %v3248_v44  ;;  %v4016_v9 = vmax.f32 %v4014_v48, %v4015_v29  ;;  %v3234_v1 = vmax.f32 %v3232_v55, %v3233_v6 }
 0x40f   : > { %vm4447_vm7 = vcmp.ge.f32.partialorder %v4191_v24, 0.0  ;;  %v4703_v45 = vmul.f32 0.01, %v4191_v24  ;;  %v4000_v14 = vmax.f32 %v10228_v4, %v3999_v2  ;;  %v6811_v40 = vrot.slane %v10482_v53, 6 }
 0x410   : > { %v7758_v34 = vpack.c.bf16 %v5089_v63, %v5089_v63  ;;  %vm4575_vm10 = vcmp.ge.f32.partialorder %v4319_v20, 0.0  ;;  %v4831_v30 = vmul.f32 0.01, %v4319_v20  ;;  %v6241_v28 = vunpack.c.l.b16 %v7630_v47 }
 0x411   : > { %v4959_v21 = vsel %vm4447_vm7, %v4191_v24, %v4703_v45  ;;  %vm4452_vm13 = vcmp.ge.f32.partialorder %v4196_v33, 0.0  ;;  %v4708_v0 = vmul.f32 0.01, %v4196_v33  ;;  %v10495_v12 = vadd.f32 %v10327_v43, %v4016_v9 }
 0x412   : > { %v7628_v35 = vpack.c.bf16 %v4959_v21, %v4959_v21  ;;  %v5087_v36 = vsel %vm4575_vm10, %v4319_v20, %v4831_v30  ;;  %v3235_v27 = vrot.slane %v3234_v1, 1  ;;  %v6238_v57 = vunpack.c.l.b16 %v7627_v59 }
 0x413   : > { %v6366_v50 = vunpack.c.l.b16 %v7755_v25  ;;  %v7756_v51 = vpack.c.bf16 %v5087_v36, %v5087_v36  ;;  %v4001_v48 = vrot.slane %v4000_v14, 2  ;;  %v6369_v4 = vunpack.c.l.b16 %v7758_v34 }
 0x414   : > { %v6239_v38 = vunpack.c.l.b16 %v7628_v35  ;;  %v10497_v53 = vsel %vm4452_vm13, %v4196_v33, %v4708_v0  ;;  %v3236_v17 = vmax.f32 %v3234_v1, %v3235_v27  ;;  %v3249_v49 = vrot.slane %v10242_v11, 4 }
 0x415   : > { %v6367_v13 = vunpack.c.l.b16 %v7756_v51  ;;  %v4002_v31 = vmax.f32 %v4000_v14, %v4001_v48  ;;  %v4017_v3 = vrot.slane %v10260_v8, 4  ;;  %v6589_v23 = vrot.slane %v6241_v28, 5  ;;  %v10772_v14 = vld [vmem:[#allocation8_spill] sm:$0xff] }
 0x416   : > { %v6585_v29 = vrot.slane %v6239_v38, 7  ;;  %v10502_v55 = vmul.f32 0.01, %v10495_v12  ;;  %v4194_v37 = vadd.f32 %v10327_v43, %v3236_v17  ;;  %v3250_v59 = vmax.f32 %v10242_v11, %v3249_v49 }
 0x417   : > { %v6809_v42 = vrot.slane %v6367_v13, 7  ;;  %v4003_v32 = vrot.slane %v4002_v31, 1  ;;  %v4018_v46 = vmax.f32 %v10260_v8, %v4017_v3  ;;  %v6813_v44 = vrot.slane %v6369_v4, 5 }
 0x418   : > { %v6586_v6 = vsel %vm6383_vm9, %v6585_v29, %v6238_v57  ;;  %v7633_v47 = vpack.c.bf16 %v10497_v53, %v10497_v53  ;;  %vm4450_vm15 = vcmp.ge.f32.partialorder %v4194_v37, 0.0  ;;  %v4706_v2 = vmul.f32 0.01, %v4194_v37 }
 0x419   : > { %v6588_v63 = vsel %vm6386_vm11, %v6587_v60, %v6586_v6  ;;  %v6810_v24 = vsel %vm6383_vm9, %v6809_v42, %v6366_v50  ;;  %v4004_v25 = vmax.f32 %v4002_v31, %v4003_v32  ;;  %v3251_v8 = vrot.slane %v3250_v59, 2 }
 0x41a   : > { %v6812_v20 = vsel %vm6386_vm11, %v6811_v40, %v6810_v24  ;;  %v6590_v11 = vsel %vm6389_vm12, %v6589_v23, %v6588_v63  ;;  %v4019_v33 = vrot.slane %v4018_v46, 2  ;;  %v4962_v9 = vsel %vm4450_vm15, %v4194_v37, %v4706_v2 }
 0x41b   : > { %v4322_v45 = vadd.f32 %v10327_v43, %v4004_v25  ;;  %v6814_v1 = vsel %vm6389_vm12, %v6813_v44, %v6812_v20  ;;  %v3237_v34 = vrot.slane %v10772_v14, 4  ;;  %vm4580_vm0 = vcmp.ge.f32.partialorder %v10495_v12, 0.0 }
 0x41c   : > { %v7631_v62 = vpack.c.bf16 %v4962_v9, %v4962_v9  ;;  %v3252_v60 = vmax.f32 %v3250_v59, %v3251_v8  ;;  %v4020_v30 = vmax.f32 %v4018_v46, %v4019_v33  ;;  %v4005_v28 = vrot.slane %v10269_v16, 4  ;;  %v10773_v33 = vld [vmem:[#allocation9_spill] sm:$0xff] }
 0x41d   : > { %vm4578_vm1 = vcmp.ge.f32.partialorder %v4322_v45, 0.0  ;;  %v4834_v40 = vmul.f32 0.01, %v4322_v45  ;;  %v3238_v21 = vmax.f32 %v10772_v14, %v3237_v34  ;;  %v3267_v0 = vrot.slane %v10278_v61, 4 }
 0x41e   : > { %v6242_v35 = vunpack.c.l.b16 %v7631_v62  ;;  %v3253_v36 = vrot.slane %v3252_v60, 1  ;;  %v4021_v27 = vrot.slane %v4020_v30, 1  ;;  %v4006_v57 = vmax.f32 %v10269_v16, %v4005_v28 }
 0x41f   : > { %v5090_v50 = vsel %vm4578_vm1, %v4322_v45, %v4834_v40  ;;  %v3239_v51 = vrot.slane %v3238_v21, 2  ;;  %v3268_v48 = vmax.f32 %v10278_v61, %v3267_v0  ;;  %v4035_v4 = vrot.slane %v10280_v26, 4 }
 0x420   : > { %v6591_v38 = vrot.slane %v6242_v35, 4  ;;  %v7759_v17 = vpack.c.bf16 %v5090_v50, %v5090_v50  ;;  %v3254_v13 = vmax.f32 %v3252_v60, %v3253_v36  ;;  %v4022_v31 = vmax.f32 %v4020_v30, %v4021_v27 }
 0x421   : > { %v3240_v49 = vmax.f32 %v3238_v21, %v3239_v51  ;;  %v4007_v3 = vrot.slane %v4006_v57, 2  ;;  %v3269_v23 = vrot.slane %v3268_v48, 2  ;;  %v4036_v29 = vmax.f32 %v10280_v26, %v4035_v4 }
 0x422   : > { %v6592_v37 = vsel %vm6392_vm14, %v6591_v38, %v6590_v11  ;;  %v6370_v42 = vunpack.c.l.b16 %v7759_v17  ;;  %v4197_v16 = vadd.f32 %v10327_v43, %v3254_v13  ;;  %v4325_v32 = vadd.f32 %v10327_v43, %v4022_v31 }
 0x423   : > { %v3241_v59 = vrot.slane %v3240_v49, 1  ;;  %v4008_v61 = vmax.f32 %v4006_v57, %v4007_v3  ;;  %v3270_v46 = vmax.f32 %v3268_v48, %v3269_v23  ;;  %v4037_v44 = vrot.slane %v4036_v29, 2 }
 0x424   : > { %v6815_v6 = vrot.slane %v6370_v42, 4  ;;  %vm4453_vm3 = vcmp.ge.f32.partialorder %v4197_v16, 0.0  ;;  %v4709_v63 = vmul.f32 0.01, %v4197_v16  ;;  %vm4581_vm2 = vcmp.ge.f32.partialorder %v4325_v32, 0.0 }
 0x425   : > { %v4837_v24 = vmul.f32 0.01, %v4325_v32  ;;  %v3242_v2 = vmax.f32 %v3240_v49, %v3241_v59  ;;  %v4009_v25 = vrot.slane %v4008_v61, 1  ;;  %v3271_v20 = vrot.slane %v3270_v46, 1 }
 0x426   : > { %v6816_v26 = vsel %vm6392_vm14, %v6815_v6, %v6814_v1  ;;  %v4965_v11 = vsel %vm4453_vm3, %v4197_v16, %v4709_v63  ;;  %v4038_v8 = vmax.f32 %v4036_v29, %v4037_v44  ;;  %v3255_v9 = vrot.slane %v10773_v33, 4 }
 0x427   : > { %v5092_v45 = vsel %vm4580_vm0, %v10495_v12, %v10502_v55  ;;  %v4195_v14 = vadd.f32 %v10327_v43, %v3242_v2  ;;  %v4010_v34 = vmax.f32 %v4008_v61, %v4009_v25  ;;  %v7634_v62 = vpack.c.bf16 %v4965_v11, %v4965_v11 }
 0x428   : > { %v5093_v60 = vsel %vm4581_vm2, %v4325_v32, %v4837_v24  ;;  %v3272_v30 = vmax.f32 %v3270_v46, %v3271_v20  ;;  %v3256_v28 = vmax.f32 %v10773_v33, %v3255_v9  ;;  %v4039_v21 = vrot.slane %v4038_v8, 1 }
 0x429   : > { %vm4451_vm4 = vcmp.ge.f32.partialorder %v4195_v14, 0.0  ;;  %v4707_v40 = vmul.f32 0.01, %v4195_v14  ;;  %v4323_v1 = vadd.f32 %v10327_v43, %v4010_v34  ;;  %v6244_v0 = vunpack.c.l.b16 %v7633_v47 }
 0x42a   : > { %v7761_v35 = vpack.c.bf16 %v5092_v45, %v5092_v45  ;;  %v3257_v36 = vrot.slane %v3256_v28, 2  ;;  %v7762_v12 = vpack.c.bf16 %v5093_v60, %v5093_v60  ;;  %v6245_v57 = vunpack.c.l.b16 %v7634_v62 }
 0x42b   : > { %v4963_v55 = vsel %vm4451_vm4, %v4195_v14, %v4707_v40  ;;  %vm4579_vm7 = vcmp.ge.f32.partialorder %v4323_v1, 0.0  ;;  %v4835_v27 = vmul.f32 0.01, %v4323_v1  ;;  %v4200_v48 = vadd.f32 %v10327_v43, %v3272_v30 }
 0x42c   : > { %v7632_v50 = vpack.c.bf16 %v4963_v55, %v4963_v55  ;;  %v4040_v4 = vmax.f32 %v4038_v8, %v4039_v21  ;;  %v4023_v38 = vrot.slane %v10288_v7, 4  ;;  %v3258_v31 = vmax.f32 %v3256_v28, %v3257_v36 }
 0x42d   : > { %v5091_v51 = vsel %vm4579_vm7, %v4323_v1, %v4835_v27  ;;  %v3273_v53 = vrot.slane %v10313_v19, 4  ;;  %v6595_v47 = vrot.slane %v6244_v0, 2  ;;  %v6372_v49 = vunpack.c.l.b16 %v7761_v35 }
 0x42e   : > { %v6243_v17 = vunpack.c.l.b16 %v7632_v50  ;;  %v7760_v13 = vpack.c.bf16 %v5091_v51, %v5091_v51  ;;  %v6373_v3 = vunpack.c.l.b16 %v7762_v12  ;;  %v4024_v42 = vmax.f32 %v10288_v7, %v4023_v38  ;;  %v10565_v12 = vld [vmem:[%s10624_s2] ss:$0 sm:$0xff] }
 0x42f   : > { %v3274_v16 = vmax.f32 %v10313_v19, %v3273_v53  ;;  %v6597_v32 = vrot.slane %v6245_v57, 1  ;;  %vm4456_vm10 = vcmp.ge.f32.partialorder %v4200_v48, 0.0  ;;  %v4712_v59 = vmul.f32 0.01, %v4200_v48 }
 0x430   : > { %v6593_v23 = vrot.slane %v6243_v17, 3  ;;  %v6371_v29 = vunpack.c.l.b16 %v7760_v13  ;;  %v4328_v61 = vadd.f32 %v10327_v43, %v4040_v4  ;;  %v3259_v6 = vrot.slane %v3258_v31, 1 }
 0x431   : > { %v4025_v63 = vrot.slane %v4024_v42, 2  ;;  %v6819_v24 = vrot.slane %v6372_v49, 2  ;;  %v3275_v25 = vrot.slane %v3274_v16, 2  ;;  %v4041_v20 = vrot.slane %v10316_v18, 4 }
 0x432   : > { %v6594_v46 = vsel %vm6395_vm5, %v6593_v23, %v6592_v37  ;;  %v6817_v44 = vrot.slane %v6371_v29, 3  ;;  %v6821_v7 = vrot.slane %v6373_v3, 1  ;;  %v4968_v37 = vsel %vm4456_vm10, %v4200_v48, %v4712_v59 }
 0x433   : > { %v6596_v2 = vsel %vm6398_vm6, %v6595_v47, %v6594_v46  ;;  %v4026_v8 = vmax.f32 %v4024_v42, %v4025_v63  ;;  %v4840_v9 = vmul.f32 0.01, %v4328_v61  ;;  %v3260_v14 = vmax.f32 %v3258_v31, %v3259_v6 }
 0x434   : > { %v6598_v19 = vsel %vm6401_vm8, %v6597_v32, %v6596_v2  ;;  %v6818_v11 = vsel %vm6395_vm5, %v6817_v44, %v6816_v26  ;;  %v3276_v62 = vmax.f32 %v3274_v16, %v3275_v25  ;;  %vm4584_vm13 = vcmp.ge.f32.partialorder %v4328_v61, 0.0 }
 0x435   : > { %v6851_v33 = vpack.c.b16 %v6598_v19, %v6598_v19  ;;  %v6820_v43 = vsel %vm6398_vm6, %v6819_v24, %v6818_v11  ;;  %v4027_v34 = vrot.slane %v4026_v8, 1  ;;  %v4042_v30 = vmax.f32 %v10316_v18, %v4041_v20 }
 0x436   : > { %v6822_v45 = vsel %vm6401_vm8, %v6821_v7, %v6820_v43  ;;  %v3261_v26 = vrot.slane %v10331_v10, 4  ;;  %v3277_v40 = vrot.slane %v3276_v62, 1  ;;  %v4029_v1 = vrot.slane %v10333_v22, 4 }
 0x437   : > { %6915 = vst [vmem:[%s8849_s29 + $0x38] sm:$0xf] %v6851_v33  ;;  %v6867_v60 = vpack.c.b16 %v6822_v45, %v6822_v45  ;;  %v4028_v28 = vmax.f32 %v4026_v8, %v4027_v34  ;;  %v7637_v21 = vpack.c.bf16 %v4968_v37, %v4968_v37  ;;  %v4043_v0 = vrot.slane %v4042_v30, 2 }
 0x438   : > { %v3262_v35 = vmax.f32 %v10331_v10, %v3261_v26  ;;  %v5096_v36 = vsel %vm4584_vm13, %v4328_v61, %v4840_v9  ;;  %v4198_v55 = vadd.f32 %v10565_v12, %v3260_v14  ;;  %v3278_v18 = vmax.f32 %v3276_v62, %v3277_v40 }
 0x439   : > { %6931 = vst [vmem:[%s8849_s29 + $0x78] sm:$0xf] %v6867_v60  ;;  %v4030_v27 = vmax.f32 %v10333_v22, %v4029_v1  ;;  %v4044_v57 = vmax.f32 %v4042_v30, %v4043_v0  ;;  %v3291_v51 = vrot.slane %v10347_v15, 4  ;;  %v4326_v48 = vadd.f32 %v10565_v12, %v4028_v28 }
 0x43a   : > { %v3263_v50 = vrot.slane %v3262_v35, 2  ;;  %v4201_v4 = vadd.f32 %v10565_v12, %v3278_v18  ;;  %v4059_v38 = vrot.slane %v10349_v41, 4  ;;  %v10573_v17 = vunpack.c.l.b16 %v7637_v21 }
 0x43b   : > { %v4031_v10 = vrot.slane %v4030_v27, 2  ;;  %v7765_v13 = vpack.c.bf16 %v5096_v36, %v5096_v36  ;;  %v4045_v31 = vrot.slane %v4044_v57, 1  ;;  %vm4454_vm15 = vcmp.ge.f32.partialorder %v4198_v55, 0.0 }
 0x43c   : > { %v3264_v53 = vmax.f32 %v3262_v35, %v3263_v50  ;;  %v4710_v47 = vmul.f32 0.01, %v4198_v55  ;;  %v4713_v49 = vmul.f32 0.01, %v4201_v4  ;;  %vm4457_vm0 = vcmp.ge.f32.partialorder %v4201_v4, 0.0 }
 0x43d   : > { %v4032_v22 = vmax.f32 %v4030_v27, %v4031_v10  ;;  %v4046_v3 = vmax.f32 %v4044_v57, %v4045_v31  ;;  %v3292_v29 = vmax.f32 %v10347_v15, %v3291_v51  ;;  %v4838_v42 = vmul.f32 0.01, %v4326_v48 }
 0x43e   : > { %v3265_v23 = vrot.slane %v3264_v53, 1  ;;  %v4060_v32 = vmax.f32 %v10349_v41, %v4059_v38  ;;  %v3279_v59 = vrot.slane %v10351_v56, 4  ;;  %v6376_v61 = vunpack.c.l.b16 %v7765_v13 }
 0x43f   : > { %v4033_v16 = vrot.slane %v4032_v22, 1  ;;  %vm4582_vm1 = vcmp.ge.f32.partialorder %v4326_v48, 0.0  ;;  %v4329_v46 = vadd.f32 %v10565_v12, %v4046_v3  ;;  %v4966_v6 = vsel %vm4454_vm15, %v4198_v55, %v4710_v47 }
 0x440   : > { %v3266_v44 = vmax.f32 %v3264_v53, %v3265_v23  ;;  %v4969_v63 = vsel %vm4457_vm0, %v4201_v4, %v4713_v49  ;;  %v3280_v2 = vmax.f32 %v10351_v56, %v3279_v59  ;;  %v3293_v20 = vrot.slane %v3292_v29, 2 }
 0x441   : > { %v4034_v24 = vmax.f32 %v4032_v22, %v4033_v16  ;;  %vm4585_vm3 = vcmp.ge.f32.partialorder %v4329_v46, 0.0  ;;  %v4841_v25 = vmul.f32 0.01, %v4329_v46  ;;  %v5094_v7 = vsel %vm4582_vm1, %v4326_v48, %v4838_v42 }
 0x442   : > { %v4199_v15 = vadd.f32 %v10565_v12, %v3266_v44  ;;  %v4061_v19 = vrot.slane %v4060_v32, 2  ;;  %v3281_v11 = vrot.slane %v3280_v2, 2  ;;  %v7638_v8 = vpack.c.bf16 %v4969_v63, %v4969_v63 }
 0x443   : > { %v4327_v41 = vadd.f32 %v10565_v12, %v4034_v24  ;;  %v5097_v33 = vsel %vm4585_vm3, %v4329_v46, %v4841_v25  ;;  %v7635_v37 = vpack.c.bf16 %v4966_v6, %v4966_v6  ;;  %v7763_v14 = vpack.c.bf16 %v5094_v7, %v5094_v7 }
 0x444   : > { %vm4455_vm2 = vcmp.ge.f32.partialorder %v4199_v15, 0.0  ;;  %v4711_v43 = vmul.f32 0.01, %v4199_v15  ;;  %v7766_v9 = vpack.c.bf16 %v5097_v33, %v5097_v33  ;;  %v3282_v34 = vmax.f32 %v3280_v2, %v3281_v11 }
 0x445   : > { %vm4583_vm4 = vcmp.ge.f32.partialorder %v4327_v41, 0.0  ;;  %v4839_v45 = vmul.f32 0.01, %v4327_v41  ;;  %v4047_v62 = vrot.slane %v10360_v58, 4  ;;  %v3294_v26 = vmax.f32 %v3292_v29, %v3293_v20 }
 0x446   : > { %v4967_v56 = vsel %vm4455_vm2, %v4199_v15, %v4711_v43  ;;  %v4062_v28 = vmax.f32 %v4060_v32, %v4061_v19  ;;  %v6601_v40 = vrot.slane %v10573_v17, 6  ;;  %v6825_v1 = vrot.slane %v6376_v61, 6 }
 0x447   : > { %v7636_v60 = vpack.c.bf16 %v4967_v56, %v4967_v56  ;;  %v5095_v30 = vsel %vm4583_vm4, %v4327_v41, %v4839_v45  ;;  %v6249_v21 = vunpack.c.l.b16 %v7638_v8  ;;  %v6377_v35 = vunpack.c.l.b16 %v7766_v9 }
 0x448   : > { %v7764_v0 = vpack.c.bf16 %v5095_v30, %v5095_v30  ;;  %v3283_v55 = vrot.slane %v3282_v34, 1  ;;  %v4048_v18 = vmax.f32 %v10360_v58, %v4047_v62  ;;  %v6246_v27 = vunpack.c.l.b16 %v7635_v37 }
 0x449   : > { %v6247_v36 = vunpack.c.l.b16 %v7636_v60  ;;  %v6374_v57 = vunpack.c.l.b16 %v7763_v14  ;;  %v3297_v51 = vrot.slane %v10377_v52, 4  ;;  %v3295_v4 = vrot.slane %v3294_v26, 1 }
 0x44a   : > { %v6375_v50 = vunpack.c.l.b16 %v7764_v0  ;;  %v4063_v10 = vrot.slane %v4062_v28, 1  ;;  %v3284_v38 = vmax.f32 %v3282_v34, %v3283_v55  ;;  %v6603_v13 = vrot.slane %v6249_v21, 5 }
 0x44b   : > { %v6599_v48 = vrot.slane %v6247_v36, 7  ;;  %v4049_v17 = vrot.slane %v4048_v18, 2  ;;  %v3298_v53 = vmax.f32 %v10377_v52, %v3297_v51  ;;  %v6827_v47 = vrot.slane %v6377_v35, 5 }
 0x44c   : > { %v6823_v31 = vrot.slane %v6375_v50, 7  ;;  %v4202_v22 = vadd.f32 %v10565_v12, %v3284_v38  ;;  %v4065_v58 = vrot.slane %v10387_v5, 4  ;;  %v3296_v32 = vmax.f32 %v3294_v26, %v3295_v4 }
 0x44d   : > { %v6600_v49 = vsel %vm6383_vm9, %v6599_v48, %v6246_v27  ;;  %v4050_v29 = vmax.f32 %v4048_v18, %v4049_v17  ;;  %v3299_v42 = vrot.slane %v3298_v53, 2  ;;  %v4064_v59 = vmax.f32 %v4062_v28, %v4063_v10 }
 0x44e   : > { %v6602_v3 = vsel %vm6386_vm11, %v6601_v40, %v6600_v49  ;;  %v6824_v23 = vsel %vm6383_vm9, %v6823_v31, %v6374_v57  ;;  %vm4458_vm7 = vcmp.ge.f32.partialorder %v4202_v22, 0.0  ;;  %v4714_v61 = vmul.f32 0.01, %v4202_v22 }
 0x44f   : > { %v6826_v16 = vsel %vm6386_vm11, %v6825_v1, %v6824_v23  ;;  %v6604_v52 = vsel %vm6389_vm12, %v6603_v13, %v6602_v3  ;;  %v4051_v46 = vrot.slane %v4050_v29, 1  ;;  %v3300_v6 = vmax.f32 %v3298_v53, %v3299_v42 }
 0x450   : > { %v6828_v44 = vsel %vm6389_vm12, %v6827_v47, %v6826_v16  ;;  %v4066_v63 = vmax.f32 %v10387_v5, %v4065_v58  ;;  %v3285_v24 = vrot.slane %v10395_v54, 4  ;;  %v4053_v2 = vrot.slane %v10398_v39, 4 }
 0x451   : > { %v4970_v25 = vsel %vm4458_vm7, %v4202_v22, %v4714_v61  ;;  %v4052_v15 = vmax.f32 %v4050_v29, %v4051_v46  ;;  %v3301_v7 = vrot.slane %v3300_v6, 1  ;;  %v4204_v11 = vadd.f32 %v10565_v12, %v3296_v32 }
 0x452   : > { %v7639_v20 = vpack.c.bf16 %v4970_v25, %v4970_v25  ;;  %v4067_v41 = vrot.slane %v4066_v63, 2  ;;  %v3286_v19 = vmax.f32 %v10395_v54, %v3285_v24  ;;  %v4332_v8 = vadd.f32 %v10565_v12, %v4064_v59 }
 0x453   : > { %v4330_v33 = vadd.f32 %v10565_v12, %v4052_v15  ;;  %v4054_v43 = vmax.f32 %v10398_v39, %v4053_v2  ;;  %v3302_v37 = vmax.f32 %v3300_v6, %v3301_v7  ;;  %vm4460_vm11 = vcmp.ge.f32.partialorder %v4204_v11, 0.0 }
 0x454   : > { %v6250_v5 = vunpack.c.l.b16 %v7639_v20  ;;  %v4068_v9 = vmax.f32 %v4066_v63, %v4067_v41  ;;  %v3287_v45 = vrot.slane %v3286_v19, 2  ;;  %v4716_v30 = vmul.f32 0.01, %v4204_v11 }
 0x455   : > { %vm4586_vm9 = vcmp.ge.f32.partialorder %v4330_v33, 0.0  ;;  %v4842_v14 = vmul.f32 0.01, %v4330_v33  ;;  %v4055_v56 = vrot.slane %v4054_v43, 2  ;;  %v4205_v62 = vadd.f32 %v10565_v12, %v3302_v37 }
 0x456   : > { %v6605_v34 = vrot.slane %v6250_v5, 4  ;;  %v4069_v60 = vrot.slane %v4068_v9, 1  ;;  %v3288_v54 = vmax.f32 %v3286_v19, %v3287_v45  ;;  %vm4588_vm12 = vcmp.ge.f32.partialorder %v4332_v8, 0.0 }
 0x457   : > { %v5098_v26 = vsel %vm4586_vm9, %v4330_v33, %v4842_v14  ;;  %v4056_v28 = vmax.f32 %v4054_v43, %v4055_v56  ;;  %v4844_v40 = vmul.f32 0.01, %v4332_v8  ;;  %v4717_v21 = vmul.f32 0.01, %v4205_v62 }
 0x458   : > { %v6606_v39 = vsel %vm6392_vm14, %v6605_v34, %v6604_v52  ;;  %v7767_v1 = vpack.c.bf16 %v5098_v26, %v5098_v26  ;;  %v4070_v0 = vmax.f32 %v4068_v9, %v4069_v60  ;;  %v3289_v35 = vrot.slane %v3288_v54, 1 }
 0x459   : > { %v4057_v36 = vrot.slane %v4056_v28, 1  ;;  %vm4461_vm10 = vcmp.ge.f32.partialorder %v4205_v62, 0.0  ;;  %v4972_v50 = vsel %vm4460_vm11, %v4204_v11, %v4716_v30  ;;  %v5100_v51 = vsel %vm4588_vm12, %v4332_v8, %v4844_v40 }
 0x45a   : > { %v6378_v55 = vunpack.c.l.b16 %v7767_v1  ;;  %v4333_v18 = vadd.f32 %v10565_v12, %v4070_v0  ;;  %v3290_v27 = vmax.f32 %v3288_v54, %v3289_v35  ;;  %v4973_v4 = vsel %vm4461_vm10, %v4205_v62, %v4717_v21 }
 0x45b   : > { %v4058_v57 = vmax.f32 %v4056_v28, %v4057_v36  ;;  %v7641_v17 = vpack.c.bf16 %v4972_v50, %v4972_v50  ;;  %v7769_v49 = vpack.c.bf16 %v5100_v51, %v5100_v51  ;;  %v7642_v22 = vpack.c.bf16 %v4973_v4, %v4973_v4 }
 0x45c   : > { %v6829_v48 = vrot.slane %v6378_v55, 4  ;;  %vm4589_vm13 = vcmp.ge.f32.partialorder %v4333_v18, 0.0  ;;  %v4845_v10 = vmul.f32 0.01, %v4333_v18  ;;  %v4203_v38 = vadd.f32 %v10565_v12, %v3290_v27 }
 0x45d   : > { %v4331_v31 = vadd.f32 %v10565_v12, %v4058_v57  ;;  %v6252_v16 = vunpack.c.l.b16 %v7641_v17  ;;  %v6380_v59 = vunpack.c.l.b16 %v7769_v49  ;;  %v6253_v61 = vunpack.c.l.b16 %v7642_v22 }
 0x45e   : > { %v6830_v13 = vsel %vm6392_vm14, %v6829_v48, %v6828_v44  ;;  %v5101_v53 = vsel %vm4589_vm13, %v4333_v18, %v4845_v10  ;;  %vm4459_vm15 = vcmp.ge.f32.partialorder %v4203_v38, 0.0  ;;  %v4715_v47 = vmul.f32 0.01, %v4203_v38 }
 0x45f   : > { %vm4587_vm0 = vcmp.ge.f32.partialorder %v4331_v31, 0.0  ;;  %v4843_v58 = vmul.f32 0.01, %v4331_v31  ;;  %v7770_v3 = vpack.c.bf16 %v5101_v53, %v5101_v53  ;;  %v6609_v6 = vrot.slane %v6252_v16, 2 }
 0x460   : > { %v4971_v23 = vsel %vm4459_vm15, %v4203_v38, %v4715_v47  ;;  %v6833_v24 = vrot.slane %v6380_v59, 2  ;;  %v6611_v2 = vrot.slane %v6253_v61, 1 }
 0x461   : > { %v7640_v29 = vpack.c.bf16 %v4971_v23, %v4971_v23  ;;  %v5099_v42 = vsel %vm4587_vm0, %v4331_v31, %v4843_v58  ;;  %v6381_v46 = vunpack.c.l.b16 %v7770_v3 }
 0x462   : > { %v7768_v32 = vpack.c.bf16 %v5099_v42, %v5099_v42 }
 0x463   : > { %v6251_v52 = vunpack.c.l.b16 %v7640_v29  ;;  %v6835_v15 = vrot.slane %v6381_v46, 1 }
 0x464   : > { %v6379_v12 = vunpack.c.l.b16 %v7768_v32 }
 0x465   : > { %v6607_v44 = vrot.slane %v6251_v52, 3 }
 0x466   : > { %v6831_v63 = vrot.slane %v6379_v12, 3 }
 0x467   : > { %v6608_v25 = vsel %vm6395_vm5, %v6607_v44, %v6606_v39 }
 0x468   : > { %v6610_v20 = vsel %vm6398_vm6, %v6609_v6, %v6608_v25  ;;  %v6832_v7 = vsel %vm6395_vm5, %v6831_v63, %v6830_v13 }
 0x469   : > { %v6612_v41 = vsel %vm6401_vm8, %v6611_v2, %v6610_v20  ;;  %v6834_v19 = vsel %vm6398_vm6, %v6833_v24, %v6832_v7 }
 0x46a   : > { %v6852_v11 = vpack.c.b16 %v6612_v41, %v6612_v41  ;;  %v6836_v8 = vsel %vm6401_vm8, %v6835_v15, %v6834_v19 }
 0x46b   : > { %v6868_v33 = vpack.c.b16 %v6836_v8, %v6836_v8 }
 0x46c   : > { %6916 = vst [vmem:[%s8849_s29 + $0x3c] sm:$0xf] %v6852_v11 }
 0x46d   : > { %6932 = vst [vmem:[%s8849_s29 + $0x7c] sm:$0xf] %v6868_v33 }
 0x46e PF: > { %s13_s12 = sadd.s32 1, %s8317_s12  }
 0x46f   : > { %p10_p5 = scmp.ge.s32.totalorder %s13_s12, 6  }
 0x471   :  { %12 = sbr.rel (!%p10_p5) target bundleno = 1 (0x1), region = 62 }

// kernel: cnn3d_forward.4
= control target key start
LH: loop header
LB: loop body
LE: loop exit
PB: predicated region body
PF: predicated region fallthrough
CT: control target
= control target key end

     0   :  { %vm7070_vm0 = vmmov 0   ;;  %vm4967_vm3 = vcmask 1041409   ;;  %vm4970_vm5 = vcmask 1042434   ;;  %vm4973_vm7 = vcmask 1043459   ;;  %s8865_s1 = inlined_call_operand.vmem [shape: bf16[3456,128], index: 1, kind: input, shape index: {}]   ;;  %s8866_s0 = inlined_call_operand.vmem [shape: bf16[144,3456], index: 0, kind: input, shape index: {}]   ;;  %s8867_s2 = inlined_call_operand.vmem [shape: f32[1,128], index: 2, kind: input, shape index: {}]   ;;  %s8868_s3 = inlined_call_operand.vmem [shape: bf16[18,128], index: 3, kind: output, shape index: {}]  }
   0x1   :  { %v6493_v0 = vld [vmem:[%s8865_s1 + $0x40] sm:$0xff]   ;;  %v6497_v4 = vld [vmem:[%s8865_s1 + $0x48] sm:$0xff]   ;;  %v6501_v8 = vld [vmem:[%s8865_s1 + $0x50] sm:$0xff]   ;;  %vm4976_vm8 = vcmask 1044484   ;;  %vm4979_vm10 = vcmask 1045509   ;;  %vm4982_vm12 = vcmask 1046534  }
   0x2   :  { %v6494_v1 = vld [vmem:[%s8865_s1 + $0xc0] sm:$0xff]   ;;  %5512 = vmatprep.subr.bf16.mxu0 %v6493_v0  ;;  %v6498_v5 = vld [vmem:[%s8865_s1 + $0xc8] sm:$0xff]   ;;  %v6502_v9 = vld [vmem:[%s8865_s1 + $0xd0] sm:$0xff]   ;;  %vm4985_vm14 = vcmask 1047559  }
   0x3   :  { %v6495_v2 = vld [vmem:[%s8865_s1] sm:$0xff]   ;;  %5582 = vmatprep.subr.bf16.mxu1 %v6494_v1  ;;  %v6499_v6 = vld [vmem:[%s8865_s1 + $0x8] sm:$0xff]   ;;  %v6503_v10 = vld [vmem:[%s8865_s1 + $0x10] sm:$0xff]  }
   0x4   :  { %v6496_v3 = vld [vmem:[%s8865_s1 + $0x80] sm:$0xff]   ;;  %5513 = vmatpush3.bf16.msra.mxu0 %v6495_v2  ;;  %v6500_v7 = vld [vmem:[%s8865_s1 + $0x88] sm:$0xff]   ;;  %v6504_v11 = vld [vmem:[%s8865_s1 + $0x90] sm:$0xff]  }
   0x5   :  { %5583 = vmatpush3.bf16.msra.mxu1 %v6496_v3  ;;  %5514 = vmatprep.subr.bf16.mxu0 %v6497_v4  ;;  %v6505_v12 = vld [vmem:[%s8865_s1 + $0x58] sm:$0xff]   ;;  %v6509_v16 = vld [vmem:[%s8865_s1 + $0x60] sm:$0xff]   ;;  %v6513_v20 = vld [vmem:[%s8865_s1 + $0x68] sm:$0xff]  }
   0x6   :  { %5584 = vmatprep.subr.bf16.mxu1 %v6498_v5  ;;  %v6506_v13 = vld [vmem:[%s8865_s1 + $0xd8] sm:$0xff]   ;;  %v6510_v17 = vld [vmem:[%s8865_s1 + $0xe0] sm:$0xff]   ;;  %v6514_v21 = vld [vmem:[%s8865_s1 + $0xe8] sm:$0xff]  }
   0x7   :  { %v6507_v14 = vld [vmem:[%s8865_s1 + $0x18] sm:$0xff]   ;;  %v6511_v18 = vld [vmem:[%s8865_s1 + $0x20] sm:$0xff]   ;;  %v6515_v22 = vld [vmem:[%s8865_s1 + $0x28] sm:$0xff]  }
   0x8   :  { %5515 = vmatpush3.bf16.msra.mxu0 %v6499_v6  ;;  %v6508_v15 = vld [vmem:[%s8865_s1 + $0x98] sm:$0xff]   ;;  %v6512_v19 = vld [vmem:[%s8865_s1 + $0xa0] sm:$0xff]   ;;  %v6516_v23 = vld [vmem:[%s8865_s1 + $0xa8] sm:$0xff]  }
   0x9   :  { %5585 = vmatpush3.bf16.msra.mxu1 %v6500_v7  ;;  %5516 = vmatprep.subr.bf16.mxu0 %v6501_v8  ;;  %v6517_v24 = vld [vmem:[%s8865_s1 + $0x70] sm:$0xff]   ;;  %v6521_v28 = vld [vmem:[%s8865_s1 + $0x78] sm:$0xff]   ;;  %v6525_v32 = vld [vmem:[%s8866_s0] ss:$108 sps:$4 sm:$0xff]  }
   0xa   :  { %5586 = vmatprep.subr.bf16.mxu1 %v6502_v9  ;;  %v6518_v25 = vld [vmem:[%s8865_s1 + $0xf0] sm:$0xff]   ;;  %v6522_v29 = vld [vmem:[%s8865_s1 + $0xf8] sm:$0xff]   ;;  %v6531_v36 = vld [vmem:[%s8865_s1 + $0x140] sm:$0xff]  }
   0xb   :  { %v6519_v26 = vld [vmem:[%s8865_s1 + $0x30] sm:$0xff]   ;;  %v6523_v30 = vld [vmem:[%s8865_s1 + $0x38] sm:$0xff]   ;;  %v6532_v37 = vld [vmem:[%s8865_s1 + $0x100] sm:$0xff]  }
   0xc   :  { %5517 = vmatpush3.bf16.msra.mxu0 %v6503_v10  ;;  %v6520_v27 = vld [vmem:[%s8865_s1 + $0xb0] sm:$0xff]   ;;  %v6524_v31 = vld [vmem:[%s8865_s1 + $0xb8] sm:$0xff]   ;;  %v6533_v38 = vld [vmem:[%s8865_s1 + $0x1c0] sm:$0xff]  }
   0xd   :  { %5587 = vmatpush3.bf16.msra.mxu1 %v6504_v11  ;;  %5518 = vmatprep.subr.bf16.mxu0 %v6505_v12  ;;  %v6527_v33 = vld [vmem:[%s8866_s0 + $0x4] ss:$108 sps:$4 sm:$0xff]   ;;  %v6528_v34 = vld [vmem:[%s8866_s0 + $0x8] ss:$108 sps:$4 sm:$0xff]   ;;  %v6530_v35 = vld [vmem:[%s8866_s0 + $0xc] ss:$108 sps:$4 sm:$0xff]  }
   0xe   :  { %5588 = vmatprep.subr.bf16.mxu1 %v6506_v13  ;;  %3251 = vmatprep.mubr.bf16.mxu0 %v6527_v33  ;;  %v6534_v39 = vld [vmem:[%s8865_s1 + $0x180] sm:$0xff]   ;;  %v6535_v40 = vld [vmem:[%s8866_s0 + $0xdc] ss:$108 sps:$4 sm:$0xff]   ;;  %v6551_v52 = vld [vmem:[%s8865_s1 + $0x150] sm:$0xff]  }
   0xf   :  { %3356 = vmatprep.mubr.bf16.mxu1 %v6530_v35  ;;  %v6537_v41 = vld [vmem:[%s8866_s0 + $0xe4] ss:$108 sps:$4 sm:$0xff]   ;;  %v6540_v43 = vld [vmem:[%s8866_s0 + $0xe0] ss:$108 sps:$4 sm:$0xff]   ;;  %v6546_v48 = vld [vmem:[%s8866_s0 + $0x1bc] ss:$108 sps:$4 sm:$0xff]  }
  0x10   :  { %5519 = vmatpush3.bf16.msra.mxu0 %v6507_v14  ;;  %v6539_v42 = vld [vmem:[%s8866_s0 + $0xd8] ss:$108 sps:$4 sm:$0xff]   ;;  %v6541_v44 = vld [vmem:[%s8865_s1 + $0x148] sm:$0xff]   ;;  %v6544_v47 = vld [vmem:[%s8866_s0 + $0x1b4] ss:$108 sps:$4 sm:$0xff]  }
  0x11   :  { %5589 = vmatpush3.bf16.msra.mxu1 %v6508_v15  ;;  %5520 = vmatprep.subr.bf16.mxu0 %v6509_v16  ;;  %v6542_v45 = vld [vmem:[%s8865_s1 + $0x108] sm:$0xff]   ;;  %v6549_v50 = vld [vmem:[%s8866_s0 + $0x1b0] ss:$108 sps:$4 sm:$0xff]   ;;  %v6550_v51 = vld [vmem:[%s8866_s0 + $0x1b8] ss:$108 sps:$4 sm:$0xff]  }
  0x12   :  { %5590 = vmatprep.subr.bf16.mxu1 %v6510_v17  ;;  %v6543_v46 = vld [vmem:[%s8865_s1 + $0x1c8] sm:$0xff]   ;;  %v6552_v53 = vld [vmem:[%s8865_s1 + $0x110] sm:$0xff]   ;;  %v6561_v60 = vld [vmem:[%s8865_s1 + $0x158] sm:$0xff]  }
  0x13   :  { %v6548_v49 = vld [vmem:[%s8865_s1 + $0x188] sm:$0xff]   ;;  %v6555_v55 = vld [vmem:[%s8866_s0 + $0x294] ss:$108 sps:$4 sm:$0xff]   ;;  %v6559_v59 = vld [vmem:[%s8866_s0 + $0x290] ss:$108 sps:$4 sm:$0xff]  }
  0x14   :  { %5521 = vmatpush3.bf16.msra.mxu0 %v6511_v18  ;;  %v6553_v54 = vld [vmem:[%s8866_s0 + $0x28c] ss:$108 sps:$4 sm:$0xff]   ;;  %v6557_v56 = vld [vmem:[%s8865_s1 + $0x1d0] sm:$0xff]   ;;  %v6571_v2 = vld [vmem:[%s8865_s1 + $0x160] sm:$0xff]  }
  0x15   :  { %5591 = vmatpush3.bf16.msra.mxu1 %v6512_v19  ;;  %5522 = vmatprep.subr.bf16.mxu0 %v6513_v20  ;;  %v6558_v57 = vld [vmem:[%s8866_s0 + $0x288] ss:$108 sps:$4 sm:$0xff]   ;;  %v6562_v61 = vld [vmem:[%s8865_s1 + $0x118] sm:$0xff]   ;;  %v6563_v62 = vld [vmem:[%s8866_s0 + $0x364] ss:$108 sps:$4 sm:$0xff]  }
  0x16   :  { %5592 = vmatprep.subr.bf16.mxu1 %v6514_v21  ;;  %v6560_v58 = vld [vmem:[%s8865_s1 + $0x190] sm:$0xff]   ;;  %v6565_v63 = vld [vmem:[%s8866_s0 + $0x36c] ss:$108 sps:$4 sm:$0xff]   ;;  %v6572_v3 = vld [vmem:[%s8865_s1 + $0x120] sm:$0xff]  }
  0x17   :  { %v6569_v0 = vld [vmem:[%s8865_s1 + $0x1d8] sm:$0xff]   ;;  %v6567_v4 = vld [vmem:[%s8866_s0 + $0x360] ss:$108 sps:$4 sm:$0xff]   ;;  %v6568_v5 = vld [vmem:[%s8866_s0 + $0x368] ss:$108 sps:$4 sm:$0xff]  }
  0x18   :  { %5523 = vmatpush3.bf16.msra.mxu0 %v6515_v22  ;;  %v6570_v1 = vld [vmem:[%s8865_s1 + $0x198] sm:$0xff]   ;;  %v6575_v7 = vld [vmem:[%s8866_s0 + $0x444] ss:$108 sps:$4 sm:$0xff]   ;;  %v6581_v10 = vld [vmem:[%s8865_s1 + $0x168] sm:$0xff]  }
  0x19   :  { %5593 = vmatpush3.bf16.msra.mxu1 %v6516_v23  ;;  %5524 = vmatprep.subr.bf16.mxu0 %v6517_v24  ;;  %v6573_v6 = vld [vmem:[%s8866_s0 + $0x43c] ss:$108 sps:$4 sm:$0xff]   ;;  %v6579_v8 = vld [vmem:[%s8865_s1 + $0x1e0] sm:$0xff]   ;;  %v6591_v18 = vld [vmem:[%s8865_s1 + $0x170] sm:$0xff]  }
  0x1a   :  { %5594 = vmatprep.subr.bf16.mxu1 %v6518_v25  ;;  %v6580_v9 = vld [vmem:[%s8865_s1 + $0x1a0] sm:$0xff]   ;;  %v6582_v11 = vld [vmem:[%s8865_s1 + $0x128] sm:$0xff]   ;;  %v6587_v19 = vld [vmem:[%s8866_s0 + $0x510] ss:$108 sps:$4 sm:$0xff]  }
  0x1b   :  { %v6577_v12 = vld [vmem:[%s8866_s0 + $0x438] ss:$108 sps:$4 sm:$0xff]   ;;  %v6578_v13 = vld [vmem:[%s8866_s0 + $0x440] ss:$108 sps:$4 sm:$0xff]   ;;  %v6585_v15 = vld [vmem:[%s8866_s0 + $0x51c] ss:$108 sps:$4 sm:$0xff]  }
  0x1c   :  { %5525 = vmatpush3.bf16.msra.mxu0 %v6519_v26  ;;  %v6583_v14 = vld [vmem:[%s8866_s0 + $0x514] ss:$108 sps:$4 sm:$0xff]   ;;  %v6589_v16 = vld [vmem:[%s8865_s1 + $0x1e8] sm:$0xff]   ;;  %v6588_v21 = vld [vmem:[%s8866_s0 + $0x518] ss:$108 sps:$4 sm:$0xff]  }
  0x1d   :  { %5595 = vmatpush3.bf16.msra.mxu1 %v6520_v27  ;;  %5526 = vmatprep.subr.bf16.mxu0 %v6521_v28  ;;  %v6590_v17 = vld [vmem:[%s8865_s1 + $0x1a8] sm:$0xff]   ;;  %v6596_v20 = vld [vmem:[%s8865_s1 + $0x130] sm:$0xff]   ;;  %v6605_v26 = vld [vmem:[%s8865_s1 + $0x178] sm:$0xff]  }
  0x1e   :  { %5596 = vmatprep.subr.bf16.mxu1 %v6522_v29  ;;  %v6592_v22 = vld [vmem:[%s8866_s0 + $0x5ec] ss:$108 sps:$4 sm:$0xff]   ;;  %v6599_v23 = vld [vmem:[%s8865_s1 + $0x1f0] sm:$0xff]   ;;  %v6619_v35 = vld [vmem:[%s8865_s1 + $0x2c0] sm:$0xff]  }
  0x1f   :  { %v6600_v24 = vld [vmem:[%s8865_s1 + $0x1b0] sm:$0xff]   ;;  %v6608_v27 = vld [vmem:[%s8865_s1 + $0x138] sm:$0xff]  }
  0x20   :  { %5527 = vmatpush3.bf16.msra.mxu0 %v6523_v30  ;;  %v6594_v25 = vld [vmem:[%s8866_s0 + $0x5f4] ss:$108 sps:$4 sm:$0xff]   ;;  %v6609_v29 = vld [vmem:[%s8865_s1 + $0x1f8] sm:$0xff]  }
  0x21   :  { %5597 = vmatpush3.bf16.msra.mxu1 %v6524_v31  ;;  %5652 = vmatprep.subr.bf16.mxu0 %v6531_v36  ;;  %v6597_v28 = vld [vmem:[%s8866_s0 + $0x5e8] ss:$108 sps:$4 sm:$0xff]   ;;  %v6598_v30 = vld [vmem:[%s8866_s0 + $0x5f0] ss:$108 sps:$4 sm:$0xff]   ;;  %v6603_v33 = vld [vmem:[%s8866_s0 + $0x6cc] ss:$108 sps:$4 sm:$0xff]  }
  0x22   :  { %5722 = vmatprep.subr.bf16.mxu1 %v6533_v38  ;;  %v6610_v31 = vld [vmem:[%s8865_s1 + $0x1b8] sm:$0xff]   ;;  %v6606_v36 = vld [vmem:[%s8866_s0 + $0x6c0] ss:$108 sps:$4 sm:$0xff]  }
  0x23   :  { %3252 = vmatmul.mubr.bf16.vlgmr.msra.gmra.mrb[0].mxu0 %v6525_v32  ;;  %v6601_v32 = vld [vmem:[%s8866_s0 + $0x6c4] ss:$108 sps:$4 sm:$0xff]   ;;  %v6613_v38 = vld [vmem:[%s8866_s0 + $0x14] ss:$108 sps:$4 sm:$0xff]  }
  0x24   :  { %3357 = vmatmul.mubr.bf16.vlgmr.msra.gmra.mrb[0].mxu1 %v6528_v34  ;;  %5653 = vmatpush3.bf16.msra.mxu0 %v6532_v37  ;;  %v6614_v34 = vld [vmem:[%s8865_s1 + $0x240] sm:$0xff]   ;;  %v6607_v37 = vld [vmem:[%s8866_s0 + $0x6c8] ss:$108 sps:$4 sm:$0xff]  }
  0x25   :  { %5723 = vmatpush3.bf16.msra.mxu1 %v6534_v39  ;;  %3259 = vmatprep.mubr.bf16.mxu0 %v6535_v40  ;;  %v6617_v39 = vld [vmem:[%s8866_s0 + $0x1c] ss:$108 sps:$4 sm:$0xff]  }
  0x26   :  { %3364 = vmatprep.mubr.bf16.mxu1 %v6537_v41  ;;  %5654 = vmatprep.subr.bf16.mxu0 %v6541_v44  ;;  %v6611_v40 = vld [vmem:[%s8866_s0 + $0x10] ss:$108 sps:$4 sm:$0xff]   ;;  %v6615_v41 = vld [vmem:[%s8866_s0 + $0x18] ss:$108 sps:$4 sm:$0xff]  }
  0x27   :  { %5724 = vmatprep.subr.bf16.mxu1 %v6543_v46  ;;  %v6621_v44 = vld [vmem:[%s8866_s0 + $0xec] ss:$108 sps:$4 sm:$0xff]  }
  0x28   :  { %5655 = vmatpush3.bf16.msra.mxu0 %v6542_v45  ;;  %v6624_v45 = vld [vmem:[%s8866_s0 + $0xf4] ss:$108 sps:$4 sm:$0xff]   ;;  %v6626_v46 = vld [vmem:[%s8865_s1 + $0x248] sm:$0xff]  }
  0x29   :  { %5725 = vmatpush3.bf16.msra.mxu1 %v6548_v49  ;;  %5656 = vmatprep.subr.bf16.mxu0 %v6551_v52  ;;  %v6623_v49 = vld [vmem:[%s8866_s0 + $0xe8] ss:$108 sps:$4 sm:$0xff]   ;;  %v6627_v52 = vld [vmem:[%s8866_s0 + $0xf0] ss:$108 sps:$4 sm:$0xff]  }
  0x2a   :  { %5726 = vmatprep.subr.bf16.mxu1 %v6557_v56  ;;  %v6638_v56 = vld [vmem:[%s8865_s1 + $0x210] sm:$0xff]  }
  0x2b   :  { %3260 = vmatmul.mubr.bf16.gmra.mrb[4].mxu0 %v6539_v42  ;;  %v6618_v42 = vld [vmem:[%s8865_s1 + $0x200] sm:$0xff]  }
  0x2c   :  { %3365 = vmatmul.mubr.bf16.gmra.mrb[4].mxu1 %v6540_v43  ;;  %3267 = vmatprep.mubr.bf16.mxu0 %v6544_v47  ;;  %v6620_v43 = vld [vmem:[%s8865_s1 + $0x280] sm:$0xff]   ;;  %v6629_v47 = vld [vmem:[%s8865_s1 + $0x2c8] sm:$0xff]  }
  0x2d   :  { %3372 = vmatprep.mubr.bf16.mxu1 %v6546_v48  ;;  %5657 = vmatpush3.bf16.msra.mxu0 %v6552_v53  ;;  %v6628_v48 = vld [vmem:[%s8865_s1 + $0x208] sm:$0xff]   ;;  %v6641_v53 = vld [vmem:[%s8865_s1 + $0x2d0] sm:$0xff]  }
  0x2e   :  { %5727 = vmatpush3.bf16.msra.mxu1 %v6560_v58  ;;  %5658 = vmatprep.subr.bf16.mxu0 %v6561_v60  ;;  %v6647_v58 = vld [vmem:[%s8865_s1 + $0x258] sm:$0xff]  }
  0x2f   :  { %5728 = vmatprep.subr.bf16.mxu1 %v6569_v0  ;;  %v6648_v60 = vld [vmem:[%s8865_s1 + $0x218] sm:$0xff]   ;;  %v6636_v0 = vld [vmem:[%s8866_s0 + $0x1c8] ss:$108 sps:$4 sm:$0xff]  }
  0x31   :  { %5659 = vmatpush3.bf16.msra.mxu0 %v6562_v61  ;;  %v6633_v61 = vld [vmem:[%s8866_s0 + $0x1c0] ss:$108 sps:$4 sm:$0xff]  }
  0x32   :  { %5729 = vmatpush3.bf16.msra.mxu1 %v6570_v1  ;;  %5660 = vmatprep.subr.bf16.mxu0 %v6571_v2  ;;  %v6639_v1 = vld [vmem:[%s8866_s0 + $0x29c] ss:$108 sps:$4 sm:$0xff]   ;;  %v6644_v2 = vld [vmem:[%s8866_s0 + $0x2a4] ss:$108 sps:$4 sm:$0xff]  }
  0x33   :  { %3268 = vmatmul.mubr.bf16.gmra.mrb[8].mxu0 %v6549_v50  ;;  %5730 = vmatprep.subr.bf16.mxu1 %v6579_v8  ;;  %v6632_v50 = vld [vmem:[%s8865_s1 + $0x288] sm:$0xff]  }
  0x34   :  { %3373 = vmatmul.mubr.bf16.gmra.mrb[8].mxu1 %v6550_v51  ;;  %3275 = vmatprep.mubr.bf16.mxu0 %v6553_v54  ;;  %v6637_v51 = vld [vmem:[%s8865_s1 + $0x250] sm:$0xff]   ;;  %v6668_v8 = vld [vmem:[%s8865_s1 + $0x228] sm:$0xff]  }
  0x35   :  { %3380 = vmatprep.mubr.bf16.mxu1 %v6555_v55  ;;  %5661 = vmatpush3.bf16.msra.mxu0 %v6572_v3  ;;  %v6630_v54 = vld [vmem:[%s8866_s0 + $0x1c4] ss:$108 sps:$4 sm:$0xff]   ;;  %v6634_v55 = vld [vmem:[%s8866_s0 + $0x1cc] ss:$108 sps:$4 sm:$0xff]  }
  0x36   :  { %5731 = vmatpush3.bf16.msra.mxu1 %v6580_v9  ;;  %5662 = vmatprep.subr.bf16.mxu0 %v6581_v10  ;;  %v6658_v3 = vld [vmem:[%s8865_s1 + $0x220] sm:$0xff]  }
  0x37   :  { %5732 = vmatprep.subr.bf16.mxu1 %v6589_v16  ;;  %v6646_v9 = vld [vmem:[%s8866_s0 + $0x2a0] ss:$108 sps:$4 sm:$0xff]   ;;  %v6651_v16 = vld [vmem:[%s8866_s0 + $0x370] ss:$108 sps:$4 sm:$0xff]  }
  0x38   :  { %v6649_v10 = vld [vmem:[%s8866_s0 + $0x374] ss:$108 sps:$4 sm:$0xff]  }
  0x39   :  { %5663 = vmatpush3.bf16.msra.mxu0 %v6582_v11  ;;  %v6653_v11 = vld [vmem:[%s8866_s0 + $0x37c] ss:$108 sps:$4 sm:$0xff]  }
  0x3a   :  { %5733 = vmatpush3.bf16.msra.mxu1 %v6590_v17  ;;  %5664 = vmatprep.subr.bf16.mxu0 %v6591_v18  ;;  %v6656_v17 = vld [vmem:[%s8866_s0 + $0x378] ss:$108 sps:$4 sm:$0xff]  }
  0x3b   :  { %3276 = vmatmul.mubr.bf16.gmra.mrb[12].mxu0 %v6558_v57  ;;  %5734 = vmatprep.subr.bf16.mxu1 %v6599_v23  ;;  %v6643_v57 = vld [vmem:[%s8865_s1 + $0x290] sm:$0xff]   ;;  %v6659_v18 = vld [vmem:[%s8866_s0 + $0x44c] ss:$108 sps:$4 sm:$0xff]  }
  0x3c   :  { %3381 = vmatmul.mubr.bf16.gmra.mrb[12].mxu1 %v6559_v59  ;;  %3283 = vmatprep.mubr.bf16.mxu0 %v6563_v62  ;;  %v6652_v59 = vld [vmem:[%s8865_s1 + $0x2d8] sm:$0xff]  }
  0x3d   :  { %3388 = vmatprep.mubr.bf16.mxu1 %v6565_v63  ;;  %5665 = vmatpush3.bf16.msra.mxu0 %v6596_v20  ;;  %v6655_v62 = vld [vmem:[%s8865_s1 + $0x298] sm:$0xff]   ;;  %v6657_v63 = vld [vmem:[%s8865_s1 + $0x260] sm:$0xff]   ;;  %v6686_v20 = vld [vmem:[%s8865_s1 + $0x2b0] sm:$0xff]  }
  0x3e   :  { %5735 = vmatpush3.bf16.msra.mxu1 %v6600_v24  ;;  %5666 = vmatprep.subr.bf16.mxu0 %v6605_v26  ;;  %v6691_v23 = vld [vmem:[%s8865_s1 + $0x238] sm:$0xff]   ;;  %v6661_v24 = vld [vmem:[%s8866_s0 + $0x448] ss:$108 sps:$4 sm:$0xff]  }
  0x3f   :  { %5736 = vmatprep.subr.bf16.mxu1 %v6609_v29  ;;  %v6665_v26 = vld [vmem:[%s8866_s0 + $0x450] ss:$108 sps:$4 sm:$0xff]   ;;  %v6672_v29 = vld [vmem:[%s8866_s0 + $0x52c] ss:$108 sps:$4 sm:$0xff]  }
  0x41   :  { %5667 = vmatpush3.bf16.msra.mxu0 %v6608_v27  ;;  %v6696_v27 = vld [vmem:[%s8865_s1 + $0x2b8] sm:$0xff]  }
  0x42   :  { %5737 = vmatpush3.bf16.msra.mxu1 %v6610_v31  ;;  %5792 = vmatprep.subr.bf16.mxu0 %v6614_v34  ;;  %v6705_v31 = vld [vmem:[%s8865_s1 + $0x3c0] sm:$0xff]   ;;  %v6678_v34 = vld [vmem:[%s8866_s0 + $0x5fc] ss:$108 sps:$4 sm:$0xff]  }
  0x43   :  { %3284 = vmatmul.mubr.bf16.gmra.mrb[16].mxu0 %v6567_v4  ;;  %5862 = vmatprep.subr.bf16.mxu1 %v6619_v35  ;;  %v6664_v4 = vld [vmem:[%s8865_s1 + $0x2e0] sm:$0xff]  }
  0x44   :  { %3389 = vmatmul.mubr.bf16.gmra.mrb[16].mxu1 %v6568_v5  ;;  %3291 = vmatprep.mubr.bf16.mxu0 %v6573_v6  ;;  %v6666_v5 = vld [vmem:[%s8865_s1 + $0x2a0] sm:$0xff]   ;;  %v6667_v6 = vld [vmem:[%s8865_s1 + $0x268] sm:$0xff]  }
  0x45   :  { %3396 = vmatprep.mubr.bf16.mxu1 %v6575_v7  ;;  %v6642_v7 = vld [vmem:[%s8866_s0 + $0x298] ss:$108 sps:$4 sm:$0xff]  }
  0x46   :  { %v6682_v35 = vld [vmem:[%s8866_s0 + $0x604] ss:$108 sps:$4 sm:$0xff]  }
  0x4b   :  { %3292 = vmatmul.mubr.bf16.gmra.mrb[20].mxu0 %v6577_v12  ;;  %v6675_v12 = vld [vmem:[%s8865_s1 + $0x2e8] sm:$0xff]  }
  0x4c   :  { %3397 = vmatmul.mubr.bf16.gmra.mrb[20].mxu1 %v6578_v13  ;;  %3299 = vmatprep.mubr.bf16.mxu0 %v6583_v14  ;;  %v6676_v13 = vld [vmem:[%s8865_s1 + $0x2a8] sm:$0xff]   ;;  %v6677_v14 = vld [vmem:[%s8865_s1 + $0x270] sm:$0xff]  }
  0x4d   :  { %3404 = vmatprep.mubr.bf16.mxu1 %v6585_v15  ;;  %v6680_v15 = vld [vmem:[%s8865_s1 + $0x230] sm:$0xff]  }
  0x53   :  { %3300 = vmatmul.mubr.bf16.gmra.mrb[24].mxu0 %v6587_v19  ;;  %v6685_v19 = vld [vmem:[%s8865_s1 + $0x2f0] sm:$0xff]  }
  0x54   :  { %3405 = vmatmul.mubr.bf16.gmra.mrb[24].mxu1 %v6588_v21  ;;  %3307 = vmatprep.mubr.bf16.mxu0 %v6592_v22  ;;  %v6662_v21 = vld [vmem:[%s8866_s0 + $0x454] ss:$108 sps:$4 sm:$0xff]   ;;  %v6689_v22 = vld [vmem:[%s8865_s1 + $0x278] sm:$0xff]  }
  0x55   :  { %3412 = vmatprep.mubr.bf16.mxu1 %v6594_v25  ;;  %v6695_v25 = vld [vmem:[%s8865_s1 + $0x2f8] sm:$0xff]  }
  0x5b   :  { %3308 = vmatmul.mubr.bf16.gmra.mrb[28].mxu0 %v6597_v28  ;;  %v6669_v28 = vld [vmem:[%s8866_s0 + $0x524] ss:$108 sps:$4 sm:$0xff]  }
  0x5c   :  { %3413 = vmatmul.mubr.bf16.gmra.mrb[28].mxu1 %v6598_v30  ;;  %3315 = vmatprep.mubr.bf16.mxu0 %v6601_v32  ;;  %v6700_v30 = vld [vmem:[%s8865_s1 + $0x340] sm:$0xff]  }
  0x5d   :  { %3420 = vmatprep.mubr.bf16.mxu1 %v6603_v33  ;;  %v6671_v32 = vld [vmem:[%s8866_s0 + $0x520] ss:$108 sps:$4 sm:$0xff]   ;;  %v6674_v33 = vld [vmem:[%s8866_s0 + $0x528] ss:$108 sps:$4 sm:$0xff]  }
  0x63   :  { %3316 = vmatmul.mubr.bf16.gmra.mrb[32].mxu0 %v6606_v36  ;;  %v6681_v36 = vld [vmem:[%s8866_s0 + $0x5f8] ss:$108 sps:$4 sm:$0xff]  }
  0x64   :  { %3421 = vmatmul.mubr.bf16.gmra.mrb[32].mxu1 %v6607_v37  ;;  %3461 = vmatprep.mubr.bf16.mxu0 %v6613_v38  ;;  %v6684_v37 = vld [vmem:[%s8866_s0 + $0x600] ss:$108 sps:$4 sm:$0xff]  }
  0x65   :  { %3566 = vmatprep.mubr.bf16.mxu1 %v6617_v39  ;;  %v6687_v38 = vld [vmem:[%s8866_s0 + $0x6d4] ss:$108 sps:$4 sm:$0xff]   ;;  %v6692_v39 = vld [vmem:[%s8866_s0 + $0x6dc] ss:$108 sps:$4 sm:$0xff]  }
  0x6b   :  { %3462 = vmatmul.mubr.bf16.vlgmr.msra.gmra.mrb[36].mxu0 %v6611_v40  ;;  %v6690_v40 = vld [vmem:[%s8866_s0 + $0x6d0] ss:$108 sps:$4 sm:$0xff]  }
  0x6c   :  { %5793 = vmatpush3.bf16.msra.mxu0 %v6618_v42  ;;  %3567 = vmatmul.mubr.bf16.vlgmr.msra.gmra.mrb[36].mxu1 %v6615_v41  ;;  %v6694_v41 = vld [vmem:[%s8866_s0 + $0x6d8] ss:$108 sps:$4 sm:$0xff]  }
  0x6d   :  { %5863 = vmatpush3.bf16.msra.mxu1 %v6620_v43  ;;  %3469 = vmatprep.mubr.bf16.mxu0 %v6621_v44  ;;  %v6699_v42 = vld [vmem:[%s8866_s0 + $0x24] ss:$108 sps:$4 sm:$0xff]   ;;  %v6703_v43 = vld [vmem:[%s8866_s0 + $0x2c] ss:$108 sps:$4 sm:$0xff]  }
  0x6e   :  { %3574 = vmatprep.mubr.bf16.mxu1 %v6624_v45  ;;  %5794 = vmatprep.subr.bf16.mxu0 %v6626_v46  ;;  %v6697_v44 = vld [vmem:[%s8866_s0 + $0x20] ss:$108 sps:$4 sm:$0xff]   ;;  %v6701_v45 = vld [vmem:[%s8866_s0 + $0x28] ss:$108 sps:$4 sm:$0xff]  }
  0x6f   :  { %5864 = vmatprep.subr.bf16.mxu1 %v6629_v47  ;;  %v6704_v46 = vld [vmem:[%s8865_s1 + $0x300] sm:$0xff]  }
  0x70   :  { %5795 = vmatpush3.bf16.msra.mxu0 %v6628_v48  ;;  %v6706_v47 = vld [vmem:[%s8865_s1 + $0x380] sm:$0xff]   ;;  %v6707_v48 = vld [vmem:[%s8866_s0 + $0xfc] ss:$108 sps:$4 sm:$0xff]  }
  0x71   :  { %5865 = vmatpush3.bf16.msra.mxu1 %v6632_v50  ;;  %5796 = vmatprep.subr.bf16.mxu0 %v6637_v51  ;;  %v6712_v50 = vld [vmem:[%s8865_s1 + $0x348] sm:$0xff]  }
  0x72   :  { %5866 = vmatprep.subr.bf16.mxu1 %v6641_v53  ;;  %v6714_v51 = vld [vmem:[%s8865_s1 + $0x308] sm:$0xff]  }
  0x73   :  { %3470 = vmatmul.mubr.bf16.gmra.mrb[40].mxu0 %v6623_v49  ;;  %v6710_v49 = vld [vmem:[%s8866_s0 + $0x104] ss:$108 sps:$4 sm:$0xff]   ;;  %v6718_v53 = vld [vmem:[%s8865_s1 + $0x388] sm:$0xff]  }
  0x74   :  { %3575 = vmatmul.mubr.bf16.gmra.mrb[40].mxu1 %v6627_v52  ;;  %3477 = vmatprep.mubr.bf16.mxu0 %v6630_v54  ;;  %v6715_v52 = vld [vmem:[%s8865_s1 + $0x3c8] sm:$0xff]   ;;  %v6709_v54 = vld [vmem:[%s8866_s0 + $0xf8] ss:$108 sps:$4 sm:$0xff]  }
  0x75   :  { %3582 = vmatprep.mubr.bf16.mxu1 %v6634_v55  ;;  %5797 = vmatpush3.bf16.msra.mxu0 %v6638_v56  ;;  %v6723_v55 = vld [vmem:[%s8865_s1 + $0x350] sm:$0xff]   ;;  %v6713_v56 = vld [vmem:[%s8866_s0 + $0x100] ss:$108 sps:$4 sm:$0xff]  }
  0x76   :  { %5867 = vmatpush3.bf16.msra.mxu1 %v6643_v57  ;;  %5798 = vmatprep.subr.bf16.mxu0 %v6647_v58  ;;  %v6727_v57 = vld [vmem:[%s8865_s1 + $0x3d0] sm:$0xff]  }
  0x77   :  { %5868 = vmatprep.subr.bf16.mxu1 %v6652_v59  ;;  %v6716_v58 = vld [vmem:[%s8866_s0 + $0x1d4] ss:$108 sps:$4 sm:$0xff]   ;;  %v6720_v59 = vld [vmem:[%s8866_s0 + $0x1dc] ss:$108 sps:$4 sm:$0xff]  }
  0x79   :  { %5799 = vmatpush3.bf16.msra.mxu0 %v6648_v60  ;;  %v6724_v60 = vld [vmem:[%s8865_s1 + $0x310] sm:$0xff]  }
  0x7a   :  { %5869 = vmatpush3.bf16.msra.mxu1 %v6655_v62  ;;  %5800 = vmatprep.subr.bf16.mxu0 %v6657_v63  ;;  %v6733_v62 = vld [vmem:[%s8865_s1 + $0x358] sm:$0xff]  }
  0x7b   :  { %3478 = vmatmul.mubr.bf16.gmra.mrb[44].mxu0 %v6633_v61  ;;  %5870 = vmatprep.subr.bf16.mxu1 %v6664_v4  ;;  %v6729_v61 = vld [vmem:[%s8865_s1 + $0x390] sm:$0xff]   ;;  %v6738_v63 = vld [vmem:[%s8865_s1 + $0x3d8] sm:$0xff]  }
  0x7c   :  { %3583 = vmatmul.mubr.bf16.gmra.mrb[44].mxu1 %v6636_v0  ;;  %3485 = vmatprep.mubr.bf16.mxu0 %v6639_v1  ;;  %v6734_v0 = vld [vmem:[%s8865_s1 + $0x318] sm:$0xff]  }
  0x7d   :  { %3590 = vmatprep.mubr.bf16.mxu1 %v6644_v2  ;;  %5801 = vmatpush3.bf16.msra.mxu0 %v6658_v3  ;;  %v6719_v1 = vld [vmem:[%s8866_s0 + $0x1d0] ss:$108 sps:$4 sm:$0xff]   ;;  %v6722_v3 = vld [vmem:[%s8866_s0 + $0x1d8] ss:$108 sps:$4 sm:$0xff]  }
  0x7e   :  { %5871 = vmatpush3.bf16.msra.mxu1 %v6666_v5  ;;  %5802 = vmatprep.subr.bf16.mxu0 %v6667_v6  ;;  %v6741_v2 = vld [vmem:[%s8865_s1 + $0x398] sm:$0xff]   ;;  %v6743_v5 = vld [vmem:[%s8865_s1 + $0x360] sm:$0xff]  }
  0x7f   :  { %5872 = vmatprep.subr.bf16.mxu1 %v6675_v12  ;;  %v6725_v4 = vld [vmem:[%s8866_s0 + $0x2ac] ss:$108 sps:$4 sm:$0xff]   ;;  %v6750_v6 = vld [vmem:[%s8865_s1 + $0x3e0] sm:$0xff]  }
  0x80   :  { %v6754_v12 = vld [vmem:[%s8865_s1 + $0x328] sm:$0xff]  }
  0x81   :  { %5803 = vmatpush3.bf16.msra.mxu0 %v6668_v8  ;;  %v6744_v8 = vld [vmem:[%s8865_s1 + $0x320] sm:$0xff]  }
  0x82   :  { %5873 = vmatpush3.bf16.msra.mxu1 %v6676_v13  ;;  %5804 = vmatprep.subr.bf16.mxu0 %v6677_v14  ;;  %v6728_v13 = vld [vmem:[%s8866_s0 + $0x2a8] ss:$108 sps:$4 sm:$0xff]  }
  0x83   :  { %3486 = vmatmul.mubr.bf16.gmra.mrb[48].mxu0 %v6642_v7  ;;  %5874 = vmatprep.subr.bf16.mxu1 %v6685_v19  ;;  %v6730_v7 = vld [vmem:[%s8866_s0 + $0x2b4] ss:$108 sps:$4 sm:$0xff]   ;;  %v6762_v14 = vld [vmem:[%s8865_s1 + $0x3a8] sm:$0xff]  }
  0x84   :  { %3591 = vmatmul.mubr.bf16.gmra.mrb[48].mxu1 %v6646_v9  ;;  %3493 = vmatprep.mubr.bf16.mxu0 %v6649_v10  ;;  %v6752_v9 = vld [vmem:[%s8865_s1 + $0x3a0] sm:$0xff]   ;;  %v6753_v10 = vld [vmem:[%s8865_s1 + $0x368] sm:$0xff]  }
  0x85   :  { %3598 = vmatprep.mubr.bf16.mxu1 %v6653_v11  ;;  %5805 = vmatpush3.bf16.msra.mxu0 %v6680_v15  ;;  %v6761_v11 = vld [vmem:[%s8865_s1 + $0x3e8] sm:$0xff]   ;;  %v6732_v15 = vld [vmem:[%s8866_s0 + $0x2b0] ss:$108 sps:$4 sm:$0xff]  }
  0x86   :  { %5875 = vmatpush3.bf16.msra.mxu1 %v6686_v20  ;;  %5806 = vmatprep.subr.bf16.mxu0 %v6689_v22  ;;  %v6739_v19 = vld [vmem:[%s8866_s0 + $0x38c] ss:$108 sps:$4 sm:$0xff]   ;;  %v6766_v20 = vld [vmem:[%s8865_s1 + $0x330] sm:$0xff]  }
  0x87   :  { %5876 = vmatprep.subr.bf16.mxu1 %v6695_v25  ;;  %v6775_v22 = vld [vmem:[%s8865_s1 + $0x378] sm:$0xff]  }
  0x88   :  { %v6777_v25 = vld [vmem:[%s8865_s1 + $0x338] sm:$0xff]  }
  0x89   :  { %5807 = vmatpush3.bf16.msra.mxu0 %v6691_v23  ;;  %v6781_v23 = vld [vmem:[%s8865_s1 + $0x3f8] sm:$0xff]  }
  0x8a   :  { %5877 = vmatpush3.bf16.msra.mxu1 %v6696_v27  ;;  %5932 = vmatprep.subr.bf16.mxu0 %v6700_v30  ;;  %v6782_v27 = vld [vmem:[%s8865_s1 + $0x3b8] sm:$0xff]  }
  0x8b   :  { %3494 = vmatmul.mubr.bf16.gmra.mrb[52].mxu0 %v6651_v16  ;;  %6002 = vmatprep.subr.bf16.mxu1 %v6705_v31  ;;  %v6735_v16 = vld [vmem:[%s8866_s0 + $0x384] ss:$108 sps:$4 sm:$0xff]   ;;  %v6745_v30 = vld [vmem:[%s8866_s0 + $0x45c] ss:$108 sps:$4 sm:$0xff]  }
  0x8c   :  { %3599 = vmatmul.mubr.bf16.gmra.mrb[52].mxu1 %v6656_v17  ;;  %3501 = vmatprep.mubr.bf16.mxu0 %v6659_v18  ;;  %v6763_v17 = vld [vmem:[%s8865_s1 + $0x370] sm:$0xff]  }
  0x8d   :  { %3606 = vmatprep.mubr.bf16.mxu1 %v6662_v21  ;;  %v6771_v18 = vld [vmem:[%s8865_s1 + $0x3f0] sm:$0xff]  }
  0x8e   :  { %v6772_v21 = vld [vmem:[%s8865_s1 + $0x3b0] sm:$0xff]  }
  0x8f   :  { %v6748_v31 = vld [vmem:[%s8866_s0 + $0x464] ss:$108 sps:$4 sm:$0xff]  }
  0x93   :  { %3502 = vmatmul.mubr.bf16.gmra.mrb[56].mxu0 %v6661_v24  ;;  %v6737_v24 = vld [vmem:[%s8866_s0 + $0x380] ss:$108 sps:$4 sm:$0xff]  }
  0x94   :  { %3607 = vmatmul.mubr.bf16.gmra.mrb[56].mxu1 %v6665_v26  ;;  %3509 = vmatprep.mubr.bf16.mxu0 %v6669_v28  ;;  %v6742_v26 = vld [vmem:[%s8866_s0 + $0x388] ss:$108 sps:$4 sm:$0xff]   ;;  %v6786_v28 = vld [vmem:[%s8865_s1 + $0x440] sm:$0xff]  }
  0x95   :  { %3614 = vmatprep.mubr.bf16.mxu1 %v6672_v29  ;;  %v6791_v29 = vld [vmem:[%s8865_s1 + $0x4c0] sm:$0xff]  }
  0x9b   :  { %3510 = vmatmul.mubr.bf16.gmra.mrb[60].mxu0 %v6671_v32  ;;  %v6747_v32 = vld [vmem:[%s8866_s0 + $0x458] ss:$108 sps:$4 sm:$0xff]  }
  0x9c   :  { %3615 = vmatmul.mubr.bf16.gmra.mrb[60].mxu1 %v6674_v33  ;;  %3517 = vmatprep.mubr.bf16.mxu0 %v6678_v34  ;;  %v6751_v33 = vld [vmem:[%s8866_s0 + $0x460] ss:$108 sps:$4 sm:$0xff]  }
  0x9d   :  { %3622 = vmatprep.mubr.bf16.mxu1 %v6682_v35  ;;  %v6755_v34 = vld [vmem:[%s8866_s0 + $0x534] ss:$108 sps:$4 sm:$0xff]   ;;  %v6758_v35 = vld [vmem:[%s8866_s0 + $0x53c] ss:$108 sps:$4 sm:$0xff]  }
  0xa3   :  { %3518 = vmatmul.mubr.bf16.gmra.mrb[64].mxu0 %v6681_v36  ;;  %v6757_v36 = vld [vmem:[%s8866_s0 + $0x530] ss:$108 sps:$4 sm:$0xff]  }
  0xa4   :  { %3623 = vmatmul.mubr.bf16.gmra.mrb[64].mxu1 %v6684_v37  ;;  %3525 = vmatprep.mubr.bf16.mxu0 %v6687_v38  ;;  %v6760_v37 = vld [vmem:[%s8866_s0 + $0x538] ss:$108 sps:$4 sm:$0xff]  }
  0xa5   :  { %3630 = vmatprep.mubr.bf16.mxu1 %v6692_v39  ;;  %v6764_v38 = vld [vmem:[%s8866_s0 + $0x60c] ss:$108 sps:$4 sm:$0xff]   ;;  %v6768_v39 = vld [vmem:[%s8866_s0 + $0x614] ss:$108 sps:$4 sm:$0xff]  }
  0xab   :  { %3526 = vmatmul.mubr.bf16.gmra.mrb[68].mxu0 %v6690_v40  ;;  %v6767_v40 = vld [vmem:[%s8866_s0 + $0x608] ss:$108 sps:$4 sm:$0xff]  }
  0xac   :  { %3631 = vmatmul.mubr.bf16.gmra.mrb[68].mxu1 %v6694_v41  ;;  %3671 = vmatprep.mubr.bf16.mxu0 %v6699_v42  ;;  %v6770_v41 = vld [vmem:[%s8866_s0 + $0x610] ss:$108 sps:$4 sm:$0xff]  }
  0xad   :  { %3776 = vmatprep.mubr.bf16.mxu1 %v6703_v43  ;;  %v6773_v42 = vld [vmem:[%s8866_s0 + $0x6e4] ss:$108 sps:$4 sm:$0xff]   ;;  %v6778_v43 = vld [vmem:[%s8866_s0 + $0x6ec] ss:$108 sps:$4 sm:$0xff]  }
  0xb3   :  { %3672 = vmatmul.mubr.bf16.vlgmr.msra.gmra.mrb[72].mxu0 %v6697_v44  ;;  %v6776_v44 = vld [vmem:[%s8866_s0 + $0x6e0] ss:$108 sps:$4 sm:$0xff]  }
  0xb4   :  { %5933 = vmatpush3.bf16.msra.mxu0 %v6704_v46  ;;  %3777 = vmatmul.mubr.bf16.vlgmr.msra.gmra.mrb[72].mxu1 %v6701_v45  ;;  %v6780_v45 = vld [vmem:[%s8866_s0 + $0x6e8] ss:$108 sps:$4 sm:$0xff]  }
  0xb5   :  { %6003 = vmatpush3.bf16.msra.mxu1 %v6706_v47  ;;  %3679 = vmatprep.mubr.bf16.mxu0 %v6707_v48  ;;  %v6785_v46 = vld [vmem:[%s8866_s0 + $0x34] ss:$108 sps:$4 sm:$0xff]   ;;  %v6789_v47 = vld [vmem:[%s8866_s0 + $0x3c] ss:$108 sps:$4 sm:$0xff]  }
  0xb6   :  { %3784 = vmatprep.mubr.bf16.mxu1 %v6710_v49  ;;  %5934 = vmatprep.subr.bf16.mxu0 %v6712_v50  ;;  %v6783_v48 = vld [vmem:[%s8866_s0 + $0x30] ss:$108 sps:$4 sm:$0xff]   ;;  %v6787_v50 = vld [vmem:[%s8866_s0 + $0x38] ss:$108 sps:$4 sm:$0xff]  }
  0xb7   :  { %6004 = vmatprep.subr.bf16.mxu1 %v6715_v52 }
  0xb8   :  { %5935 = vmatpush3.bf16.msra.mxu0 %v6714_v51  ;;  %v6790_v51 = vld [vmem:[%s8865_s1 + $0x400] sm:$0xff]  }
  0xb9   :  { %6005 = vmatpush3.bf16.msra.mxu1 %v6718_v53  ;;  %5936 = vmatprep.subr.bf16.mxu0 %v6723_v55 }
  0xba   :  { %6006 = vmatprep.subr.bf16.mxu1 %v6727_v57 }
  0xbb   :  { %3680 = vmatmul.mubr.bf16.gmra.mrb[76].mxu0 %v6709_v54  ;;  %v6793_v54 = vld [vmem:[%s8866_s0 + $0x10c] ss:$108 sps:$4 sm:$0xff]  }
  0xbc   :  { %3785 = vmatmul.mubr.bf16.gmra.mrb[76].mxu1 %v6713_v56  ;;  %3687 = vmatprep.mubr.bf16.mxu0 %v6716_v58  ;;  %v6792_v58 = vld [vmem:[%s8865_s1 + $0x480] sm:$0xff]  }
  0xbd   :  { %3792 = vmatprep.mubr.bf16.mxu1 %v6720_v59  ;;  %5937 = vmatpush3.bf16.msra.mxu0 %v6724_v60 }
  0xbe   :  { %6007 = vmatpush3.bf16.msra.mxu1 %v6729_v61  ;;  %5938 = vmatprep.subr.bf16.mxu0 %v6733_v62  ;;  %v6796_v62 = vld [vmem:[%s8866_s0 + $0x114] ss:$108 sps:$4 sm:$0xff]  }
  0xbf   :  { %6008 = vmatprep.subr.bf16.mxu1 %v6738_v63  ;;  %v6798_v63 = vld [vmem:[%s8865_s1 + $0x448] sm:$0xff]  }
  0xc1   :  { %5939 = vmatpush3.bf16.msra.mxu0 %v6734_v0 }
  0xc2   :  { %6009 = vmatpush3.bf16.msra.mxu1 %v6741_v2  ;;  %5940 = vmatprep.subr.bf16.mxu0 %v6743_v5  ;;  %v6800_v2 = vld [vmem:[%s8865_s1 + $0x408] sm:$0xff]  }
  0xc3   :  { %3688 = vmatmul.mubr.bf16.gmra.mrb[80].mxu0 %v6719_v1  ;;  %6010 = vmatprep.subr.bf16.mxu1 %v6750_v6  ;;  %v6801_v5 = vld [vmem:[%s8865_s1 + $0x4c8] sm:$0xff]  }
  0xc4   :  { %3793 = vmatmul.mubr.bf16.gmra.mrb[80].mxu1 %v6722_v3  ;;  %3695 = vmatprep.mubr.bf16.mxu0 %v6725_v4  ;;  %v6804_v6 = vld [vmem:[%s8865_s1 + $0x488] sm:$0xff]  }
  0xc5   :  { %3800 = vmatprep.mubr.bf16.mxu1 %v6730_v7  ;;  %5941 = vmatpush3.bf16.msra.mxu0 %v6744_v8  ;;  %v6795_v8 = vld [vmem:[%s8866_s0 + $0x108] ss:$108 sps:$4 sm:$0xff]  }
  0xc6   :  { %6011 = vmatpush3.bf16.msra.mxu1 %v6752_v9  ;;  %5942 = vmatprep.subr.bf16.mxu0 %v6753_v10  ;;  %v6809_v9 = vld [vmem:[%s8865_s1 + $0x450] sm:$0xff]  }
  0xc7   :  { %6012 = vmatprep.subr.bf16.mxu1 %v6761_v11  ;;  %v6799_v11 = vld [vmem:[%s8866_s0 + $0x110] ss:$108 sps:$4 sm:$0xff]  }
  0xc9   :  { %5943 = vmatpush3.bf16.msra.mxu0 %v6754_v12  ;;  %v6813_v12 = vld [vmem:[%s8865_s1 + $0x4d0] sm:$0xff]  }
  0xca   :  { %6013 = vmatpush3.bf16.msra.mxu1 %v6762_v14  ;;  %5944 = vmatprep.subr.bf16.mxu0 %v6763_v17 }
  0xcb   :  { %3696 = vmatmul.mubr.bf16.gmra.mrb[84].mxu0 %v6728_v13  ;;  %6014 = vmatprep.subr.bf16.mxu1 %v6771_v18 }
  0xcc   :  { %3801 = vmatmul.mubr.bf16.gmra.mrb[84].mxu1 %v6732_v15  ;;  %3703 = vmatprep.mubr.bf16.mxu0 %v6735_v16  ;;  %v6802_v15 = vld [vmem:[%s8866_s0 + $0x1e4] ss:$108 sps:$4 sm:$0xff]  }
  0xcd   :  { %3808 = vmatprep.mubr.bf16.mxu1 %v6739_v19  ;;  %5945 = vmatpush3.bf16.msra.mxu0 %v6766_v20  ;;  %v6806_v19 = vld [vmem:[%s8866_s0 + $0x1ec] ss:$108 sps:$4 sm:$0xff]   ;;  %v6810_v20 = vld [vmem:[%s8865_s1 + $0x410] sm:$0xff]  }
  0xce   :  { %6015 = vmatpush3.bf16.msra.mxu1 %v6772_v21  ;;  %5946 = vmatprep.subr.bf16.mxu0 %v6775_v22  ;;  %v6815_v21 = vld [vmem:[%s8865_s1 + $0x490] sm:$0xff]  }
  0xcf   :  { %6016 = vmatprep.subr.bf16.mxu1 %v6781_v23 }
  0xd1   :  { %5947 = vmatpush3.bf16.msra.mxu0 %v6777_v25 }
  0xd2   :  { %6017 = vmatpush3.bf16.msra.mxu1 %v6782_v27  ;;  %6072 = vmatprep.subr.bf16.mxu0 %v6786_v28  ;;  %v6819_v27 = vld [vmem:[%s8865_s1 + $0x458] sm:$0xff]  }
  0xd3   :  { %3704 = vmatmul.mubr.bf16.gmra.mrb[88].mxu0 %v6737_v24  ;;  %6142 = vmatprep.subr.bf16.mxu1 %v6791_v29 }
  0xd4   :  { %3809 = vmatmul.mubr.bf16.gmra.mrb[88].mxu1 %v6742_v26  ;;  %3711 = vmatprep.mubr.bf16.mxu0 %v6745_v30  ;;  %v6824_v30 = vld [vmem:[%s8865_s1 + $0x4d8] sm:$0xff]  }
  0xd5   :  { %3816 = vmatprep.mubr.bf16.mxu1 %v6748_v31  ;;  %v6820_v31 = vld [vmem:[%s8865_s1 + $0x418] sm:$0xff]  }
  0xdb   :  { %3712 = vmatmul.mubr.bf16.gmra.mrb[92].mxu0 %v6747_v32 }
  0xdc   :  { %3817 = vmatmul.mubr.bf16.gmra.mrb[92].mxu1 %v6751_v33  ;;  %3719 = vmatprep.mubr.bf16.mxu0 %v6755_v34  ;;  %v6805_v33 = vld [vmem:[%s8866_s0 + $0x1e0] ss:$108 sps:$4 sm:$0xff]   ;;  %v6827_v34 = vld [vmem:[%s8865_s1 + $0x498] sm:$0xff]  }
  0xdd   :  { %3824 = vmatprep.mubr.bf16.mxu1 %v6758_v35 }
  0xe3   :  { %3720 = vmatmul.mubr.bf16.gmra.mrb[96].mxu0 %v6757_v36  ;;  %v6808_v36 = vld [vmem:[%s8866_s0 + $0x1e8] ss:$108 sps:$4 sm:$0xff]  }
  0xe4   :  { %3825 = vmatmul.mubr.bf16.gmra.mrb[96].mxu1 %v6760_v37  ;;  %3727 = vmatprep.mubr.bf16.mxu0 %v6764_v38  ;;  %v6811_v37 = vld [vmem:[%s8866_s0 + $0x2bc] ss:$108 sps:$4 sm:$0xff]   ;;  %v6829_v38 = vld [vmem:[%s8865_s1 + $0x460] sm:$0xff]  }
  0xe5   :  { %3832 = vmatprep.mubr.bf16.mxu1 %v6768_v39 }
  0xeb   :  { %3728 = vmatmul.mubr.bf16.gmra.mrb[100].mxu0 %v6767_v40 }
  0xec   :  { %3833 = vmatmul.mubr.bf16.gmra.mrb[100].mxu1 %v6770_v41  ;;  %3735 = vmatprep.mubr.bf16.mxu0 %v6773_v42  ;;  %v6836_v41 = vld [vmem:[%s8865_s1 + $0x4e0] sm:$0xff]  }
  0xed   :  { %3840 = vmatprep.mubr.bf16.mxu1 %v6778_v43 }
  0xf3   :  { %3736 = vmatmul.mubr.bf16.gmra.mrb[104].mxu0 %v6776_v44 }
  0xf4   :  { %3841 = vmatmul.mubr.bf16.gmra.mrb[104].mxu1 %v6780_v45  ;;  %3881 = vmatprep.mubr.bf16.mxu0 %v6785_v46  ;;  %v6816_v45 = vld [vmem:[%s8866_s0 + $0x2c4] ss:$108 sps:$4 sm:$0xff]  }
  0xf5   :  { %3986 = vmatprep.mubr.bf16.mxu1 %v6789_v47 }
  0xf6   :  { %v5528_v49 = vpop.f32.mrb[0].mxu0 }
  0xf7   :  { %v5598_v52 = vpop.f32.mrb[0].mxu1  ;;  %v5529_v53 = vpop.f32.mrb[1].mxu0 }
  0xf8   :  { %v5530_v55 = vadd.f32 %v5529_v53, %v5528_v49  ;;  %v5599_v56 = vpop.f32.mrb[1].mxu1  ;;  %v5531_v57 = vpop.f32.mrb[2].mxu0  ;;  %v6830_v49 = vld [vmem:[%s8865_s1 + $0x420] sm:$0xff]   ;;  %v6839_v53 = vld [vmem:[%s8865_s1 + $0x468] sm:$0xff]  }
  0xf9   :  { %v5600_v59 = vadd.f32 %v5599_v56, %v5598_v52  ;;  %v5601_v60 = vpop.f32.mrb[2].mxu1  ;;  %v5532_v61 = vpop.f32.mrb[3].mxu0 }
  0xfa   :  { %v5533_v0 = vadd.f32 %v5532_v61, %v5531_v57  ;;  %v5602_v1 = vpop.f32.mrb[3].mxu1  ;;  %v6818_v61 = vld [vmem:[%s8866_s0 + $0x2c0] ss:$108 sps:$4 sm:$0xff]  }
  0xfb   :  { %v7835_v3 = vadd.f32 %v5600_v59, %v5530_v55  ;;  %v5603_v4 = vadd.f32 %v5602_v1, %v5601_v60  ;;  %3882 = vmatmul.mubr.bf16.vlgmr.msra.gmra.mrb[108].mxu0 %v6783_v48  ;;  %v6840_v59 = vld [vmem:[%s8865_s1 + $0x428] sm:$0xff]  }
  0xfc   :  { %6073 = vmatpush3.bf16.msra.mxu0 %v6790_v51  ;;  %3987 = vmatmul.mubr.bf16.vlgmr.msra.gmra.mrb[108].mxu1 %v6787_v50  ;;  %v6838_v50 = vld [vmem:[%s8865_s1 + $0x4a0] sm:$0xff]  }
  0xfd   :  { %v7843_v7 = vadd.f32 %v5603_v4, %v5533_v0  ;;  %6143 = vmatpush3.bf16.msra.mxu1 %v6792_v58  ;;  %3889 = vmatprep.mubr.bf16.mxu0 %v6793_v54  ;;  %v6847_v54 = vld [vmem:[%s8865_s1 + $0x4e8] sm:$0xff]   ;;  %v6814_v58 = vld [vmem:[%s8866_s0 + $0x2b8] ss:$108 sps:$4 sm:$0xff]   ;;  %v6849_v0 = vld [vmem:[%s8865_s1 + $0x470] sm:$0xff]  }
  0xfe   :  { %v5534_v10 = vpop.f32.mrb[4].mxu0  ;;  %3994 = vmatprep.mubr.bf16.mxu1 %v6796_v62  ;;  %6074 = vmatprep.subr.bf16.mxu0 %v6798_v63  ;;  %v6821_v62 = vld [vmem:[%s8866_s0 + $0x394] ss:$108 sps:$4 sm:$0xff]   ;;  %v6848_v63 = vld [vmem:[%s8865_s1 + $0x4a8] sm:$0xff]  }
  0xff   :  { %v5604_v13 = vpop.f32.mrb[4].mxu1  ;;  %v5535_v14 = vpop.f32.mrb[5].mxu0  ;;  %6144 = vmatprep.subr.bf16.mxu1 %v6801_v5  ;;  %v6825_v4 = vld [vmem:[%s8866_s0 + $0x39c] ss:$108 sps:$4 sm:$0xff]   ;;  %v6857_v5 = vld [vmem:[%s8865_s1 + $0x4f0] sm:$0xff]  }
 0x100   :  { %v5536_v16 = vadd.f32 %v5535_v14, %v5534_v10  ;;  %v5605_v17 = vpop.f32.mrb[5].mxu1  ;;  %v5537_v18 = vpop.f32.mrb[6].mxu0  ;;  %6075 = vmatpush3.bf16.msra.mxu0 %v6800_v2  ;;  %v6852_v10 = vld [vmem:[%s8865_s1 + $0x430] sm:$0xff]  }
 0x101   :  { %v5606_v22 = vadd.f32 %v5605_v17, %v5604_v13  ;;  %v5607_v23 = vpop.f32.mrb[6].mxu1  ;;  %v5538_v24 = vpop.f32.mrb[7].mxu0  ;;  %6145 = vmatpush3.bf16.msra.mxu1 %v6804_v6  ;;  %6076 = vmatprep.subr.bf16.mxu0 %v6809_v9  ;;  %v6858_v14 = vld [vmem:[%s8865_s1 + $0x4b0] sm:$0xff]  }
 0x102   :  { %v5539_v25 = vadd.f32 %v5538_v24, %v5537_v18  ;;  %v5608_v26 = vpop.f32.mrb[7].mxu1  ;;  %6146 = vmatprep.subr.bf16.mxu1 %v6813_v12  ;;  %v6868_v24 = vld [vmem:[%s8865_s1 + $0x4b8] sm:$0xff]  }
 0x103   :  { %v7872_v28 = vadd.f32 %v5606_v22, %v5536_v16  ;;  %v5609_v29 = vadd.f32 %v5608_v26, %v5607_v23  ;;  %3890 = vmatmul.mubr.bf16.gmra.mrb[112].mxu0 %v6795_v8  ;;  %v6823_v23 = vld [vmem:[%s8866_s0 + $0x390] ss:$108 sps:$4 sm:$0xff]   ;;  %v6828_v26 = vld [vmem:[%s8866_s0 + $0x398] ss:$108 sps:$4 sm:$0xff]  }
 0x104   :  { %3995 = vmatmul.mubr.bf16.gmra.mrb[112].mxu1 %v6799_v11  ;;  %3897 = vmatprep.mubr.bf16.mxu0 %v6802_v15  ;;  %v6861_v15 = vld [vmem:[%s8865_s1 + $0x478] sm:$0xff]  }
 0x105   :  { %v7880_v32 = vadd.f32 %v5609_v29, %v5539_v25  ;;  %4002 = vmatprep.mubr.bf16.mxu1 %v6806_v19  ;;  %6077 = vmatpush3.bf16.msra.mxu0 %v6810_v20  ;;  %v6867_v20 = vld [vmem:[%s8865_s1 + $0x4f8] sm:$0xff]   ;;  %v6872_v29 = vld [vmem:[%s8865_s1 + $0x540] sm:$0xff]  }
 0x106   :  { %v5540_v35 = vpop.f32.mrb[8].mxu0  ;;  %6147 = vmatpush3.bf16.msra.mxu1 %v6815_v21  ;;  %6078 = vmatprep.subr.bf16.mxu0 %v6819_v27  ;;  %v6863_v21 = vld [vmem:[%s8865_s1 + $0x438] sm:$0xff]  }
 0x107   :  { %v5610_v39 = vpop.f32.mrb[8].mxu1  ;;  %v5541_v40 = vpop.f32.mrb[9].mxu0  ;;  %6148 = vmatprep.subr.bf16.mxu1 %v6824_v30  ;;  %v6831_v27 = vld [vmem:[%s8866_s0 + $0x46c] ss:$108 sps:$4 sm:$0xff]  }
 0x108   :  { %v5542_v42 = vadd.f32 %v5541_v40, %v5540_v35  ;;  %v5611_v43 = vpop.f32.mrb[9].mxu1  ;;  %v5543_v44 = vpop.f32.mrb[10].mxu0 }
 0x109   :  { %v5612_v46 = vadd.f32 %v5611_v43, %v5610_v39  ;;  %v5613_v47 = vpop.f32.mrb[10].mxu1  ;;  %v5544_v48 = vpop.f32.mrb[11].mxu0  ;;  %6079 = vmatpush3.bf16.msra.mxu0 %v6820_v31 }
 0x10a   :  { %v5545_v51 = vadd.f32 %v5544_v48, %v5543_v44  ;;  %v5614_v52 = vpop.f32.mrb[11].mxu1  ;;  %6149 = vmatpush3.bf16.msra.mxu1 %v6827_v34  ;;  %6080 = vmatprep.subr.bf16.mxu0 %v6829_v38  ;;  %v6837_v48 = vld [vmem:[%s8866_s0 + $0x470] ss:$108 sps:$4 sm:$0xff]  }
 0x10b   :  { %v7915_v55 = vadd.f32 %v5612_v46, %v5542_v42  ;;  %v5615_v56 = vadd.f32 %v5614_v52, %v5613_v47  ;;  %3898 = vmatmul.mubr.bf16.gmra.mrb[116].mxu0 %v6805_v33  ;;  %6150 = vmatprep.subr.bf16.mxu1 %v6836_v41  ;;  %v6877_v33 = vld [vmem:[%s8865_s1 + $0x5c0] sm:$0xff]   ;;  %v6833_v46 = vld [vmem:[%s8866_s0 + $0x468] ss:$108 sps:$4 sm:$0xff]  }
 0x10c   :  { %4003 = vmatmul.mubr.bf16.gmra.mrb[116].mxu1 %v6808_v36  ;;  %3905 = vmatprep.mubr.bf16.mxu0 %v6811_v37  ;;  %v6834_v37 = vld [vmem:[%s8866_s0 + $0x474] ss:$108 sps:$4 sm:$0xff]  }
 0x10d   :  { %v7917_v57 = vadd.f32 %v5615_v56, %v5545_v51  ;;  %4010 = vmatprep.mubr.bf16.mxu1 %v6816_v45  ;;  %6081 = vmatpush3.bf16.msra.mxu0 %v6830_v49  ;;  %v6841_v51 = vld [vmem:[%s8866_s0 + $0x544] ss:$108 sps:$4 sm:$0xff]  }
 0x10e   :  { %v5546_v60 = vpop.f32.mrb[12].mxu0  ;;  %6151 = vmatpush3.bf16.msra.mxu1 %v6838_v50  ;;  %6082 = vmatprep.subr.bf16.mxu0 %v6839_v53 }
 0x10f   :  { %v5616_v1 = vpop.f32.mrb[12].mxu1  ;;  %v5547_v2 = vpop.f32.mrb[13].mxu0  ;;  %6152 = vmatprep.subr.bf16.mxu1 %v6847_v54 }
 0x110   :  { %v5548_v6 = vadd.f32 %v5547_v2, %v5546_v60  ;;  %v5617_v8 = vpop.f32.mrb[13].mxu1  ;;  %v5549_v9 = vpop.f32.mrb[14].mxu0  ;;  %v6844_v60 = vld [vmem:[%s8866_s0 + $0x54c] ss:$108 sps:$4 sm:$0xff]  }
 0x111   :  { %v5618_v11 = vadd.f32 %v5617_v8, %v5616_v1  ;;  %v5619_v12 = vpop.f32.mrb[14].mxu1  ;;  %v5550_v13 = vpop.f32.mrb[15].mxu0  ;;  %6083 = vmatpush3.bf16.msra.mxu0 %v6840_v59  ;;  %v6843_v2 = vld [vmem:[%s8866_s0 + $0x540] ss:$108 sps:$4 sm:$0xff]  }
 0x112   :  { %v5551_v16 = vadd.f32 %v5550_v13, %v5549_v9  ;;  %v5620_v17 = vpop.f32.mrb[15].mxu1  ;;  %6153 = vmatpush3.bf16.msra.mxu1 %v6848_v63  ;;  %6084 = vmatprep.subr.bf16.mxu0 %v6849_v0 }
 0x113   :  { %v7952_v18 = vadd.f32 %v5618_v11, %v5548_v6  ;;  %v5621_v19 = vadd.f32 %v5620_v17, %v5619_v12  ;;  %3906 = vmatmul.mubr.bf16.gmra.mrb[120].mxu0 %v6814_v58  ;;  %6154 = vmatprep.subr.bf16.mxu1 %v6857_v5  ;;  %v6846_v5 = vld [vmem:[%s8866_s0 + $0x548] ss:$108 sps:$4 sm:$0xff]  }
 0x114   :  { %4011 = vmatmul.mubr.bf16.gmra.mrb[120].mxu1 %v6818_v61  ;;  %3913 = vmatprep.mubr.bf16.mxu0 %v6821_v62  ;;  %v6850_v12 = vld [vmem:[%s8866_s0 + $0x61c] ss:$108 sps:$4 sm:$0xff]  }
 0x115   :  { %v7960_v22 = vadd.f32 %v5621_v19, %v5551_v16  ;;  %4018 = vmatprep.mubr.bf16.mxu1 %v6825_v4  ;;  %6085 = vmatpush3.bf16.msra.mxu0 %v6852_v10  ;;  %v6854_v16 = vld [vmem:[%s8866_s0 + $0x624] ss:$108 sps:$4 sm:$0xff]  }
 0x116   :  { %v5552_v25 = vpop.f32.mrb[16].mxu0  ;;  %6155 = vmatpush3.bf16.msra.mxu1 %v6858_v14  ;;  %6086 = vmatprep.subr.bf16.mxu0 %v6861_v15 }
 0x117   :  { %v5622_v30 = vpop.f32.mrb[16].mxu1  ;;  %v5553_v31 = vpop.f32.mrb[17].mxu0  ;;  %6156 = vmatprep.subr.bf16.mxu1 %v6867_v20 }
 0x118   :  { %v5554_v34 = vadd.f32 %v5553_v31, %v5552_v25  ;;  %v5623_v35 = vpop.f32.mrb[17].mxu1  ;;  %v5555_v36 = vpop.f32.mrb[18].mxu0  ;;  %v6853_v25 = vld [vmem:[%s8866_s0 + $0x618] ss:$108 sps:$4 sm:$0xff]  }
 0x119   :  { %v5624_v38 = vadd.f32 %v5623_v35, %v5622_v30  ;;  %v5625_v39 = vpop.f32.mrb[18].mxu1  ;;  %v5556_v40 = vpop.f32.mrb[19].mxu0  ;;  %6087 = vmatpush3.bf16.msra.mxu0 %v6863_v21 }
 0x11a   :  { %v5557_v41 = vadd.f32 %v5556_v40, %v5555_v36  ;;  %v5626_v42 = vpop.f32.mrb[19].mxu1  ;;  %6157 = vmatpush3.bf16.msra.mxu1 %v6868_v24  ;;  %6212 = vmatprep.subr.bf16.mxu0 %v6872_v29  ;;  %v6856_v29 = vld [vmem:[%s8866_s0 + $0x620] ss:$108 sps:$4 sm:$0xff]  }
 0x11b   :  { %v7983_v43 = vadd.f32 %v5624_v38, %v5554_v34  ;;  %v5627_v44 = vadd.f32 %v5626_v42, %v5625_v39  ;;  %3914 = vmatmul.mubr.bf16.gmra.mrb[124].mxu0 %v6823_v23  ;;  %6282 = vmatprep.subr.bf16.mxu1 %v6877_v33  ;;  %v6859_v34 = vld [vmem:[%s8866_s0 + $0x6f4] ss:$108 sps:$4 sm:$0xff]   ;;  %v6864_v38 = vld [vmem:[%s8866_s0 + $0x6fc] ss:$108 sps:$4 sm:$0xff]  }
 0x11c   :  { %4019 = vmatmul.mubr.bf16.gmra.mrb[124].mxu1 %v6828_v26  ;;  %3921 = vmatprep.mubr.bf16.mxu0 %v6831_v27 }
 0x11d   :  { %v7985_v45 = vadd.f32 %v5627_v44, %v5557_v41  ;;  %4026 = vmatprep.mubr.bf16.mxu1 %v6834_v37 }
 0x11e   :  { %v5558_v47 = vpop.f32.mrb[20].mxu0 }
 0x11f   :  { %v5628_v49 = vpop.f32.mrb[20].mxu1  ;;  %v5559_v50 = vpop.f32.mrb[21].mxu0 }
 0x120   :  { %v5560_v52 = vadd.f32 %v5559_v50, %v5558_v47  ;;  %v5629_v53 = vpop.f32.mrb[21].mxu1  ;;  %v5561_v54 = vpop.f32.mrb[22].mxu0  ;;  %v6866_v50 = vld [vmem:[%s8866_s0 + $0x6f8] ss:$108 sps:$4 sm:$0xff]  }
 0x121   :  { %v5630_v56 = vadd.f32 %v5629_v53, %v5628_v49  ;;  %v5631_v58 = vpop.f32.mrb[22].mxu1  ;;  %v5562_v59 = vpop.f32.mrb[23].mxu0 }
 0x122   :  { %v5563_v61 = vadd.f32 %v5562_v59, %v5561_v54  ;;  %v5632_v62 = vpop.f32.mrb[23].mxu1  ;;  %v6871_v54 = vld [vmem:[%s8866_s0 + $0x44] ss:$108 sps:$4 sm:$0xff]  }
 0x123   :  { %v7999_v63 = vadd.f32 %v5630_v56, %v5560_v52  ;;  %v5633_v0 = vadd.f32 %v5632_v62, %v5631_v58  ;;  %3922 = vmatmul.mubr.bf16.gmra.mrb[128].mxu0 %v6833_v46  ;;  %v6862_v46 = vld [vmem:[%s8866_s0 + $0x6f0] ss:$108 sps:$4 sm:$0xff]  }
 0x124   :  { %4027 = vmatmul.mubr.bf16.gmra.mrb[128].mxu1 %v6837_v48  ;;  %3929 = vmatprep.mubr.bf16.mxu0 %v6841_v51 }
 0x125   :  { %v8001_v1 = vadd.f32 %v5633_v0, %v5563_v61  ;;  %4034 = vmatprep.mubr.bf16.mxu1 %v6844_v60  ;;  %v6875_v60 = vld [vmem:[%s8866_s0 + $0x4c] ss:$108 sps:$4 sm:$0xff]  }
 0x126   :  { %v5564_v4 = vpop.f32.mrb[24].mxu0 }
 0x127   :  { %v5634_v6 = vpop.f32.mrb[24].mxu1  ;;  %v5565_v8 = vpop.f32.mrb[25].mxu0 }
 0x128   :  { %v5566_v9 = vadd.f32 %v5565_v8, %v5564_v4  ;;  %v5635_v10 = vpop.f32.mrb[25].mxu1  ;;  %v5567_v11 = vpop.f32.mrb[26].mxu0  ;;  %v6873_v8 = vld [vmem:[%s8866_s0 + $0x48] ss:$108 sps:$4 sm:$0xff]  }
 0x129   :  { %v5636_v13 = vadd.f32 %v5635_v10, %v5634_v6  ;;  %v5637_v14 = vpop.f32.mrb[26].mxu1  ;;  %v5568_v15 = vpop.f32.mrb[27].mxu0 }
 0x12a   :  { %v5569_v17 = vadd.f32 %v5568_v15, %v5567_v11  ;;  %v5638_v19 = vpop.f32.mrb[27].mxu1 }
 0x12b   :  { %v8015_v20 = vadd.f32 %v5636_v13, %v5566_v9  ;;  %v5639_v21 = vadd.f32 %v5638_v19, %v5637_v14  ;;  %3930 = vmatmul.mubr.bf16.gmra.mrb[132].mxu0 %v6843_v2  ;;  %v6876_v9 = vld [vmem:[%s8865_s1 + $0x500] sm:$0xff]  }
 0x12c   :  { %4035 = vmatmul.mubr.bf16.gmra.mrb[132].mxu1 %v6846_v5  ;;  %3937 = vmatprep.mubr.bf16.mxu0 %v6850_v12  ;;  %v6869_v5 = vld [vmem:[%s8866_s0 + $0x40] ss:$108 sps:$4 sm:$0xff]   ;;  %v6879_v12 = vld [vmem:[%s8866_s0 + $0x11c] ss:$108 sps:$4 sm:$0xff]  }
 0x12d   :  { %v8017_v23 = vadd.f32 %v5639_v21, %v5569_v17  ;;  %4042 = vmatprep.mubr.bf16.mxu1 %v6854_v16  ;;  %v6878_v16 = vld [vmem:[%s8865_s1 + $0x580] sm:$0xff]  }
 0x12e   :  { %v5570_v24 = vpop.f32.mrb[28].mxu0 }
 0x12f   :  { %v5640_v26 = vpop.f32.mrb[28].mxu1  ;;  %v5571_v27 = vpop.f32.mrb[29].mxu0 }
 0x130   :  { %v5572_v30 = vadd.f32 %v5571_v27, %v5570_v24  ;;  %v5641_v31 = vpop.f32.mrb[29].mxu1  ;;  %v5573_v33 = vpop.f32.mrb[30].mxu0  ;;  %v6884_v24 = vld [vmem:[%s8865_s1 + $0x548] sm:$0xff]  }
 0x131   :  { %v5642_v35 = vadd.f32 %v5641_v31, %v5640_v26  ;;  %v5643_v36 = vpop.f32.mrb[30].mxu1  ;;  %v5574_v37 = vpop.f32.mrb[31].mxu0 }
 0x132   :  { %v5575_v39 = vadd.f32 %v5574_v37, %v5573_v33  ;;  %v5644_v40 = vpop.f32.mrb[31].mxu1  ;;  %v6887_v33 = vld [vmem:[%s8865_s1 + $0x5c8] sm:$0xff]   ;;  %v6895_v37 = vld [vmem:[%s8865_s1 + $0x550] sm:$0xff]  }
 0x133   :  { %v8031_v41 = vadd.f32 %v5642_v35, %v5572_v30  ;;  %v5645_v42 = vadd.f32 %v5644_v40, %v5643_v36  ;;  %3938 = vmatmul.mubr.bf16.gmra.mrb[136].mxu0 %v6853_v25  ;;  %v6886_v30 = vld [vmem:[%s8865_s1 + $0x508] sm:$0xff]   ;;  %v6881_v36 = vld [vmem:[%s8866_s0 + $0x118] ss:$108 sps:$4 sm:$0xff]   ;;  %v6899_v40 = vld [vmem:[%s8865_s1 + $0x5d0] sm:$0xff]  }
 0x134   :  { %4043 = vmatmul.mubr.bf16.gmra.mrb[136].mxu1 %v6856_v29  ;;  %3945 = vmatprep.mubr.bf16.mxu0 %v6859_v34  ;;  %v6882_v29 = vld [vmem:[%s8866_s0 + $0x124] ss:$108 sps:$4 sm:$0xff]  }
 0x135   :  { %v8033_v44 = vadd.f32 %v5645_v42, %v5575_v39  ;;  %4050 = vmatprep.mubr.bf16.mxu1 %v6864_v38  ;;  %v6885_v39 = vld [vmem:[%s8866_s0 + $0x120] ss:$108 sps:$4 sm:$0xff]  }
 0x136   :  { %v5576_v47 = vpop.f32.mrb[32].mxu0 }
 0x137   :  { %v5646_v48 = vpop.f32.mrb[32].mxu1  ;;  %v5577_v49 = vpop.f32.mrb[33].mxu0 }
 0x138   :  { %v5578_v51 = vadd.f32 %v5577_v49, %v5576_v47  ;;  %v5647_v52 = vpop.f32.mrb[33].mxu1  ;;  %v5579_v53 = vpop.f32.mrb[34].mxu0  ;;  %v6888_v47 = vld [vmem:[%s8866_s0 + $0x1f4] ss:$108 sps:$4 sm:$0xff]  }
 0x139   :  { %v5648_v56 = vadd.f32 %v5647_v52, %v5646_v48  ;;  %v5649_v58 = vpop.f32.mrb[34].mxu1  ;;  %v5580_v59 = vpop.f32.mrb[35].mxu0 }
 0x13a   :  { %v5581_v61 = vadd.f32 %v5580_v59, %v5579_v53  ;;  %v5650_v62 = vpop.f32.mrb[35].mxu1 }
 0x13b   :  { %v8047_v0 = vadd.f32 %v5648_v56, %v5578_v51  ;;  %v5651_v2 = vadd.f32 %v5650_v62, %v5649_v58  ;;  %3946 = vmatmul.mubr.bf16.gmra.mrb[140].mxu0 %v6862_v46  ;;  %v6892_v51 = vld [vmem:[%s8866_s0 + $0x1fc] ss:$108 sps:$4 sm:$0xff]   ;;  %v6896_v56 = vld [vmem:[%s8865_s1 + $0x510] sm:$0xff]  }
 0x13c   :  { %4051 = vmatmul.mubr.bf16.gmra.mrb[140].mxu1 %v6866_v50  ;;  %4091 = vmatprep.mubr.bf16.mxu0 %v6871_v54  ;;  %v6901_v58 = vld [vmem:[%s8865_s1 + $0x590] sm:$0xff]   ;;  %v6905_v62 = vld [vmem:[%s8865_s1 + $0x558] sm:$0xff]  }
 0x13d   :  { %v8049_v4 = vadd.f32 %v5651_v2, %v5581_v61  ;;  %4196 = vmatprep.mubr.bf16.mxu1 %v6875_v60 }
 0x13e   :  { %v5668_v6 = vpop.f32.mrb[36].mxu0 }
 0x13f   :  { %v5669_v10 = vpop.f32.mrb[37].mxu0  ;;  %v5738_v11 = vpop.f32.mrb[36].mxu1 }
 0x140   :  { %v5670_v13 = vadd.f32 %v5669_v10, %v5668_v6  ;;  %v5671_v14 = vpop.f32.mrb[38].mxu0  ;;  %v5739_v15 = vpop.f32.mrb[37].mxu1  ;;  %v6913_v10 = vld [vmem:[%s8865_s1 + $0x598] sm:$0xff]  }
 0x141   :  { %v5672_v17 = vpop.f32.mrb[39].mxu0  ;;  %v5740_v19 = vadd.f32 %v5739_v15, %v5738_v11  ;;  %v5741_v21 = vpop.f32.mrb[38].mxu1 }
 0x142   :  { %v3464_v25 = vadd.f32 %v5670_v13, %v7835_v3  ;;  %v5673_v26 = vadd.f32 %v5672_v17, %v5671_v14  ;;  %v5742_v27 = vpop.f32.mrb[39].mxu1  ;;  %v6890_v3 = vld [vmem:[%s8865_s1 + $0x588] sm:$0xff]   ;;  %v6915_v14 = vld [vmem:[%s8865_s1 + $0x560] sm:$0xff]  }
 0x143   :  { %v5743_v31 = vadd.f32 %v5742_v27, %v5741_v21  ;;  %4092 = vmatmul.mubr.bf16.vlgmr.msra.gmra.mrb[144].mxu0 %v6869_v5  ;;  %v6910_v5 = vld [vmem:[%s8865_s1 + $0x5d8] sm:$0xff]   ;;  %v6902_v17 = vld [vmem:[%s8866_s0 + $0x2d4] ss:$108 sps:$4 sm:$0xff]  }
 0x144   :  { %v3467_v34 = vadd.f32 %v5673_v26, %v7843_v7  ;;  %v8080_v35 = vadd.f32 %v5740_v19, %v3464_v25  ;;  %6213 = vmatpush3.bf16.msra.mxu0 %v6876_v9  ;;  %4197 = vmatmul.mubr.bf16.vlgmr.msra.gmra.mrb[144].mxu1 %v6873_v8  ;;  %v6891_v9 = vld [vmem:[%s8866_s0 + $0x1f0] ss:$108 sps:$4 sm:$0xff]   ;;  %v6897_v13 = vld [vmem:[%s8866_s0 + $0x2cc] ss:$108 sps:$4 sm:$0xff]   ;;  %v6922_v19 = vld [vmem:[%s8865_s1 + $0x5e0] sm:$0xff]  }
 0x145   :  { %6283 = vmatpush3.bf16.msra.mxu1 %v6878_v16  ;;  %4099 = vmatprep.mubr.bf16.mxu0 %v6879_v12  ;;  %v6894_v12 = vld [vmem:[%s8866_s0 + $0x1f8] ss:$108 sps:$4 sm:$0xff]  }
 0x146   :  { %v8091_v38 = vadd.f32 %v5743_v31, %v3467_v34  ;;  %v5674_v7 = vpop.f32.mrb[40].mxu0  ;;  %4204 = vmatprep.mubr.bf16.mxu1 %v6882_v29  ;;  %6214 = vmatprep.subr.bf16.mxu0 %v6884_v24  ;;  %v6916_v26 = vld [vmem:[%s8865_s1 + $0x520] sm:$0xff]  }
 0x147   :  { %v5675_v42 = vpop.f32.mrb[41].mxu0  ;;  %v5744_v46 = vpop.f32.mrb[40].mxu1  ;;  %6284 = vmatprep.subr.bf16.mxu1 %v6887_v33  ;;  %v6924_v27 = vld [vmem:[%s8865_s1 + $0x5a0] sm:$0xff]  }
 0x148   :  { %v5676_v48 = vadd.f32 %v5675_v42, %v5674_v7  ;;  %v5677_v49 = vpop.f32.mrb[42].mxu0  ;;  %v5745_v50 = vpop.f32.mrb[41].mxu1  ;;  %6215 = vmatpush3.bf16.msra.mxu0 %v6886_v30  ;;  %v6933_v7 = vld [vmem:[%s8865_s1 + $0x5e8] sm:$0xff]  }
 0x149   :  { %v5678_v52 = vpop.f32.mrb[43].mxu0  ;;  %v5746_v53 = vadd.f32 %v5745_v50, %v5744_v46  ;;  %v5747_v54 = vpop.f32.mrb[42].mxu1  ;;  %6285 = vmatpush3.bf16.msra.mxu1 %v6890_v3  ;;  %6216 = vmatprep.subr.bf16.mxu0 %v6895_v37  ;;  %v6926_v42 = vld [vmem:[%s8865_s1 + $0x528] sm:$0xff]  }
 0x14a   :  { %v3472_v59 = vadd.f32 %v5676_v48, %v7872_v28  ;;  %v5679_v60 = vadd.f32 %v5678_v52, %v5677_v49  ;;  %v5748_v61 = vpop.f32.mrb[43].mxu1  ;;  %6286 = vmatprep.subr.bf16.mxu1 %v6899_v40  ;;  %v6906_v28 = vld [vmem:[%s8865_s1 + $0x518] sm:$0xff]   ;;  %v6934_v46 = vld [vmem:[%s8865_s1 + $0x5a8] sm:$0xff]   ;;  %v6935_v49 = vld [vmem:[%s8865_s1 + $0x570] sm:$0xff]  }
 0x14b   :  { %v5749_v2 = vadd.f32 %v5748_v61, %v5747_v54  ;;  %4100 = vmatmul.mubr.bf16.gmra.mrb[148].mxu0 %v6881_v36  ;;  %v6925_v36 = vld [vmem:[%s8865_s1 + $0x568] sm:$0xff]   ;;  %v6904_v48 = vld [vmem:[%s8866_s0 + $0x2d0] ss:$108 sps:$4 sm:$0xff]  }
 0x14c   :  { %v3475_v6 = vadd.f32 %v5679_v60, %v7880_v32  ;;  %v8119_v8 = vadd.f32 %v5746_v53, %v3472_v59  ;;  %4205 = vmatmul.mubr.bf16.gmra.mrb[148].mxu1 %v6885_v39  ;;  %4107 = vmatprep.mubr.bf16.mxu0 %v6888_v47  ;;  %v6943_v52 = vld [vmem:[%s8865_s1 + $0x5f0] sm:$0xff]  }
 0x14d   :  { %4212 = vmatprep.mubr.bf16.mxu1 %v6892_v51  ;;  %6217 = vmatpush3.bf16.msra.mxu0 %v6896_v56 }
 0x14e   :  { %v8130_v11 = vadd.f32 %v5749_v2, %v3475_v6  ;;  %v5680_v32 = vpop.f32.mrb[44].mxu0  ;;  %6287 = vmatpush3.bf16.msra.mxu1 %v6901_v58  ;;  %6218 = vmatprep.subr.bf16.mxu0 %v6905_v62  ;;  %v6907_v58 = vld [vmem:[%s8866_s0 + $0x3a4] ss:$108 sps:$4 sm:$0xff]   ;;  %v6911_v62 = vld [vmem:[%s8866_s0 + $0x3ac] ss:$108 sps:$4 sm:$0xff]  }
 0x14f   :  { %v5681_v15 = vpop.f32.mrb[45].mxu0  ;;  %v5750_v16 = vpop.f32.mrb[44].mxu1  ;;  %6288 = vmatprep.subr.bf16.mxu1 %v6910_v5  ;;  %v6938_v2 = vld [vmem:[%s8865_s1 + $0x530] sm:$0xff]  }
 0x150   :  { %v5682_v21 = vadd.f32 %v5681_v15, %v5680_v32  ;;  %v5683_v24 = vpop.f32.mrb[46].mxu0  ;;  %v5751_v25 = vpop.f32.mrb[45].mxu1  ;;  %v6953_v32 = vld [vmem:[%s8865_s1 + $0x5f8] sm:$0xff]  }
 0x151   :  { %v5684_v29 = vpop.f32.mrb[47].mxu0  ;;  %v5752_v30 = vadd.f32 %v5751_v25, %v5750_v16  ;;  %v5753_v31 = vpop.f32.mrb[46].mxu1  ;;  %6219 = vmatpush3.bf16.msra.mxu0 %v6906_v28  ;;  %v6949_v15 = vld [vmem:[%s8865_s1 + $0x538] sm:$0xff]  }
 0x152   :  { %v3480_v33 = vadd.f32 %v5682_v21, %v7915_v55  ;;  %v5685_v34 = vadd.f32 %v5684_v29, %v5683_v24  ;;  %v5754_v3 = vpop.f32.mrb[47].mxu1  ;;  %6289 = vmatpush3.bf16.msra.mxu1 %v6913_v10  ;;  %6220 = vmatprep.subr.bf16.mxu0 %v6915_v14  ;;  %v6900_v55 = vld [vmem:[%s8866_s0 + $0x2c8] ss:$108 sps:$4 sm:$0xff]   ;;  %v6947_v10 = vld [vmem:[%s8865_s1 + $0x578] sm:$0xff]   ;;  %v6909_v14 = vld [vmem:[%s8866_s0 + $0x3a0] ss:$108 sps:$4 sm:$0xff]  }
 0x153   :  { %v5755_v37 = vadd.f32 %v5754_v3, %v5753_v31  ;;  %4108 = vmatmul.mubr.bf16.gmra.mrb[152].mxu0 %v6891_v9  ;;  %6290 = vmatprep.subr.bf16.mxu1 %v6922_v19  ;;  %v6944_v9 = vld [vmem:[%s8865_s1 + $0x5b0] sm:$0xff]   ;;  %v6954_v19 = vld [vmem:[%s8865_s1 + $0x5b8] sm:$0xff]   ;;  %v6958_v21 = vld [vmem:[%s8865_s1 + $0x640] sm:$0xff]  }
 0x154   :  { %v3483_v39 = vadd.f32 %v5685_v34, %v7917_v57  ;;  %v8161_v40 = vadd.f32 %v5752_v30, %v3480_v33  ;;  %4213 = vmatmul.mubr.bf16.gmra.mrb[152].mxu1 %v6894_v12  ;;  %4115 = vmatprep.mubr.bf16.mxu0 %v6897_v13  ;;  %v6920_v31 = vld [vmem:[%s8866_s0 + $0x484] ss:$108 sps:$4 sm:$0xff]  }
 0x155   :  { %4220 = vmatprep.mubr.bf16.mxu1 %v6902_v17  ;;  %6221 = vmatpush3.bf16.msra.mxu0 %v6916_v26  ;;  %v6917_v26 = vld [vmem:[%s8866_s0 + $0x47c] ss:$108 sps:$4 sm:$0xff]  }
 0x156   :  { %v8172_v47 = vadd.f32 %v5755_v37, %v3483_v39  ;;  %v5686_v57 = vpop.f32.mrb[48].mxu0  ;;  %6291 = vmatpush3.bf16.msra.mxu1 %v6924_v27  ;;  %6222 = vmatprep.subr.bf16.mxu0 %v6925_v36 }
 0x157   :  { %v5687_v50 = vpop.f32.mrb[49].mxu0  ;;  %v5756_v51 = vpop.f32.mrb[48].mxu1  ;;  %6292 = vmatprep.subr.bf16.mxu1 %v6933_v7 }
 0x158   :  { %v5688_v53 = vadd.f32 %v5687_v50, %v5686_v57  ;;  %v5689_v54 = vpop.f32.mrb[50].mxu0  ;;  %v5757_v56 = vpop.f32.mrb[49].mxu1  ;;  %v6919_v57 = vld [vmem:[%s8866_s0 + $0x478] ss:$108 sps:$4 sm:$0xff]  }
 0x159   :  { %v5690_v59 = vpop.f32.mrb[51].mxu0  ;;  %v5758_v60 = vadd.f32 %v5757_v56, %v5756_v51  ;;  %v5759_v61 = vpop.f32.mrb[50].mxu1  ;;  %6223 = vmatpush3.bf16.msra.mxu0 %v6926_v42 }
 0x15a   :  { %v3488_v5 = vadd.f32 %v5688_v53, %v7952_v18  ;;  %v5691_v6 = vadd.f32 %v5690_v59, %v5689_v54  ;;  %v5760_v28 = vpop.f32.mrb[51].mxu1  ;;  %6293 = vmatpush3.bf16.msra.mxu1 %v6934_v46  ;;  %6224 = vmatprep.subr.bf16.mxu0 %v6935_v49  ;;  %v6923_v49 = vld [vmem:[%s8866_s0 + $0x480] ss:$108 sps:$4 sm:$0xff]  }
 0x15b   :  { %v5761_v12 = vadd.f32 %v5760_v28, %v5759_v61  ;;  %4116 = vmatmul.mubr.bf16.gmra.mrb[156].mxu0 %v6900_v55  ;;  %6294 = vmatprep.subr.bf16.mxu1 %v6943_v52  ;;  %v7069_v55 = vmov 0.0   ;;  %v6927_v54 = vld [vmem:[%s8866_s0 + $0x554] ss:$108 sps:$4 sm:$0xff]  }
 0x15c   :  { %v3491_v18 = vadd.f32 %v5691_v6, %v7960_v22  ;;  %v8203_v13 = vadd.f32 %v5758_v60, %v3488_v5  ;;  %4221 = vmatmul.mubr.bf16.gmra.mrb[156].mxu1 %v6904_v48  ;;  %4123 = vmatprep.mubr.bf16.mxu0 %v6907_v58  ;;  %v6914_v22 = vld [vmem:[%s8866_s0 + $0x3a8] ss:$108 sps:$4 sm:$0xff]  }
 0x15d   :  { %4228 = vmatprep.mubr.bf16.mxu1 %v6911_v62  ;;  %6225 = vmatpush3.bf16.msra.mxu0 %v6938_v2  ;;  %v6930_v60 = vld [vmem:[%s8866_s0 + $0x55c] ss:$108 sps:$4 sm:$0xff]  }
 0x15e   :  { %v8211_v16 = vadd.f32 %v5761_v12, %v3491_v18  ;;  %v5692_v17 = vpop.f32.mrb[52].mxu0  ;;  %6295 = vmatpush3.bf16.msra.mxu1 %v6944_v9  ;;  %6226 = vmatprep.subr.bf16.mxu0 %v6947_v10 }
 0x15f   :  { %v5693_v24 = vpop.f32.mrb[53].mxu0  ;;  %v5762_v25 = vpop.f32.mrb[52].mxu1  ;;  %6296 = vmatprep.subr.bf16.mxu1 %v6953_v32  ;;  %v6929_v32 = vld [vmem:[%s8866_s0 + $0x550] ss:$108 sps:$4 sm:$0xff]  }
 0x160   :  { %v5694_v27 = vadd.f32 %v5693_v24, %v5692_v17  ;;  %v5695_v29 = vpop.f32.mrb[54].mxu0  ;;  %v5763_v30 = vpop.f32.mrb[53].mxu1  ;;  %v6936_v17 = vld [vmem:[%s8866_s0 + $0x62c] ss:$108 sps:$4 sm:$0xff]   ;;  %v6940_v24 = vld [vmem:[%s8866_s0 + $0x634] ss:$108 sps:$4 sm:$0xff]  }
 0x161   :  { %v5696_v33 = vpop.f32.mrb[55].mxu0  ;;  %v5764_v34 = vadd.f32 %v5763_v30, %v5762_v25  ;;  %v5765_v3 = vpop.f32.mrb[54].mxu1  ;;  %6227 = vmatpush3.bf16.msra.mxu0 %v6949_v15 }
 0x162   :  { %v3496_v36 = vadd.f32 %v5694_v27, %v7983_v43  ;;  %v5697_v37 = vadd.f32 %v5696_v33, %v5695_v29  ;;  %v5766_v7 = vpop.f32.mrb[55].mxu1  ;;  %6297 = vmatpush3.bf16.msra.mxu1 %v6954_v19  ;;  %6352 = vmatprep.subr.bf16.mxu0 %v6958_v21 }
 0x163   :  { %v5767_v39 = vadd.f32 %v5766_v7, %v5765_v3  ;;  %4124 = vmatmul.mubr.bf16.gmra.mrb[160].mxu0 %v6909_v14  ;;  %6439 = vmatprep.subr.bf16.mxu1 %v7069_v55  ;;  %v6939_v3 = vld [vmem:[%s8866_s0 + $0x628] ss:$108 sps:$4 sm:$0xff]  }
 0x164   :  { %v3499_v42 = vadd.f32 %v5697_v37, %v7985_v45  ;;  %v8231_v46 = vadd.f32 %v5764_v34, %v3496_v36  ;;  %4229 = vmatmul.mubr.bf16.gmra.mrb[160].mxu1 %v6914_v22  ;;  %4131 = vmatprep.mubr.bf16.mxu0 %v6917_v26  ;;  %v6942_v37 = vld [vmem:[%s8866_s0 + $0x630] ss:$108 sps:$4 sm:$0xff]  }
 0x165   :  { %4236 = vmatprep.mubr.bf16.mxu1 %v6920_v31 }
 0x166   :  { %v8236_v43 = vadd.f32 %v5767_v39, %v3499_v42  ;;  %v5698_v48 = vpop.f32.mrb[56].mxu0  ;;  %v6945_v42 = vld [vmem:[%s8866_s0 + $0x704] ss:$108 sps:$4 sm:$0xff]  }
 0x167   :  { %v5699_v50 = vpop.f32.mrb[57].mxu0  ;;  %v5768_v51 = vpop.f32.mrb[56].mxu1 }
 0x168   :  { %v5700_v52 = vadd.f32 %v5699_v50, %v5698_v48  ;;  %v5701_v45 = vpop.f32.mrb[58].mxu0  ;;  %v5769_v53 = vpop.f32.mrb[57].mxu1  ;;  %v6950_v50 = vld [vmem:[%s8866_s0 + $0x70c] ss:$108 sps:$4 sm:$0xff]  }
 0x169   :  { %v5702_v56 = vpop.f32.mrb[59].mxu0  ;;  %v5770_v58 = vadd.f32 %v5769_v53, %v5768_v51  ;;  %v5771_v59 = vpop.f32.mrb[58].mxu1 }
 0x16a   :  { %v3504_v61 = vadd.f32 %v5700_v52, %v7999_v63  ;;  %v5703_v62 = vadd.f32 %v5702_v56, %v5701_v45  ;;  %v5772_v2 = vpop.f32.mrb[59].mxu1  ;;  %v6932_v63 = vld [vmem:[%s8866_s0 + $0x558] ss:$108 sps:$4 sm:$0xff]  }
 0x16b   :  { %v5773_v5 = vadd.f32 %v5772_v2, %v5771_v59  ;;  %4132 = vmatmul.mubr.bf16.gmra.mrb[164].mxu0 %v6919_v57 }
 0x16c   :  { %v3507_v6 = vadd.f32 %v5703_v62, %v8001_v1  ;;  %v8249_v28 = vadd.f32 %v5770_v58, %v3504_v61  ;;  %4237 = vmatmul.mubr.bf16.gmra.mrb[164].mxu1 %v6923_v49  ;;  %4139 = vmatprep.mubr.bf16.mxu0 %v6927_v54  ;;  %v6948_v58 = vld [vmem:[%s8866_s0 + $0x700] ss:$108 sps:$4 sm:$0xff]  }
 0x16d   :  { %4244 = vmatprep.mubr.bf16.mxu1 %v6930_v60 }
 0x16e   :  { %v8251_v9 = vadd.f32 %v5773_v5, %v3507_v6  ;;  %v5704_v10 = vpop.f32.mrb[60].mxu0 }
 0x16f   :  { %v5705_v12 = vpop.f32.mrb[61].mxu0  ;;  %v5774_v18 = vpop.f32.mrb[60].mxu1 }
 0x170   :  { %v5706_v14 = vadd.f32 %v5705_v12, %v5704_v10  ;;  %v5707_v1 = vpop.f32.mrb[62].mxu0  ;;  %v5775_v15 = vpop.f32.mrb[61].mxu1  ;;  %v6961_v12 = vld [vmem:[%s8866_s0 + $0x5c] ss:$108 sps:$4 sm:$0xff]  }
 0x171   :  { %v5708_v22 = vpop.f32.mrb[63].mxu0  ;;  %v5776_v19 = vadd.f32 %v5775_v15, %v5774_v18  ;;  %v5777_v21 = vpop.f32.mrb[62].mxu1 }
 0x172   :  { %v3512_v25 = vadd.f32 %v5706_v14, %v8015_v20  ;;  %v5709_v26 = vadd.f32 %v5708_v22, %v5707_v1  ;;  %v5778_v27 = vpop.f32.mrb[63].mxu1 }
 0x173   :  { %v5779_v29 = vadd.f32 %v5778_v27, %v5777_v21  ;;  %4140 = vmatmul.mubr.bf16.gmra.mrb[168].mxu0 %v6929_v32 }
 0x174   :  { %v3515_v30 = vadd.f32 %v5709_v26, %v8017_v23  ;;  %v8267_v31 = vadd.f32 %v5776_v19, %v3512_v25  ;;  %4245 = vmatmul.mubr.bf16.gmra.mrb[168].mxu1 %v6932_v63  ;;  %4147 = vmatprep.mubr.bf16.mxu0 %v6936_v17 }
 0x175   :  { %4252 = vmatprep.mubr.bf16.mxu1 %v6940_v24 }
 0x176   :  { %v8269_v33 = vadd.f32 %v5779_v29, %v3515_v30  ;;  %v5710_v34 = vpop.f32.mrb[64].mxu0  ;;  %v6962_v30 = vld [vmem:[%s8865_s1 + $0x600] sm:$0xff]  }
 0x177   :  { %v5711_v36 = vpop.f32.mrb[65].mxu0  ;;  %v5780_v20 = vpop.f32.mrb[64].mxu1 }
 0x178   :  { %v5712_v7 = vadd.f32 %v5711_v36, %v5710_v34  ;;  %v5713_v23 = vpop.f32.mrb[66].mxu0  ;;  %v5781_v39 = vpop.f32.mrb[65].mxu1 }
 0x179   :  { %v5714_v57 = vpop.f32.mrb[67].mxu0  ;;  %v5782_v48 = vadd.f32 %v5781_v39, %v5780_v20  ;;  %v5783_v49 = vpop.f32.mrb[66].mxu1  ;;  %v6963_v20 = vld [vmem:[%s8865_s1 + $0x680] sm:$0xff]  }
 0x17a   :  { %v3520_v51 = vadd.f32 %v5712_v7, %v8031_v41  ;;  %v5715_v52 = vadd.f32 %v5714_v57, %v5713_v23  ;;  %v5784_v45 = vpop.f32.mrb[67].mxu1  ;;  %v6952_v41 = vld [vmem:[%s8866_s0 + $0x708] ss:$108 sps:$4 sm:$0xff]  }
 0x17b   :  { %v5785_v53 = vadd.f32 %v5784_v45, %v5783_v49  ;;  %4148 = vmatmul.mubr.bf16.gmra.mrb[172].mxu0 %v6939_v3  ;;  %v6969_v57 = vld [vmem:[%s8865_s1 + $0x648] sm:$0xff]  }
 0x17c   :  { %v3523_v54 = vadd.f32 %v5715_v52, %v8033_v44  ;;  %v8285_v56 = vadd.f32 %v5782_v48, %v3520_v51  ;;  %4253 = vmatmul.mubr.bf16.gmra.mrb[172].mxu1 %v6942_v37  ;;  %4155 = vmatprep.mubr.bf16.mxu0 %v6945_v42  ;;  %v6957_v44 = vld [vmem:[%s8866_s0 + $0x54] ss:$108 sps:$4 sm:$0xff]   ;;  %v6964_v37 = vld [vmem:[%s8866_s0 + $0x12c] ss:$108 sps:$4 sm:$0xff]  }
 0x17d   :  { %4260 = vmatprep.mubr.bf16.mxu1 %v6950_v50  ;;  %v6967_v42 = vld [vmem:[%s8866_s0 + $0x134] ss:$108 sps:$4 sm:$0xff]   ;;  %v6974_v51 = vld [vmem:[%s8865_s1 + $0x688] sm:$0xff]  }
 0x17e   :  { %v8290_v59 = vadd.f32 %v5785_v53, %v3523_v54  ;;  %v5716_v60 = vpop.f32.mrb[68].mxu0  ;;  %v6979_v52 = vld [vmem:[%s8865_s1 + $0x650] sm:$0xff]  }
 0x17f   :  { %v5717_v61 = vpop.f32.mrb[69].mxu0  ;;  %v5786_v62 = vpop.f32.mrb[68].mxu1 }
 0x180   :  { %v5718_v2 = vadd.f32 %v5717_v61, %v5716_v60  ;;  %v5719_v5 = vpop.f32.mrb[70].mxu0  ;;  %v5787_v6 = vpop.f32.mrb[69].mxu1  ;;  %v6970_v61 = vld [vmem:[%s8866_s0 + $0x130] ss:$108 sps:$4 sm:$0xff]  }
 0x181   :  { %v5720_v10 = vpop.f32.mrb[71].mxu0  ;;  %v5788_v32 = vadd.f32 %v5787_v6, %v5786_v62  ;;  %v5789_v63 = vpop.f32.mrb[70].mxu1  ;;  %v6972_v62 = vld [vmem:[%s8866_s0 + $0x204] ss:$108 sps:$4 sm:$0xff]  }
 0x182   :  { %v3528_v18 = vadd.f32 %v5718_v2, %v8047_v0  ;;  %v5721_v14 = vadd.f32 %v5720_v10, %v5719_v5  ;;  %v5790_v1 = vpop.f32.mrb[71].mxu1  ;;  %v6955_v0 = vld [vmem:[%s8866_s0 + $0x50] ss:$108 sps:$4 sm:$0xff]   ;;  %v6976_v10 = vld [vmem:[%s8866_s0 + $0x20c] ss:$108 sps:$4 sm:$0xff]  }
 0x183   :  { %v5791_v15 = vadd.f32 %v5790_v1, %v5789_v63  ;;  %4156 = vmatmul.mubr.bf16.gmra.mrb[176].mxu0 %v6948_v58  ;;  %v6966_v58 = vld [vmem:[%s8866_s0 + $0x128] ss:$108 sps:$4 sm:$0xff]   ;;  %v6988_v1 = vld [vmem:[%s8865_s1 + $0x658] sm:$0xff]  }
 0x184   :  { %v3531_v17 = vadd.f32 %v5721_v14, %v8049_v4  ;;  %v8303_v22 = vadd.f32 %v5788_v32, %v3528_v18  ;;  %4261 = vmatmul.mubr.bf16.gmra.mrb[176].mxu1 %v6952_v41  ;;  %4301 = vmatprep.mubr.bf16.mxu0 %v6957_v44  ;;  %v6959_v4 = vld [vmem:[%s8866_s0 + $0x58] ss:$108 sps:$4 sm:$0xff]   ;;  %v6980_v32 = vld [vmem:[%s8865_s1 + $0x610] sm:$0xff]  }
 0x185   :  { %4406 = vmatprep.mubr.bf16.mxu1 %v6961_v12  ;;  %v6984_v14 = vld [vmem:[%s8865_s1 + $0x690] sm:$0xff]  }
 0x186   :  { %v8305_v19 = vadd.f32 %v5791_v15, %v3531_v17  ;;  %v5808_v21 = vpop.f32.mrb[72].mxu0 }
 0x187   :  { %v5809_v24 = vpop.f32.mrb[73].mxu0  ;;  %v5878_v25 = vpop.f32.mrb[72].mxu1 }
 0x188   :  { %v5810_v26 = vadd.f32 %v5809_v24, %v5808_v21  ;;  %v5811_v27 = vpop.f32.mrb[74].mxu0  ;;  %v5879_v29 = vpop.f32.mrb[73].mxu1 }
 0x189   :  { %v5812_v34 = vpop.f32.mrb[75].mxu0  ;;  %v5880_v3 = vadd.f32 %v5879_v29, %v5878_v25  ;;  %v5881_v36 = vpop.f32.mrb[74].mxu1  ;;  %v6975_v29 = vld [vmem:[%s8866_s0 + $0x200] ss:$108 sps:$4 sm:$0xff]  }
 0x18a   :  { %v3674_v7 = vadd.f32 %v5810_v26, %v8080_v35  ;;  %v5813_v23 = vadd.f32 %v5812_v34, %v5811_v27  ;;  %v5882_v39 = vpop.f32.mrb[75].mxu1  ;;  %v6971_v35 = vld [vmem:[%s8865_s1 + $0x608] sm:$0xff]  }
 0x18b   :  { %v5883_v48 = vadd.f32 %v5882_v39, %v5881_v36  ;;  %4302 = vmatmul.mubr.bf16.vlgmr.msra.gmra.mrb[180].mxu0 %v6955_v0  ;;  %v6995_v0 = vld [vmem:[%s8865_s1 + $0x698] sm:$0xff]   ;;  %v6998_v39 = vld [vmem:[%s8865_s1 + $0x620] sm:$0xff]  }
 0x18c   :  { %v3677_v49 = vadd.f32 %v5813_v23, %v8091_v38  ;;  %v8330_v50 = vadd.f32 %v5880_v3, %v3674_v7  ;;  %6353 = vmatpush3.bf16.msra.mxu0 %v6962_v30  ;;  %4407 = vmatmul.mubr.bf16.vlgmr.msra.gmra.mrb[180].mxu1 %v6959_v4  ;;  %v6978_v3 = vld [vmem:[%s8866_s0 + $0x208] ss:$108 sps:$4 sm:$0xff]   ;;  %v6985_v23 = vld [vmem:[%s8866_s0 + $0x2e4] ss:$108 sps:$4 sm:$0xff]  }
 0x18d   :  { %6440 = vmatpush3.bf16.msra.mxu1 %v6963_v20  ;;  %4309 = vmatprep.mubr.bf16.mxu0 %v6964_v37  ;;  %v6981_v36 = vld [vmem:[%s8866_s0 + $0x2dc] ss:$108 sps:$4 sm:$0xff]  }
 0x18e   :  { %v8341_v45 = vadd.f32 %v5883_v48, %v3677_v49  ;;  %v5814_v38 = vpop.f32.mrb[76].mxu0  ;;  %4414 = vmatprep.mubr.bf16.mxu1 %v6967_v42  ;;  %6354 = vmatprep.subr.bf16.mxu0 %v6969_v57  ;;  %v7005_v49 = vld [vmem:[%s8865_s1 + $0x6a0] sm:$0xff]  }
 0x18f   :  { %v5815_v53 = vpop.f32.mrb[77].mxu0  ;;  %v5884_v54 = vpop.f32.mrb[76].mxu1  ;;  %6441 = vmatprep.subr.bf16.mxu1 %v7069_v55 }
 0x190   :  { %v5816_v60 = vadd.f32 %v5815_v53, %v5814_v38  ;;  %v5817_v41 = vpop.f32.mrb[78].mxu0  ;;  %v5885_v44 = vpop.f32.mrb[77].mxu1  ;;  %6355 = vmatpush3.bf16.msra.mxu0 %v6971_v35  ;;  %v7006_v35 = vld [vmem:[%s8865_s1 + $0x668] sm:$0xff]  }
 0x191   :  { %v5818_v2 = vpop.f32.mrb[79].mxu0  ;;  %v5886_v5 = vadd.f32 %v5885_v44, %v5884_v54  ;;  %v5887_v6 = vpop.f32.mrb[78].mxu1  ;;  %6442 = vmatpush3.bf16.msra.mxu1 %v6974_v51  ;;  %6356 = vmatprep.subr.bf16.mxu0 %v6979_v52  ;;  %v6983_v44 = vld [vmem:[%s8866_s0 + $0x2d8] ss:$108 sps:$4 sm:$0xff]  }
 0x192   :  { %v3682_v63 = vadd.f32 %v5816_v60, %v8119_v8  ;;  %v5819_v12 = vadd.f32 %v5818_v2, %v5817_v41  ;;  %v5888_v18 = vpop.f32.mrb[79].mxu1  ;;  %6443 = vmatprep.subr.bf16.mxu1 %v7069_v55  ;;  %v6989_v8 = vld [vmem:[%s8865_s1 + $0x618] sm:$0xff]  }
 0x193   :  { %v5889_v15 = vadd.f32 %v5888_v18, %v5887_v6  ;;  %4310 = vmatmul.mubr.bf16.gmra.mrb[184].mxu0 %v6966_v58  ;;  %v7014_v58 = vld [vmem:[%s8865_s1 + $0x6a8] sm:$0xff]   ;;  %v6990_v6 = vld [vmem:[%s8866_s0 + $0x3b4] ss:$108 sps:$4 sm:$0xff]  }
 0x194   :  { %v3685_v17 = vadd.f32 %v5819_v12, %v8130_v11  ;;  %v8368_v21 = vadd.f32 %v5886_v5, %v3682_v63  ;;  %4415 = vmatmul.mubr.bf16.gmra.mrb[184].mxu1 %v6970_v61  ;;  %4317 = vmatprep.mubr.bf16.mxu0 %v6972_v62  ;;  %v6997_v11 = vld [vmem:[%s8865_s1 + $0x660] sm:$0xff]   ;;  %v6993_v12 = vld [vmem:[%s8866_s0 + $0x3bc] ss:$108 sps:$4 sm:$0xff]   ;;  %v7018_v18 = vld [vmem:[%s8865_s1 + $0x630] sm:$0xff]  }
 0x195   :  { %4422 = vmatprep.mubr.bf16.mxu1 %v6976_v10  ;;  %6357 = vmatpush3.bf16.msra.mxu0 %v6980_v32  ;;  %v6987_v5 = vld [vmem:[%s8866_s0 + $0x2e0] ss:$108 sps:$4 sm:$0xff]  }
 0x196   :  { %v8373_v24 = vadd.f32 %v5889_v15, %v3685_v17  ;;  %v5820_v25 = vpop.f32.mrb[80].mxu0  ;;  %6444 = vmatpush3.bf16.msra.mxu1 %v6984_v14  ;;  %6358 = vmatprep.subr.bf16.mxu0 %v6988_v1  ;;  %v7023_v17 = vld [vmem:[%s8865_s1 + $0x6b0] sm:$0xff]  }
 0x197   :  { %v5821_v26 = vpop.f32.mrb[81].mxu0  ;;  %v5890_v27 = vpop.f32.mrb[80].mxu1  ;;  %6445 = vmatprep.subr.bf16.mxu1 %v7069_v55 }
 0x198   :  { %v5822_v4 = vadd.f32 %v5821_v26, %v5820_v25  ;;  %v5823_v30 = vpop.f32.mrb[82].mxu0  ;;  %v5891_v34 = vpop.f32.mrb[81].mxu1 }
 0x199   :  { %v5824_v20 = vpop.f32.mrb[83].mxu0  ;;  %v5892_v37 = vadd.f32 %v5891_v34, %v5890_v27  ;;  %v5893_v7 = vpop.f32.mrb[82].mxu1  ;;  %6359 = vmatpush3.bf16.msra.mxu0 %v6989_v8  ;;  %v7026_v8 = vld [vmem:[%s8865_s1 + $0x678] sm:$0xff]  }
 0x19a   :  { %v3690_v42 = vadd.f32 %v5822_v4, %v8161_v40  ;;  %v5825_v57 = vadd.f32 %v5824_v20, %v5823_v30  ;;  %v5894_v48 = vpop.f32.mrb[83].mxu1  ;;  %6446 = vmatpush3.bf16.msra.mxu1 %v6995_v0  ;;  %6360 = vmatprep.subr.bf16.mxu0 %v6997_v11  ;;  %v7007_v40 = vld [vmem:[%s8865_s1 + $0x628] sm:$0xff]   ;;  %v6992_v30 = vld [vmem:[%s8866_s0 + $0x3b0] ss:$108 sps:$4 sm:$0xff]   ;;  %v6996_v20 = vld [vmem:[%s8866_s0 + $0x3b8] ss:$108 sps:$4 sm:$0xff]  }
 0x19b   :  { %v5895_v51 = vadd.f32 %v5894_v48, %v5893_v7  ;;  %4318 = vmatmul.mubr.bf16.gmra.mrb[188].mxu0 %v6975_v29  ;;  %6447 = vmatprep.subr.bf16.mxu1 %v7069_v55  ;;  %v7032_v29 = vld [vmem:[%s8865_s1 + $0x6b8] sm:$0xff]  }
 0x19c   :  { %v3693_v52 = vadd.f32 %v5825_v57, %v8172_v47  ;;  %v8406_v38 = vadd.f32 %v5892_v37, %v3690_v42  ;;  %4423 = vmatmul.mubr.bf16.gmra.mrb[188].mxu1 %v6978_v3  ;;  %4325 = vmatprep.mubr.bf16.mxu0 %v6981_v36  ;;  %v7015_v47 = vld [vmem:[%s8865_s1 + $0x670] sm:$0xff]   ;;  %v6999_v37 = vld [vmem:[%s8866_s0 + $0x48c] ss:$108 sps:$4 sm:$0xff]  }
 0x19d   :  { %4430 = vmatprep.mubr.bf16.mxu1 %v6985_v23  ;;  %6361 = vmatpush3.bf16.msra.mxu0 %v6998_v39  ;;  %v7002_v42 = vld [vmem:[%s8866_s0 + $0x494] ss:$108 sps:$4 sm:$0xff]  }
 0x19e   :  { %v8411_v53 = vadd.f32 %v5895_v51, %v3693_v52  ;;  %v5826_v54 = vpop.f32.mrb[84].mxu0  ;;  %6448 = vmatpush3.bf16.msra.mxu1 %v7005_v49  ;;  %6362 = vmatprep.subr.bf16.mxu0 %v7006_v35 }
 0x19f   :  { %v5827_v60 = vpop.f32.mrb[85].mxu0  ;;  %v5896_v41 = vpop.f32.mrb[84].mxu1  ;;  %6449 = vmatprep.subr.bf16.mxu1 %v7069_v55 }
 0x1a0   :  { %v5828_v61 = vadd.f32 %v5827_v60, %v5826_v54  ;;  %v5829_v62 = vpop.f32.mrb[86].mxu0  ;;  %v5897_v2 = vpop.f32.mrb[85].mxu1 }
 0x1a1   :  { %v5830_v10 = vpop.f32.mrb[87].mxu0  ;;  %v5898_v32 = vadd.f32 %v5897_v2, %v5896_v41  ;;  %v5899_v63 = vpop.f32.mrb[86].mxu1  ;;  %6363 = vmatpush3.bf16.msra.mxu0 %v7007_v40 }
 0x1a2   :  { %v3698_v14 = vadd.f32 %v5828_v61, %v8203_v13  ;;  %v5831_v1 = vadd.f32 %v5830_v10, %v5829_v62  ;;  %v5900_v15 = vpop.f32.mrb[87].mxu1  ;;  %6450 = vmatpush3.bf16.msra.mxu1 %v7014_v58  ;;  %6364 = vmatprep.subr.bf16.mxu0 %v7015_v47  ;;  %v7028_v13 = vld [vmem:[%s8865_s1 + $0x638] sm:$0xff]   ;;  %v7008_v61 = vld [vmem:[%s8866_s0 + $0x564] ss:$108 sps:$4 sm:$0xff]  }
 0x1a3   :  { %v5901_v25 = vadd.f32 %v5900_v15, %v5899_v63  ;;  %4326 = vmatmul.mubr.bf16.gmra.mrb[192].mxu0 %v6983_v44  ;;  %6451 = vmatprep.subr.bf16.mxu1 %v7069_v55 }
 0x1a4   :  { %v3701_v0 = vadd.f32 %v5831_v1, %v8211_v16  ;;  %v8444_v11 = vadd.f32 %v5898_v32, %v3698_v14  ;;  %4431 = vmatmul.mubr.bf16.gmra.mrb[192].mxu1 %v6987_v5  ;;  %4333 = vmatprep.mubr.bf16.mxu0 %v6990_v6  ;;  %v7011_v6 = vld [vmem:[%s8866_s0 + $0x56c] ss:$108 sps:$4 sm:$0xff]  }
 0x1a5   :  { %4438 = vmatprep.mubr.bf16.mxu1 %v6993_v12  ;;  %6365 = vmatpush3.bf16.msra.mxu0 %v7018_v18 }
 0x1a6   :  { %v8449_v26 = vadd.f32 %v5901_v25, %v3701_v0  ;;  %v5832_v27 = vpop.f32.mrb[88].mxu0  ;;  %6452 = vmatpush3.bf16.msra.mxu1 %v7023_v17  ;;  %6366 = vmatprep.subr.bf16.mxu0 %v7026_v8 }
 0x1a7   :  { %v5833_v16 = vpop.f32.mrb[89].mxu0  ;;  %v5902_v4 = vpop.f32.mrb[88].mxu1  ;;  %6453 = vmatprep.subr.bf16.mxu1 %v7069_v55 }
 0x1a8   :  { %v5834_v34 = vadd.f32 %v5833_v16, %v5832_v27  ;;  %v5835_v3 = vpop.f32.mrb[90].mxu0  ;;  %v5903_v36 = vpop.f32.mrb[89].mxu1  ;;  %v7016_v27 = vld [vmem:[%s8866_s0 + $0x63c] ss:$108 sps:$4 sm:$0xff]  }
 0x1a9   :  { %v5836_v7 = vpop.f32.mrb[91].mxu0  ;;  %v5904_v23 = vadd.f32 %v5903_v36, %v5902_v4  ;;  %v5905_v39 = vpop.f32.mrb[90].mxu1  ;;  %6367 = vmatpush3.bf16.msra.mxu0 %v7028_v13 }
 0x1aa   :  { %v3706_v57 = vadd.f32 %v5834_v34, %v8231_v46  ;;  %v5837_v48 = vadd.f32 %v5836_v7, %v5835_v3  ;;  %v5906_v49 = vpop.f32.mrb[91].mxu1  ;;  %6454 = vmatpush3.bf16.msra.mxu1 %v7032_v29  ;;  %v7001_v46 = vld [vmem:[%s8866_s0 + $0x488] ss:$108 sps:$4 sm:$0xff]  }
 0x1ab   :  { %v5907_v35 = vadd.f32 %v5906_v49, %v5905_v39  ;;  %4334 = vmatmul.mubr.bf16.gmra.mrb[196].mxu0 %v6992_v30  ;;  %v7020_v30 = vld [vmem:[%s8866_s0 + $0x644] ss:$108 sps:$4 sm:$0xff]  }
 0x1ac   :  { %v3709_v51 = vadd.f32 %v5837_v48, %v8236_v43  ;;  %v8469_v52 = vadd.f32 %v5904_v23, %v3706_v57  ;;  %4439 = vmatmul.mubr.bf16.gmra.mrb[196].mxu1 %v6996_v20  ;;  %4341 = vmatprep.mubr.bf16.mxu0 %v6999_v37  ;;  %v7004_v43 = vld [vmem:[%s8866_s0 + $0x490] ss:$108 sps:$4 sm:$0xff]  }
 0x1ad   :  { %4446 = vmatprep.mubr.bf16.mxu1 %v7002_v42 }
 0x1ae   :  { %v8471_v40 = vadd.f32 %v5907_v35, %v3709_v51  ;;  %v5838_v54 = vpop.f32.mrb[92].mxu0  ;;  %v7024_v51 = vld [vmem:[%s8866_s0 + $0x714] ss:$108 sps:$4 sm:$0xff]  }
 0x1af   :  { %v5839_v58 = vpop.f32.mrb[93].mxu0  ;;  %v5908_v47 = vpop.f32.mrb[92].mxu1 }
 0x1b0   :  { %v5840_v60 = vadd.f32 %v5839_v58, %v5838_v54  ;;  %v5841_v41 = vpop.f32.mrb[94].mxu0  ;;  %v5909_v44 = vpop.f32.mrb[93].mxu1 }
 0x1b1   :  { %v5842_v62 = vpop.f32.mrb[95].mxu0  ;;  %v5910_v2 = vadd.f32 %v5909_v44, %v5908_v47  ;;  %v5911_v5 = vpop.f32.mrb[94].mxu1 }
 0x1b2   :  { %v3714_v10 = vadd.f32 %v5840_v60, %v8249_v28  ;;  %v5843_v32 = vadd.f32 %v5842_v62, %v5841_v41  ;;  %v5912_v63 = vpop.f32.mrb[95].mxu1  ;;  %v7010_v28 = vld [vmem:[%s8866_s0 + $0x560] ss:$108 sps:$4 sm:$0xff]  }
 0x1b3   :  { %v5913_v12 = vadd.f32 %v5912_v63, %v5911_v5  ;;  %4342 = vmatmul.mubr.bf16.gmra.mrb[200].mxu0 %v7001_v46  ;;  %v7029_v46 = vld [vmem:[%s8866_s0 + $0x71c] ss:$108 sps:$4 sm:$0xff]  }
 0x1b4   :  { %v3717_v18 = vadd.f32 %v5843_v32, %v8251_v9  ;;  %v8487_v14 = vadd.f32 %v5910_v2, %v3714_v10  ;;  %4447 = vmatmul.mubr.bf16.gmra.mrb[200].mxu1 %v7004_v43  ;;  %4349 = vmatprep.mubr.bf16.mxu0 %v7008_v61  ;;  %v7013_v9 = vld [vmem:[%s8866_s0 + $0x568] ss:$108 sps:$4 sm:$0xff]  }
 0x1b5   :  { %4454 = vmatprep.mubr.bf16.mxu1 %v7011_v6 }
 0x1b6   :  { %v8489_v1 = vadd.f32 %v5913_v12, %v3717_v18  ;;  %v5844_v15 = vpop.f32.mrb[96].mxu0  ;;  %v7035_v18 = vld [vmem:[%s8866_s0 + $0x64] ss:$108 sps:$4 sm:$0xff]  }
 0x1b7   :  { %v5845_v17 = vpop.f32.mrb[97].mxu0  ;;  %v5914_v8 = vpop.f32.mrb[96].mxu1 }
 0x1b8   :  { %v5846_v25 = vadd.f32 %v5845_v17, %v5844_v15  ;;  %v5847_v0 = vpop.f32.mrb[98].mxu0  ;;  %v5915_v13 = vpop.f32.mrb[97].mxu1 }
 0x1b9   :  { %v5848_v29 = vpop.f32.mrb[99].mxu0  ;;  %v5916_v16 = vadd.f32 %v5915_v13, %v5914_v8  ;;  %v5917_v4 = vpop.f32.mrb[98].mxu1 }
 0x1ba   :  { %v3722_v34 = vadd.f32 %v5846_v25, %v8267_v31  ;;  %v5849_v3 = vadd.f32 %v5848_v29, %v5847_v0  ;;  %v5918_v36 = vpop.f32.mrb[99].mxu1  ;;  %v7019_v31 = vld [vmem:[%s8866_s0 + $0x638] ss:$108 sps:$4 sm:$0xff]  }
 0x1bb   :  { %v5919_v20 = vadd.f32 %v5918_v36, %v5917_v4  ;;  %4350 = vmatmul.mubr.bf16.gmra.mrb[204].mxu0 %v7010_v28  ;;  %v7036_v36 = vld [vmem:[%s8866_s0 + $0x68] ss:$108 sps:$4 sm:$0xff]  }
 0x1bc   :  { %v3725_v37 = vadd.f32 %v5849_v3, %v8269_v33  ;;  %v8505_v7 = vadd.f32 %v5916_v16, %v3722_v34  ;;  %4455 = vmatmul.mubr.bf16.gmra.mrb[204].mxu1 %v7013_v9  ;;  %4357 = vmatprep.mubr.bf16.mxu0 %v7016_v27  ;;  %v7022_v33 = vld [vmem:[%s8866_s0 + $0x640] ss:$108 sps:$4 sm:$0xff]  }
 0x1bd   :  { %4462 = vmatprep.mubr.bf16.mxu1 %v7020_v30 }
 0x1be   :  { %v8507_v23 = vadd.f32 %v5919_v20, %v3725_v37  ;;  %v5850_v39 = vpop.f32.mrb[100].mxu0  ;;  %v7037_v20 = vld [vmem:[%s8866_s0 + $0x13c] ss:$108 sps:$4 sm:$0xff]  }
 0x1bf   :  { %v5851_v42 = vpop.f32.mrb[101].mxu0  ;;  %v5920_v57 = vpop.f32.mrb[100].mxu1 }
 0x1c0   :  { %v5852_v48 = vadd.f32 %v5851_v42, %v5850_v39  ;;  %v5853_v49 = vpop.f32.mrb[102].mxu0  ;;  %v5921_v35 = vpop.f32.mrb[101].mxu1 }
 0x1c1   :  { %v5854_v54 = vpop.f32.mrb[103].mxu0  ;;  %v5922_v58 = vadd.f32 %v5921_v35, %v5920_v57  ;;  %v5923_v47 = vpop.f32.mrb[102].mxu1 }
 0x1c2   :  { %v3730_v60 = vadd.f32 %v5852_v48, %v8285_v56  ;;  %v5855_v41 = vadd.f32 %v5854_v54, %v5853_v49  ;;  %v5924_v44 = vpop.f32.mrb[103].mxu1  ;;  %v7027_v56 = vld [vmem:[%s8866_s0 + $0x710] ss:$108 sps:$4 sm:$0xff]  }
 0x1c3   :  { %v5925_v43 = vadd.f32 %v5924_v44, %v5923_v47  ;;  %4358 = vmatmul.mubr.bf16.gmra.mrb[208].mxu0 %v7019_v31  ;;  %v7041_v44 = vld [vmem:[%s8866_s0 + $0x214] ss:$108 sps:$4 sm:$0xff]  }
 0x1c4   :  { %v3733_v61 = vadd.f32 %v5855_v41, %v8290_v59  ;;  %v8523_v62 = vadd.f32 %v5922_v58, %v3730_v60  ;;  %4463 = vmatmul.mubr.bf16.gmra.mrb[208].mxu1 %v7022_v33  ;;  %4365 = vmatprep.mubr.bf16.mxu0 %v7024_v51  ;;  %v7031_v59 = vld [vmem:[%s8866_s0 + $0x718] ss:$108 sps:$4 sm:$0xff]  }
 0x1c5   :  { %4470 = vmatprep.mubr.bf16.mxu1 %v7029_v46 }
 0x1c6   :  { %v8525_v2 = vadd.f32 %v5925_v43, %v3733_v61  ;;  %v5856_v5 = vpop.f32.mrb[104].mxu0 }
 0x1c7   :  { %v5857_v6 = vpop.f32.mrb[105].mxu0  ;;  %v5926_v10 = vpop.f32.mrb[104].mxu1 }
 0x1c8   :  { %v5858_v32 = vadd.f32 %v5857_v6, %v5856_v5  ;;  %v5859_v63 = vpop.f32.mrb[106].mxu0  ;;  %v5927_v12 = vpop.f32.mrb[105].mxu1 }
 0x1c9   :  { %v5860_v15 = vpop.f32.mrb[107].mxu0  ;;  %v5928_v17 = vadd.f32 %v5927_v12, %v5926_v10  ;;  %v5929_v8 = vpop.f32.mrb[106].mxu1 }
 0x1ca   :  { %v3738_v28 = vadd.f32 %v5858_v32, %v8303_v22  ;;  %v5861_v25 = vadd.f32 %v5860_v15, %v5859_v63  ;;  %v5930_v0 = vpop.f32.mrb[107].mxu1  ;;  %v7033_v22 = vld [vmem:[%s8866_s0 + $0x60] ss:$108 sps:$4 sm:$0xff]  }
 0x1cb   :  { %v5931_v13 = vadd.f32 %v5930_v0, %v5929_v8  ;;  %4366 = vmatmul.mubr.bf16.gmra.mrb[212].mxu0 %v7027_v56  ;;  %v7045_v0 = vld [vmem:[%s8866_s0 + $0x2ec] ss:$108 sps:$4 sm:$0xff]  }
 0x1cc   :  { %v3741_v9 = vadd.f32 %v5861_v25, %v8305_v19  ;;  %v8538_v27 = vadd.f32 %v5928_v17, %v3738_v28  ;;  %4471 = vmatmul.mubr.bf16.gmra.mrb[212].mxu1 %v7031_v59  ;;  %4511 = vmatprep.mubr.bf16.mxu0 %v7035_v18 }
 0x1cd   :  { %6455 = vmatprep.mubr.msk.bf16.mxu1 %vm7070_vm0, %v7069_v55 }
 0x1ce   :  { %v8542_v29 = vadd.f32 %v5931_v13, %v3741_v9  ;;  %v5948_v16 = vpop.f32.mrb[108].mxu0 }
 0x1cf   :  { %v5949_v4 = vpop.f32.mrb[109].mxu0  ;;  %v6018_v30 = vpop.f32.mrb[108].mxu1 }
 0x1d0   :  { %v5950_v34 = vadd.f32 %v5949_v4, %v5948_v16  ;;  %v5951_v3 = vpop.f32.mrb[110].mxu0  ;;  %v6019_v19 = vpop.f32.mrb[109].mxu1 }
 0x1d1   :  { %v5952_v37 = vpop.f32.mrb[111].mxu0  ;;  %v6020_v39 = vadd.f32 %v6019_v19, %v6018_v30  ;;  %v6021_v42 = vpop.f32.mrb[110].mxu1 }
 0x1d2   :  { %v3884_v57 = vadd.f32 %v5950_v34, %v8330_v50  ;;  %v5953_v31 = vadd.f32 %v5952_v37, %v5951_v3  ;;  %v6022_v48 = vpop.f32.mrb[111].mxu1  ;;  %v7039_v50 = vld [vmem:[%s8866_s0 + $0x138] ss:$108 sps:$4 sm:$0xff]  }
 0x1d3   :  { %v6023_v49 = vadd.f32 %v6022_v48, %v6021_v42  ;;  %4512 = vmatmul.mubr.bf16.vlgmr.msra.gmra.mrb[216].mxu0 %v7033_v22  ;;  %v7049_v48 = vld [vmem:[%s8866_s0 + $0x3c4] ss:$108 sps:$4 sm:$0xff]  }
 0x1d4   :  { %v3887_v35 = vadd.f32 %v5953_v31, %v8341_v45  ;;  %v8555_v33 = vadd.f32 %v6020_v39, %v3884_v57  ;;  %6456 = vmatmul.mubr.bf16.vlgmr.msra.gmra.mrb[216].mxu1 %v7036_v36  ;;  %4519 = vmatprep.mubr.bf16.mxu0 %v7037_v20  ;;  %v7040_v45 = vld [vmem:[%s8866_s0 + $0x140] ss:$108 sps:$4 sm:$0xff]  }
 0x1d5   :  { %6459 = vmatprep.mubr.msk.bf16.mxu1 %vm7070_vm0, %v7069_v55 }
 0x1d6   :  { %v8559_v51 = vadd.f32 %v6023_v49, %v3887_v35  ;;  %v5954_v54 = vpop.f32.mrb[112].mxu0 }
 0x1d7   :  { %v5955_v58 = vpop.f32.mrb[113].mxu0  ;;  %v6024_v47 = vpop.f32.mrb[112].mxu1 }
 0x1d8   :  { %v5956_v46 = vadd.f32 %v5955_v58, %v5954_v54  ;;  %v5957_v60 = vpop.f32.mrb[114].mxu0  ;;  %v6025_v41 = vpop.f32.mrb[113].mxu1 }
 0x1d9   :  { %v5958_v43 = vpop.f32.mrb[115].mxu0  ;;  %v6026_v61 = vadd.f32 %v6025_v41, %v6024_v47  ;;  %v6027_v5 = vpop.f32.mrb[114].mxu1 }
 0x1da   :  { %v3892_v6 = vadd.f32 %v5956_v46, %v8368_v21  ;;  %v5959_v10 = vadd.f32 %v5958_v43, %v5957_v60  ;;  %v6028_v56 = vpop.f32.mrb[115].mxu1  ;;  %v7043_v21 = vld [vmem:[%s8866_s0 + $0x210] ss:$108 sps:$4 sm:$0xff]  }
 0x1db   :  { %v6029_v32 = vadd.f32 %v6028_v56, %v6027_v5  ;;  %4520 = vmatmul.mubr.bf16.gmra.mrb[220].mxu0 %v7039_v50  ;;  %v7053_v56 = vld [vmem:[%s8866_s0 + $0x49c] ss:$108 sps:$4 sm:$0xff]  }
 0x1dc   :  { %v3895_v63 = vadd.f32 %v5959_v10, %v8373_v24  ;;  %v8572_v12 = vadd.f32 %v6026_v61, %v3892_v6  ;;  %6460 = vmatmul.mubr.bf16.gmra.mrb[220].mxu1 %v7040_v45  ;;  %4527 = vmatprep.mubr.bf16.mxu0 %v7041_v44  ;;  %v7044_v24 = vld [vmem:[%s8866_s0 + $0x218] ss:$108 sps:$4 sm:$0xff]  }
 0x1dd   :  { %6463 = vmatprep.mubr.msk.bf16.mxu1 %vm7070_vm0, %v7069_v55 }
 0x1de   :  { %v8576_v59 = vadd.f32 %v6029_v32, %v3895_v63  ;;  %v5960_v18 = vpop.f32.mrb[116].mxu0 }
 0x1df   :  { %v5961_v15 = vpop.f32.mrb[117].mxu0  ;;  %v6030_v17 = vpop.f32.mrb[116].mxu1 }
 0x1e0   :  { %v5962_v8 = vadd.f32 %v5961_v15, %v5960_v18  ;;  %v5963_v28 = vpop.f32.mrb[118].mxu0  ;;  %v6031_v25 = vpop.f32.mrb[117].mxu1 }
 0x1e1   :  { %v5964_v13 = vpop.f32.mrb[119].mxu0  ;;  %v6032_v9 = vadd.f32 %v6031_v25, %v6030_v17  ;;  %v6033_v16 = vpop.f32.mrb[118].mxu1 }
 0x1e2   :  { %v3900_v4 = vadd.f32 %v5962_v8, %v8406_v38  ;;  %v5965_v30 = vadd.f32 %v5964_v13, %v5963_v28  ;;  %v6034_v22 = vpop.f32.mrb[119].mxu1  ;;  %v7047_v38 = vld [vmem:[%s8866_s0 + $0x2e8] ss:$108 sps:$4 sm:$0xff]  }
 0x1e3   :  { %v6035_v34 = vadd.f32 %v6034_v22, %v6033_v16  ;;  %4528 = vmatmul.mubr.bf16.gmra.mrb[224].mxu0 %v7043_v21  ;;  %v7057_v22 = vld [vmem:[%s8866_s0 + $0x574] ss:$108 sps:$4 sm:$0xff]  }
 0x1e4   :  { %v3903_v3 = vadd.f32 %v5965_v30, %v8411_v53  ;;  %v8589_v19 = vadd.f32 %v6032_v9, %v3900_v4  ;;  %6464 = vmatmul.mubr.bf16.gmra.mrb[224].mxu1 %v7044_v24  ;;  %4535 = vmatprep.mubr.bf16.mxu0 %v7045_v0  ;;  %v7048_v53 = vld [vmem:[%s8866_s0 + $0x2f0] ss:$108 sps:$4 sm:$0xff]  }
 0x1e5   :  { %6467 = vmatprep.mubr.msk.bf16.mxu1 %vm7070_vm0, %v7069_v55 }
 0x1e6   :  { %v8593_v36 = vadd.f32 %v6035_v34, %v3903_v3  ;;  %v5966_v20 = vpop.f32.mrb[120].mxu0 }
 0x1e7   :  { %v5967_v37 = vpop.f32.mrb[121].mxu0  ;;  %v6036_v39 = vpop.f32.mrb[120].mxu1 }
 0x1e8   :  { %v5968_v42 = vadd.f32 %v5967_v37, %v5966_v20  ;;  %v5969_v57 = vpop.f32.mrb[122].mxu0  ;;  %v6037_v31 = vpop.f32.mrb[121].mxu1 }
 0x1e9   :  { %v5970_v49 = vpop.f32.mrb[123].mxu0  ;;  %v6038_v35 = vadd.f32 %v6037_v31, %v6036_v39  ;;  %v6039_v54 = vpop.f32.mrb[122].mxu1 }
 0x1ea   :  { %v3908_v58 = vadd.f32 %v5968_v42, %v8444_v11  ;;  %v5971_v47 = vadd.f32 %v5970_v49, %v5969_v57  ;;  %v6040_v50 = vpop.f32.mrb[123].mxu1  ;;  %v7051_v11 = vld [vmem:[%s8866_s0 + $0x3c0] ss:$108 sps:$4 sm:$0xff]  }
 0x1eb   :  { %v6041_v46 = vadd.f32 %v6040_v50, %v6039_v54  ;;  %4536 = vmatmul.mubr.bf16.gmra.mrb[228].mxu0 %v7047_v38  ;;  %v7061_v50 = vld [vmem:[%s8866_s0 + $0x64c] ss:$108 sps:$4 sm:$0xff]  }
 0x1ec   :  { %v3911_v60 = vadd.f32 %v5971_v47, %v8449_v26  ;;  %v8606_v41 = vadd.f32 %v6038_v35, %v3908_v58  ;;  %6468 = vmatmul.mubr.bf16.gmra.mrb[228].mxu1 %v7048_v53  ;;  %4543 = vmatprep.mubr.bf16.mxu0 %v7049_v48  ;;  %v7052_v26 = vld [vmem:[%s8866_s0 + $0x3c8] ss:$108 sps:$4 sm:$0xff]  }
 0x1ed   :  { %6471 = vmatprep.mubr.msk.bf16.mxu1 %vm7070_vm0, %v7069_v55 }
 0x1ee   :  { %v8610_v45 = vadd.f32 %v6041_v46, %v3911_v60  ;;  %v5972_v44 = vpop.f32.mrb[124].mxu0 }
 0x1ef   :  { %v5973_v43 = vpop.f32.mrb[125].mxu0  ;;  %v6042_v61 = vpop.f32.mrb[124].mxu1 }
 0x1f0   :  { %v5974_v5 = vadd.f32 %v5973_v43, %v5972_v44  ;;  %v5975_v6 = vpop.f32.mrb[126].mxu0  ;;  %v6043_v10 = vpop.f32.mrb[125].mxu1 }
 0x1f1   :  { %v5976_v32 = vpop.f32.mrb[127].mxu0  ;;  %v6044_v63 = vadd.f32 %v6043_v10, %v6042_v61  ;;  %v6045_v18 = vpop.f32.mrb[126].mxu1 }
 0x1f2   :  { %v3916_v15 = vadd.f32 %v5974_v5, %v8469_v52  ;;  %v5977_v17 = vadd.f32 %v5976_v32, %v5975_v6  ;;  %v6046_v21 = vpop.f32.mrb[127].mxu1  ;;  %v7055_v52 = vld [vmem:[%s8866_s0 + $0x498] ss:$108 sps:$4 sm:$0xff]  }
 0x1f3   :  { %v6047_v8 = vadd.f32 %v6046_v21, %v6045_v18  ;;  %4544 = vmatmul.mubr.bf16.gmra.mrb[232].mxu0 %v7051_v11  ;;  %v7065_v21 = vld [vmem:[%s8866_s0 + $0x724] ss:$108 sps:$4 sm:$0xff]  }
 0x1f4   :  { %v3919_v28 = vadd.f32 %v5977_v17, %v8471_v40  ;;  %v8623_v25 = vadd.f32 %v6044_v63, %v3916_v15  ;;  %6472 = vmatmul.mubr.bf16.gmra.mrb[232].mxu1 %v7052_v26  ;;  %4551 = vmatprep.mubr.bf16.mxu0 %v7053_v56  ;;  %v7056_v40 = vld [vmem:[%s8866_s0 + $0x4a0] ss:$108 sps:$4 sm:$0xff]  }
 0x1f5   :  { %6475 = vmatprep.mubr.msk.bf16.mxu1 %vm7070_vm0, %v7069_v55 }
 0x1f6   :  { %v8627_v24 = vadd.f32 %v6047_v8, %v3919_v28  ;;  %v5978_v0 = vpop.f32.mrb[128].mxu0 }
 0x1f7   :  { %v5979_v13 = vpop.f32.mrb[129].mxu0  ;;  %v6048_v9 = vpop.f32.mrb[128].mxu1 }
 0x1f8   :  { %v5980_v16 = vadd.f32 %v5979_v13, %v5978_v0  ;;  %v5981_v4 = vpop.f32.mrb[130].mxu0  ;;  %v6049_v30 = vpop.f32.mrb[129].mxu1 }
 0x1f9   :  { %v5982_v34 = vpop.f32.mrb[131].mxu0  ;;  %v6050_v3 = vadd.f32 %v6049_v30, %v6048_v9  ;;  %v6051_v20 = vpop.f32.mrb[130].mxu1 }
 0x1fa   :  { %v3924_v37 = vadd.f32 %v5980_v16, %v8487_v14  ;;  %v5983_v39 = vadd.f32 %v5982_v34, %v5981_v4  ;;  %v6052_v38 = vpop.f32.mrb[131].mxu1  ;;  %v7059_v14 = vld [vmem:[%s8866_s0 + $0x570] ss:$108 sps:$4 sm:$0xff]  }
 0x1fb   :  { %v6053_v42 = vadd.f32 %v6052_v38, %v6051_v20  ;;  %4552 = vmatmul.mubr.bf16.gmra.mrb[236].mxu0 %v7055_v52 }
 0x1fc   :  { %v3927_v57 = vadd.f32 %v5983_v39, %v8489_v1  ;;  %v8640_v31 = vadd.f32 %v6050_v3, %v3924_v37  ;;  %6476 = vmatmul.mubr.bf16.gmra.mrb[236].mxu1 %v7056_v40  ;;  %4559 = vmatprep.mubr.bf16.mxu0 %v7057_v22  ;;  %v7060_v1 = vld [vmem:[%s8866_s0 + $0x578] ss:$108 sps:$4 sm:$0xff]  }
 0x1fd   :  { %6479 = vmatprep.mubr.msk.bf16.mxu1 %vm7070_vm0, %v7069_v55 }
 0x1fe   :  { %v8644_v53 = vadd.f32 %v6053_v42, %v3927_v57  ;;  %v5984_v48 = vpop.f32.mrb[132].mxu0 }
 0x1ff   :  { %v5985_v49 = vpop.f32.mrb[133].mxu0  ;;  %v6054_v35 = vpop.f32.mrb[132].mxu1 }
 0x200   :  { %v5986_v54 = vadd.f32 %v5985_v49, %v5984_v48  ;;  %v5987_v58 = vpop.f32.mrb[134].mxu0  ;;  %v6055_v47 = vpop.f32.mrb[133].mxu1 }
 0x201   :  { %v5988_v46 = vpop.f32.mrb[135].mxu0  ;;  %v6056_v60 = vadd.f32 %v6055_v47, %v6054_v35  ;;  %v6057_v44 = vpop.f32.mrb[134].mxu1 }
 0x202   :  { %v3932_v43 = vadd.f32 %v5986_v54, %v8505_v7  ;;  %v5989_v61 = vadd.f32 %v5988_v46, %v5987_v58  ;;  %v6058_v11 = vpop.f32.mrb[135].mxu1  ;;  %v7063_v7 = vld [vmem:[%s8866_s0 + $0x648] ss:$108 sps:$4 sm:$0xff]  }
 0x203   :  { %v6059_v5 = vadd.f32 %v6058_v11, %v6057_v44  ;;  %4560 = vmatmul.mubr.bf16.gmra.mrb[240].mxu0 %v7059_v14 }
 0x204   :  { %v3935_v6 = vadd.f32 %v5989_v61, %v8507_v23  ;;  %v8657_v10 = vadd.f32 %v6056_v60, %v3932_v43  ;;  %6480 = vmatmul.mubr.bf16.gmra.mrb[240].mxu1 %v7060_v1  ;;  %4567 = vmatprep.mubr.bf16.mxu0 %v7061_v50  ;;  %v7064_v23 = vld [vmem:[%s8866_s0 + $0x650] ss:$108 sps:$4 sm:$0xff]  }
 0x205   :  { %6483 = vmatprep.mubr.msk.bf16.mxu1 %vm7070_vm0, %v7069_v55 }
 0x206   :  { %v8661_v26 = vadd.f32 %v6059_v5, %v3935_v6  ;;  %v5990_v56 = vpop.f32.mrb[136].mxu0 }
 0x207   :  { %v5991_v32 = vpop.f32.mrb[137].mxu0  ;;  %v6060_v63 = vpop.f32.mrb[136].mxu1 }
 0x208   :  { %v5992_v18 = vadd.f32 %v5991_v32, %v5990_v56  ;;  %v5993_v15 = vpop.f32.mrb[138].mxu0  ;;  %v6061_v17 = vpop.f32.mrb[137].mxu1 }
 0x209   :  { %v5994_v8 = vpop.f32.mrb[139].mxu0  ;;  %v6062_v28 = vadd.f32 %v6061_v17, %v6060_v63  ;;  %v6063_v0 = vpop.f32.mrb[138].mxu1 }
 0x20a   :  { %v3940_v13 = vadd.f32 %v5992_v18, %v8523_v62  ;;  %v5995_v9 = vadd.f32 %v5994_v8, %v5993_v15  ;;  %v6064_v52 = vpop.f32.mrb[139].mxu1  ;;  %v7067_v62 = vld [vmem:[%s8866_s0 + $0x720] ss:$108 sps:$4 sm:$0xff]  }
 0x20b   :  { %v6065_v16 = vadd.f32 %v6064_v52, %v6063_v0  ;;  %4568 = vmatmul.mubr.bf16.gmra.mrb[244].mxu0 %v7063_v7 }
 0x20c   :  { %v3943_v4 = vadd.f32 %v5995_v9, %v8525_v2  ;;  %v8674_v30 = vadd.f32 %v6062_v28, %v3940_v13  ;;  %6484 = vmatmul.mubr.bf16.gmra.mrb[244].mxu1 %v7064_v23  ;;  %4575 = vmatprep.mubr.bf16.mxu0 %v7065_v21  ;;  %v7068_v2 = vld [vmem:[%s8866_s0 + $0x728] ss:$108 sps:$4 sm:$0xff]  }
 0x20d   :  { %6487 = vmatprep.mubr.msk.bf16.mxu1 %vm7070_vm0, %v7069_v55 }
 0x20e   :  { %v8678_v40 = vadd.f32 %v6065_v16, %v3943_v4  ;;  %v5996_v22 = vpop.f32.mrb[140].mxu0 }
 0x20f   :  { %v5997_v34 = vpop.f32.mrb[141].mxu0  ;;  %v6066_v3 = vpop.f32.mrb[140].mxu1 }
 0x210   :  { %v5998_v20 = vadd.f32 %v5997_v34, %v5996_v22  ;;  %v5999_v37 = vpop.f32.mrb[142].mxu0  ;;  %v6067_v39 = vpop.f32.mrb[141].mxu1 }
 0x211   :  { %v6000_v38 = vpop.f32.mrb[143].mxu0  ;;  %v6068_v42 = vadd.f32 %v6067_v39, %v6066_v3  ;;  %v6069_v57 = vpop.f32.mrb[142].mxu1 }
 0x212   :  { %v3948_v55 = vadd.f32 %v5998_v20, %v8538_v27  ;;  %v6001_v48 = vadd.f32 %v6000_v38, %v5999_v37  ;;  %v6070_v49 = vpop.f32.mrb[143].mxu1 }
 0x213   :  { %v6071_v35 = vadd.f32 %v6070_v49, %v6069_v57  ;;  %4576 = vmatmul.mubr.bf16.gmra.mrb[248].mxu0 %v7067_v62 }
 0x214   :  { %v3951_v14 = vadd.f32 %v6001_v48, %v8542_v29  ;;  %v8688_v54 = vadd.f32 %v6068_v42, %v3948_v55  ;;  %6488 = vmatmul.mubr.bf16.gmra.mrb[248].mxu1 %v7068_v2 }
 0x216   :  { %v8690_v58 = vadd.f32 %v6071_v35, %v3951_v14  ;;  %v6088_v47 = vpop.f32.mrb[144].mxu0 }
 0x217   :  { %v6089_v1 = vpop.f32.mrb[145].mxu0  ;;  %v6158_v50 = vpop.f32.mrb[144].mxu1 }
 0x218   :  { %v6090_v46 = vadd.f32 %v6089_v1, %v6088_v47  ;;  %v6091_v60 = vpop.f32.mrb[146].mxu0  ;;  %v6159_v44 = vpop.f32.mrb[145].mxu1 }
 0x219   :  { %v6092_v43 = vpop.f32.mrb[147].mxu0  ;;  %v6160_v61 = vadd.f32 %v6159_v44, %v6158_v50  ;;  %v6161_v27 = vpop.f32.mrb[146].mxu1 }
 0x21a   :  { %v4094_v11 = vadd.f32 %v6090_v46, %v8555_v33  ;;  %v6093_v5 = vadd.f32 %v6092_v43, %v6091_v60  ;;  %v6162_v6 = vpop.f32.mrb[147].mxu1 }
 0x21b   :  { %v6163_v56 = vadd.f32 %v6162_v6, %v6161_v27 }
 0x21c   :  { %v4097_v29 = vadd.f32 %v6093_v5, %v8559_v51  ;;  %v8694_v32 = vadd.f32 %v6160_v61, %v4094_v11 }
 0x21e   :  { %v8696_v63 = vadd.f32 %v6163_v56, %v4097_v29  ;;  %v6094_v7 = vpop.f32.mrb[148].mxu0 }
 0x21f   :  { %v6095_v18 = vpop.f32.mrb[149].mxu0  ;;  %v6164_v15 = vpop.f32.mrb[148].mxu1 }
 0x220   :  { %v6096_v17 = vadd.f32 %v6095_v18, %v6094_v7  ;;  %v6097_v23 = vpop.f32.mrb[150].mxu0  ;;  %v6165_v21 = vpop.f32.mrb[149].mxu1 }
 0x221   :  { %v6098_v8 = vpop.f32.mrb[151].mxu0  ;;  %v6166_v28 = vadd.f32 %v6165_v21, %v6164_v15  ;;  %v6167_v0 = vpop.f32.mrb[150].mxu1 }
 0x222   :  { %v4102_v33 = vadd.f32 %v6096_v17, %v8572_v12  ;;  %v6099_v13 = vadd.f32 %v6098_v8, %v6097_v23  ;;  %v6168_v9 = vpop.f32.mrb[151].mxu1 }
 0x223   :  { %v6169_v52 = vadd.f32 %v6168_v9, %v6167_v0 }
 0x224   :  { %v4105_v51 = vadd.f32 %v6099_v13, %v8576_v59  ;;  %v8700_v16 = vadd.f32 %v6166_v28, %v4102_v33 }
 0x226   :  { %v8702_v4 = vadd.f32 %v6169_v52, %v4105_v51  ;;  %v6100_v22 = vpop.f32.mrb[152].mxu0 }
 0x227   :  { %v6101_v34 = vpop.f32.mrb[153].mxu0  ;;  %v6170_v3 = vpop.f32.mrb[152].mxu1 }
 0x228   :  { %v6102_v62 = vadd.f32 %v6101_v34, %v6100_v22  ;;  %v6103_v20 = vpop.f32.mrb[154].mxu0  ;;  %v6171_v37 = vpop.f32.mrb[153].mxu1 }
 0x229   :  { %v6104_v39 = vpop.f32.mrb[155].mxu0  ;;  %v6172_v2 = vadd.f32 %v6171_v37, %v6170_v3  ;;  %v6173_v38 = vpop.f32.mrb[154].mxu1 }
 0x22a   :  { %v4110_v12 = vadd.f32 %v6102_v62, %v8589_v19  ;;  %v6105_v42 = vadd.f32 %v6104_v39, %v6103_v20  ;;  %v6174_v57 = vpop.f32.mrb[155].mxu1 }
 0x22b   :  { %v6175_v55 = vadd.f32 %v6174_v57, %v6173_v38 }
 0x22c   :  { %v4113_v59 = vadd.f32 %v6105_v42, %v8593_v36  ;;  %v8706_v48 = vadd.f32 %v6172_v2, %v4110_v12 }
 0x22e   :  { %v8708_v49 = vadd.f32 %v6175_v55, %v4113_v59  ;;  %v6106_v35 = vpop.f32.mrb[156].mxu0 }
 0x22f   :  { %v6107_v14 = vpop.f32.mrb[157].mxu0  ;;  %v6176_v47 = vpop.f32.mrb[156].mxu1 }
 0x230   :  { %v6108_v1 = vadd.f32 %v6107_v14, %v6106_v35  ;;  %v6109_v50 = vpop.f32.mrb[158].mxu0  ;;  %v6177_v46 = vpop.f32.mrb[157].mxu1 }
 0x231   :  { %v6110_v60 = vpop.f32.mrb[159].mxu0  ;;  %v6178_v44 = vadd.f32 %v6177_v46, %v6176_v47  ;;  %v6179_v43 = vpop.f32.mrb[158].mxu1 }
 0x232   :  { %v4118_v19 = vadd.f32 %v6108_v1, %v8606_v41  ;;  %v6111_v61 = vadd.f32 %v6110_v60, %v6109_v50  ;;  %v6180_v27 = vpop.f32.mrb[159].mxu1 }
 0x233   :  { %v6181_v11 = vadd.f32 %v6180_v27, %v6179_v43 }
 0x234   :  { %v4121_v36 = vadd.f32 %v6111_v61, %v8610_v45  ;;  %v8712_v5 = vadd.f32 %v6178_v44, %v4118_v19 }
 0x236   :  { %v8714_v6 = vadd.f32 %v6181_v11, %v4121_v36  ;;  %v6112_v56 = vpop.f32.mrb[160].mxu0 }
 0x237   :  { %v6113_v29 = vpop.f32.mrb[161].mxu0  ;;  %v6182_v7 = vpop.f32.mrb[160].mxu1 }
 0x238   :  { %v6114_v18 = vadd.f32 %v6113_v29, %v6112_v56  ;;  %v6115_v15 = vpop.f32.mrb[162].mxu0  ;;  %v6183_v17 = vpop.f32.mrb[161].mxu1 }
 0x239   :  { %v6116_v23 = vpop.f32.mrb[163].mxu0  ;;  %v6184_v21 = vadd.f32 %v6183_v17, %v6182_v7  ;;  %v6185_v8 = vpop.f32.mrb[162].mxu1 }
 0x23a   :  { %v4126_v41 = vadd.f32 %v6114_v18, %v8623_v25  ;;  %v6117_v28 = vadd.f32 %v6116_v23, %v6115_v15  ;;  %v6186_v0 = vpop.f32.mrb[163].mxu1 }
 0x23b   :  { %v6187_v33 = vadd.f32 %v6186_v0, %v6185_v8 }
 0x23c   :  { %v4129_v45 = vadd.f32 %v6117_v28, %v8627_v24  ;;  %v8718_v13 = vadd.f32 %v6184_v21, %v4126_v41 }
 0x23e   :  { %v8720_v9 = vadd.f32 %v6187_v33, %v4129_v45  ;;  %v6118_v52 = vpop.f32.mrb[164].mxu0 }
 0x23f   :  { %v6119_v51 = vpop.f32.mrb[165].mxu0  ;;  %v6188_v22 = vpop.f32.mrb[164].mxu1 }
 0x240   :  { %v6120_v34 = vadd.f32 %v6119_v51, %v6118_v52  ;;  %v6121_v3 = vpop.f32.mrb[166].mxu0  ;;  %v6189_v62 = vpop.f32.mrb[165].mxu1 }
 0x241   :  { %v6122_v20 = vpop.f32.mrb[167].mxu0  ;;  %v6190_v37 = vadd.f32 %v6189_v62, %v6188_v22  ;;  %v6191_v39 = vpop.f32.mrb[166].mxu1 }
 0x242   :  { %v4134_v25 = vadd.f32 %v6120_v34, %v8640_v31  ;;  %v6123_v2 = vadd.f32 %v6122_v20, %v6121_v3  ;;  %v6192_v38 = vpop.f32.mrb[167].mxu1 }
 0x243   :  { %v6193_v12 = vadd.f32 %v6192_v38, %v6191_v39 }
 0x244   :  { %v4137_v24 = vadd.f32 %v6123_v2, %v8644_v53  ;;  %v8724_v42 = vadd.f32 %v6190_v37, %v4134_v25 }
 0x246   :  { %v8726_v57 = vadd.f32 %v6193_v12, %v4137_v24  ;;  %v6124_v55 = vpop.f32.mrb[168].mxu0 }
 0x247   :  { %v6125_v59 = vpop.f32.mrb[169].mxu0  ;;  %v6194_v35 = vpop.f32.mrb[168].mxu1 }
 0x248   :  { %v6126_v14 = vadd.f32 %v6125_v59, %v6124_v55  ;;  %v6127_v47 = vpop.f32.mrb[170].mxu0  ;;  %v6195_v1 = vpop.f32.mrb[169].mxu1 }
 0x249   :  { %v6128_v50 = vpop.f32.mrb[171].mxu0  ;;  %v6196_v46 = vadd.f32 %v6195_v1, %v6194_v35  ;;  %v6197_v60 = vpop.f32.mrb[170].mxu1 }
 0x24a   :  { %v4142_v31 = vadd.f32 %v6126_v14, %v8657_v10  ;;  %v6129_v44 = vadd.f32 %v6128_v50, %v6127_v47  ;;  %v6198_v43 = vpop.f32.mrb[171].mxu1 }
 0x24b   :  { %v6199_v19 = vadd.f32 %v6198_v43, %v6197_v60 }
 0x24c   :  { %v4145_v53 = vadd.f32 %v6129_v44, %v8661_v26  ;;  %v8730_v61 = vadd.f32 %v6196_v46, %v4142_v31 }
 0x24e   :  { %v8732_v27 = vadd.f32 %v6199_v19, %v4145_v53  ;;  %v6130_v11 = vpop.f32.mrb[172].mxu0 }
 0x24f   :  { %v6131_v36 = vpop.f32.mrb[173].mxu0  ;;  %v6200_v56 = vpop.f32.mrb[172].mxu1 }
 0x250   :  { %v6132_v29 = vadd.f32 %v6131_v36, %v6130_v11  ;;  %v6133_v7 = vpop.f32.mrb[174].mxu0  ;;  %v6201_v18 = vpop.f32.mrb[173].mxu1 }
 0x251   :  { %v6134_v15 = vpop.f32.mrb[175].mxu0  ;;  %v6202_v17 = vadd.f32 %v6201_v18, %v6200_v56  ;;  %v6203_v23 = vpop.f32.mrb[174].mxu1 }
 0x252   :  { %v4150_v10 = vadd.f32 %v6132_v29, %v8674_v30  ;;  %v6135_v21 = vadd.f32 %v6134_v15, %v6133_v7  ;;  %v6204_v8 = vpop.f32.mrb[175].mxu1 }
 0x253   :  { %v6205_v41 = vadd.f32 %v6204_v8, %v6203_v23 }
 0x254   :  { %v4153_v26 = vadd.f32 %v6135_v21, %v8678_v40  ;;  %v8736_v28 = vadd.f32 %v6202_v17, %v4150_v10 }
 0x256   :  { %v8738_v0 = vadd.f32 %v6205_v41, %v4153_v26  ;;  %v6136_v33 = vpop.f32.mrb[176].mxu0 }
 0x257   :  { %v6137_v45 = vpop.f32.mrb[177].mxu0  ;;  %v6206_v52 = vpop.f32.mrb[176].mxu1 }
 0x258   :  { %v6138_v51 = vadd.f32 %v6137_v45, %v6136_v33  ;;  %v6139_v22 = vpop.f32.mrb[178].mxu0  ;;  %v6207_v34 = vpop.f32.mrb[177].mxu1 }
 0x259   :  { %v6140_v3 = vpop.f32.mrb[179].mxu0  ;;  %v6208_v62 = vadd.f32 %v6207_v34, %v6206_v52  ;;  %v6209_v20 = vpop.f32.mrb[178].mxu1 }
 0x25a   :  { %v4158_v30 = vadd.f32 %v6138_v51, %v8688_v54  ;;  %v6141_v37 = vadd.f32 %v6140_v3, %v6139_v22  ;;  %v6210_v39 = vpop.f32.mrb[179].mxu1 }
 0x25b   :  { %v6211_v25 = vadd.f32 %v6210_v39, %v6209_v20 }
 0x25c   :  { %v4161_v40 = vadd.f32 %v6141_v37, %v8690_v58  ;;  %v8742_v2 = vadd.f32 %v6208_v62, %v4158_v30 }
 0x25e   :  { %v8744_v38 = vadd.f32 %v6211_v25, %v4161_v40  ;;  %v6228_v12 = vpop.f32.mrb[180].mxu0 }
 0x25f   :  { %v6229_v24 = vpop.f32.mrb[181].mxu0  ;;  %v6298_v55 = vpop.f32.mrb[180].mxu1 }
 0x260   :  { %v6230_v59 = vadd.f32 %v6229_v24, %v6228_v12  ;;  %v6231_v35 = vpop.f32.mrb[182].mxu0  ;;  %v6299_v14 = vpop.f32.mrb[181].mxu1 }
 0x261   :  { %v6232_v47 = vpop.f32.mrb[183].mxu0  ;;  %v6300_v1 = vadd.f32 %v6299_v14, %v6298_v55  ;;  %v6301_v50 = vpop.f32.mrb[182].mxu1 }
 0x262   :  { %v4304_v54 = vadd.f32 %v6230_v59, %v8694_v32  ;;  %v6233_v46 = vadd.f32 %v6232_v47, %v6231_v35  ;;  %v6302_v60 = vpop.f32.mrb[183].mxu1 }
 0x263   :  { %v6303_v31 = vadd.f32 %v6302_v60, %v6301_v50 }
 0x264   :  { %v4307_v58 = vadd.f32 %v6233_v46, %v8696_v63  ;;  %v8748_v44 = vadd.f32 %v6300_v1, %v4304_v54 }
 0x266   :  { %v8750_v43 = vadd.f32 %v6303_v31, %v4307_v58  ;;  %v6234_v19 = vpop.f32.mrb[184].mxu0 }
 0x267   :  { %v6235_v53 = vpop.f32.mrb[185].mxu0  ;;  %v6304_v11 = vpop.f32.mrb[184].mxu1 }
 0x268   :  { %v6236_v36 = vadd.f32 %v6235_v53, %v6234_v19  ;;  %v6237_v56 = vpop.f32.mrb[186].mxu0  ;;  %v6305_v29 = vpop.f32.mrb[185].mxu1 }
 0x269   :  { %v6238_v7 = vpop.f32.mrb[187].mxu0  ;;  %v6306_v18 = vadd.f32 %v6305_v29, %v6304_v11  ;;  %v6307_v15 = vpop.f32.mrb[186].mxu1 }
 0x26a   :  { %v4312_v32 = vadd.f32 %v6236_v36, %v8700_v16  ;;  %v6239_v17 = vadd.f32 %v6238_v7, %v6237_v56  ;;  %v6308_v23 = vpop.f32.mrb[187].mxu1 }
 0x26b   :  { %v6309_v10 = vadd.f32 %v6308_v23, %v6307_v15 }
 0x26c   :  { %v4315_v63 = vadd.f32 %v6239_v17, %v8702_v4  ;;  %v8754_v21 = vadd.f32 %v6306_v18, %v4312_v32 }
 0x26e   :  { %v8756_v8 = vadd.f32 %v6309_v10, %v4315_v63  ;;  %v6240_v41 = vpop.f32.mrb[188].mxu0 }
 0x26f   :  { %v6241_v26 = vpop.f32.mrb[189].mxu0  ;;  %v6310_v33 = vpop.f32.mrb[188].mxu1 }
 0x270   :  { %v6242_v45 = vadd.f32 %v6241_v26, %v6240_v41  ;;  %v6243_v52 = vpop.f32.mrb[190].mxu0  ;;  %v6311_v51 = vpop.f32.mrb[189].mxu1 }
 0x271   :  { %v6244_v22 = vpop.f32.mrb[191].mxu0  ;;  %v6312_v34 = vadd.f32 %v6311_v51, %v6310_v33  ;;  %v6313_v3 = vpop.f32.mrb[190].mxu1 }
 0x272   :  { %v4320_v16 = vadd.f32 %v6242_v45, %v8706_v48  ;;  %v6245_v62 = vadd.f32 %v6244_v22, %v6243_v52  ;;  %v6314_v20 = vpop.f32.mrb[191].mxu1 }
 0x273   :  { %v6315_v30 = vadd.f32 %v6314_v20, %v6313_v3 }
 0x274   :  { %v4323_v4 = vadd.f32 %v6245_v62, %v8708_v49  ;;  %v8760_v37 = vadd.f32 %v6312_v34, %v4320_v16 }
 0x276   :  { %v8762_v39 = vadd.f32 %v6315_v30, %v4323_v4  ;;  %v6246_v25 = vpop.f32.mrb[192].mxu0 }
 0x277   :  { %v6247_v40 = vpop.f32.mrb[193].mxu0  ;;  %v6316_v12 = vpop.f32.mrb[192].mxu1 }
 0x278   :  { %v6248_v24 = vadd.f32 %v6247_v40, %v6246_v25  ;;  %v6249_v55 = vpop.f32.mrb[194].mxu0  ;;  %v6317_v59 = vpop.f32.mrb[193].mxu1 }
 0x279   :  { %v6250_v35 = vpop.f32.mrb[195].mxu0  ;;  %v6318_v14 = vadd.f32 %v6317_v59, %v6316_v12  ;;  %v6319_v47 = vpop.f32.mrb[194].mxu1 }
 0x27a   :  { %v4328_v48 = vadd.f32 %v6248_v24, %v8712_v5  ;;  %v6251_v1 = vadd.f32 %v6250_v35, %v6249_v55  ;;  %v6320_v50 = vpop.f32.mrb[195].mxu1 }
 0x27b   :  { %v6321_v54 = vadd.f32 %v6320_v50, %v6319_v47 }
 0x27c   :  { %v4331_v49 = vadd.f32 %v6251_v1, %v8714_v6  ;;  %v8766_v46 = vadd.f32 %v6318_v14, %v4328_v48 }
 0x27e   :  { %v8768_v60 = vadd.f32 %v6321_v54, %v4331_v49  ;;  %v6252_v31 = vpop.f32.mrb[196].mxu0 }
 0x27f   :  { %v6253_v58 = vpop.f32.mrb[197].mxu0  ;;  %v6322_v19 = vpop.f32.mrb[196].mxu1 }
 0x280   :  { %v6254_v53 = vadd.f32 %v6253_v58, %v6252_v31  ;;  %v6255_v11 = vpop.f32.mrb[198].mxu0  ;;  %v6323_v36 = vpop.f32.mrb[197].mxu1 }
 0x281   :  { %v6256_v56 = vpop.f32.mrb[199].mxu0  ;;  %v6324_v29 = vadd.f32 %v6323_v36, %v6322_v19  ;;  %v6325_v7 = vpop.f32.mrb[198].mxu1 }
 0x282   :  { %v4336_v5 = vadd.f32 %v6254_v53, %v8718_v13  ;;  %v6257_v18 = vadd.f32 %v6256_v56, %v6255_v11  ;;  %v6326_v15 = vpop.f32.mrb[199].mxu1 }
 0x283   :  { %v6327_v32 = vadd.f32 %v6326_v15, %v6325_v7 }
 0x284   :  { %v4339_v6 = vadd.f32 %v6257_v18, %v8720_v9  ;;  %v8772_v17 = vadd.f32 %v6324_v29, %v4336_v5 }
 0x286   :  { %v8774_v23 = vadd.f32 %v6327_v32, %v4339_v6  ;;  %v6258_v10 = vpop.f32.mrb[200].mxu0 }
 0x287   :  { %v6259_v63 = vpop.f32.mrb[201].mxu0  ;;  %v6328_v41 = vpop.f32.mrb[200].mxu1 }
 0x288   :  { %v6260_v26 = vadd.f32 %v6259_v63, %v6258_v10  ;;  %v6261_v33 = vpop.f32.mrb[202].mxu0  ;;  %v6329_v45 = vpop.f32.mrb[201].mxu1 }
 0x289   :  { %v6262_v52 = vpop.f32.mrb[203].mxu0  ;;  %v6330_v51 = vadd.f32 %v6329_v45, %v6328_v41  ;;  %v6331_v22 = vpop.f32.mrb[202].mxu1 }
 0x28a   :  { %v4344_v13 = vadd.f32 %v6260_v26, %v8724_v42  ;;  %v6263_v34 = vadd.f32 %v6262_v52, %v6261_v33  ;;  %v6332_v3 = vpop.f32.mrb[203].mxu1 }
 0x28b   :  { %v6333_v16 = vadd.f32 %v6332_v3, %v6331_v22 }
 0x28c   :  { %v4347_v9 = vadd.f32 %v6263_v34, %v8726_v57  ;;  %v8778_v62 = vadd.f32 %v6330_v51, %v4344_v13 }
 0x28e   :  { %v8780_v20 = vadd.f32 %v6333_v16, %v4347_v9  ;;  %v6264_v30 = vpop.f32.mrb[204].mxu0 }
 0x28f   :  { %v6265_v4 = vpop.f32.mrb[205].mxu0  ;;  %v6334_v25 = vpop.f32.mrb[204].mxu1 }
 0x290   :  { %v6266_v40 = vadd.f32 %v6265_v4, %v6264_v30  ;;  %v6267_v12 = vpop.f32.mrb[206].mxu0  ;;  %v6335_v24 = vpop.f32.mrb[205].mxu1 }
 0x291   :  { %v6268_v55 = vpop.f32.mrb[207].mxu0  ;;  %v6336_v59 = vadd.f32 %v6335_v24, %v6334_v25  ;;  %v6337_v35 = vpop.f32.mrb[206].mxu1 }
 0x292   :  { %v4352_v42 = vadd.f32 %v6266_v40, %v8730_v61  ;;  %v6269_v14 = vadd.f32 %v6268_v55, %v6267_v12  ;;  %v6338_v47 = vpop.f32.mrb[207].mxu1 }
 0x293   :  { %v6339_v48 = vadd.f32 %v6338_v47, %v6337_v35 }
 0x294   :  { %v4355_v57 = vadd.f32 %v6269_v14, %v8732_v27  ;;  %v8784_v1 = vadd.f32 %v6336_v59, %v4352_v42 }
 0x296   :  { %v8786_v50 = vadd.f32 %v6339_v48, %v4355_v57  ;;  %v6270_v54 = vpop.f32.mrb[208].mxu0 }
 0x297   :  { %v6271_v49 = vpop.f32.mrb[209].mxu0  ;;  %v6340_v31 = vpop.f32.mrb[208].mxu1 }
 0x298   :  { %v6272_v58 = vadd.f32 %v6271_v49, %v6270_v54  ;;  %v6273_v19 = vpop.f32.mrb[210].mxu0  ;;  %v6341_v53 = vpop.f32.mrb[209].mxu1 }
 0x299   :  { %v6274_v11 = vpop.f32.mrb[211].mxu0  ;;  %v6342_v36 = vadd.f32 %v6341_v53, %v6340_v31  ;;  %v6343_v56 = vpop.f32.mrb[210].mxu1 }
 0x29a   :  { %v4360_v61 = vadd.f32 %v6272_v58, %v8736_v28  ;;  %v6275_v29 = vadd.f32 %v6274_v11, %v6273_v19  ;;  %v6344_v7 = vpop.f32.mrb[211].mxu1 }
 0x29b   :  { %v6345_v5 = vadd.f32 %v6344_v7, %v6343_v56 }
 0x29c   :  { %v4363_v27 = vadd.f32 %v6275_v29, %v8738_v0  ;;  %v8790_v18 = vadd.f32 %v6342_v36, %v4360_v61 }
 0x29e   :  { %v8792_v15 = vadd.f32 %v6345_v5, %v4363_v27  ;;  %v6276_v32 = vpop.f32.mrb[212].mxu0 }
 0x29f   :  { %v6277_v6 = vpop.f32.mrb[213].mxu0  ;;  %v6346_v10 = vpop.f32.mrb[212].mxu1 }
 0x2a0   :  { %v6278_v63 = vadd.f32 %v6277_v6, %v6276_v32  ;;  %v6279_v41 = vpop.f32.mrb[214].mxu0  ;;  %v6347_v26 = vpop.f32.mrb[213].mxu1 }
 0x2a1   :  { %v6280_v33 = vpop.f32.mrb[215].mxu0  ;;  %v6348_v45 = vadd.f32 %v6347_v26, %v6346_v10  ;;  %v6349_v52 = vpop.f32.mrb[214].mxu1  ;;  %v8807_v26 = vld [vmem:[%s8867_s2] ss:$0 sm:$0xff] }
 0x2a2   :  { %v4368_v28 = vadd.f32 %v6278_v63, %v8742_v2  ;;  %v6281_v51 = vadd.f32 %v6280_v33, %v6279_v41  ;;  %v6350_v22 = vpop.f32.mrb[215].mxu1 }
 0x2a3   :  { %v6351_v13 = vadd.f32 %v6350_v22, %v6349_v52 }
 0x2a4   :  { %v4371_v0 = vadd.f32 %v6281_v51, %v8744_v38  ;;  %v8796_v34 = vadd.f32 %v6348_v45, %v4368_v28 }
 0x2a6   :  { %v8798_v3 = vadd.f32 %v6351_v13, %v4371_v0  ;;  %v6368_v16 = vpop.f32.mrb[216].mxu0 }
 0x2a7   :  { %v6369_v9 = vpop.f32.mrb[217].mxu0  ;;  %v4618_v30 = vpop.f32.mrb[216].mxu1 }
 0x2a8   :  { %v6370_v4 = vadd.f32 %v6369_v9, %v6368_v16  ;;  %v6371_v25 = vpop.f32.mrb[218].mxu0  ;;  %v6457_v40 = vpop.f32.mrb[217].mxu1 }
 0x2a9   :  { %v6372_v12 = vpop.f32.mrb[219].mxu0  ;;  %v4621_v24 = vpop.f32.mrb[218].mxu1 }
 0x2aa   :  { %v6373_v55 = vadd.f32 %v6372_v12, %v6371_v25  ;;  %v4514_v2 = vadd.f32 %v6370_v4, %v8748_v44  ;;  %v6458_v59 = vpop.f32.mrb[219].mxu1 }
 0x2ac   :  { %v4619_v35 = vadd.f32 %v4618_v30, %v4514_v2  ;;  %v4517_v42 = vadd.f32 %v6373_v55, %v8750_v43 }
 0x2ae   :  { %v4689_v38 = vrot.slane %v4619_v35, 4  ;;  %v4622_v14 = vadd.f32 %v4621_v24, %v4517_v42  ;;  %v6374_v47 = vpop.f32.mrb[220].mxu0 }
 0x2af   :  { %v6375_v48 = vpop.f32.mrb[221].mxu0  ;;  %v4626_v57 = vpop.f32.mrb[220].mxu1 }
 0x2b0   :  { %v4690_v54 = vmax.f32 %v4619_v35, %v4689_v38  ;;  %v4695_v49 = vrot.slane %v4622_v14, 4  ;;  %v6376_v31 = vadd.f32 %v6375_v48, %v6374_v47  ;;  %v6377_v58 = vpop.f32.mrb[222].mxu0  ;;  %v6461_v19 = vpop.f32.mrb[221].mxu1 }
 0x2b1   :  { %v6378_v53 = vpop.f32.mrb[223].mxu0  ;;  %v4629_v11 = vpop.f32.mrb[222].mxu1 }
 0x2b2   :  { %v4691_v36 = vrot.slane %v4690_v54, 2  ;;  %v4696_v56 = vmax.f32 %v4622_v14, %v4695_v49  ;;  %v6379_v61 = vadd.f32 %v6378_v53, %v6377_v58  ;;  %v4522_v44 = vadd.f32 %v6376_v31, %v8754_v21  ;;  %v6462_v29 = vpop.f32.mrb[223].mxu1 }
 0x2b4   :  { %v4692_v7 = vmax.f32 %v4690_v54, %v4691_v36  ;;  %v4697_v43 = vrot.slane %v4696_v56, 2  ;;  %v4627_v5 = vadd.f32 %v4626_v57, %v4522_v44  ;;  %v4525_v27 = vadd.f32 %v6379_v61, %v8756_v8 }
 0x2b6   :  { %v4693_v32 = vrot.slane %v4692_v7, 1  ;;  %v4698_v6 = vmax.f32 %v4696_v56, %v4697_v43  ;;  %v4701_v10 = vrot.slane %v4627_v5, 4  ;;  %v4630_v63 = vadd.f32 %v4629_v11, %v4525_v27  ;;  %v6380_v41 = vpop.f32.mrb[224].mxu0 }
 0x2b7   :  { %v6381_v33 = vpop.f32.mrb[225].mxu0  ;;  %v4634_v45 = vpop.f32.mrb[224].mxu1 }
 0x2b8   :  { %v4694_v52 = vmax.f32 %v4692_v7, %v4693_v32  ;;  %v4699_v21 = vrot.slane %v4698_v6, 1  ;;  %v4702_v28 = vmax.f32 %v4627_v5, %v4701_v10  ;;  %v4707_v51 = vrot.slane %v4630_v63, 4  ;;  %v6383_v22 = vpop.f32.mrb[226].mxu0  ;;  %v6465_v13 = vpop.f32.mrb[225].mxu1 }
 0x2b9   :  { %v6382_v0 = vadd.f32 %v6381_v33, %v6380_v41  ;;  %v6384_v8 = vpop.f32.mrb[227].mxu0  ;;  %v4637_v16 = vpop.f32.mrb[226].mxu1 }
 0x2ba   :  { %v4804_v9 = vadd.f32 %v8807_v26, %v4694_v52  ;;  %v4700_v30 = vmax.f32 %v4698_v6, %v4699_v21  ;;  %v4703_v4 = vrot.slane %v4702_v28, 2  ;;  %v4708_v25 = vmax.f32 %v4630_v63, %v4707_v51  ;;  %v6466_v40 = vpop.f32.mrb[227].mxu1 }
 0x2bb   :  { %v6385_v12 = vadd.f32 %v6384_v8, %v6383_v22  ;;  %v4530_v24 = vadd.f32 %v6382_v0, %v8760_v37 }
 0x2bc   :  { %vm4822_vm1 = vcmp.ge.f32.partialorder %v4804_v9, 0.0  ;;  %v4840_v55 = vmul.f32 0.01, %v4804_v9  ;;  %v4805_v2 = vadd.f32 %v8807_v26, %v4700_v30  ;;  %v4704_v59 = vmax.f32 %v4702_v28, %v4703_v4 }
 0x2bd   :  { %v4709_v35 = vrot.slane %v4708_v25, 2  ;;  %v4635_v42 = vadd.f32 %v4634_v45, %v4530_v24  ;;  %v4533_v38 = vadd.f32 %v6385_v12, %v8762_v39 }
 0x2be   :  { %v4858_v14 = vsel %vm4822_vm1, %v4804_v9, %v4840_v55  ;;  %vm4823_vm2 = vcmp.ge.f32.partialorder %v4805_v2, 0.0  ;;  %v4841_v47 = vmul.f32 0.01, %v4805_v2  ;;  %v4705_v48 = vrot.slane %v4704_v59, 1  ;;  %v6386_v57 = vpop.f32.mrb[228].mxu0 }
 0x2bf   :  { %v5494_v54 = vpack.c.bf16 %v4858_v14, %v4858_v14  ;;  %v4710_v49 = vmax.f32 %v4708_v25, %v4709_v35  ;;  %v4713_v31 = vrot.slane %v4635_v42, 4  ;;  %v4638_v58 = vadd.f32 %v4637_v16, %v4533_v38  ;;  %v6387_v19 = vpop.f32.mrb[229].mxu0  ;;  %v4642_v37 = vpop.f32.mrb[228].mxu1 }
 0x2c0   :  { %v4859_v53 = vsel %vm4823_vm2, %v4805_v2, %v4841_v47  ;;  %v4706_v11 = vmax.f32 %v4704_v59, %v4705_v48  ;;  %v6388_v36 = vadd.f32 %v6387_v19, %v6386_v57  ;;  %v6389_v56 = vpop.f32.mrb[230].mxu0  ;;  %v6469_v61 = vpop.f32.mrb[229].mxu1 }
 0x2c1   :  { %v5495_v44 = vpack.c.bf16 %v4859_v53, %v4859_v53  ;;  %v4711_v29 = vrot.slane %v4710_v49, 1  ;;  %v4714_v39 = vmax.f32 %v4635_v42, %v4713_v31  ;;  %v6390_v7 = vpop.f32.mrb[231].mxu0  ;;  %v4645_v43 = vpop.f32.mrb[230].mxu1  ;;  %v4719_v27 = vrot.slane %v4638_v58, 4 }
 0x2c2   :  { %v4806_v5 = vadd.f32 %v8807_v26, %v4706_v11  ;;  %v6391_v32 = vadd.f32 %v6390_v7, %v6389_v56  ;;  %v4538_v6 = vadd.f32 %v6388_v36, %v8766_v46  ;;  %v6470_v10 = vpop.f32.mrb[231].mxu1  ;;  %v4948_v63 = vunpack.c.l.b16 %v5494_v54 }
 0x2c3   :  { %v4949_v41 = vunpack.c.l.b16 %v5495_v44  ;;  %v4712_v33 = vmax.f32 %v4710_v49, %v4711_v29  ;;  %v4715_v45 = vrot.slane %v4714_v39, 2  ;;  %v4720_v21 = vmax.f32 %v4638_v58, %v4719_v27 }
 0x2c4   :  { %vm4824_vm4 = vcmp.ge.f32.partialorder %v4806_v5, 0.0  ;;  %v4842_v52 = vmul.f32 0.01, %v4806_v5  ;;  %v4643_v28 = vadd.f32 %v4642_v37, %v4538_v6  ;;  %v4541_v0 = vadd.f32 %v6391_v32, %v8768_v60 }
 0x2c5   :  { %v4966_v51 = vrot.slane %v4949_v41, 7  ;;  %v4807_v22 = vadd.f32 %v8807_v26, %v4712_v33  ;;  %v4716_v13 = vmax.f32 %v4714_v39, %v4715_v45  ;;  %v4721_v16 = vrot.slane %v4720_v21, 2 }
 0x2c6   :  { %v4860_v8 = vsel %vm4824_vm4, %v4806_v5, %v4842_v52  ;;  %v4725_v9 = vrot.slane %v4643_v28, 4  ;;  %v6392_v46 = vpop.f32.mrb[232].mxu0  ;;  %v4646_v59 = vadd.f32 %v4645_v43, %v4541_v0 }
 0x2c7   :  { %v4968_v30 = vsel %vm4967_vm3, %v4966_v51, %v4948_v63  ;;  %v5496_v4 = vpack.c.bf16 %v4860_v8, %v4860_v8  ;;  %vm4825_vm6 = vcmp.ge.f32.partialorder %v4807_v22, 0.0  ;;  %v4843_v25 = vmul.f32 0.01, %v4807_v22  ;;  %v6393_v40 = vpop.f32.mrb[233].mxu0  ;;  %v4650_v12 = vpop.f32.mrb[232].mxu1 }
 0x2c8   :  { %v4717_v24 = vrot.slane %v4716_v13, 1  ;;  %v4722_v55 = vmax.f32 %v4720_v21, %v4721_v16  ;;  %v4726_v2 = vmax.f32 %v4643_v28, %v4725_v9  ;;  %v6395_v35 = vpop.f32.mrb[234].mxu0  ;;  %v6473_v42 = vpop.f32.mrb[233].mxu1  ;;  %v6394_v14 = vadd.f32 %v6393_v40, %v6392_v46 }
 0x2c9   :  { %v4950_v38 = vunpack.c.l.b16 %v5496_v4  ;;  %v4861_v60 = vsel %vm4825_vm6, %v4807_v22, %v4843_v25  ;;  %v6396_v47 = vpop.f32.mrb[235].mxu0  ;;  %v4653_v48 = vpop.f32.mrb[234].mxu1  ;;  %v4731_v37 = vrot.slane %v4646_v59, 4 }
 0x2ca   :  { %v5497_v57 = vpack.c.bf16 %v4861_v60, %v4861_v60  ;;  %v4718_v54 = vmax.f32 %v4716_v13, %v4717_v24  ;;  %v4723_v49 = vrot.slane %v4722_v55, 1  ;;  %v4727_v31 = vrot.slane %v4726_v2, 2  ;;  %v6474_v58 = vpop.f32.mrb[235].mxu1 }
 0x2cb   :  { %v4969_v19 = vrot.slane %v4950_v38, 6  ;;  %v6397_v53 = vadd.f32 %v6396_v47, %v6395_v35  ;;  %v4546_v11 = vadd.f32 %v6394_v14, %v8772_v17  ;;  %v4732_v39 = vmax.f32 %v4646_v59, %v4731_v37 }
 0x2cc   :  { %v4951_v36 = vunpack.c.l.b16 %v5497_v57  ;;  %v4808_v56 = vadd.f32 %v8807_v26, %v4718_v54  ;;  %v4724_v61 = vmax.f32 %v4722_v55, %v4723_v49  ;;  %v4728_v44 = vmax.f32 %v4726_v2, %v4727_v31 }
 0x2cd   :  { %v4971_v29 = vsel %vm4970_vm5, %v4969_v19, %v4968_v30  ;;  %v4651_v7 = vadd.f32 %v4650_v12, %v4546_v11  ;;  %v4549_v43 = vadd.f32 %v6397_v53, %v8774_v23  ;;  %v4733_v10 = vrot.slane %v4732_v39, 2 }
 0x2ce   :  { %v4972_v5 = vrot.slane %v4951_v36, 5  ;;  %vm4826_vm9 = vcmp.ge.f32.partialorder %v4808_v56, 0.0  ;;  %v4844_v27 = vmul.f32 0.01, %v4808_v56  ;;  %v4809_v32 = vadd.f32 %v8807_v26, %v4724_v61  ;;  %v6398_v6 = vpop.f32.mrb[236].mxu0 }
 0x2cf   :  { %v4729_v17 = vrot.slane %v4728_v44, 1  ;;  %v4737_v63 = vrot.slane %v4651_v7, 4  ;;  %v4654_v41 = vadd.f32 %v4653_v48, %v4549_v43  ;;  %v6399_v33 = vpop.f32.mrb[237].mxu0  ;;  %v4658_v45 = vpop.f32.mrb[236].mxu1  ;;  %v4734_v0 = vmax.f32 %v4732_v39, %v4733_v10 }
 0x2d0   :  { %v4974_v52 = vsel %vm4973_vm7, %v4972_v5, %v4971_v29  ;;  %v4862_v21 = vsel %vm4826_vm9, %v4808_v56, %v4844_v27  ;;  %vm4827_vm11 = vcmp.ge.f32.partialorder %v4809_v32, 0.0  ;;  %v4845_v28 = vmul.f32 0.01, %v4809_v32  ;;  %v6401_v51 = vpop.f32.mrb[238].mxu0  ;;  %v6477_v23 = vpop.f32.mrb[237].mxu1 }
 0x2d1   :  { %v5498_v22 = vpack.c.bf16 %v4862_v21, %v4862_v21  ;;  %v4730_v13 = vmax.f32 %v4728_v44, %v4729_v17  ;;  %v4738_v8 = vmax.f32 %v4651_v7, %v4737_v63  ;;  %v6402_v16 = vpop.f32.mrb[239].mxu0  ;;  %v4661_v9 = vpop.f32.mrb[238].mxu1  ;;  %v4743_v30 = vrot.slane %v4654_v41, 4 }
 0x2d2   :  { %v4863_v46 = vsel %vm4827_vm11, %v4809_v32, %v4845_v28  ;;  %v6400_v4 = vadd.f32 %v6399_v33, %v6398_v6  ;;  %v6403_v25 = vadd.f32 %v6402_v16, %v6401_v51  ;;  %v6478_v40 = vpop.f32.mrb[239].mxu1  ;;  %v4735_v2 = vrot.slane %v4734_v0, 1 }
 0x2d3   :  { %v4952_v12 = vunpack.c.l.b16 %v5498_v22  ;;  %v5499_v24 = vpack.c.bf16 %v4863_v46, %v4863_v46  ;;  %v4810_v55 = vadd.f32 %v8807_v26, %v4730_v13  ;;  %v4739_v59 = vrot.slane %v4738_v8, 2 }
 0x2d4   :  { %v4744_v35 = vmax.f32 %v4654_v41, %v4743_v30  ;;  %v4554_v42 = vadd.f32 %v6400_v4, %v8778_v62  ;;  %v4557_v38 = vadd.f32 %v6403_v25, %v8780_v20  ;;  %v4736_v48 = vmax.f32 %v4734_v0, %v4735_v2 }
 0x2d5   :  { %v4975_v60 = vrot.slane %v4952_v12, 4  ;;  %v4953_v14 = vunpack.c.l.b16 %v5499_v24  ;;  %vm4828_vm13 = vcmp.ge.f32.partialorder %v4810_v55, 0.0  ;;  %v4846_v47 = vmul.f32 0.01, %v4810_v55 }
 0x2d6   :  { %v4740_v57 = vmax.f32 %v4738_v8, %v4739_v59  ;;  %v4745_v54 = vrot.slane %v4744_v35, 2  ;;  %v4659_v49 = vadd.f32 %v4658_v45, %v4554_v42  ;;  %v6404_v31 = vpop.f32.mrb[240].mxu0  ;;  %v4662_v53 = vadd.f32 %v4661_v9, %v4557_v38 }
 0x2d7   :  { %v4977_v58 = vsel %vm4976_vm8, %v4975_v60, %v4974_v52  ;;  %v4978_v19 = vrot.slane %v4953_v14, 3  ;;  %v4864_v37 = vsel %vm4828_vm13, %v4810_v55, %v4846_v47  ;;  %v6405_v11 = vpop.f32.mrb[241].mxu0  ;;  %v4666_v36 = vpop.f32.mrb[240].mxu1  ;;  %v4811_v62 = vadd.f32 %v8807_v26, %v4736_v48 }
 0x2d8   :  { %v5500_v56 = vpack.c.bf16 %v4864_v37, %v4864_v37  ;;  %v4741_v20 = vrot.slane %v4740_v57, 1  ;;  %v4746_v61 = vmax.f32 %v4744_v35, %v4745_v54  ;;  %v6407_v44 = vpop.f32.mrb[242].mxu0  ;;  %v6481_v29 = vpop.f32.mrb[241].mxu1  ;;  %v4749_v7 = vrot.slane %v4659_v49, 4 }
 0x2d9   :  { %v4980_v39 = vsel %vm4979_vm10, %v4978_v19, %v4977_v58  ;;  %v4755_v43 = vrot.slane %v4662_v53, 4  ;;  %v6406_v5 = vadd.f32 %v6405_v11, %v6404_v31  ;;  %v6408_v27 = vpop.f32.mrb[243].mxu0  ;;  %v4669_v32 = vpop.f32.mrb[242].mxu1  ;;  %vm4829_vm15 = vcmp.ge.f32.partialorder %v4811_v62, 0.0 }
 0x2da   :  { %v4954_v6 = vunpack.c.l.b16 %v5500_v56  ;;  %v4847_v17 = vmul.f32 0.01, %v4811_v62  ;;  %v4742_v10 = vmax.f32 %v4740_v57, %v4741_v20  ;;  %v6482_v63 = vpop.f32.mrb[243].mxu1  ;;  %v4747_v41 = vrot.slane %v4746_v61, 1 }
 0x2db   :  { %v4750_v33 = vmax.f32 %v4659_v49, %v4749_v7  ;;  %v4756_v45 = vmax.f32 %v4662_v53, %v4755_v43  ;;  %v6409_v52 = vadd.f32 %v6408_v27, %v6407_v44  ;;  %v4562_v23 = vadd.f32 %v6406_v5, %v8784_v1 }
 0x2dc   :  { %v4981_v21 = vrot.slane %v4954_v6, 2  ;;  %v4865_v28 = vsel %vm4829_vm15, %v4811_v62, %v4847_v17  ;;  %v4812_v51 = vadd.f32 %v8807_v26, %v4742_v10  ;;  %v4748_v13 = vmax.f32 %v4746_v61, %v4747_v41 }
 0x2dd   :  { %v5501_v22 = vpack.c.bf16 %v4865_v28, %v4865_v28  ;;  %v4751_v0 = vrot.slane %v4750_v33, 2  ;;  %v4757_v8 = vrot.slane %v4756_v45, 2  ;;  %v4667_v46 = vadd.f32 %v4666_v36, %v4562_v23 }
 0x2de   :  { %v4983_v16 = vsel %vm4982_vm12, %v4981_v21, %v4980_v39  ;;  %vm4830_vm0 = vcmp.ge.f32.partialorder %v4812_v51, 0.0  ;;  %v4848_v9 = vmul.f32 0.01, %v4812_v51  ;;  %v6410_v30 = vpop.f32.mrb[244].mxu0  ;;  %v4813_v25 = vadd.f32 %v8807_v26, %v4748_v13 }
 0x2df   :  { %v4955_v4 = vunpack.c.l.b16 %v5501_v22  ;;  %v4752_v40 = vmax.f32 %v4750_v33, %v4751_v0  ;;  %v4758_v12 = vmax.f32 %v4756_v45, %v4757_v8  ;;  %v6411_v24 = vpop.f32.mrb[245].mxu0  ;;  %v4674_v55 = vpop.f32.mrb[244].mxu1  ;;  %v4761_v59 = vrot.slane %v4667_v46, 4 }
 0x2e0   :  { %v4866_v2 = vsel %vm4830_vm0, %v4812_v51, %v4848_v9  ;;  %v4565_v1 = vadd.f32 %v6409_v52, %v8786_v50  ;;  %v6412_v35 = vadd.f32 %v6411_v24, %v6410_v30  ;;  %v6413_v42 = vpop.f32.mrb[246].mxu0  ;;  %v6485_v38 = vpop.f32.mrb[245].mxu1  ;;  %vm4831_vm1 = vcmp.ge.f32.partialorder %v4813_v25, 0.0 }
 0x2e1   :  { %v4984_v60 = vrot.slane %v4955_v4, 1  ;;  %v5502_v14 = vpack.c.bf16 %v4866_v2, %v4866_v2  ;;  %v4849_v47 = vmul.f32 0.01, %v4813_v25  ;;  %v6414_v48 = vpop.f32.mrb[247].mxu0  ;;  %v4677_v57 = vpop.f32.mrb[246].mxu1  ;;  %v4753_v54 = vrot.slane %v4752_v40, 1 }
 0x2e2   :  { %v4759_v49 = vrot.slane %v4758_v12, 1  ;;  %v4762_v31 = vmax.f32 %v4667_v46, %v4761_v59  ;;  %v4670_v58 = vadd.f32 %v4669_v32, %v4565_v1  ;;  %v6486_v19 = vpop.f32.mrb[247].mxu1  ;;  %v6415_v11 = vadd.f32 %v6414_v48, %v6413_v42 }
 0x2e3   :  { %v4986_v37 = vsel %vm4985_vm14, %v4984_v60, %v4983_v16  ;;  %v4867_v53 = vsel %vm4831_vm1, %v4813_v25, %v4849_v47  ;;  %v4754_v56 = vmax.f32 %v4752_v40, %v4753_v54  ;;  %v4570_v44 = vadd.f32 %v6412_v35, %v8790_v18 }
 0x2e4   :  { %v5003_v36 = vpack.c.b16 %v4986_v37, %v4986_v37  ;;  %v5503_v50 = vpack.c.bf16 %v4867_v53, %v4867_v53  ;;  %v4760_v62 = vmax.f32 %v4758_v12, %v4759_v49  ;;  %v4763_v20 = vrot.slane %v4762_v31, 2 }
 0x2e5   :  { %v4767_v61 = vrot.slane %v4670_v58, 4  ;;  %v4573_v29 = vadd.f32 %v6415_v11, %v8792_v15  ;;  %v4956_v39 = vunpack.c.l.b16 %v5502_v14  ;;  %v4814_v43 = vadd.f32 %v8807_v26, %v4754_v56 }
 0x2e6   :  { %5009 = vst [vmem:[%s8868_s3] sm:$0xf] %v5003_v36  ;;  %v4957_v7 = vunpack.c.l.b16 %v5503_v50  ;;  %v4815_v5 = vadd.f32 %v8807_v26, %v4760_v62  ;;  %v6416_v27 = vpop.f32.mrb[248].mxu0  ;;  %v4764_v32 = vmax.f32 %v4762_v31, %v4763_v20  ;;  %v4675_v17 = vadd.f32 %v4674_v55, %v4570_v44 }
 0x2e7   :  { %v4768_v6 = vmax.f32 %v4670_v58, %v4767_v61  ;;  %v4678_v10 = vadd.f32 %v4677_v57, %v4573_v29  ;;  %v6417_v63 = vpop.f32.mrb[249].mxu0  ;;  %v4682_v41 = vpop.f32.mrb[248].mxu1  ;;  %vm4832_vm2 = vcmp.ge.f32.partialorder %v4814_v43, 0.0  ;;  %v4850_v15 = vmul.f32 0.01, %v4814_v43 }
 0x2e8   :  { %v4987_v18 = vrot.slane %v4957_v7, 7  ;;  %vm4833_vm4 = vcmp.ge.f32.partialorder %v4815_v5, 0.0  ;;  %v6419_v33 = vpop.f32.mrb[250].mxu0  ;;  %v4851_v45 = vmul.f32 0.01, %v4815_v5  ;;  %v4765_v52 = vrot.slane %v4764_v32, 1 }
 0x2e9   :  { %v4769_v21 = vrot.slane %v4768_v6, 2  ;;  %v4773_v28 = vrot.slane %v4675_v17, 4  ;;  %v6420_v51 = vpop.f32.mrb[251].mxu0  ;;  %v4868_v22 = vsel %vm4832_vm2, %v4814_v43, %v4850_v15  ;;  %v4779_v13 = vrot.slane %v4678_v10, 4  ;;  %v6489_v8 = vpop.f32.mrb[249].mxu1 }
 0x2ea   :  { %v4988_v23 = vsel %vm4967_vm3, %v4987_v18, %v4956_v39  ;;  %v6418_v0 = vadd.f32 %v6417_v63, %v6416_v27  ;;  %v5504_v16 = vpack.c.bf16 %v4868_v22, %v4868_v22  ;;  %v4869_v9 = vsel %vm4833_vm4, %v4815_v5, %v4851_v45  ;;  %v4685_v4 = vpop.f32.mrb[250].mxu1 }
 0x2eb   :  { %v4766_v46 = vmax.f32 %v4764_v32, %v4765_v52  ;;  %v4770_v30 = vmax.f32 %v4768_v6, %v4769_v21  ;;  %v5505_v25 = vpack.c.bf16 %v4869_v9, %v4869_v9  ;;  %v4774_v40 = vmax.f32 %v4675_v17, %v4773_v28  ;;  %v6490_v55 = vpop.f32.mrb[251].mxu1 }
 0x2ec   :  { %v4780_v12 = vmax.f32 %v4678_v10, %v4779_v13  ;;  %v6421_v24 = vadd.f32 %v6420_v51, %v6419_v33  ;;  %v4958_v2 = vunpack.c.l.b16 %v5504_v16  ;;  %v4578_v35 = vadd.f32 %v6418_v0, %v8796_v34 }
 0x2ed   :  { %v4816_v59 = vadd.f32 %v8807_v26, %v4766_v46  ;;  %v4771_v1 = vrot.slane %v4770_v30, 1  ;;  %v4959_v42 = vunpack.c.l.b16 %v5505_v25  ;;  %v4775_v38 = vrot.slane %v4774_v40, 2 }
 0x2ee   :  { %v4781_v60 = vrot.slane %v4780_v12, 2  ;;  %v4581_v14 = vadd.f32 %v6421_v24, %v8798_v3  ;;  %v4989_v47 = vrot.slane %v4958_v2, 6  ;;  %v4683_v58 = vadd.f32 %v4682_v41, %v4578_v35 }
 0x2ef   :  { %vm4834_vm6 = vcmp.ge.f32.partialorder %v4816_v59, 0.0  ;;  %v4852_v48 = vmul.f32 0.01, %v4816_v59  ;;  %v4772_v57 = vmax.f32 %v4770_v30, %v4771_v1  ;;  %v4991_v54 = vrot.slane %v4959_v42, 5 }
 0x2f0   :  { %v4776_v49 = vmax.f32 %v4774_v40, %v4775_v38  ;;  %v4782_v31 = vmax.f32 %v4780_v12, %v4781_v60  ;;  %v4990_v19 = vsel %vm4970_vm5, %v4989_v47, %v4988_v23  ;;  %v4686_v11 = vadd.f32 %v4685_v4, %v4581_v14 }
 0x2f1   :  { %v4870_v37 = vsel %vm4834_vm6, %v4816_v59, %v4852_v48  ;;  %v4817_v53 = vadd.f32 %v8807_v26, %v4772_v57  ;;  %v4992_v34 = vsel %vm4973_vm7, %v4991_v54, %v4990_v19  ;;  %v4785_v62 = vrot.slane %v4683_v58, 4 }
 0x2f2   :  { %v5506_v36 = vpack.c.bf16 %v4870_v37, %v4870_v37  ;;  %v4777_v50 = vrot.slane %v4776_v49, 1  ;;  %v4783_v56 = vrot.slane %v4782_v31, 1  ;;  %v4791_v20 = vrot.slane %v4686_v11, 4 }
 0x2f3   :  { %vm4835_vm9 = vcmp.ge.f32.partialorder %v4817_v53, 0.0  ;;  %v4853_v3 = vmul.f32 0.01, %v4817_v53  ;;  %v4786_v7 = vmax.f32 %v4683_v58, %v4785_v62 }
 0x2f4   :  { %v4960_v61 = vunpack.c.l.b16 %v5506_v36  ;;  %v4778_v44 = vmax.f32 %v4776_v49, %v4777_v50  ;;  %v4784_v29 = vmax.f32 %v4782_v31, %v4783_v56  ;;  %v4792_v43 = vmax.f32 %v4686_v11, %v4791_v20 }
 0x2f5   :  { %v4871_v39 = vsel %vm4835_vm9, %v4817_v53, %v4853_v3  ;;  %v4787_v17 = vrot.slane %v4786_v7, 2 }
 0x2f6   :  { %v4993_v5 = vrot.slane %v4960_v61, 4  ;;  %v5507_v27 = vpack.c.bf16 %v4871_v39, %v4871_v39  ;;  %v4818_v32 = vadd.f32 %v8807_v26, %v4778_v44  ;;  %v4819_v6 = vadd.f32 %v8807_v26, %v4784_v29 }
 0x2f7   :  { %v4793_v10 = vrot.slane %v4792_v43, 2  ;;  %v4788_v33 = vmax.f32 %v4786_v7, %v4787_v17 }
 0x2f8   :  { %v4994_v63 = vsel %vm4976_vm8, %v4993_v5, %v4992_v34  ;;  %v4961_v41 = vunpack.c.l.b16 %v5507_v27  ;;  %vm4836_vm5 = vcmp.ge.f32.partialorder %v4818_v32, 0.0  ;;  %v4854_v18 = vmul.f32 0.01, %v4818_v32 }
 0x2f9   :  { %vm4837_vm7 = vcmp.ge.f32.partialorder %v4819_v6, 0.0  ;;  %v4855_v15 = vmul.f32 0.01, %v4819_v6  ;;  %v4794_v45 = vmax.f32 %v4792_v43, %v4793_v10  ;;  %v4789_v23 = vrot.slane %v4788_v33, 1 }
 0x2fa   :  { %v4995_v52 = vrot.slane %v4961_v41, 3  ;;  %v4872_v21 = vsel %vm4836_vm5, %v4818_v32, %v4854_v18 }
 0x2fb   :  { %v5508_v28 = vpack.c.bf16 %v4872_v21, %v4872_v21  ;;  %v4873_v51 = vsel %vm4837_vm7, %v4819_v6, %v4855_v15  ;;  %v4795_v22 = vrot.slane %v4794_v45, 1  ;;  %v4790_v16 = vmax.f32 %v4788_v33, %v4789_v23 }
 0x2fc   :  { %v4996_v13 = vsel %vm4979_vm10, %v4995_v52, %v4994_v63  ;;  %v5509_v0 = vpack.c.bf16 %v4873_v51, %v4873_v51 }
 0x2fd   :  { %v4962_v8 = vunpack.c.l.b16 %v5508_v28  ;;  %v4796_v9 = vmax.f32 %v4794_v45, %v4795_v22  ;;  %v4820_v4 = vadd.f32 %v8807_v26, %v4790_v16 }
 0x2fe   :  { %v4963_v46 = vunpack.c.l.b16 %v5509_v0 }
 0x2ff   :  { %v4997_v30 = vrot.slane %v4962_v8, 2  ;;  %v4821_v25 = vadd.f32 %v8807_v26, %v4796_v9  ;;  %vm4838_vm8 = vcmp.ge.f32.partialorder %v4820_v4, 0.0  ;;  %v4856_v24 = vmul.f32 0.01, %v4820_v4 }
 0x300   :  { %v4999_v40 = vrot.slane %v4963_v46, 1 }
 0x301   :  { %v4998_v12 = vsel %vm4982_vm12, %v4997_v30, %v4996_v13  ;;  %vm4839_vm11 = vcmp.ge.f32.partialorder %v4821_v25, 0.0  ;;  %v4857_v2 = vmul.f32 0.01, %v4821_v25  ;;  %v4874_v1 = vsel %vm4838_vm8, %v4820_v4, %v4856_v24 }
 0x302   :  { %v5000_v55 = vsel %vm4985_vm14, %v4999_v40, %v4998_v12  ;;  %v5510_v42 = vpack.c.bf16 %v4874_v1, %v4874_v1 }
 0x303   :  { %v5004_v59 = vpack.c.b16 %v5000_v55, %v5000_v55  ;;  %v4875_v35 = vsel %vm4839_vm11, %v4821_v25, %v4857_v2 }
 0x304   :  { %v5511_v38 = vpack.c.bf16 %v4875_v35, %v4875_v35  ;;  %v4964_v26 = vunpack.c.l.b16 %v5510_v42 }
 0x305   :  { %5010 = vst [vmem:[%s8868_s3 + $0x4] sm:$0xf] %v5004_v59 }
 0x306   :  { %v4965_v60 = vunpack.c.l.b16 %v5511_v38 }
 0x308   :  { %v5001_v14 = vrot.slane %v4965_v60, 7 }
 0x30a   :  { %v5002_v47 = vsel %vm4967_vm3, %v5001_v14, %v4964_v26 }
 0x30b   :  { %v5005_v48 = vpack.c.b16 %v5002_v47, %v5002_v47 }
 0x30d   :  { %5011 = vst [vmem:[%s8868_s3 + $0x8] sm:$0x1] %v5005_v48 }

// kernel: cnn3d_forward.5
= control target key start
LH: loop header
LB: loop body
LE: loop exit
PB: predicated region body
PF: predicated region fallthrough
CT: control target
= control target key end

     0   :  { %v193_v27 = vlaneseq  ;;  %v1400_v35 = vmov 1966171168   ;;  %vm1402_vm0 = vmmov 0   ;;  %s1748_s0 = inlined_call_operand.vmem [shape: bf16[2,1152], index: 0, kind: input, shape index: {}]   ;;  %s1749_s1 = inlined_call_operand.vmem [shape: bf16[1152,128], index: 1, kind: input, shape index: {}]   ;;  %s1750_s2 = inlined_call_operand.vmem [shape: f32[1,128], index: 2, kind: input, shape index: {}]   ;;  %s1751_s3 = inlined_call_operand.vmem [shape: f32[1,128], index: 3, kind: input, shape index: {}]   ;;  %s1752_s4 = inlined_call_operand.vmem [shape: f32[1,128], index: 4, kind: input, shape index: {}]   ;;  %s1753_s5 = inlined_call_operand.vmem [shape: f32[1,128], index: 5, kind: input, shape index: {}]   ;;  %s1754_s6 = inlined_call_operand.vmem [shape: f32[1,128], index: 6, kind: input, shape index: {}]   ;;  %s1755_s7 = inlined_call_operand.vmem [shape: bf16[128,128], index: 7, kind: input, shape index: {}]   ;;  %s1756_s8 = inlined_call_operand.vmem [shape: f32[1,128], index: 8, kind: input, shape index: {}]   ;;  %s1757_s9 = inlined_call_operand.hbm [shape: f32[2,128], index: 9, kind: output, shape index: {}]  }
   0x1   :  { %v1293_v0 = vld [vmem:[%s1749_s1 + $0x40] sm:$0xff]   ;;  %v1297_v4 = vld [vmem:[%s1749_s1 + $0x48] sm:$0xff]   ;;  %v1301_v8 = vld [vmem:[%s1749_s1 + $0x50] sm:$0xff]   ;;  %v191_v36 = vunpack.c.l.s4 %v1400_v35 }
   0x2   :  { %v1294_v1 = vld [vmem:[%s1749_s1] sm:$0xff]   ;;  %1143 = vmatprep.subr.bf16.mxu0 %v1293_v0  ;;  %v1298_v5 = vld [vmem:[%s1749_s1 + $0x8] sm:$0xff]   ;;  %v1302_v9 = vld [vmem:[%s1749_s1 + $0x10] sm:$0xff]   ;;  %v1547_v32 = vshrl.u32 %v193_v27, 7 }
   0x3   :  { %v1295_v2 = vld [vmem:[%s1749_s1 + $0xc0] sm:$0xff]   ;;  %1144 = vmatpush3.bf16.msra.mxu0 %v1294_v1  ;;  %v1299_v6 = vld [vmem:[%s1749_s1 + $0xc8] sm:$0xff]   ;;  %v1303_v10 = vld [vmem:[%s1749_s1 + $0xd0] sm:$0xff]   ;;  %v192_v39 = vunpack.c.0.s8 %v191_v36 }
   0x4   :  { %v1296_v3 = vld [vmem:[%s1749_s1 + $0x80] sm:$0xff]   ;;  %1165 = vmatprep.subr.bf16.mxu1 %v1295_v2  ;;  %1145 = vmatprep.subr.bf16.mxu0 %v1297_v4  ;;  %v1300_v7 = vld [vmem:[%s1749_s1 + $0x88] sm:$0xff]   ;;  %v1304_v11 = vld [vmem:[%s1749_s1 + $0x90] sm:$0xff]  }
   0x5   :  { %1166 = vmatpush3.bf16.msra.mxu1 %v1296_v3  ;;  %v1305_v12 = vld [vmem:[%s1749_s1 + $0x58] sm:$0xff]   ;;  %v1309_v16 = vld [vmem:[%s1749_s1 + $0x60] sm:$0xff]   ;;  %v1313_v20 = vld [vmem:[%s1749_s1 + $0x68] sm:$0xff]   ;;  %v1562_v41 = vsub.s32 %v192_v39, %v1547_v32 }
   0x6   :  { %1167 = vmatprep.subr.bf16.mxu1 %v1299_v6  ;;  %v1306_v13 = vld [vmem:[%s1749_s1 + $0x18] sm:$0xff]   ;;  %v1310_v17 = vld [vmem:[%s1749_s1 + $0x20] sm:$0xff]   ;;  %v1314_v21 = vld [vmem:[%s1749_s1 + $0x28] sm:$0xff]  }
   0x7   :  { %1146 = vmatpush3.bf16.msra.mxu0 %v1298_v5  ;;  %v1307_v14 = vld [vmem:[%s1749_s1 + $0xd8] sm:$0xff]   ;;  %v1311_v18 = vld [vmem:[%s1749_s1 + $0xe0] sm:$0xff]   ;;  %v1315_v22 = vld [vmem:[%s1749_s1 + $0xe8] sm:$0xff]  }
   0x8   :  { %1147 = vmatprep.subr.bf16.mxu0 %v1301_v8  ;;  %v1308_v15 = vld [vmem:[%s1749_s1 + $0x98] sm:$0xff]   ;;  %v1312_v19 = vld [vmem:[%s1749_s1 + $0xa0] sm:$0xff]   ;;  %v1316_v23 = vld [vmem:[%s1749_s1 + $0xa8] sm:$0xff]  }
   0x9   :  { %1168 = vmatpush3.bf16.msra.mxu1 %v1300_v7  ;;  %v1317_v24 = vld [vmem:[%s1749_s1 + $0x70] sm:$0xff]   ;;  %v1321_v29 = vld [vmem:[%s1749_s1 + $0x78] sm:$0xff]   ;;  %v34_v33 = vld [vmem:[%s1748_s0] sm:$0xff] }
   0xa   :  { %1169 = vmatprep.subr.bf16.mxu1 %v1303_v10  ;;  %v1318_v25 = vld [vmem:[%s1749_s1 + $0x30] sm:$0xff]   ;;  %v1322_v30 = vld [vmem:[%s1749_s1 + $0x38] sm:$0xff]   ;;  %v1326_v37 = vld [vmem:[%s1749_s1 + $0x140] sm:$0xff]   ;;  %v189_v38 = vcombine.high %v34_v33, %v34_v33  ;;  %v196_v42 = vrot.slane %v34_v33, %v1562_v41 }
   0xb   :  { %1148 = vmatpush3.bf16.msra.mxu0 %v1302_v9  ;;  %v1319_v26 = vld [vmem:[%s1749_s1 + $0xf0] sm:$0xff]   ;;  %v1323_v31 = vld [vmem:[%s1749_s1 + $0xf8] sm:$0xff]   ;;  %v1328_v40 = vld [vmem:[%s1749_s1 + $0x1c0] sm:$0xff]  }
   0xc   :  { %1149 = vmatprep.subr.bf16.mxu0 %v1305_v12  ;;  %v1320_v28 = vld [vmem:[%s1749_s1 + $0xb0] sm:$0xff]   ;;  %v1325_v34 = vld [vmem:[%s1749_s1 + $0xb8] sm:$0xff]   ;;  %v1566_v43 = vrot.slane %v189_v38, %v1562_v41  ;;  %v204_v44 = vcombine.high %v196_v42, %v196_v42  ;;  %v212_v45 = vrot.slane %v196_v42, %v1562_v41  ;;  %v1327_v48 = vld [vmem:[%s1749_s1 + $0x100] sm:$0xff]  }
   0xd   :  { %1170 = vmatpush3.bf16.msra.mxu1 %v1304_v11  ;;  %v1330_v51 = vld [vmem:[%s1749_s1 + $0x148] sm:$0xff]   ;;  %v1329_v53 = vld [vmem:[%s1749_s1 + $0x180] sm:$0xff]   ;;  %v1334_v57 = vld [vmem:[%s1749_s1 + $0x150] sm:$0xff]  }
   0xe   :  { %1171 = vmatprep.subr.bf16.mxu1 %v1307_v14  ;;  %v205_v46 = vcombine.high %v1566_v43, %v1566_v43  ;;  %v226_v47 = vrot.slane %v204_v44, %v1562_v41  ;;  %v234_v50 = vcombine.high %v212_v45, %v212_v45  ;;  %v1332_v54 = vld [vmem:[%s1749_s1 + $0x1c8] sm:$0xff]   ;;  %v1336_v59 = vld [vmem:[%s1749_s1 + $0x1d0] sm:$0xff]   ;;  %v1338_v61 = vld [vmem:[%s1749_s1 + $0x158] sm:$0xff]  }
   0xf   :  { %1150 = vmatpush3.bf16.msra.mxu0 %v1306_v13  ;;  %v1331_v56 = vld [vmem:[%s1749_s1 + $0x108] sm:$0xff]   ;;  %v1335_v60 = vld [vmem:[%s1749_s1 + $0x110] sm:$0xff]   ;;  %v1340_v63 = vld [vmem:[%s1749_s1 + $0x1d8] sm:$0xff]  }
  0x10   :  { %1151 = vmatprep.subr.bf16.mxu0 %v1309_v16  ;;  %v233_v49 = vrot.slane %v205_v46, %v1562_v41  ;;  %725 = vmatprep.mubr.bf16.mxu0 %v226_v47  ;;  %v236_v52 = vcombine.high %v226_v47, %v226_v47  ;;  %v1333_v58 = vld [vmem:[%s1749_s1 + $0x188] sm:$0xff]   ;;  %v1337_v62 = vld [vmem:[%s1749_s1 + $0x190] sm:$0xff]   ;;  %v1339_v0 = vld [vmem:[%s1749_s1 + $0x118] sm:$0xff]  }
  0x11   :  { %1172 = vmatpush3.bf16.msra.mxu1 %v1308_v15  ;;  %v1342_v1 = vld [vmem:[%s1749_s1 + $0x160] sm:$0xff]   ;;  %v1341_v2 = vld [vmem:[%s1749_s1 + $0x198] sm:$0xff]   ;;  %v1346_v5 = vld [vmem:[%s1749_s1 + $0x168] sm:$0xff]  }
  0x12   :  { %1173 = vmatprep.subr.bf16.mxu1 %v1311_v18  ;;  %v237_v55 = vcombine.high %v233_v49, %v233_v49  ;;  %765 = vmatprep.mubr.bf16.mxu1 %v236_v52  ;;  %v1344_v3 = vld [vmem:[%s1749_s1 + $0x1e0] sm:$0xff]   ;;  %v1348_v7 = vld [vmem:[%s1749_s1 + $0x1e8] sm:$0xff]   ;;  %v1350_v9 = vld [vmem:[%s1749_s1 + $0x170] sm:$0xff]  }
  0x13   :  { %1152 = vmatpush3.bf16.msra.mxu0 %v1310_v17  ;;  %v1343_v4 = vld [vmem:[%s1749_s1 + $0x120] sm:$0xff]   ;;  %v1347_v8 = vld [vmem:[%s1749_s1 + $0x128] sm:$0xff]   ;;  %v1352_v11 = vld [vmem:[%s1749_s1 + $0x1f0] sm:$0xff]   ;;  %v219_v17 = vrot.slane %v1566_v43, %v1562_v41 }
  0x14   :  { %1153 = vmatprep.subr.bf16.mxu0 %v1313_v20  ;;  %v1345_v6 = vld [vmem:[%s1749_s1 + $0x1a0] sm:$0xff]   ;;  %v1349_v10 = vld [vmem:[%s1749_s1 + $0x1a8] sm:$0xff]   ;;  %v1351_v12 = vld [vmem:[%s1749_s1 + $0x130] sm:$0xff]   ;;  %v1401_v20 = vmov 0.0  }
  0x15   :  { %1174 = vmatpush3.bf16.msra.mxu1 %v1312_v19  ;;  %v1354_v13 = vld [vmem:[%s1749_s1 + $0x178] sm:$0xff]   ;;  %v1353_v14 = vld [vmem:[%s1749_s1 + $0x1b0] sm:$0xff]   ;;  %v1358_v19 = vld [vmem:[%s1749_s1 + $0x200] sm:$0xff]  }
  0x16   :  { %1175 = vmatprep.subr.bf16.mxu1 %v1315_v22  ;;  %v1356_v15 = vld [vmem:[%s1749_s1 + $0x1f8] sm:$0xff]   ;;  %v1359_v22 = vld [vmem:[%s1749_s1 + $0x208] sm:$0xff]  }
  0x17   :  { %1154 = vmatpush3.bf16.msra.mxu0 %v1314_v21  ;;  %v1355_v16 = vld [vmem:[%s1749_s1 + $0x138] sm:$0xff]   ;;  %v235_v21 = vcombine.high %v219_v17, %v219_v17 }
  0x18   :  { %1155 = vmatprep.subr.bf16.mxu0 %v1317_v24  ;;  %v1357_v18 = vld [vmem:[%s1749_s1 + $0x1b8] sm:$0xff]  }
  0x19   :  { %1176 = vmatpush3.bf16.msra.mxu1 %v1316_v23 }
  0x1a   :  { %1177 = vmatprep.subr.bf16.mxu1 %v1319_v26 }
  0x1b   :  { %1156 = vmatpush3.bf16.msra.mxu0 %v1318_v25 }
  0x1c   :  { %1157 = vmatprep.subr.bf16.mxu0 %v1321_v29 }
  0x1d   :  { %1178 = vmatpush3.bf16.msra.mxu1 %v1320_v28 }
  0x1e   :  { %1179 = vmatprep.subr.bf16.mxu1 %v1323_v31 }
  0x1f   :  { %1158 = vmatpush3.bf16.msra.mxu0 %v1322_v30 }
  0x20   :  { %1187 = vmatprep.subr.bf16.mxu0 %v1326_v37 }
  0x21   :  { %1180 = vmatpush3.bf16.msra.mxu1 %v1325_v34 }
  0x22   :  { %1209 = vmatprep.subr.bf16.mxu1 %v1328_v40  ;;  %726 = vmatmul.mubr.bf16.vlgmr.msra.gmra.mrb[0].mxu0 %v212_v45 }
  0x23   :  { %1188 = vmatpush3.bf16.msra.mxu0 %v1327_v48  ;;  %805 = vmatprep.mubr.bf16.mxu0 %v233_v49 }
  0x24   :  { %766 = vmatmul.mubr.bf16.vlgmr.msra.gmra.mrb[0].mxu1 %v234_v50  ;;  %1189 = vmatprep.subr.bf16.mxu0 %v1330_v51 }
  0x25   :  { %1210 = vmatpush3.bf16.msra.mxu1 %v1329_v53  ;;  %845 = vmatprep.mubr.bf16.mxu1 %v237_v55 }
  0x26   :  { %1211 = vmatprep.subr.bf16.mxu1 %v1332_v54 }
  0x27   :  { %1190 = vmatpush3.bf16.msra.mxu0 %v1331_v56 }
  0x28   :  { %1191 = vmatprep.subr.bf16.mxu0 %v1334_v57 }
  0x29   :  { %1212 = vmatpush3.bf16.msra.mxu1 %v1333_v58 }
  0x2a   :  { %1213 = vmatprep.subr.bf16.mxu1 %v1336_v59 }
  0x2b   :  { %1192 = vmatpush3.bf16.msra.mxu0 %v1335_v60 }
  0x2c   :  { %1193 = vmatprep.subr.bf16.mxu0 %v1338_v61 }
  0x2d   :  { %1214 = vmatpush3.bf16.msra.mxu1 %v1337_v62 }
  0x2e   :  { %1215 = vmatprep.subr.bf16.mxu1 %v1340_v63 }
  0x2f   :  { %1194 = vmatpush3.bf16.msra.mxu0 %v1339_v0 }
  0x30   :  { %1195 = vmatprep.subr.bf16.mxu0 %v1342_v1 }
  0x31   :  { %1216 = vmatpush3.bf16.msra.mxu1 %v1341_v2 }
  0x32   :  { %1217 = vmatprep.subr.bf16.mxu1 %v1344_v3 }
  0x33   :  { %1196 = vmatpush3.bf16.msra.mxu0 %v1343_v4 }
  0x34   :  { %1197 = vmatprep.subr.bf16.mxu0 %v1346_v5 }
  0x35   :  { %1218 = vmatpush3.bf16.msra.mxu1 %v1345_v6 }
  0x36   :  { %1219 = vmatprep.subr.bf16.mxu1 %v1348_v7 }
  0x37   :  { %1198 = vmatpush3.bf16.msra.mxu0 %v1347_v8 }
  0x38   :  { %1199 = vmatprep.subr.bf16.mxu0 %v1350_v9 }
  0x39   :  { %1220 = vmatpush3.bf16.msra.mxu1 %v1349_v10 }
  0x3a   :  { %1221 = vmatprep.subr.bf16.mxu1 %v1352_v11 }
  0x3b   :  { %1200 = vmatpush3.bf16.msra.mxu0 %v1351_v12 }
  0x3c   :  { %1201 = vmatprep.subr.bf16.mxu0 %v1354_v13 }
  0x3d   :  { %1222 = vmatpush3.bf16.msra.mxu1 %v1353_v14 }
  0x3e   :  { %1223 = vmatprep.subr.bf16.mxu1 %v1356_v15 }
  0x3f   :  { %1202 = vmatpush3.bf16.msra.mxu0 %v1355_v16 }
  0x40   :  { %1249 = vmatprep.subr.bf16.mxu0 %v1401_v20 }
  0x41   :  { %1224 = vmatpush3.bf16.msra.mxu1 %v1357_v18 }
  0x42   :  { %806 = vmatmul.mubr.bf16.vlgmr.msra.gmra.mrb[4].mxu0 %v219_v17  ;;  %1269 = vmatprep.subr.bf16.mxu1 %v1401_v20 }
  0x43   :  { %1250 = vmatpush3.bf16.msra.mxu0 %v1358_v19  ;;  %1265 = vmatprep.mubr.msk.bf16.mxu0 %vm1402_vm0, %v1401_v20 }
  0x44   :  { %14 = vsyncpa [#allocation3], 0  ;;  %846 = vmatmul.mubr.bf16.vlgmr.msra.gmra.mrb[4].mxu1 %v235_v21  ;;  %1251 = vmatprep.subr.bf16.mxu0 %v1401_v20  ;;  %v1360_v23 = vld [vmem:[%s1749_s1 + $0x210] sm:$0xff]   ;;  %v1361_v24 = vld [vmem:[%s1749_s1 + $0x218] sm:$0xff]   ;;  %v910_v4 = vsub.s32 0, %v1547_v32 }
  0x45   :  { %1285 = vmatprep.mubr.msk.bf16.mxu1 %vm1402_vm0, %v1401_v20  ;;  %v1362_v25 = vld [vmem:[%s1749_s1 + $0x220] sm:$0xff]   ;;  %v1363_v26 = vld [vmem:[%s1749_s1 + $0x228] sm:$0xff]   ;;  %v1364_v27 = vld [vmem:[%s1749_s1 + $0x230] sm:$0xff]  }
  0x46   :  { %v1365_v28 = vld [vmem:[%s1749_s1 + $0x238] sm:$0xff]   ;;  %v1058_v29 = vld.sshfl [vmem:[%s1748_s0 + $0x8] sm:$0x1 pattern:$0x75316420]  ;;  %v1366_v31 = vld [vmem:[%s1755_s7] sm:$0xff]  }
  0x47   :  { %1252 = vmatpush3.bf16.msra.mxu0 %v1359_v22  ;;  %v251_v30 = vrot.slane %v1058_v29, %v1562_v41  ;;  %1270 = vmatpush3.bf16.msra.mxu1 %v1366_v31  ;;  %v1367_v33 = vld [vmem:[%s1755_s7 + $0x8] sm:$0xff]   ;;  %v1368_v34 = vld [vmem:[%s1755_s7 + $0x10] sm:$0xff]   ;;  %v1369_v35 = vld [vmem:[%s1755_s7 + $0x18] sm:$0xff]  }
  0x48   :  { %1253 = vmatprep.subr.bf16.mxu0 %v1401_v20  ;;  %1271 = vmatprep.subr.bf16.mxu1 %v1401_v20  ;;  %v1370_v36 = vld [vmem:[%s1755_s7 + $0x20] sm:$0xff]   ;;  %v1371_v37 = vld [vmem:[%s1755_s7 + $0x28] sm:$0xff]   ;;  %v1372_v38 = vld [vmem:[%s1755_s7 + $0x30] sm:$0xff]  }
  0x49   :  { %v1373_v39 = vld [vmem:[%s1755_s7 + $0x38] sm:$0xff]   ;;  %v1057_v41 = vld [vmem:[%s1750_s2] ss:$0 sm:$0xff] }
  0x4a   :  { %v904_v1 = vld [vmem:[%s1754_s6] sm:$0x1] }
  0x4b   :  { %1254 = vmatpush3.bf16.msra.mxu0 %v1360_v23  ;;  %1272 = vmatpush3.bf16.msra.mxu1 %v1367_v33  ;;  %v905_v2 = vadd.f32 1e-05, %v904_v1  ;;  %v1131_v10 = vld [vmem:[%s1753_s5] ss:$0 sm:$0xff]  ;;  %s1403_s5 = smov [#allocation2]  }
  0x4c   :  { %1255 = vmatprep.subr.bf16.mxu0 %v1401_v20  ;;  %1273 = vmatprep.subr.bf16.mxu1 %v1401_v20  ;;  %v1132_v15 = vld [vmem:[%s1751_s3] ss:$0 sm:$0xff]  ;;  %s1049_s12 = sshll.u32 %s1403_s5, 4  ;;  %s1050_s12 = int_to_ptr.vmem [resolvable:$true] %s1049_s12 }
  0x4d   :  { %1374 = vrsqrt.f32 %v905_v2  ;;  %v1133_v32 = vld [vmem:[%s1752_s4] ss:$0 sm:$0xff]  ;;  %s1376_s3 = scalar_lea.vmem %s1050_s12, 32  ;;  %p1381_p1 = scmp.lt.s32.totalorder %s1050_s12, %s1050_s12 }
  0x4e   :  { %p1377_p0 = scmp.ne.s32.totalorder %s1050_s12, %s1376_s3  ;;  %p1382_p2 = scmp.lt.s32.totalorder %s1376_s3, %s1376_s3 }
  0x4f   :  { %1256 = vmatpush3.bf16.msra.mxu0 %v1361_v24  ;;  %1274 = vmatpush3.bf16.msra.mxu1 %v1368_v34 }
  0x50   :  { %1257 = vmatprep.subr.bf16.mxu0 %v1401_v20  ;;  %1275 = vmatprep.subr.bf16.mxu1 %v1401_v20  ;;  %p1383_p3 = por %p1382_p2, %p1381_p1 }
  0x52   :  { %p1384_p4 = pnand %p1383_p3, %p1377_p0 }
  0x53   :  { %1258 = vmatpush3.bf16.msra.mxu0 %v1362_v25  ;;  %1276 = vmatpush3.bf16.msra.mxu1 %v1369_v35 }
  0x54   :  { %1259 = vmatprep.subr.bf16.mxu0 %v1401_v20  ;;  %1277 = vmatprep.subr.bf16.mxu1 %v1401_v20 }
  0x57   :  { %1260 = vmatpush3.bf16.msra.mxu0 %v1363_v26  ;;  %1278 = vmatpush3.bf16.msra.mxu1 %v1370_v36  ;;  %v1375_v5 = vpop.eup %1374 }
  0x58   :  { %1261 = vmatprep.subr.bf16.mxu0 %v1401_v20  ;;  %1279 = vmatprep.subr.bf16.mxu1 %v1401_v20  ;;  %v911_v12 = vrot.slane %v1375_v5, %v910_v4 }
  0x5b   :  { %1262 = vmatpush3.bf16.msra.mxu0 %v1364_v27  ;;  %1280 = vmatpush3.bf16.msra.mxu1 %v1371_v37 }
  0x5c   :  { %1263 = vmatprep.subr.bf16.mxu0 %v1401_v20  ;;  %1281 = vmatprep.subr.bf16.mxu1 %v1401_v20 }
  0x5f   :  { %1264 = vmatpush3.bf16.msra.mxu0 %v1365_v28  ;;  %1282 = vmatpush3.bf16.msra.mxu1 %v1372_v38 }
  0x60   :  { %1283 = vmatprep.subr.bf16.mxu1 %v1401_v20  ;;  %v1134_v20 = vld [vmem:[%s1756_s8] ss:$0 sm:$0xff] }
  0x62   :  { %1266 = vmatmul.mubr.bf16.vlgmr.msra.gmra.mrb[8].mxu0 %v251_v30 }
  0x63   :  { %1284 = vmatpush3.bf16.msra.mxu1 %v1373_v39 }
  0xf5   :  { %v1159_v40 = vpop.f32.mrb[0].mxu0 }
  0xf6   :  { %v1160_v42 = vpop.f32.mrb[1].mxu0 }
  0xf7   :  { %v1161_v43 = vadd.f32 %v1160_v42, %v1159_v40  ;;  %v1162_v44 = vpop.f32.mrb[2].mxu0  ;;  %v1181_v45 = vpop.f32.mrb[0].mxu1 }
  0xf8   :  { %v1163_v46 = vpop.f32.mrb[3].mxu0  ;;  %v1182_v47 = vpop.f32.mrb[1].mxu1 }
  0xf9   :  { %v728_v48 = vadd.f32 %v1161_v43, %v1057_v41  ;;  %v1183_v49 = vadd.f32 %v1182_v47, %v1181_v45  ;;  %v1184_v50 = vpop.f32.mrb[2].mxu1 }
  0xfa   :  { %v1185_v51 = vpop.f32.mrb[3].mxu1 }
  0xfb   :  { %v768_v52 = vadd.f32 %v1183_v49, %v728_v48 }
 0x115   :  { %v1203_v53 = vpop.f32.mrb[4].mxu0 }
 0x116   :  { %v1204_v54 = vpop.f32.mrb[5].mxu0 }
 0x117   :  { %v1205_v55 = vadd.f32 %v1204_v54, %v1203_v53  ;;  %v1206_v56 = vpop.f32.mrb[6].mxu0  ;;  %v1225_v57 = vpop.f32.mrb[4].mxu1 }
 0x118   :  { %v1207_v58 = vpop.f32.mrb[7].mxu0  ;;  %v1226_v59 = vpop.f32.mrb[5].mxu1 }
 0x119   :  { %v808_v60 = vadd.f32 %v1205_v55, %v768_v52  ;;  %v1227_v61 = vadd.f32 %v1226_v59, %v1225_v57  ;;  %v1228_v62 = vpop.f32.mrb[6].mxu1 }
 0x11a   :  { %v1229_v63 = vpop.f32.mrb[7].mxu1 }
 0x11b   :  { %v848_v0 = vadd.f32 %v1227_v61, %v808_v60 }
 0x135   :  { %v887_v3 = vpop.f32.mrb[8].mxu0 }
 0x136   :  { %v888_v6 = vadd.f32 %v887_v3, %v848_v0  ;;  %v1267_v7 = vpop.f32.mrb[9].mxu0 }
 0x137   :  { %v890_v8 = vpop.f32.mrb[10].mxu0 }
 0x138   :  { %vm893_vm1 = vcmp.ge.f32.partialorder %v888_v6, 0.0  ;;  %v894_v9 = vmul.f32 0.01, %v888_v6  ;;  %v1268_v11 = vpop.f32.mrb[11].mxu0 }
 0x13a   :  { %v895_v13 = vsel %vm893_vm1, %v888_v6, %v894_v9 }
 0x13b   :  { %v903_v14 = vsub.f32 %v895_v13, %v1131_v10 }
 0x13d   :  { %v913_v16 = vmul.f32 %v911_v12, %v903_v14 }
 0x13f   :  { %v921_v17 = vmul.f32 %v1132_v15, %v913_v16 }
 0x141   :  { %v929_v18 = vadd.f32 %v1133_v32, %v921_v17 }
 0x143   :  { %v930_v19 = vpack.c.bf16 %v929_v18, %v929_v18 }
 0x145   :  { %1286 = vmatmul.mubr.bf16.vlgmr.msra.gmra.mrb[8].mxu1 %v930_v19 }
 0x218   :  { %v1036_v21 = vpop.f32.mrb[8].mxu1 }
 0x219   :  { %v1037_v22 = vadd.f32 %v1134_v20, %v1036_v21  ;;  %v1287_v23 = vpop.f32.mrb[9].mxu1 }
 0x21a   :  { %v1039_v24 = vpop.f32.mrb[10].mxu1 }
 0x21b   :  { %1042 = vst [vmem:[#allocation2] sm:$0x3] %v1037_v22  ;;  %v1288_v25 = vpop.f32.mrb[11].mxu1 }
 0x21c   :  { %1387 = shalt.err (!%p1384_p4)
}
 0x21d   :  { %s1388_s8 = scalar_lea.hbm %s1757_s9, 32 }
 0x21e   :  { %p1389_p5 = scmp.ne.s32.totalorder %s1757_s9, %s1388_s8  ;;  %p1392_p6 = scmp.lt.u32.totalorder %s1388_s8, %s1757_s9 }
 0x220   :  { %p1394_p7 = pnand %p1392_p6, %p1389_p5 }
 0x222   :  { %1397 = shalt.err (!%p1394_p7)
}
 0x223   :  { %1052 = dma.vmem_to_hbm [thread:$0]  %s1050_s12, 32, %s1757_s9, [#allocation3]  }
 0x224   :  { %1398 = dma.done.wait [#allocation3], 32  }
 0x225   :  { %1399 = vsyncadd [#allocation3], 4294967264 }
 0x226   :  { %1056 = vsyncpa [#allocation3], 1 }

</bundles_post_ra>
